<compile_context>
chip_gen: v7x
topology: tpu7x:2x2x1
jax: 0.10.0
libtpu: 0.0.40
codegen_flags: <defaults>
</compile_context>

<pallas_src>
import functools

import numpy as np
import jax
import jax.numpy as jnp
from jax.experimental import pallas as pl
from jax.experimental.pallas import tpu as pltpu


NUM_HEADS = 8
D_MODEL = 128
D_FF = 2048
NUM_TRANS1_LAYERS = 4
NUM_STACKED_LAYERS = 1 + NUM_TRANS1_LAYERS     # [enc2, trans1_0..trans1_3]


# ----------------------------------------------------------------------------
# In-kernel helpers
# ----------------------------------------------------------------------------

def _layernorm(x, gamma, beta, eps=1e-5):
    mu = jnp.mean(x, axis=-1, keepdims=True)
    xc = x - mu
    var = jnp.mean(xc * xc, axis=-1, keepdims=True)
    return xc * jax.lax.rsqrt(var + eps) * gamma + beta


def _encoder_apply(x, mask_add, wqkv, bqkv, wo, bo, ln1g, ln1b,
                   ff1w, ff1b, ff2w, ff2b, ln2g, ln2b, *, B, L):
    """One post-norm TransformerEncoderLayer on [B*L, D] batch-major rows.

    wqkv / wo / ff1w / ff2w are bf16; activations are cast to bf16 at the dot
    inputs only, accumulation / softmax / LayerNorm stay in f32.  The
    1/sqrt(Dh) scale is pre-folded into the Q columns of wqkv / bqkv.
    """
    D = x.shape[1]
    Dh = D // NUM_HEADS

    qkv = jnp.dot(x.astype(jnp.bfloat16), wqkv,
                  preferred_element_type=jnp.float32) + bqkv        # [B*L, 3D]
    q = qkv[:, 0 * D:1 * D]
    k = qkv[:, 1 * D:2 * D]
    v = qkv[:, 2 * D:3 * D]

    rows = []
    # TODO(synk): replace the static B/H unroll with a "parallel" grid axis
    # (or lax.fori_loop) if the graph count grows; fine at B*H <= 16.
    for b in range(B):
        qb = q[b * L:(b + 1) * L, :]
        kb = k[b * L:(b + 1) * L, :]
        vb = v[b * L:(b + 1) * L, :]
        acc = jnp.zeros((L, D), jnp.float32)
        for hh in range(NUM_HEADS):
            lo, hi = hh * Dh, (hh + 1) * Dh
            qh = qb[:, lo:hi]
            kh = kb[:, lo:hi]
            vh = vb[:, lo:hi]
            s = jax.lax.dot_general(qh, kh, (((1,), (1,)), ((), ())),
                                    preferred_element_type=jnp.float32)  # [L, L]
            if mask_add is not None:
                s = s + mask_add[b:b + 1, :]
            s = s - jnp.max(s, axis=-1, keepdims=True)
            p = jnp.exp(s)
            p = p * pl.reciprocal(jnp.sum(p, axis=-1, keepdims=True), approx=True)
            ah = jnp.dot(p, vh, preferred_element_type=jnp.float32)      # [L, Dh]
            # Accumulate each head straight into the out-projection (no 8-way
            # lane concat); wo row slices are sublane aligned (Dh = 16).
            acc = acc + jnp.dot(ah.astype(jnp.bfloat16), wo[lo:hi, :],
                                preferred_element_type=jnp.float32)
        rows.append(acc)
    attn = (jnp.concatenate(rows, axis=0) if B > 1 else rows[0]) + bo    # [B*L, D]

    x = x + attn                                   # dropout = identity (eval)
    x = _layernorm(x, ln1g, ln1b)

    ff = jnp.dot(x.astype(jnp.bfloat16), ff1w,
                 preferred_element_type=jnp.float32) + ff1b
    ff = jnp.maximum(ff, 0.0)
    ff = jnp.dot(ff.astype(jnp.bfloat16), ff2w,
                 preferred_element_type=jnp.float32) + ff2b
    x = x + ff
    x = _layernorm(x, ln2g, ln2b)
    return x


# ----------------------------------------------------------------------------
# Fully fused kernel: GNN + pool/pad + enc2 + 4x trans1 + tail, grid=(5,)
# ----------------------------------------------------------------------------

def _fused_kernel(x_ref, ahat_ref, gw1_ref, gb1_ref, gw2_ref, gb2_ref,
                  selcat_ref, mask_ref, sumsel_ref, linw_ref, linb_ref,
                  wqkv_ref, bqkv_ref, wo_ref, bo_ref, ln1g_ref, ln1b_ref,
                  ff1w_ref, ff1b_ref, ff2w_ref, ff2b_ref, ln2g_ref, ln2b_ref,
                  out_ref, pooled_act, padded_act, *, G, Lmax):
    layer = pl.program_id(0)
    last = pl.num_programs(0) - 1

    def layer_weights():
        return dict(
            wqkv=wqkv_ref[...], bqkv=bqkv_ref[...],
            wo=wo_ref[...], bo=bo_ref[...],
            ln1g=ln1g_ref[...], ln1b=ln1b_ref[...],
            ff1w=ff1w_ref[...], ff1b=ff1b_ref[...],
            ff2w=ff2w_ref[...], ff2b=ff2b_ref[...],
            ln2g=ln2g_ref[...], ln2b=ln2b_ref[...])

    @pl.when(layer == 0)
    def _():
        # GNN (dense 2-layer GCN stand-in) + concat + global_add_pool +
        # pad_sequence (one stacked selection matmul) + encoder_layer2.
        x = x_ref[...]                                              # [N, 64]
        a = ahat_ref[...]                                           # [N, N]
        h = jnp.dot(a, x, preferred_element_type=jnp.float32)
        h = jnp.dot(h, gw1_ref[...], preferred_element_type=jnp.float32) + gb1_ref[...]
        h = jnp.maximum(h, 0.0)
        h = jnp.dot(a, h, preferred_element_type=jnp.float32)
        h = jnp.dot(h, gw2_ref[...], preferred_element_type=jnp.float32) + gb2_ref[...]
        feats = jnp.concatenate([x, h], axis=-1)                    # [N, 128]
        sel_out = jnp.dot(selcat_ref[...], feats,
                          preferred_element_type=jnp.float32)       # [G+G*Lmax, 128]
        padded_act[...] = sel_out[G:, :]                            # pad_sequence
        w = layer_weights()          # grid-slot 0 holds encoder_layer2 weights
        pooled_act[...] = _encoder_apply(sel_out[:G, :], None, **w, B=1, L=G)

    @pl.when(layer > 0)
    def _():
        w = layer_weights()          # grid-slot l holds trans1 layer l-1
        padded_act[...] = _encoder_apply(padded_act[...], mask_ref[...],
                                         **w, B=G, L=Lmax)

    @pl.when(layer == last)
    def _():
        # Per-graph sequence sum (padded rows included, like PyTorch) + concat
        # with the enc2 branch, folded into a split of lin1's weight.
        seq_sum = jnp.dot(sumsel_ref[...], padded_act[...],
                          preferred_element_type=jnp.float32)       # [G, D]
        att = pooled_act[...]                                       # [G, D]
        wl = linw_ref[...]                                          # [2D, 1]
        out = (jnp.dot(att, wl[:D_MODEL, :], preferred_element_type=jnp.float32)
               + jnp.dot(seq_sum, wl[D_MODEL:, :], preferred_element_type=jnp.float32)
               + linb_ref[...])                                     # [G, 1]
        out_ref[...] = out.astype(out_ref.dtype)


def _const_spec(arr):
    nd = arr.ndim
    return pl.BlockSpec(tuple(arr.shape), lambda l, _n=nd: (0,) * _n)


def _layer_spec(tail_shape):
    nd = len(tail_shape)
    return pl.BlockSpec((None,) + tuple(tail_shape),
                        lambda l, _n=nd: (l,) + (0,) * _n)


def _cost_estimate(G, Lmax):
    rows_t = G * Lmax

    def per_layer(rows):
        return 2 * rows * D_MODEL * (3 * D_MODEL + D_MODEL + 2 * D_FF)

    flops = NUM_TRANS1_LAYERS * per_layer(rows_t) + per_layer(G)
    weight_bytes = NUM_STACKED_LAYERS * 2 * (
        D_MODEL * 3 * D_MODEL + D_MODEL * D_MODEL + 2 * D_MODEL * D_FF)
    transcendentals = (NUM_TRANS1_LAYERS * G * NUM_HEADS * Lmax * Lmax
                       + NUM_HEADS * G * G)
    return pl.CostEstimate(flops=int(flops), transcendentals=int(transcendentals),
                           bytes_accessed=int(weight_bytes))


# ----------------------------------------------------------------------------
# Forward-pass builder (graph structure is static -> host-side numpy constants)
# ----------------------------------------------------------------------------

def make_forward(graph_sizes):
    G = len(graph_sizes)
    N = sum(graph_sizes)
    Lmax = max(graph_sizes)

    # Stacked selection matrix: rows [0, G) = global_add_pool,
    # rows [G, G + G*Lmax) = pad_sequence (batch-major).
    selcat_np = np.zeros((G + G * Lmax, N), np.float32)
    mask_np = np.full((G, Lmax), -1e30, np.float32)   # additive key-padding mask
    sumsel_np = np.zeros((G, G * Lmax), np.float32)   # per-graph sequence sum
    off = 0
    for g, sz in enumerate(graph_sizes):
        selcat_np[g, off:off + sz] = 1.0
        for t in range(sz):
            selcat_np[G + g * Lmax + t, off + t] = 1.0
        mask_np[g, :sz] = 0.0
        sumsel_np[g, g * Lmax:(g + 1) * Lmax] = 1.0
        off += sz

    selcat = jnp.asarray(selcat_np)
    mask_add = jnp.asarray(mask_np)
    sumsel = jnp.asarray(sumsel_np)

    kern = functools.partial(_fused_kernel, G=G, Lmax=Lmax)
    cost = _cost_estimate(G, Lmax)

    def forward(packed, x, a_hat):
        gp = packed["gnn"]
        inputs = (x, a_hat, gp["w1"], gp["b1"], gp["w2"], gp["b2"],
                  selcat, mask_add, sumsel, packed["lin1_w"], packed["lin1_b"],
                  packed["wqkv"], packed["bqkv"], packed["wo"], packed["bo"],
                  packed["ln1g"], packed["ln1b"],
                  packed["ff1w"], packed["ff1b"], packed["ff2w"], packed["ff2b"],
                  packed["ln2g"], packed["ln2b"])
        in_specs = ([_const_spec(a) for a in inputs[:11]]
                    + [_layer_spec(a.shape[1:]) for a in inputs[11:]])
        out = pl.pallas_call(
            kern,
            out_shape=jax.ShapeDtypeStruct((G, 1), jnp.float32),
            grid_spec=pltpu.PrefetchScalarGridSpec(
                num_scalar_prefetch=0,
                grid=(NUM_STACKED_LAYERS,),
                in_specs=in_specs,
                out_specs=pl.BlockSpec((G, 1), lambda l: (0, 0)),
                scratch_shapes=[pltpu.VMEM((G, D_MODEL), jnp.float32),
                                pltpu.VMEM((G * Lmax, D_MODEL), jnp.float32)]),
            compiler_params=pltpu.CompilerParams(
                dimension_semantics=("arbitrary",),
                vmem_limit_bytes=32 * 1024 * 1024),
            cost_estimate=cost,
        )(*inputs)
        return out[:, 0]                                           # [G]

    return jax.jit(forward)


# ----------------------------------------------------------------------------
# Parameter init (PyTorch-like layout) and packing for the fused kernel
# ----------------------------------------------------------------------------

def init_encoder_layer(key, d_model=D_MODEL, d_ff=D_FF):
    ks = jax.random.split(key, 4)
    s = 0.02
    return dict(
        in_proj_w=jax.random.normal(ks[0], (d_model, 3 * d_model), jnp.float32) * s,
        in_proj_b=jnp.zeros((1, 3 * d_model), jnp.float32),
        out_proj_w=jax.random.normal(ks[1], (d_model, d_model), jnp.float32) * s,
        out_proj_b=jnp.zeros((1, d_model), jnp.float32),
        ln1_g=jnp.ones((1, d_model), jnp.float32),
        ln1_b=jnp.zeros((1, d_model), jnp.float32),
        ff1_w=jax.random.normal(ks[2], (d_model, d_ff), jnp.float32) * s,
        ff1_b=jnp.zeros((1, d_ff), jnp.float32),
        ff2_w=jax.random.normal(ks[3], (d_ff, d_model), jnp.float32) * s,
        ff2_b=jnp.zeros((1, d_model), jnp.float32),
        ln2_g=jnp.ones((1, d_model), jnp.float32),
        ln2_b=jnp.zeros((1, d_model), jnp.float32),
    )


def init_params(key):
    k_gnn, k_enc2, k_t, k_lin = jax.random.split(key, 4)
    kg1, kg2 = jax.random.split(k_gnn)
    return dict(
        gnn=dict(
            w1=jax.random.normal(kg1, (64, 64), jnp.float32) * 0.05,
            b1=jnp.zeros((1, 64), jnp.float32),
            w2=jax.random.normal(kg2, (64, 64), jnp.float32) * 0.05,
            b2=jnp.zeros((1, 64), jnp.float32),
        ),
        enc2=init_encoder_layer(k_enc2),
        trans1=[init_encoder_layer(k)
                for k in jax.random.split(k_t, NUM_TRANS1_LAYERS)],
        # lin1: nn.init.normal_(w, 0, 0.001), bias = 0 (per reset_parameters)
        lin1_w=jax.random.normal(k_lin, (2 * D_MODEL, 1), jnp.float32) * 0.001,
        lin1_b=jnp.zeros((1, 1), jnp.float32),
    )


def pack_params(params):
    """Stack [enc2, trans1_0..3] per weight kind, fold 1/sqrt(Dh) into the Q
    columns of in_proj (weights AND bias), cast big matmul weights to bf16."""
    layers = [params["enc2"]] + list(params["trans1"])
    scale = 1.0 / float(np.sqrt(D_MODEL // NUM_HEADS))

    def fold_q(a):
        return jnp.concatenate([a[:, :D_MODEL] * scale, a[:, D_MODEL:]], axis=-1)

    def stk(name):
        return jnp.stack([lp[name] for lp in layers], axis=0)

    return dict(
        gnn=params["gnn"],
        lin1_w=params["lin1_w"], lin1_b=params["lin1_b"],
        wqkv=jnp.stack([fold_q(lp["in_proj_w"]) for lp in layers],
                       axis=0).astype(jnp.bfloat16),
        bqkv=jnp.stack([fold_q(lp["in_proj_b"]) for lp in layers], axis=0),
        wo=stk("out_proj_w").astype(jnp.bfloat16), bo=stk("out_proj_b"),
        ln1g=stk("ln1_g"), ln1b=stk("ln1_b"),
        ff1w=stk("ff1_w").astype(jnp.bfloat16), ff1b=stk("ff1_b"),
        ff2w=stk("ff2_w").astype(jnp.bfloat16), ff2b=stk("ff2_b"),
        ln2g=stk("ln2_g"), ln2b=stk("ln2_b"),
    )


# ----------------------------------------------------------------------------
# Main
# ----------------------------------------------------------------------------

if __name__ == "__main__":
    key = jax.random.PRNGKey(0)
    k_param, k_x, k_adj = jax.random.split(key, 3)

    graph_sizes = [5, 3]          # 2 graphs, 8 nodes total
    N = sum(graph_sizes)
    F = 64                        # num_node_features

    params = init_params(k_param)
    packed = pack_params(params)

    # TODO(synk): resnet18 embedding skipped; x is the 64-d node embedding.
    x = jax.random.normal(k_x, (N, F), jnp.float32)

    # Block-diagonal adjacency with self-loops, row-normalized (host-side numpy).
    adj = np.zeros((N, N), np.float32)
    off = 0
    rk = k_adj
    for sz in graph_sizes:
        rk, sub = jax.random.split(rk)
        blk = np.asarray(jax.random.uniform(sub, (sz, sz)) > 0.5, dtype=np.float32)
        blk = np.maximum(blk, blk.T)
        adj[off:off + sz, off:off + sz] = blk
        off += sz
    adj = adj + np.eye(N, dtype=np.float32)
    a_hat = jnp.asarray(adj / adj.sum(axis=1, keepdims=True))

    forward = make_forward(graph_sizes)
    fine_score = forward(packed, x, a_hat)
    jax.block_until_ready(fine_score)
    assert fine_score.shape == (len(graph_sizes),)
    print("KERNEL_OK")
</pallas_src>

<mosaic_0001>
module attributes {stable_mosaic.version = 11 : i64} {
  func.func @_fused_kernel(%arg0: i32, %arg1: memref<8x64xf32, #tpu.memory_space<vmem>>, %arg2: memref<8x8xf32, #tpu.memory_space<vmem>>, %arg3: memref<64x64xf32, #tpu.memory_space<vmem>>, %arg4: memref<1x64xf32, #tpu.memory_space<vmem>>, %arg5: memref<64x64xf32, #tpu.memory_space<vmem>>, %arg6: memref<1x64xf32, #tpu.memory_space<vmem>>, %arg7: memref<12x8xf32, #tpu.memory_space<vmem>>, %arg8: memref<2x5xf32, #tpu.memory_space<vmem>>, %arg9: memref<2x10xf32, #tpu.memory_space<vmem>>, %arg10: memref<256x1xf32, #tpu.memory_space<vmem>>, %arg11: memref<1x1xf32, #tpu.memory_space<vmem>>, %arg12: memref<1x128x384xbf16, #tpu.memory_space<vmem>>, %arg13: memref<1x1x384xf32, #tpu.memory_space<vmem>>, %arg14: memref<1x128x128xbf16, #tpu.memory_space<vmem>>, %arg15: memref<1x1x128xf32, #tpu.memory_space<vmem>>, %arg16: memref<1x1x128xf32, #tpu.memory_space<vmem>>, %arg17: memref<1x1x128xf32, #tpu.memory_space<vmem>>, %arg18: memref<1x128x2048xbf16, #tpu.memory_space<vmem>>, %arg19: memref<1x1x2048xf32, #tpu.memory_space<vmem>>, %arg20: memref<1x2048x128xbf16, #tpu.memory_space<vmem>>, %arg21: memref<1x1x128xf32, #tpu.memory_space<vmem>>, %arg22: memref<1x1x128xf32, #tpu.memory_space<vmem>>, %arg23: memref<1x1x128xf32, #tpu.memory_space<vmem>>, %arg24: memref<2x1xf32, #tpu.memory_space<vmem>>, %arg25: memref<2x128xf32, #tpu.memory_space<vmem>>, %arg26: memref<10x128xf32, #tpu.memory_space<vmem>>) attributes {dimension_semantics = [#tpu.dimension_semantics<arbitrary>], iteration_bounds = array<i64: 5>, scalar_prefetch = 0 : i64, scratch_operands = 2 : i64, tpu.core_type = #tpu.core_type<tc>, window_params = [{pipeline_mode = #tpu.pipeline_mode<synchronous>, transform_indices = @transform_0, window_bounds = array<i64: 8, 64>}, {pipeline_mode = #tpu.pipeline_mode<synchronous>, transform_indices = @transform_1, window_bounds = array<i64: 8, 8>}, {pipeline_mode = #tpu.pipeline_mode<synchronous>, transform_indices = @transform_2, window_bounds = array<i64: 64, 64>}, {pipeline_mode = #tpu.pipeline_mode<synchronous>, transform_indices = @transform_3, window_bounds = array<i64: 1, 64>}, {pipeline_mode = #tpu.pipeline_mode<synchronous>, transform_indices = @transform_4, window_bounds = array<i64: 64, 64>}, {pipeline_mode = #tpu.pipeline_mode<synchronous>, transform_indices = @transform_5, window_bounds = array<i64: 1, 64>}, {pipeline_mode = #tpu.pipeline_mode<synchronous>, transform_indices = @transform_6, window_bounds = array<i64: 12, 8>}, {pipeline_mode = #tpu.pipeline_mode<synchronous>, transform_indices = @transform_7, window_bounds = array<i64: 2, 5>}, {pipeline_mode = #tpu.pipeline_mode<synchronous>, transform_indices = @transform_8, window_bounds = array<i64: 2, 10>}, {pipeline_mode = #tpu.pipeline_mode<synchronous>, transform_indices = @transform_9, window_bounds = array<i64: 256, 1>}, {pipeline_mode = #tpu.pipeline_mode<synchronous>, transform_indices = @transform_10, window_bounds = array<i64: 1, 1>}, {transform_indices = @transform_11, window_bounds = array<i64: 1, 128, 384>}, {transform_indices = @transform_12, window_bounds = array<i64: 1, 1, 384>}, {transform_indices = @transform_13, window_bounds = array<i64: 1, 128, 128>}, {transform_indices = @transform_14, window_bounds = array<i64: 1, 1, 128>}, {transform_indices = @transform_15, window_bounds = array<i64: 1, 1, 128>}, {transform_indices = @transform_16, window_bounds = array<i64: 1, 1, 128>}, {transform_indices = @transform_17, window_bounds = array<i64: 1, 128, 2048>}, {transform_indices = @transform_18, window_bounds = array<i64: 1, 1, 2048>}, {transform_indices = @transform_19, window_bounds = array<i64: 1, 2048, 128>}, {transform_indices = @transform_20, window_bounds = array<i64: 1, 1, 128>}, {transform_indices = @transform_21, window_bounds = array<i64: 1, 1, 128>}, {transform_indices = @transform_22, window_bounds = array<i64: 1, 1, 128>}, {pipeline_mode = #tpu.pipeline_mode<synchronous>, transform_indices = @transform_23, window_bounds = array<i64: 2, 1>}]} {
    %c0_i32 = arith.constant 0 : i32
    %0 = arith.cmpi eq, %arg0, %c0_i32 : i32
    %1 = arith.extui %0 : i1 to i32
    %c0_i32_0 = arith.constant 0 : i32
    %2 = arith.cmpi ne, %1, %c0_i32_0 : i32
    scf.if %2 {
      %c0 = arith.constant 0 : index
      %c0_4 = arith.constant 0 : index
      %9 = vector.load %arg1[%c0, %c0_4] : memref<8x64xf32, #tpu.memory_space<vmem>>, vector<8x64xf32>
      %c0_5 = arith.constant 0 : index
      %c0_6 = arith.constant 0 : index
      %10 = vector.load %arg2[%c0_5, %c0_6] : memref<8x8xf32, #tpu.memory_space<vmem>>, vector<8x8xf32>
      %cst = arith.constant dense<0.000000e+00> : vector<8x64xf32>
      %11 = tpu.matmul %10, %9, %cst {dimension_numbers = #tpu.dot_dimension_numbers<[1], [0], [0], [1], [0, 0, 1, 1], [], []>} : vector<8x8xf32>, vector<8x64xf32>, vector<8x64xf32> -> vector<8x64xf32>
      %c0_7 = arith.constant 0 : index
      %c0_8 = arith.constant 0 : index
      %12 = vector.load %arg3[%c0_7, %c0_8] : memref<64x64xf32, #tpu.memory_space<vmem>>, vector<64x64xf32>
      %cst_9 = arith.constant dense<0.000000e+00> : vector<8x64xf32>
      %13 = tpu.matmul %11, %12, %cst_9 {dimension_numbers = #tpu.dot_dimension_numbers<[1], [0], [0], [1], [0, 0, 1, 1], [], []>} : vector<8x64xf32>, vector<64x64xf32>, vector<8x64xf32> -> vector<8x64xf32>
      %c0_10 = arith.constant 0 : index
      %c0_11 = arith.constant 0 : index
      %14 = vector.load %arg4[%c0_10, %c0_11] : memref<1x64xf32, #tpu.memory_space<vmem>>, vector<1x64xf32>
      %15 = vector.broadcast %14 : vector<1x64xf32> to vector<8x64xf32>
      %16 = arith.addf %13, %15 : vector<8x64xf32>
      %cst_12 = arith.constant 0.000000e+00 : f32
      %17 = vector.broadcast %cst_12 : f32 to vector<8x64xf32>
      %18 = arith.maximumf %16, %17 : vector<8x64xf32>
      %cst_13 = arith.constant dense<0.000000e+00> : vector<8x64xf32>
      %19 = tpu.matmul %10, %18, %cst_13 {dimension_numbers = #tpu.dot_dimension_numbers<[1], [0], [0], [1], [0, 0, 1, 1], [], []>} : vector<8x8xf32>, vector<8x64xf32>, vector<8x64xf32> -> vector<8x64xf32>
      %c0_14 = arith.constant 0 : index
      %c0_15 = arith.constant 0 : index
      %20 = vector.load %arg5[%c0_14, %c0_15] : memref<64x64xf32, #tpu.memory_space<vmem>>, vector<64x64xf32>
      %cst_16 = arith.constant dense<0.000000e+00> : vector<8x64xf32>
      %21 = tpu.matmul %19, %20, %cst_16 {dimension_numbers = #tpu.dot_dimension_numbers<[1], [0], [0], [1], [0, 0, 1, 1], [], []>} : vector<8x64xf32>, vector<64x64xf32>, vector<8x64xf32> -> vector<8x64xf32>
      %c0_17 = arith.constant 0 : index
      %c0_18 = arith.constant 0 : index
      %22 = vector.load %arg6[%c0_17, %c0_18] : memref<1x64xf32, #tpu.memory_space<vmem>>, vector<1x64xf32>
      %23 = vector.broadcast %22 : vector<1x64xf32> to vector<8x64xf32>
      %24 = arith.addf %21, %23 : vector<8x64xf32>
      %25 = tpu.concatenate %9, %24 in 1 : vector<8x64xf32>, vector<8x64xf32> -> vector<8x128xf32>
      %c0_19 = arith.constant 0 : index
      %c0_20 = arith.constant 0 : index
      %26 = vector.load %arg7[%c0_19, %c0_20] : memref<12x8xf32, #tpu.memory_space<vmem>>, vector<12x8xf32>
      %cst_21 = arith.constant dense<0.000000e+00> : vector<12x128xf32>
      %27 = tpu.matmul %26, %25, %cst_21 {dimension_numbers = #tpu.dot_dimension_numbers<[1], [0], [0], [1], [0, 0, 1, 1], [], []>} : vector<12x8xf32>, vector<8x128xf32>, vector<12x128xf32> -> vector<12x128xf32>
      %28 = vector.extract_strided_slice %27 {offsets = [2, 0], sizes = [10, 128], strides = [1, 1]} : vector<12x128xf32> to vector<10x128xf32>
      %c0_22 = arith.constant 0 : index
      %c0_23 = arith.constant 0 : index
      %29 = vector.load %arg26[%c0_22, %c0_23] : memref<10x128xf32, #tpu.memory_space<vmem>>, vector<10x128xf32>
      tpu.vector_store %arg26[%c0_22, %c0_23], %28 {strides = array<i32>} : memref<10x128xf32, #tpu.memory_space<vmem>>, vector<10x128xf32>,
      %c0_24 = arith.constant 0 : index
      %c0_25 = arith.constant 0 : index
      %c0_26 = arith.constant 0 : index
      %30 = vector.load %arg12[%c0_24, %c0_25, %c0_26] : memref<1x128x384xbf16, #tpu.memory_space<vmem>>, vector<1x128x384xbf16>
      %31 = vector.shape_cast %30 : vector<1x128x384xbf16> to vector<128x384xbf16>
      %c0_27 = arith.constant 0 : index
      %c0_28 = arith.constant 0 : index
      %c0_29 = arith.constant 0 : index
      %32 = vector.load %arg13[%c0_27, %c0_28, %c0_29] : memref<1x1x384xf32, #tpu.memory_space<vmem>>, vector<1x1x384xf32>
      %33 = vector.shape_cast %32 : vector<1x1x384xf32> to vector<1x384xf32>
      %c0_30 = arith.constant 0 : index
      %c0_31 = arith.constant 0 : index
      %c0_32 = arith.constant 0 : index
      %34 = vector.load %arg14[%c0_30, %c0_31, %c0_32] : memref<1x128x128xbf16, #tpu.memory_space<vmem>>, vector<1x128x128xbf16>
      %35 = vector.shape_cast %34 : vector<1x128x128xbf16> to vector<128x128xbf16>
      %c0_33 = arith.constant 0 : index
      %c0_34 = arith.constant 0 : index
      %c0_35 = arith.constant 0 : index
      %36 = vector.load %arg15[%c0_33, %c0_34, %c0_35] : memref<1x1x128xf32, #tpu.memory_space<vmem>>, vector<1x1x128xf32>
      %37 = vector.shape_cast %36 : vector<1x1x128xf32> to vector<1x128xf32>
      %c0_36 = arith.constant 0 : index
      %c0_37 = arith.constant 0 : index
      %c0_38 = arith.constant 0 : index
      %38 = vector.load %arg16[%c0_36, %c0_37, %c0_38] : memref<1x1x128xf32, #tpu.memory_space<vmem>>, vector<1x1x128xf32>
      %39 = vector.shape_cast %38 : vector<1x1x128xf32> to vector<1x128xf32>
      %c0_39 = arith.constant 0 : index
      %c0_40 = arith.constant 0 : index
      %c0_41 = arith.constant 0 : index
      %40 = vector.load %arg17[%c0_39, %c0_40, %c0_41] : memref<1x1x128xf32, #tpu.memory_space<vmem>>, vector<1x1x128xf32>
      %41 = vector.shape_cast %40 : vector<1x1x128xf32> to vector<1x128xf32>
      %c0_42 = arith.constant 0 : index
      %c0_43 = arith.constant 0 : index
      %c0_44 = arith.constant 0 : index
      %42 = vector.load %arg18[%c0_42, %c0_43, %c0_44] : memref<1x128x2048xbf16, #tpu.memory_space<vmem>>, vector<1x128x2048xbf16>
      %43 = vector.shape_cast %42 : vector<1x128x2048xbf16> to vector<128x2048xbf16>
      %c0_45 = arith.constant 0 : index
      %c0_46 = arith.constant 0 : index
      %c0_47 = arith.constant 0 : index
      %44 = vector.load %arg19[%c0_45, %c0_46, %c0_47] : memref<1x1x2048xf32, #tpu.memory_space<vmem>>, vector<1x1x2048xf32>
      %45 = vector.shape_cast %44 : vector<1x1x2048xf32> to vector<1x2048xf32>
      %c0_48 = arith.constant 0 : index
      %c0_49 = arith.constant 0 : index
      %c0_50 = arith.constant 0 : index
      %46 = vector.load %arg20[%c0_48, %c0_49, %c0_50] : memref<1x2048x128xbf16, #tpu.memory_space<vmem>>, vector<1x2048x128xbf16>
      %47 = vector.shape_cast %46 : vector<1x2048x128xbf16> to vector<2048x128xbf16>
      %c0_51 = arith.constant 0 : index
      %c0_52 = arith.constant 0 : index
      %c0_53 = arith.constant 0 : index
      %48 = vector.load %arg21[%c0_51, %c0_52, %c0_53] : memref<1x1x128xf32, #tpu.memory_space<vmem>>, vector<1x1x128xf32>
      %49 = vector.shape_cast %48 : vector<1x1x128xf32> to vector<1x128xf32>
      %c0_54 = arith.constant 0 : index
      %c0_55 = arith.constant 0 : index
      %c0_56 = arith.constant 0 : index
      %50 = vector.load %arg22[%c0_54, %c0_55, %c0_56] : memref<1x1x128xf32, #tpu.memory_space<vmem>>, vector<1x1x128xf32>
      %51 = vector.shape_cast %50 : vector<1x1x128xf32> to vector<1x128xf32>
      %c0_57 = arith.constant 0 : index
      %c0_58 = arith.constant 0 : index
      %c0_59 = arith.constant 0 : index
      %52 = vector.load %arg23[%c0_57, %c0_58, %c0_59] : memref<1x1x128xf32, #tpu.memory_space<vmem>>, vector<1x1x128xf32>
      %53 = vector.shape_cast %52 : vector<1x1x128xf32> to vector<1x128xf32>
      %54 = vector.extract_strided_slice %27 {offsets = [0, 0], sizes = [2, 128], strides = [1, 1]} : vector<12x128xf32> to vector<2x128xf32>
      %55 = arith.truncf %54 : vector<2x128xf32> to vector<2x128xbf16>
      %cst_60 = arith.constant dense<0.000000e+00> : vector<2x384xf32>
      %56 = tpu.matmul %55, %31, %cst_60 {dimension_numbers = #tpu.dot_dimension_numbers<[1], [0], [0], [1], [0, 0, 1, 1], [], []>} : vector<2x128xbf16>, vector<128x384xbf16>, vector<2x384xf32> -> vector<2x384xf32>
      %57 = vector.broadcast %33 : vector<1x384xf32> to vector<2x384xf32>
      %58 = arith.addf %56, %57 : vector<2x384xf32>
      %59 = vector.extract_strided_slice %58 {offsets = [0, 0], sizes = [2, 128], strides = [1, 1]} : vector<2x384xf32> to vector<2x128xf32>
      %60 = vector.extract_strided_slice %58 {offsets = [0, 128], sizes = [2, 128], strides = [1, 1]} : vector<2x384xf32> to vector<2x128xf32>
      %61 = vector.extract_strided_slice %58 {offsets = [0, 256], sizes = [2, 128], strides = [1, 1]} : vector<2x384xf32> to vector<2x128xf32>
      %cst_61 = arith.constant 0.000000e+00 : f32
      %62 = vector.broadcast %cst_61 : f32 to vector<2x128xf32>
      %63 = vector.extract_strided_slice %59 {offsets = [0, 0], sizes = [2, 16], strides = [1, 1]} : vector<2x128xf32> to vector<2x16xf32>
      %64 = vector.extract_strided_slice %60 {offsets = [0, 0], sizes = [2, 16], strides = [1, 1]} : vector<2x128xf32> to vector<2x16xf32>
      %65 = vector.extract_strided_slice %61 {offsets = [0, 0], sizes = [2, 16], strides = [1, 1]} : vector<2x128xf32> to vector<2x16xf32>
      %cst_62 = arith.constant dense<0.000000e+00> : vector<2x2xf32>
      %66 = tpu.matmul %63, %64, %cst_62 {dimension_numbers = #tpu.dot_dimension_numbers<[1], [1], [0], [0], [0, 0, 1, 0], [], []>} : vector<2x16xf32>, vector<2x16xf32>, vector<2x2xf32> -> vector<2x2xf32>
      %cst_63 = arith.constant dense<0xFF800000> : vector<2xf32>
      %67 = vector.multi_reduction <maximumf>, %66, %cst_63 [1] : vector<2x2xf32> to vector<2xf32>
      %68 = vector.shape_cast %67 : vector<2xf32> to vector<2x1xf32>
      %69 = vector.broadcast %68 : vector<2x1xf32> to vector<2x2xf32>
      %70 = arith.subf %66, %69 : vector<2x2xf32>
      %71 = math.exp %70 : vector<2x2xf32>
      %cst_64 = arith.constant dense<0.000000e+00> : vector<2xf32>
      %72 = vector.multi_reduction <add>, %71, %cst_64 [1] : vector<2x2xf32> to vector<2xf32>
      %73 = vector.shape_cast %72 : vector<2xf32> to vector<2x1xf32>
      %74 = tpu.reciprocal %73 {approx = true} : vector<2x1xf32> -> vector<2x1xf32>
      %75 = vector.broadcast %74 : vector<2x1xf32> to vector<2x2xf32>
      %76 = arith.mulf %71, %75 : vector<2x2xf32>
      %cst_65 = arith.constant dense<0.000000e+00> : vector<2x16xf32>
      %77 = tpu.matmul %76, %65, %cst_65 {dimension_numbers = #tpu.dot_dimension_numbers<[1], [0], [0], [1], [0, 0, 1, 1], [], []>} : vector<2x2xf32>, vector<2x16xf32>, vector<2x16xf32> -> vector<2x16xf32>
      %78 = arith.truncf %77 : vector<2x16xf32> to vector<2x16xbf16>
      %79 = vector.extract_strided_slice %35 {offsets = [0, 0], sizes = [16, 128], strides = [1, 1]} : vector<128x128xbf16> to vector<16x128xbf16>
      %cst_66 = arith.constant dense<0.000000e+00> : vector<2x128xf32>
      %80 = tpu.matmul %78, %79, %cst_66 {dimension_numbers = #tpu.dot_dimension_numbers<[1], [0], [0], [1], [0, 0, 1, 1], [], []>} : vector<2x16xbf16>, vector<16x128xbf16>, vector<2x128xf32> -> vector<2x128xf32>
      %81 = arith.addf %62, %80 : vector<2x128xf32>
      %82 = vector.extract_strided_slice %59 {offsets = [0, 16], sizes = [2, 16], strides = [1, 1]} : vector<2x128xf32> to vector<2x16xf32>
      %83 = vector.extract_strided_slice %60 {offsets = [0, 16], sizes = [2, 16], strides = [1, 1]} : vector<2x128xf32> to vector<2x16xf32>
      %84 = vector.extract_strided_slice %61 {offsets = [0, 16], sizes = [2, 16], strides = [1, 1]} : vector<2x128xf32> to vector<2x16xf32>
      %cst_67 = arith.constant dense<0.000000e+00> : vector<2x2xf32>
      %85 = tpu.matmul %82, %83, %cst_67 {dimension_numbers = #tpu.dot_dimension_numbers<[1], [1], [0], [0], [0, 0, 1, 0], [], []>} : vector<2x16xf32>, vector<2x16xf32>, vector<2x2xf32> -> vector<2x2xf32>
      %cst_68 = arith.constant dense<0xFF800000> : vector<2xf32>
      %86 = vector.multi_reduction <maximumf>, %85, %cst_68 [1] : vector<2x2xf32> to vector<2xf32>
      %87 = vector.shape_cast %86 : vector<2xf32> to vector<2x1xf32>
      %88 = vector.broadcast %87 : vector<2x1xf32> to vector<2x2xf32>
      %89 = arith.subf %85, %88 : vector<2x2xf32>
      %90 = math.exp %89 : vector<2x2xf32>
      %cst_69 = arith.constant dense<0.000000e+00> : vector<2xf32>
      %91 = vector.multi_reduction <add>, %90, %cst_69 [1] : vector<2x2xf32> to vector<2xf32>
      %92 = vector.shape_cast %91 : vector<2xf32> to vector<2x1xf32>
      %93 = tpu.reciprocal %92 {approx = true} : vector<2x1xf32> -> vector<2x1xf32>
      %94 = vector.broadcast %93 : vector<2x1xf32> to vector<2x2xf32>
      %95 = arith.mulf %90, %94 : vector<2x2xf32>
      %cst_70 = arith.constant dense<0.000000e+00> : vector<2x16xf32>
      %96 = tpu.matmul %95, %84, %cst_70 {dimension_numbers = #tpu.dot_dimension_numbers<[1], [0], [0], [1], [0, 0, 1, 1], [], []>} : vector<2x2xf32>, vector<2x16xf32>, vector<2x16xf32> -> vector<2x16xf32>
      %97 = arith.truncf %96 : vector<2x16xf32> to vector<2x16xbf16>
      %98 = vector.extract_strided_slice %35 {offsets = [16, 0], sizes = [16, 128], strides = [1, 1]} : vector<128x128xbf16> to vector<16x128xbf16>
      %cst_71 = arith.constant dense<0.000000e+00> : vector<2x128xf32>
      %99 = tpu.matmul %97, %98, %cst_71 {dimension_numbers = #tpu.dot_dimension_numbers<[1], [0], [0], [1], [0, 0, 1, 1], [], []>} : vector<2x16xbf16>, vector<16x128xbf16>, vector<2x128xf32> -> vector<2x128xf32>
      %100 = arith.addf %81, %99 : vector<2x128xf32>
      %101 = vector.extract_strided_slice %59 {offsets = [0, 32], sizes = [2, 16], strides = [1, 1]} : vector<2x128xf32> to vector<2x16xf32>
      %102 = vector.extract_strided_slice %60 {offsets = [0, 32], sizes = [2, 16], strides = [1, 1]} : vector<2x128xf32> to vector<2x16xf32>
      %103 = vector.extract_strided_slice %61 {offsets = [0, 32], sizes = [2, 16], strides = [1, 1]} : vector<2x128xf32> to vector<2x16xf32>
      %cst_72 = arith.constant dense<0.000000e+00> : vector<2x2xf32>
      %104 = tpu.matmul %101, %102, %cst_72 {dimension_numbers = #tpu.dot_dimension_numbers<[1], [1], [0], [0], [0, 0, 1, 0], [], []>} : vector<2x16xf32>, vector<2x16xf32>, vector<2x2xf32> -> vector<2x2xf32>
      %cst_73 = arith.constant dense<0xFF800000> : vector<2xf32>
      %105 = vector.multi_reduction <maximumf>, %104, %cst_73 [1] : vector<2x2xf32> to vector<2xf32>
      %106 = vector.shape_cast %105 : vector<2xf32> to vector<2x1xf32>
      %107 = vector.broadcast %106 : vector<2x1xf32> to vector<2x2xf32>
      %108 = arith.subf %104, %107 : vector<2x2xf32>
      %109 = math.exp %108 : vector<2x2xf32>
      %cst_74 = arith.constant dense<0.000000e+00> : vector<2xf32>
      %110 = vector.multi_reduction <add>, %109, %cst_74 [1] : vector<2x2xf32> to vector<2xf32>
      %111 = vector.shape_cast %110 : vector<2xf32> to vector<2x1xf32>
      %112 = tpu.reciprocal %111 {approx = true} : vector<2x1xf32> -> vector<2x1xf32>
      %113 = vector.broadcast %112 : vector<2x1xf32> to vector<2x2xf32>
      %114 = arith.mulf %109, %113 : vector<2x2xf32>
      %cst_75 = arith.constant dense<0.000000e+00> : vector<2x16xf32>
      %115 = tpu.matmul %114, %103, %cst_75 {dimension_numbers = #tpu.dot_dimension_numbers<[1], [0], [0], [1], [0, 0, 1, 1], [], []>} : vector<2x2xf32>, vector<2x16xf32>, vector<2x16xf32> -> vector<2x16xf32>
      %116 = arith.truncf %115 : vector<2x16xf32> to vector<2x16xbf16>
      %117 = vector.extract_strided_slice %35 {offsets = [32, 0], sizes = [16, 128], strides = [1, 1]} : vector<128x128xbf16> to vector<16x128xbf16>
      %cst_76 = arith.constant dense<0.000000e+00> : vector<2x128xf32>
      %118 = tpu.matmul %116, %117, %cst_76 {dimension_numbers = #tpu.dot_dimension_numbers<[1], [0], [0], [1], [0, 0, 1, 1], [], []>} : vector<2x16xbf16>, vector<16x128xbf16>, vector<2x128xf32> -> vector<2x128xf32>
      %119 = arith.addf %100, %118 : vector<2x128xf32>
      %120 = vector.extract_strided_slice %59 {offsets = [0, 48], sizes = [2, 16], strides = [1, 1]} : vector<2x128xf32> to vector<2x16xf32>
      %121 = vector.extract_strided_slice %60 {offsets = [0, 48], sizes = [2, 16], strides = [1, 1]} : vector<2x128xf32> to vector<2x16xf32>
      %122 = vector.extract_strided_slice %61 {offsets = [0, 48], sizes = [2, 16], strides = [1, 1]} : vector<2x128xf32> to vector<2x16xf32>
      %cst_77 = arith.constant dense<0.000000e+00> : vector<2x2xf32>
      %123 = tpu.matmul %120, %121, %cst_77 {dimension_numbers = #tpu.dot_dimension_numbers<[1], [1], [0], [0], [0, 0, 1, 0], [], []>} : vector<2x16xf32>, vector<2x16xf32>, vector<2x2xf32> -> vector<2x2xf32>
      %cst_78 = arith.constant dense<0xFF800000> : vector<2xf32>
      %124 = vector.multi_reduction <maximumf>, %123, %cst_78 [1] : vector<2x2xf32> to vector<2xf32>
      %125 = vector.shape_cast %124 : vector<2xf32> to vector<2x1xf32>
      %126 = vector.broadcast %125 : vector<2x1xf32> to vector<2x2xf32>
      %127 = arith.subf %123, %126 : vector<2x2xf32>
      %128 = math.exp %127 : vector<2x2xf32>
      %cst_79 = arith.constant dense<0.000000e+00> : vector<2xf32>
      %129 = vector.multi_reduction <add>, %128, %cst_79 [1] : vector<2x2xf32> to vector<2xf32>
      %130 = vector.shape_cast %129 : vector<2xf32> to vector<2x1xf32>
      %131 = tpu.reciprocal %130 {approx = true} : vector<2x1xf32> -> vector<2x1xf32>
      %132 = vector.broadcast %131 : vector<2x1xf32> to vector<2x2xf32>
      %133 = arith.mulf %128, %132 : vector<2x2xf32>
      %cst_80 = arith.constant dense<0.000000e+00> : vector<2x16xf32>
      %134 = tpu.matmul %133, %122, %cst_80 {dimension_numbers = #tpu.dot_dimension_numbers<[1], [0], [0], [1], [0, 0, 1, 1], [], []>} : vector<2x2xf32>, vector<2x16xf32>, vector<2x16xf32> -> vector<2x16xf32>
      %135 = arith.truncf %134 : vector<2x16xf32> to vector<2x16xbf16>
      %136 = vector.extract_strided_slice %35 {offsets = [48, 0], sizes = [16, 128], strides = [1, 1]} : vector<128x128xbf16> to vector<16x128xbf16>
      %cst_81 = arith.constant dense<0.000000e+00> : vector<2x128xf32>
      %137 = tpu.matmul %135, %136, %cst_81 {dimension_numbers = #tpu.dot_dimension_numbers<[1], [0], [0], [1], [0, 0, 1, 1], [], []>} : vector<2x16xbf16>, vector<16x128xbf16>, vector<2x128xf32> -> vector<2x128xf32>
      %138 = arith.addf %119, %137 : vector<2x128xf32>
      %139 = vector.extract_strided_slice %59 {offsets = [0, 64], sizes = [2, 16], strides = [1, 1]} : vector<2x128xf32> to vector<2x16xf32>
      %140 = vector.extract_strided_slice %60 {offsets = [0, 64], sizes = [2, 16], strides = [1, 1]} : vector<2x128xf32> to vector<2x16xf32>
      %141 = vector.extract_strided_slice %61 {offsets = [0, 64], sizes = [2, 16], strides = [1, 1]} : vector<2x128xf32> to vector<2x16xf32>
      %cst_82 = arith.constant dense<0.000000e+00> : vector<2x2xf32>
      %142 = tpu.matmul %139, %140, %cst_82 {dimension_numbers = #tpu.dot_dimension_numbers<[1], [1], [0], [0], [0, 0, 1, 0], [], []>} : vector<2x16xf32>, vector<2x16xf32>, vector<2x2xf32> -> vector<2x2xf32>
      %cst_83 = arith.constant dense<0xFF800000> : vector<2xf32>
      %143 = vector.multi_reduction <maximumf>, %142, %cst_83 [1] : vector<2x2xf32> to vector<2xf32>
      %144 = vector.shape_cast %143 : vector<2xf32> to vector<2x1xf32>
      %145 = vector.broadcast %144 : vector<2x1xf32> to vector<2x2xf32>
      %146 = arith.subf %142, %145 : vector<2x2xf32>
      %147 = math.exp %146 : vector<2x2xf32>
      %cst_84 = arith.constant dense<0.000000e+00> : vector<2xf32>
      %148 = vector.multi_reduction <add>, %147, %cst_84 [1] : vector<2x2xf32> to vector<2xf32>
      %149 = vector.shape_cast %148 : vector<2xf32> to vector<2x1xf32>
      %150 = tpu.reciprocal %149 {approx = true} : vector<2x1xf32> -> vector<2x1xf32>
      %151 = vector.broadcast %150 : vector<2x1xf32> to vector<2x2xf32>
      %152 = arith.mulf %147, %151 : vector<2x2xf32>
      %cst_85 = arith.constant dense<0.000000e+00> : vector<2x16xf32>
      %153 = tpu.matmul %152, %141, %cst_85 {dimension_numbers = #tpu.dot_dimension_numbers<[1], [0], [0], [1], [0, 0, 1, 1], [], []>} : vector<2x2xf32>, vector<2x16xf32>, vector<2x16xf32> -> vector<2x16xf32>
      %154 = arith.truncf %153 : vector<2x16xf32> to vector<2x16xbf16>
      %155 = vector.extract_strided_slice %35 {offsets = [64, 0], sizes = [16, 128], strides = [1, 1]} : vector<128x128xbf16> to vector<16x128xbf16>
      %cst_86 = arith.constant dense<0.000000e+00> : vector<2x128xf32>
      %156 = tpu.matmul %154, %155, %cst_86 {dimension_numbers = #tpu.dot_dimension_numbers<[1], [0], [0], [1], [0, 0, 1, 1], [], []>} : vector<2x16xbf16>, vector<16x128xbf16>, vector<2x128xf32> -> vector<2x128xf32>
      %157 = arith.addf %138, %156 : vector<2x128xf32>
      %158 = vector.extract_strided_slice %59 {offsets = [0, 80], sizes = [2, 16], strides = [1, 1]} : vector<2x128xf32> to vector<2x16xf32>
      %159 = vector.extract_strided_slice %60 {offsets = [0, 80], sizes = [2, 16], strides = [1, 1]} : vector<2x128xf32> to vector<2x16xf32>
      %160 = vector.extract_strided_slice %61 {offsets = [0, 80], sizes = [2, 16], strides = [1, 1]} : vector<2x128xf32> to vector<2x16xf32>
      %cst_87 = arith.constant dense<0.000000e+00> : vector<2x2xf32>
      %161 = tpu.matmul %158, %159, %cst_87 {dimension_numbers = #tpu.dot_dimension_numbers<[1], [1], [0], [0], [0, 0, 1, 0], [], []>} : vector<2x16xf32>, vector<2x16xf32>, vector<2x2xf32> -> vector<2x2xf32>
      %cst_88 = arith.constant dense<0xFF800000> : vector<2xf32>
      %162 = vector.multi_reduction <maximumf>, %161, %cst_88 [1] : vector<2x2xf32> to vector<2xf32>
      %163 = vector.shape_cast %162 : vector<2xf32> to vector<2x1xf32>
      %164 = vector.broadcast %163 : vector<2x1xf32> to vector<2x2xf32>
      %165 = arith.subf %161, %164 : vector<2x2xf32>
      %166 = math.exp %165 : vector<2x2xf32>
      %cst_89 = arith.constant dense<0.000000e+00> : vector<2xf32>
      %167 = vector.multi_reduction <add>, %166, %cst_89 [1] : vector<2x2xf32> to vector<2xf32>
      %168 = vector.shape_cast %167 : vector<2xf32> to vector<2x1xf32>
      %169 = tpu.reciprocal %168 {approx = true} : vector<2x1xf32> -> vector<2x1xf32>
      %170 = vector.broadcast %169 : vector<2x1xf32> to vector<2x2xf32>
      %171 = arith.mulf %166, %170 : vector<2x2xf32>
      %cst_90 = arith.constant dense<0.000000e+00> : vector<2x16xf32>
      %172 = tpu.matmul %171, %160, %cst_90 {dimension_numbers = #tpu.dot_dimension_numbers<[1], [0], [0], [1], [0, 0, 1, 1], [], []>} : vector<2x2xf32>, vector<2x16xf32>, vector<2x16xf32> -> vector<2x16xf32>
      %173 = arith.truncf %172 : vector<2x16xf32> to vector<2x16xbf16>
      %174 = vector.extract_strided_slice %35 {offsets = [80, 0], sizes = [16, 128], strides = [1, 1]} : vector<128x128xbf16> to vector<16x128xbf16>
      %cst_91 = arith.constant dense<0.000000e+00> : vector<2x128xf32>
      %175 = tpu.matmul %173, %174, %cst_91 {dimension_numbers = #tpu.dot_dimension_numbers<[1], [0], [0], [1], [0, 0, 1, 1], [], []>} : vector<2x16xbf16>, vector<16x128xbf16>, vector<2x128xf32> -> vector<2x128xf32>
      %176 = arith.addf %157, %175 : vector<2x128xf32>
      %177 = vector.extract_strided_slice %59 {offsets = [0, 96], sizes = [2, 16], strides = [1, 1]} : vector<2x128xf32> to vector<2x16xf32>
      %178 = vector.extract_strided_slice %60 {offsets = [0, 96], sizes = [2, 16], strides = [1, 1]} : vector<2x128xf32> to vector<2x16xf32>
      %179 = vector.extract_strided_slice %61 {offsets = [0, 96], sizes = [2, 16], strides = [1, 1]} : vector<2x128xf32> to vector<2x16xf32>
      %cst_92 = arith.constant dense<0.000000e+00> : vector<2x2xf32>
      %180 = tpu.matmul %177, %178, %cst_92 {dimension_numbers = #tpu.dot_dimension_numbers<[1], [1], [0], [0], [0, 0, 1, 0], [], []>} : vector<2x16xf32>, vector<2x16xf32>, vector<2x2xf32> -> vector<2x2xf32>
      %cst_93 = arith.constant dense<0xFF800000> : vector<2xf32>
      %181 = vector.multi_reduction <maximumf>, %180, %cst_93 [1] : vector<2x2xf32> to vector<2xf32>
      %182 = vector.shape_cast %181 : vector<2xf32> to vector<2x1xf32>
      %183 = vector.broadcast %182 : vector<2x1xf32> to vector<2x2xf32>
      %184 = arith.subf %180, %183 : vector<2x2xf32>
      %185 = math.exp %184 : vector<2x2xf32>
      %cst_94 = arith.constant dense<0.000000e+00> : vector<2xf32>
      %186 = vector.multi_reduction <add>, %185, %cst_94 [1] : vector<2x2xf32> to vector<2xf32>
      %187 = vector.shape_cast %186 : vector<2xf32> to vector<2x1xf32>
      %188 = tpu.reciprocal %187 {approx = true} : vector<2x1xf32> -> vector<2x1xf32>
      %189 = vector.broadcast %188 : vector<2x1xf32> to vector<2x2xf32>
      %190 = arith.mulf %185, %189 : vector<2x2xf32>
      %cst_95 = arith.constant dense<0.000000e+00> : vector<2x16xf32>
      %191 = tpu.matmul %190, %179, %cst_95 {dimension_numbers = #tpu.dot_dimension_numbers<[1], [0], [0], [1], [0, 0, 1, 1], [], []>} : vector<2x2xf32>, vector<2x16xf32>, vector<2x16xf32> -> vector<2x16xf32>
      %192 = arith.truncf %191 : vector<2x16xf32> to vector<2x16xbf16>
      %193 = vector.extract_strided_slice %35 {offsets = [96, 0], sizes = [16, 128], strides = [1, 1]} : vector<128x128xbf16> to vector<16x128xbf16>
      %cst_96 = arith.constant dense<0.000000e+00> : vector<2x128xf32>
      %194 = tpu.matmul %192, %193, %cst_96 {dimension_numbers = #tpu.dot_dimension_numbers<[1], [0], [0], [1], [0, 0, 1, 1], [], []>} : vector<2x16xbf16>, vector<16x128xbf16>, vector<2x128xf32> -> vector<2x128xf32>
      %195 = arith.addf %176, %194 : vector<2x128xf32>
      %196 = vector.extract_strided_slice %59 {offsets = [0, 112], sizes = [2, 16], strides = [1, 1]} : vector<2x128xf32> to vector<2x16xf32>
      %197 = vector.extract_strided_slice %60 {offsets = [0, 112], sizes = [2, 16], strides = [1, 1]} : vector<2x128xf32> to vector<2x16xf32>
      %198 = vector.extract_strided_slice %61 {offsets = [0, 112], sizes = [2, 16], strides = [1, 1]} : vector<2x128xf32> to vector<2x16xf32>
      %cst_97 = arith.constant dense<0.000000e+00> : vector<2x2xf32>
      %199 = tpu.matmul %196, %197, %cst_97 {dimension_numbers = #tpu.dot_dimension_numbers<[1], [1], [0], [0], [0, 0, 1, 0], [], []>} : vector<2x16xf32>, vector<2x16xf32>, vector<2x2xf32> -> vector<2x2xf32>
      %cst_98 = arith.constant dense<0xFF800000> : vector<2xf32>
      %200 = vector.multi_reduction <maximumf>, %199, %cst_98 [1] : vector<2x2xf32> to vector<2xf32>
      %201 = vector.shape_cast %200 : vector<2xf32> to vector<2x1xf32>
      %202 = vector.broadcast %201 : vector<2x1xf32> to vector<2x2xf32>
      %203 = arith.subf %199, %202 : vector<2x2xf32>
      %204 = math.exp %203 : vector<2x2xf32>
      %cst_99 = arith.constant dense<0.000000e+00> : vector<2xf32>
      %205 = vector.multi_reduction <add>, %204, %cst_99 [1] : vector<2x2xf32> to vector<2xf32>
      %206 = vector.shape_cast %205 : vector<2xf32> to vector<2x1xf32>
      %207 = tpu.reciprocal %206 {approx = true} : vector<2x1xf32> -> vector<2x1xf32>
      %208 = vector.broadcast %207 : vector<2x1xf32> to vector<2x2xf32>
      %209 = arith.mulf %204, %208 : vector<2x2xf32>
      %cst_100 = arith.constant dense<0.000000e+00> : vector<2x16xf32>
      %210 = tpu.matmul %209, %198, %cst_100 {dimension_numbers = #tpu.dot_dimension_numbers<[1], [0], [0], [1], [0, 0, 1, 1], [], []>} : vector<2x2xf32>, vector<2x16xf32>, vector<2x16xf32> -> vector<2x16xf32>
      %211 = arith.truncf %210 : vector<2x16xf32> to vector<2x16xbf16>
      %212 = vector.extract_strided_slice %35 {offsets = [112, 0], sizes = [16, 128], strides = [1, 1]} : vector<128x128xbf16> to vector<16x128xbf16>
      %cst_101 = arith.constant dense<0.000000e+00> : vector<2x128xf32>
      %213 = tpu.matmul %211, %212, %cst_101 {dimension_numbers = #tpu.dot_dimension_numbers<[1], [0], [0], [1], [0, 0, 1, 1], [], []>} : vector<2x16xbf16>, vector<16x128xbf16>, vector<2x128xf32> -> vector<2x128xf32>
      %214 = arith.addf %195, %213 : vector<2x128xf32>
      %215 = vector.broadcast %37 : vector<1x128xf32> to vector<2x128xf32>
      %216 = arith.addf %214, %215 : vector<2x128xf32>
      %217 = arith.addf %54, %216 : vector<2x128xf32>
      %cst_102 = arith.constant dense<0.000000e+00> : vector<2xf32>
      %218 = vector.multi_reduction <add>, %217, %cst_102 [1] : vector<2x128xf32> to vector<2xf32>
      %219 = vector.shape_cast %218 : vector<2xf32> to vector<2x1xf32>
      %cst_103 = arith.constant 1.280000e+02 : f32
      %220 = vector.broadcast %cst_103 : f32 to vector<2x1xf32>
      %221 = arith.divf %219, %220 : vector<2x1xf32>
      %222 = vector.broadcast %221 : vector<2x1xf32> to vector<2x128xf32>
      %223 = arith.subf %217, %222 : vector<2x128xf32>
      %224 = arith.mulf %223, %223 : vector<2x128xf32>
      %cst_104 = arith.constant dense<0.000000e+00> : vector<2xf32>
      %225 = vector.multi_reduction <add>, %224, %cst_104 [1] : vector<2x128xf32> to vector<2xf32>
      %226 = vector.shape_cast %225 : vector<2xf32> to vector<2x1xf32>
      %cst_105 = arith.constant 1.280000e+02 : f32
      %227 = vector.broadcast %cst_105 : f32 to vector<2x1xf32>
      %228 = arith.divf %226, %227 : vector<2x1xf32>
      %cst_106 = arith.constant 9.99999974E-6 : f32
      %229 = vector.broadcast %cst_106 : f32 to vector<2x1xf32>
      %230 = arith.addf %228, %229 : vector<2x1xf32>
      %231 = math.rsqrt %230 : vector<2x1xf32>
      %232 = vector.broadcast %231 : vector<2x1xf32> to vector<2x128xf32>
      %233 = arith.mulf %223, %232 : vector<2x128xf32>
      %234 = vector.broadcast %39 : vector<1x128xf32> to vector<2x128xf32>
      %235 = arith.mulf %233, %234 : vector<2x128xf32>
      %236 = vector.broadcast %41 : vector<1x128xf32> to vector<2x128xf32>
      %237 = arith.addf %235, %236 : vector<2x128xf32>
      %238 = arith.truncf %237 : vector<2x128xf32> to vector<2x128xbf16>
      %cst_107 = arith.constant dense<0.000000e+00> : vector<2x2048xf32>
      %239 = tpu.matmul %238, %43, %cst_107 {dimension_numbers = #tpu.dot_dimension_numbers<[1], [0], [0], [1], [0, 0, 1, 1], [], []>} : vector<2x128xbf16>, vector<128x2048xbf16>, vector<2x2048xf32> -> vector<2x2048xf32>
      %240 = vector.broadcast %45 : vector<1x2048xf32> to vector<2x2048xf32>
      %241 = arith.addf %239, %240 : vector<2x2048xf32>
      %cst_108 = arith.constant 0.000000e+00 : f32
      %242 = vector.broadcast %cst_108 : f32 to vector<2x2048xf32>
      %243 = arith.maximumf %241, %242 : vector<2x2048xf32>
      %244 = arith.truncf %243 : vector<2x2048xf32> to vector<2x2048xbf16>
      %cst_109 = arith.constant dense<0.000000e+00> : vector<2x128xf32>
      %245 = tpu.matmul %244, %47, %cst_109 {dimension_numbers = #tpu.dot_dimension_numbers<[1], [0], [0], [1], [0, 0, 1, 1], [], []>} : vector<2x2048xbf16>, vector<2048x128xbf16>, vector<2x128xf32> -> vector<2x128xf32>
      %246 = vector.broadcast %49 : vector<1x128xf32> to vector<2x128xf32>
      %247 = arith.addf %245, %246 : vector<2x128xf32>
      %248 = arith.addf %237, %247 : vector<2x128xf32>
      %cst_110 = arith.constant dense<0.000000e+00> : vector<2xf32>
      %249 = vector.multi_reduction <add>, %248, %cst_110 [1] : vector<2x128xf32> to vector<2xf32>
      %250 = vector.shape_cast %249 : vector<2xf32> to vector<2x1xf32>
      %cst_111 = arith.constant 1.280000e+02 : f32
      %251 = vector.broadcast %cst_111 : f32 to vector<2x1xf32>
      %252 = arith.divf %250, %251 : vector<2x1xf32>
      %253 = vector.broadcast %252 : vector<2x1xf32> to vector<2x128xf32>
      %254 = arith.subf %248, %253 : vector<2x128xf32>
      %255 = arith.mulf %254, %254 : vector<2x128xf32>
      %cst_112 = arith.constant dense<0.000000e+00> : vector<2xf32>
      %256 = vector.multi_reduction <add>, %255, %cst_112 [1] : vector<2x128xf32> to vector<2xf32>
      %257 = vector.shape_cast %256 : vector<2xf32> to vector<2x1xf32>
      %cst_113 = arith.constant 1.280000e+02 : f32
      %258 = vector.broadcast %cst_113 : f32 to vector<2x1xf32>
      %259 = arith.divf %257, %258 : vector<2x1xf32>
      %cst_114 = arith.constant 9.99999974E-6 : f32
      %260 = vector.broadcast %cst_114 : f32 to vector<2x1xf32>
      %261 = arith.addf %259, %260 : vector<2x1xf32>
      %262 = math.rsqrt %261 : vector<2x1xf32>
      %263 = vector.broadcast %262 : vector<2x1xf32> to vector<2x128xf32>
      %264 = arith.mulf %254, %263 : vector<2x128xf32>
      %265 = vector.broadcast %51 : vector<1x128xf32> to vector<2x128xf32>
      %266 = arith.mulf %264, %265 : vector<2x128xf32>
      %267 = vector.broadcast %53 : vector<1x128xf32> to vector<2x128xf32>
      %268 = arith.addf %266, %267 : vector<2x128xf32>
      %c0_115 = arith.constant 0 : index
      %c0_116 = arith.constant 0 : index
      %269 = vector.load %arg25[%c0_115, %c0_116] : memref<2x128xf32, #tpu.memory_space<vmem>>, vector<2x128xf32>
      tpu.vector_store %arg25[%c0_115, %c0_116], %268 {strides = array<i32>} : memref<2x128xf32, #tpu.memory_space<vmem>>, vector<2x128xf32>,
    } else {
    }
    %c0_i32_1 = arith.constant 0 : i32
    %3 = arith.cmpi sgt, %arg0, %c0_i32_1 : i32
    %4 = arith.extui %3 : i1 to i32
    %c0_i32_2 = arith.constant 0 : i32
    %5 = arith.cmpi ne, %4, %c0_i32_2 : i32
    scf.if %5 {
      %c0 = arith.constant 0 : index
      %c0_4 = arith.constant 0 : index
      %c0_5 = arith.constant 0 : index
      %9 = vector.load %arg12[%c0, %c0_4, %c0_5] : memref<1x128x384xbf16, #tpu.memory_space<vmem>>, vector<1x128x384xbf16>
      %10 = vector.shape_cast %9 : vector<1x128x384xbf16> to vector<128x384xbf16>
      %c0_6 = arith.constant 0 : index
      %c0_7 = arith.constant 0 : index
      %c0_8 = arith.constant 0 : index
      %11 = vector.load %arg13[%c0_6, %c0_7, %c0_8] : memref<1x1x384xf32, #tpu.memory_space<vmem>>, vector<1x1x384xf32>
      %12 = vector.shape_cast %11 : vector<1x1x384xf32> to vector<1x384xf32>
      %c0_9 = arith.constant 0 : index
      %c0_10 = arith.constant 0 : index
      %c0_11 = arith.constant 0 : index
      %13 = vector.load %arg14[%c0_9, %c0_10, %c0_11] : memref<1x128x128xbf16, #tpu.memory_space<vmem>>, vector<1x128x128xbf16>
      %14 = vector.shape_cast %13 : vector<1x128x128xbf16> to vector<128x128xbf16>
      %c0_12 = arith.constant 0 : index
      %c0_13 = arith.constant 0 : index
      %c0_14 = arith.constant 0 : index
      %15 = vector.load %arg15[%c0_12, %c0_13, %c0_14] : memref<1x1x128xf32, #tpu.memory_space<vmem>>, vector<1x1x128xf32>
      %16 = vector.shape_cast %15 : vector<1x1x128xf32> to vector<1x128xf32>
      %c0_15 = arith.constant 0 : index
      %c0_16 = arith.constant 0 : index
      %c0_17 = arith.constant 0 : index
      %17 = vector.load %arg16[%c0_15, %c0_16, %c0_17] : memref<1x1x128xf32, #tpu.memory_space<vmem>>, vector<1x1x128xf32>
      %18 = vector.shape_cast %17 : vector<1x1x128xf32> to vector<1x128xf32>
      %c0_18 = arith.constant 0 : index
      %c0_19 = arith.constant 0 : index
      %c0_20 = arith.constant 0 : index
      %19 = vector.load %arg17[%c0_18, %c0_19, %c0_20] : memref<1x1x128xf32, #tpu.memory_space<vmem>>, vector<1x1x128xf32>
      %20 = vector.shape_cast %19 : vector<1x1x128xf32> to vector<1x128xf32>
      %c0_21 = arith.constant 0 : index
      %c0_22 = arith.constant 0 : index
      %c0_23 = arith.constant 0 : index
      %21 = vector.load %arg18[%c0_21, %c0_22, %c0_23] : memref<1x128x2048xbf16, #tpu.memory_space<vmem>>, vector<1x128x2048xbf16>
      %22 = vector.shape_cast %21 : vector<1x128x2048xbf16> to vector<128x2048xbf16>
      %c0_24 = arith.constant 0 : index
      %c0_25 = arith.constant 0 : index
      %c0_26 = arith.constant 0 : index
      %23 = vector.load %arg19[%c0_24, %c0_25, %c0_26] : memref<1x1x2048xf32, #tpu.memory_space<vmem>>, vector<1x1x2048xf32>
      %24 = vector.shape_cast %23 : vector<1x1x2048xf32> to vector<1x2048xf32>
      %c0_27 = arith.constant 0 : index
      %c0_28 = arith.constant 0 : index
      %c0_29 = arith.constant 0 : index
      %25 = vector.load %arg20[%c0_27, %c0_28, %c0_29] : memref<1x2048x128xbf16, #tpu.memory_space<vmem>>, vector<1x2048x128xbf16>
      %26 = vector.shape_cast %25 : vector<1x2048x128xbf16> to vector<2048x128xbf16>
      %c0_30 = arith.constant 0 : index
      %c0_31 = arith.constant 0 : index
      %c0_32 = arith.constant 0 : index
      %27 = vector.load %arg21[%c0_30, %c0_31, %c0_32] : memref<1x1x128xf32, #tpu.memory_space<vmem>>, vector<1x1x128xf32>
      %28 = vector.shape_cast %27 : vector<1x1x128xf32> to vector<1x128xf32>
      %c0_33 = arith.constant 0 : index
      %c0_34 = arith.constant 0 : index
      %c0_35 = arith.constant 0 : index
      %29 = vector.load %arg22[%c0_33, %c0_34, %c0_35] : memref<1x1x128xf32, #tpu.memory_space<vmem>>, vector<1x1x128xf32>
      %30 = vector.shape_cast %29 : vector<1x1x128xf32> to vector<1x128xf32>
      %c0_36 = arith.constant 0 : index
      %c0_37 = arith.constant 0 : index
      %c0_38 = arith.constant 0 : index
      %31 = vector.load %arg23[%c0_36, %c0_37, %c0_38] : memref<1x1x128xf32, #tpu.memory_space<vmem>>, vector<1x1x128xf32>
      %32 = vector.shape_cast %31 : vector<1x1x128xf32> to vector<1x128xf32>
      %c0_39 = arith.constant 0 : index
      %c0_40 = arith.constant 0 : index
      %33 = vector.load %arg26[%c0_39, %c0_40] : memref<10x128xf32, #tpu.memory_space<vmem>>, vector<10x128xf32>
      %c0_41 = arith.constant 0 : index
      %c0_42 = arith.constant 0 : index
      %34 = vector.load %arg8[%c0_41, %c0_42] : memref<2x5xf32, #tpu.memory_space<vmem>>, vector<2x5xf32>
      %35 = arith.truncf %33 : vector<10x128xf32> to vector<10x128xbf16>
      %cst = arith.constant dense<0.000000e+00> : vector<10x384xf32>
      %36 = tpu.matmul %35, %10, %cst {dimension_numbers = #tpu.dot_dimension_numbers<[1], [0], [0], [1], [0, 0, 1, 1], [], []>} : vector<10x128xbf16>, vector<128x384xbf16>, vector<10x384xf32> -> vector<10x384xf32>
      %37 = vector.broadcast %12 : vector<1x384xf32> to vector<10x384xf32>
      %38 = arith.addf %36, %37 : vector<10x384xf32>
      %39 = vector.extract_strided_slice %38 {offsets = [0, 0], sizes = [10, 128], strides = [1, 1]} : vector<10x384xf32> to vector<10x128xf32>
      %40 = vector.extract_strided_slice %38 {offsets = [0, 128], sizes = [10, 128], strides = [1, 1]} : vector<10x384xf32> to vector<10x128xf32>
      %41 = vector.extract_strided_slice %38 {offsets = [0, 256], sizes = [10, 128], strides = [1, 1]} : vector<10x384xf32> to vector<10x128xf32>
      %42 = vector.extract_strided_slice %39 {offsets = [0, 0], sizes = [5, 128], strides = [1, 1]} : vector<10x128xf32> to vector<5x128xf32>
      %43 = vector.extract_strided_slice %40 {offsets = [0, 0], sizes = [5, 128], strides = [1, 1]} : vector<10x128xf32> to vector<5x128xf32>
      %44 = vector.extract_strided_slice %41 {offsets = [0, 0], sizes = [5, 128], strides = [1, 1]} : vector<10x128xf32> to vector<5x128xf32>
      %cst_43 = arith.constant 0.000000e+00 : f32
      %45 = vector.broadcast %cst_43 : f32 to vector<5x128xf32>
      %46 = vector.extract_strided_slice %42 {offsets = [0, 0], sizes = [5, 16], strides = [1, 1]} : vector<5x128xf32> to vector<5x16xf32>
      %47 = vector.extract_strided_slice %43 {offsets = [0, 0], sizes = [5, 16], strides = [1, 1]} : vector<5x128xf32> to vector<5x16xf32>
      %48 = vector.extract_strided_slice %44 {offsets = [0, 0], sizes = [5, 16], strides = [1, 1]} : vector<5x128xf32> to vector<5x16xf32>
      %cst_44 = arith.constant dense<0.000000e+00> : vector<5x5xf32>
      %49 = tpu.matmul %46, %47, %cst_44 {dimension_numbers = #tpu.dot_dimension_numbers<[1], [1], [0], [0], [0, 0, 1, 0], [], []>} : vector<5x16xf32>, vector<5x16xf32>, vector<5x5xf32> -> vector<5x5xf32>
      %50 = vector.extract_strided_slice %34 {offsets = [0, 0], sizes = [1, 5], strides = [1, 1]} : vector<2x5xf32> to vector<1x5xf32>
      %51 = vector.broadcast %50 : vector<1x5xf32> to vector<5x5xf32>
      %52 = arith.addf %49, %51 : vector<5x5xf32>
      %cst_45 = arith.constant dense<0xFF800000> : vector<5xf32>
      %53 = vector.multi_reduction <maximumf>, %52, %cst_45 [1] : vector<5x5xf32> to vector<5xf32>
      %54 = vector.shape_cast %53 : vector<5xf32> to vector<5x1xf32>
      %55 = vector.broadcast %54 : vector<5x1xf32> to vector<5x5xf32>
      %56 = arith.subf %52, %55 : vector<5x5xf32>
      %57 = math.exp %56 : vector<5x5xf32>
      %cst_46 = arith.constant dense<0.000000e+00> : vector<5xf32>
      %58 = vector.multi_reduction <add>, %57, %cst_46 [1] : vector<5x5xf32> to vector<5xf32>
      %59 = vector.shape_cast %58 : vector<5xf32> to vector<5x1xf32>
      %60 = tpu.reciprocal %59 {approx = true} : vector<5x1xf32> -> vector<5x1xf32>
      %61 = vector.broadcast %60 : vector<5x1xf32> to vector<5x5xf32>
      %62 = arith.mulf %57, %61 : vector<5x5xf32>
      %cst_47 = arith.constant dense<0.000000e+00> : vector<5x16xf32>
      %63 = tpu.matmul %62, %48, %cst_47 {dimension_numbers = #tpu.dot_dimension_numbers<[1], [0], [0], [1], [0, 0, 1, 1], [], []>} : vector<5x5xf32>, vector<5x16xf32>, vector<5x16xf32> -> vector<5x16xf32>
      %64 = arith.truncf %63 : vector<5x16xf32> to vector<5x16xbf16>
      %65 = vector.extract_strided_slice %14 {offsets = [0, 0], sizes = [16, 128], strides = [1, 1]} : vector<128x128xbf16> to vector<16x128xbf16>
      %cst_48 = arith.constant dense<0.000000e+00> : vector<5x128xf32>
      %66 = tpu.matmul %64, %65, %cst_48 {dimension_numbers = #tpu.dot_dimension_numbers<[1], [0], [0], [1], [0, 0, 1, 1], [], []>} : vector<5x16xbf16>, vector<16x128xbf16>, vector<5x128xf32> -> vector<5x128xf32>
      %67 = arith.addf %45, %66 : vector<5x128xf32>
      %68 = vector.extract_strided_slice %42 {offsets = [0, 16], sizes = [5, 16], strides = [1, 1]} : vector<5x128xf32> to vector<5x16xf32>
      %69 = vector.extract_strided_slice %43 {offsets = [0, 16], sizes = [5, 16], strides = [1, 1]} : vector<5x128xf32> to vector<5x16xf32>
      %70 = vector.extract_strided_slice %44 {offsets = [0, 16], sizes = [5, 16], strides = [1, 1]} : vector<5x128xf32> to vector<5x16xf32>
      %cst_49 = arith.constant dense<0.000000e+00> : vector<5x5xf32>
      %71 = tpu.matmul %68, %69, %cst_49 {dimension_numbers = #tpu.dot_dimension_numbers<[1], [1], [0], [0], [0, 0, 1, 0], [], []>} : vector<5x16xf32>, vector<5x16xf32>, vector<5x5xf32> -> vector<5x5xf32>
      %72 = vector.extract_strided_slice %34 {offsets = [0, 0], sizes = [1, 5], strides = [1, 1]} : vector<2x5xf32> to vector<1x5xf32>
      %73 = vector.broadcast %72 : vector<1x5xf32> to vector<5x5xf32>
      %74 = arith.addf %71, %73 : vector<5x5xf32>
      %cst_50 = arith.constant dense<0xFF800000> : vector<5xf32>
      %75 = vector.multi_reduction <maximumf>, %74, %cst_50 [1] : vector<5x5xf32> to vector<5xf32>
      %76 = vector.shape_cast %75 : vector<5xf32> to vector<5x1xf32>
      %77 = vector.broadcast %76 : vector<5x1xf32> to vector<5x5xf32>
      %78 = arith.subf %74, %77 : vector<5x5xf32>
      %79 = math.exp %78 : vector<5x5xf32>
      %cst_51 = arith.constant dense<0.000000e+00> : vector<5xf32>
      %80 = vector.multi_reduction <add>, %79, %cst_51 [1] : vector<5x5xf32> to vector<5xf32>
      %81 = vector.shape_cast %80 : vector<5xf32> to vector<5x1xf32>
      %82 = tpu.reciprocal %81 {approx = true} : vector<5x1xf32> -> vector<5x1xf32>
      %83 = vector.broadcast %82 : vector<5x1xf32> to vector<5x5xf32>
      %84 = arith.mulf %79, %83 : vector<5x5xf32>
      %cst_52 = arith.constant dense<0.000000e+00> : vector<5x16xf32>
      %85 = tpu.matmul %84, %70, %cst_52 {dimension_numbers = #tpu.dot_dimension_numbers<[1], [0], [0], [1], [0, 0, 1, 1], [], []>} : vector<5x5xf32>, vector<5x16xf32>, vector<5x16xf32> -> vector<5x16xf32>
      %86 = arith.truncf %85 : vector<5x16xf32> to vector<5x16xbf16>
      %87 = vector.extract_strided_slice %14 {offsets = [16, 0], sizes = [16, 128], strides = [1, 1]} : vector<128x128xbf16> to vector<16x128xbf16>
      %cst_53 = arith.constant dense<0.000000e+00> : vector<5x128xf32>
      %88 = tpu.matmul %86, %87, %cst_53 {dimension_numbers = #tpu.dot_dimension_numbers<[1], [0], [0], [1], [0, 0, 1, 1], [], []>} : vector<5x16xbf16>, vector<16x128xbf16>, vector<5x128xf32> -> vector<5x128xf32>
      %89 = arith.addf %67, %88 : vector<5x128xf32>
      %90 = vector.extract_strided_slice %42 {offsets = [0, 32], sizes = [5, 16], strides = [1, 1]} : vector<5x128xf32> to vector<5x16xf32>
      %91 = vector.extract_strided_slice %43 {offsets = [0, 32], sizes = [5, 16], strides = [1, 1]} : vector<5x128xf32> to vector<5x16xf32>
      %92 = vector.extract_strided_slice %44 {offsets = [0, 32], sizes = [5, 16], strides = [1, 1]} : vector<5x128xf32> to vector<5x16xf32>
      %cst_54 = arith.constant dense<0.000000e+00> : vector<5x5xf32>
      %93 = tpu.matmul %90, %91, %cst_54 {dimension_numbers = #tpu.dot_dimension_numbers<[1], [1], [0], [0], [0, 0, 1, 0], [], []>} : vector<5x16xf32>, vector<5x16xf32>, vector<5x5xf32> -> vector<5x5xf32>
      %94 = vector.extract_strided_slice %34 {offsets = [0, 0], sizes = [1, 5], strides = [1, 1]} : vector<2x5xf32> to vector<1x5xf32>
      %95 = vector.broadcast %94 : vector<1x5xf32> to vector<5x5xf32>
      %96 = arith.addf %93, %95 : vector<5x5xf32>
      %cst_55 = arith.constant dense<0xFF800000> : vector<5xf32>
      %97 = vector.multi_reduction <maximumf>, %96, %cst_55 [1] : vector<5x5xf32> to vector<5xf32>
      %98 = vector.shape_cast %97 : vector<5xf32> to vector<5x1xf32>
      %99 = vector.broadcast %98 : vector<5x1xf32> to vector<5x5xf32>
      %100 = arith.subf %96, %99 : vector<5x5xf32>
      %101 = math.exp %100 : vector<5x5xf32>
      %cst_56 = arith.constant dense<0.000000e+00> : vector<5xf32>
      %102 = vector.multi_reduction <add>, %101, %cst_56 [1] : vector<5x5xf32> to vector<5xf32>
      %103 = vector.shape_cast %102 : vector<5xf32> to vector<5x1xf32>
      %104 = tpu.reciprocal %103 {approx = true} : vector<5x1xf32> -> vector<5x1xf32>
      %105 = vector.broadcast %104 : vector<5x1xf32> to vector<5x5xf32>
      %106 = arith.mulf %101, %105 : vector<5x5xf32>
      %cst_57 = arith.constant dense<0.000000e+00> : vector<5x16xf32>
      %107 = tpu.matmul %106, %92, %cst_57 {dimension_numbers = #tpu.dot_dimension_numbers<[1], [0], [0], [1], [0, 0, 1, 1], [], []>} : vector<5x5xf32>, vector<5x16xf32>, vector<5x16xf32> -> vector<5x16xf32>
      %108 = arith.truncf %107 : vector<5x16xf32> to vector<5x16xbf16>
      %109 = vector.extract_strided_slice %14 {offsets = [32, 0], sizes = [16, 128], strides = [1, 1]} : vector<128x128xbf16> to vector<16x128xbf16>
      %cst_58 = arith.constant dense<0.000000e+00> : vector<5x128xf32>
      %110 = tpu.matmul %108, %109, %cst_58 {dimension_numbers = #tpu.dot_dimension_numbers<[1], [0], [0], [1], [0, 0, 1, 1], [], []>} : vector<5x16xbf16>, vector<16x128xbf16>, vector<5x128xf32> -> vector<5x128xf32>
      %111 = arith.addf %89, %110 : vector<5x128xf32>
      %112 = vector.extract_strided_slice %42 {offsets = [0, 48], sizes = [5, 16], strides = [1, 1]} : vector<5x128xf32> to vector<5x16xf32>
      %113 = vector.extract_strided_slice %43 {offsets = [0, 48], sizes = [5, 16], strides = [1, 1]} : vector<5x128xf32> to vector<5x16xf32>
      %114 = vector.extract_strided_slice %44 {offsets = [0, 48], sizes = [5, 16], strides = [1, 1]} : vector<5x128xf32> to vector<5x16xf32>
      %cst_59 = arith.constant dense<0.000000e+00> : vector<5x5xf32>
      %115 = tpu.matmul %112, %113, %cst_59 {dimension_numbers = #tpu.dot_dimension_numbers<[1], [1], [0], [0], [0, 0, 1, 0], [], []>} : vector<5x16xf32>, vector<5x16xf32>, vector<5x5xf32> -> vector<5x5xf32>
      %116 = vector.extract_strided_slice %34 {offsets = [0, 0], sizes = [1, 5], strides = [1, 1]} : vector<2x5xf32> to vector<1x5xf32>
      %117 = vector.broadcast %116 : vector<1x5xf32> to vector<5x5xf32>
      %118 = arith.addf %115, %117 : vector<5x5xf32>
      %cst_60 = arith.constant dense<0xFF800000> : vector<5xf32>
      %119 = vector.multi_reduction <maximumf>, %118, %cst_60 [1] : vector<5x5xf32> to vector<5xf32>
      %120 = vector.shape_cast %119 : vector<5xf32> to vector<5x1xf32>
      %121 = vector.broadcast %120 : vector<5x1xf32> to vector<5x5xf32>
      %122 = arith.subf %118, %121 : vector<5x5xf32>
      %123 = math.exp %122 : vector<5x5xf32>
      %cst_61 = arith.constant dense<0.000000e+00> : vector<5xf32>
      %124 = vector.multi_reduction <add>, %123, %cst_61 [1] : vector<5x5xf32> to vector<5xf32>
      %125 = vector.shape_cast %124 : vector<5xf32> to vector<5x1xf32>
      %126 = tpu.reciprocal %125 {approx = true} : vector<5x1xf32> -> vector<5x1xf32>
      %127 = vector.broadcast %126 : vector<5x1xf32> to vector<5x5xf32>
      %128 = arith.mulf %123, %127 : vector<5x5xf32>
      %cst_62 = arith.constant dense<0.000000e+00> : vector<5x16xf32>
      %129 = tpu.matmul %128, %114, %cst_62 {dimension_numbers = #tpu.dot_dimension_numbers<[1], [0], [0], [1], [0, 0, 1, 1], [], []>} : vector<5x5xf32>, vector<5x16xf32>, vector<5x16xf32> -> vector<5x16xf32>
      %130 = arith.truncf %129 : vector<5x16xf32> to vector<5x16xbf16>
      %131 = vector.extract_strided_slice %14 {offsets = [48, 0], sizes = [16, 128], strides = [1, 1]} : vector<128x128xbf16> to vector<16x128xbf16>
      %cst_63 = arith.constant dense<0.000000e+00> : vector<5x128xf32>
      %132 = tpu.matmul %130, %131, %cst_63 {dimension_numbers = #tpu.dot_dimension_numbers<[1], [0], [0], [1], [0, 0, 1, 1], [], []>} : vector<5x16xbf16>, vector<16x128xbf16>, vector<5x128xf32> -> vector<5x128xf32>
      %133 = arith.addf %111, %132 : vector<5x128xf32>
      %134 = vector.extract_strided_slice %42 {offsets = [0, 64], sizes = [5, 16], strides = [1, 1]} : vector<5x128xf32> to vector<5x16xf32>
      %135 = vector.extract_strided_slice %43 {offsets = [0, 64], sizes = [5, 16], strides = [1, 1]} : vector<5x128xf32> to vector<5x16xf32>
      %136 = vector.extract_strided_slice %44 {offsets = [0, 64], sizes = [5, 16], strides = [1, 1]} : vector<5x128xf32> to vector<5x16xf32>
      %cst_64 = arith.constant dense<0.000000e+00> : vector<5x5xf32>
      %137 = tpu.matmul %134, %135, %cst_64 {dimension_numbers = #tpu.dot_dimension_numbers<[1], [1], [0], [0], [0, 0, 1, 0], [], []>} : vector<5x16xf32>, vector<5x16xf32>, vector<5x5xf32> -> vector<5x5xf32>
      %138 = vector.extract_strided_slice %34 {offsets = [0, 0], sizes = [1, 5], strides = [1, 1]} : vector<2x5xf32> to vector<1x5xf32>
      %139 = vector.broadcast %138 : vector<1x5xf32> to vector<5x5xf32>
      %140 = arith.addf %137, %139 : vector<5x5xf32>
      %cst_65 = arith.constant dense<0xFF800000> : vector<5xf32>
      %141 = vector.multi_reduction <maximumf>, %140, %cst_65 [1] : vector<5x5xf32> to vector<5xf32>
      %142 = vector.shape_cast %141 : vector<5xf32> to vector<5x1xf32>
      %143 = vector.broadcast %142 : vector<5x1xf32> to vector<5x5xf32>
      %144 = arith.subf %140, %143 : vector<5x5xf32>
      %145 = math.exp %144 : vector<5x5xf32>
      %cst_66 = arith.constant dense<0.000000e+00> : vector<5xf32>
      %146 = vector.multi_reduction <add>, %145, %cst_66 [1] : vector<5x5xf32> to vector<5xf32>
      %147 = vector.shape_cast %146 : vector<5xf32> to vector<5x1xf32>
      %148 = tpu.reciprocal %147 {approx = true} : vector<5x1xf32> -> vector<5x1xf32>
      %149 = vector.broadcast %148 : vector<5x1xf32> to vector<5x5xf32>
      %150 = arith.mulf %145, %149 : vector<5x5xf32>
      %cst_67 = arith.constant dense<0.000000e+00> : vector<5x16xf32>
      %151 = tpu.matmul %150, %136, %cst_67 {dimension_numbers = #tpu.dot_dimension_numbers<[1], [0], [0], [1], [0, 0, 1, 1], [], []>} : vector<5x5xf32>, vector<5x16xf32>, vector<5x16xf32> -> vector<5x16xf32>
      %152 = arith.truncf %151 : vector<5x16xf32> to vector<5x16xbf16>
      %153 = vector.extract_strided_slice %14 {offsets = [64, 0], sizes = [16, 128], strides = [1, 1]} : vector<128x128xbf16> to vector<16x128xbf16>
      %cst_68 = arith.constant dense<0.000000e+00> : vector<5x128xf32>
      %154 = tpu.matmul %152, %153, %cst_68 {dimension_numbers = #tpu.dot_dimension_numbers<[1], [0], [0], [1], [0, 0, 1, 1], [], []>} : vector<5x16xbf16>, vector<16x128xbf16>, vector<5x128xf32> -> vector<5x128xf32>
      %155 = arith.addf %133, %154 : vector<5x128xf32>
      %156 = vector.extract_strided_slice %42 {offsets = [0, 80], sizes = [5, 16], strides = [1, 1]} : vector<5x128xf32> to vector<5x16xf32>
      %157 = vector.extract_strided_slice %43 {offsets = [0, 80], sizes = [5, 16], strides = [1, 1]} : vector<5x128xf32> to vector<5x16xf32>
      %158 = vector.extract_strided_slice %44 {offsets = [0, 80], sizes = [5, 16], strides = [1, 1]} : vector<5x128xf32> to vector<5x16xf32>
      %cst_69 = arith.constant dense<0.000000e+00> : vector<5x5xf32>
      %159 = tpu.matmul %156, %157, %cst_69 {dimension_numbers = #tpu.dot_dimension_numbers<[1], [1], [0], [0], [0, 0, 1, 0], [], []>} : vector<5x16xf32>, vector<5x16xf32>, vector<5x5xf32> -> vector<5x5xf32>
      %160 = vector.extract_strided_slice %34 {offsets = [0, 0], sizes = [1, 5], strides = [1, 1]} : vector<2x5xf32> to vector<1x5xf32>
      %161 = vector.broadcast %160 : vector<1x5xf32> to vector<5x5xf32>
      %162 = arith.addf %159, %161 : vector<5x5xf32>
      %cst_70 = arith.constant dense<0xFF800000> : vector<5xf32>
      %163 = vector.multi_reduction <maximumf>, %162, %cst_70 [1] : vector<5x5xf32> to vector<5xf32>
      %164 = vector.shape_cast %163 : vector<5xf32> to vector<5x1xf32>
      %165 = vector.broadcast %164 : vector<5x1xf32> to vector<5x5xf32>
      %166 = arith.subf %162, %165 : vector<5x5xf32>
      %167 = math.exp %166 : vector<5x5xf32>
      %cst_71 = arith.constant dense<0.000000e+00> : vector<5xf32>
      %168 = vector.multi_reduction <add>, %167, %cst_71 [1] : vector<5x5xf32> to vector<5xf32>
      %169 = vector.shape_cast %168 : vector<5xf32> to vector<5x1xf32>
      %170 = tpu.reciprocal %169 {approx = true} : vector<5x1xf32> -> vector<5x1xf32>
      %171 = vector.broadcast %170 : vector<5x1xf32> to vector<5x5xf32>
      %172 = arith.mulf %167, %171 : vector<5x5xf32>
      %cst_72 = arith.constant dense<0.000000e+00> : vector<5x16xf32>
      %173 = tpu.matmul %172, %158, %cst_72 {dimension_numbers = #tpu.dot_dimension_numbers<[1], [0], [0], [1], [0, 0, 1, 1], [], []>} : vector<5x5xf32>, vector<5x16xf32>, vector<5x16xf32> -> vector<5x16xf32>
      %174 = arith.truncf %173 : vector<5x16xf32> to vector<5x16xbf16>
      %175 = vector.extract_strided_slice %14 {offsets = [80, 0], sizes = [16, 128], strides = [1, 1]} : vector<128x128xbf16> to vector<16x128xbf16>
      %cst_73 = arith.constant dense<0.000000e+00> : vector<5x128xf32>
      %176 = tpu.matmul %174, %175, %cst_73 {dimension_numbers = #tpu.dot_dimension_numbers<[1], [0], [0], [1], [0, 0, 1, 1], [], []>} : vector<5x16xbf16>, vector<16x128xbf16>, vector<5x128xf32> -> vector<5x128xf32>
      %177 = arith.addf %155, %176 : vector<5x128xf32>
      %178 = vector.extract_strided_slice %42 {offsets = [0, 96], sizes = [5, 16], strides = [1, 1]} : vector<5x128xf32> to vector<5x16xf32>
      %179 = vector.extract_strided_slice %43 {offsets = [0, 96], sizes = [5, 16], strides = [1, 1]} : vector<5x128xf32> to vector<5x16xf32>
      %180 = vector.extract_strided_slice %44 {offsets = [0, 96], sizes = [5, 16], strides = [1, 1]} : vector<5x128xf32> to vector<5x16xf32>
      %cst_74 = arith.constant dense<0.000000e+00> : vector<5x5xf32>
      %181 = tpu.matmul %178, %179, %cst_74 {dimension_numbers = #tpu.dot_dimension_numbers<[1], [1], [0], [0], [0, 0, 1, 0], [], []>} : vector<5x16xf32>, vector<5x16xf32>, vector<5x5xf32> -> vector<5x5xf32>
      %182 = vector.extract_strided_slice %34 {offsets = [0, 0], sizes = [1, 5], strides = [1, 1]} : vector<2x5xf32> to vector<1x5xf32>
      %183 = vector.broadcast %182 : vector<1x5xf32> to vector<5x5xf32>
      %184 = arith.addf %181, %183 : vector<5x5xf32>
      %cst_75 = arith.constant dense<0xFF800000> : vector<5xf32>
      %185 = vector.multi_reduction <maximumf>, %184, %cst_75 [1] : vector<5x5xf32> to vector<5xf32>
      %186 = vector.shape_cast %185 : vector<5xf32> to vector<5x1xf32>
      %187 = vector.broadcast %186 : vector<5x1xf32> to vector<5x5xf32>
      %188 = arith.subf %184, %187 : vector<5x5xf32>
      %189 = math.exp %188 : vector<5x5xf32>
      %cst_76 = arith.constant dense<0.000000e+00> : vector<5xf32>
      %190 = vector.multi_reduction <add>, %189, %cst_76 [1] : vector<5x5xf32> to vector<5xf32>
      %191 = vector.shape_cast %190 : vector<5xf32> to vector<5x1xf32>
      %192 = tpu.reciprocal %191 {approx = true} : vector<5x1xf32> -> vector<5x1xf32>
      %193 = vector.broadcast %192 : vector<5x1xf32> to vector<5x5xf32>
      %194 = arith.mulf %189, %193 : vector<5x5xf32>
      %cst_77 = arith.constant dense<0.000000e+00> : vector<5x16xf32>
      %195 = tpu.matmul %194, %180, %cst_77 {dimension_numbers = #tpu.dot_dimension_numbers<[1], [0], [0], [1], [0, 0, 1, 1], [], []>} : vector<5x5xf32>, vector<5x16xf32>, vector<5x16xf32> -> vector<5x16xf32>
      %196 = arith.truncf %195 : vector<5x16xf32> to vector<5x16xbf16>
      %197 = vector.extract_strided_slice %14 {offsets = [96, 0], sizes = [16, 128], strides = [1, 1]} : vector<128x128xbf16> to vector<16x128xbf16>
      %cst_78 = arith.constant dense<0.000000e+00> : vector<5x128xf32>
      %198 = tpu.matmul %196, %197, %cst_78 {dimension_numbers = #tpu.dot_dimension_numbers<[1], [0], [0], [1], [0, 0, 1, 1], [], []>} : vector<5x16xbf16>, vector<16x128xbf16>, vector<5x128xf32> -> vector<5x128xf32>
      %199 = arith.addf %177, %198 : vector<5x128xf32>
      %200 = vector.extract_strided_slice %42 {offsets = [0, 112], sizes = [5, 16], strides = [1, 1]} : vector<5x128xf32> to vector<5x16xf32>
      %201 = vector.extract_strided_slice %43 {offsets = [0, 112], sizes = [5, 16], strides = [1, 1]} : vector<5x128xf32> to vector<5x16xf32>
      %202 = vector.extract_strided_slice %44 {offsets = [0, 112], sizes = [5, 16], strides = [1, 1]} : vector<5x128xf32> to vector<5x16xf32>
      %cst_79 = arith.constant dense<0.000000e+00> : vector<5x5xf32>
      %203 = tpu.matmul %200, %201, %cst_79 {dimension_numbers = #tpu.dot_dimension_numbers<[1], [1], [0], [0], [0, 0, 1, 0], [], []>} : vector<5x16xf32>, vector<5x16xf32>, vector<5x5xf32> -> vector<5x5xf32>
      %204 = vector.extract_strided_slice %34 {offsets = [0, 0], sizes = [1, 5], strides = [1, 1]} : vector<2x5xf32> to vector<1x5xf32>
      %205 = vector.broadcast %204 : vector<1x5xf32> to vector<5x5xf32>
      %206 = arith.addf %203, %205 : vector<5x5xf32>
      %cst_80 = arith.constant dense<0xFF800000> : vector<5xf32>
      %207 = vector.multi_reduction <maximumf>, %206, %cst_80 [1] : vector<5x5xf32> to vector<5xf32>
      %208 = vector.shape_cast %207 : vector<5xf32> to vector<5x1xf32>
      %209 = vector.broadcast %208 : vector<5x1xf32> to vector<5x5xf32>
      %210 = arith.subf %206, %209 : vector<5x5xf32>
      %211 = math.exp %210 : vector<5x5xf32>
      %cst_81 = arith.constant dense<0.000000e+00> : vector<5xf32>
      %212 = vector.multi_reduction <add>, %211, %cst_81 [1] : vector<5x5xf32> to vector<5xf32>
      %213 = vector.shape_cast %212 : vector<5xf32> to vector<5x1xf32>
      %214 = tpu.reciprocal %213 {approx = true} : vector<5x1xf32> -> vector<5x1xf32>
      %215 = vector.broadcast %214 : vector<5x1xf32> to vector<5x5xf32>
      %216 = arith.mulf %211, %215 : vector<5x5xf32>
      %cst_82 = arith.constant dense<0.000000e+00> : vector<5x16xf32>
      %217 = tpu.matmul %216, %202, %cst_82 {dimension_numbers = #tpu.dot_dimension_numbers<[1], [0], [0], [1], [0, 0, 1, 1], [], []>} : vector<5x5xf32>, vector<5x16xf32>, vector<5x16xf32> -> vector<5x16xf32>
      %218 = arith.truncf %217 : vector<5x16xf32> to vector<5x16xbf16>
      %219 = vector.extract_strided_slice %14 {offsets = [112, 0], sizes = [16, 128], strides = [1, 1]} : vector<128x128xbf16> to vector<16x128xbf16>
      %cst_83 = arith.constant dense<0.000000e+00> : vector<5x128xf32>
      %220 = tpu.matmul %218, %219, %cst_83 {dimension_numbers = #tpu.dot_dimension_numbers<[1], [0], [0], [1], [0, 0, 1, 1], [], []>} : vector<5x16xbf16>, vector<16x128xbf16>, vector<5x128xf32> -> vector<5x128xf32>
      %221 = arith.addf %199, %220 : vector<5x128xf32>
      %222 = vector.extract_strided_slice %39 {offsets = [5, 0], sizes = [5, 128], strides = [1, 1]} : vector<10x128xf32> to vector<5x128xf32>
      %223 = vector.extract_strided_slice %40 {offsets = [5, 0], sizes = [5, 128], strides = [1, 1]} : vector<10x128xf32> to vector<5x128xf32>
      %224 = vector.extract_strided_slice %41 {offsets = [5, 0], sizes = [5, 128], strides = [1, 1]} : vector<10x128xf32> to vector<5x128xf32>
      %cst_84 = arith.constant 0.000000e+00 : f32
      %225 = vector.broadcast %cst_84 : f32 to vector<5x128xf32>
      %226 = vector.extract_strided_slice %222 {offsets = [0, 0], sizes = [5, 16], strides = [1, 1]} : vector<5x128xf32> to vector<5x16xf32>
      %227 = vector.extract_strided_slice %223 {offsets = [0, 0], sizes = [5, 16], strides = [1, 1]} : vector<5x128xf32> to vector<5x16xf32>
      %228 = vector.extract_strided_slice %224 {offsets = [0, 0], sizes = [5, 16], strides = [1, 1]} : vector<5x128xf32> to vector<5x16xf32>
      %cst_85 = arith.constant dense<0.000000e+00> : vector<5x5xf32>
      %229 = tpu.matmul %226, %227, %cst_85 {dimension_numbers = #tpu.dot_dimension_numbers<[1], [1], [0], [0], [0, 0, 1, 0], [], []>} : vector<5x16xf32>, vector<5x16xf32>, vector<5x5xf32> -> vector<5x5xf32>
      %230 = vector.extract_strided_slice %34 {offsets = [1, 0], sizes = [1, 5], strides = [1, 1]} : vector<2x5xf32> to vector<1x5xf32>
      %231 = vector.broadcast %230 : vector<1x5xf32> to vector<5x5xf32>
      %232 = arith.addf %229, %231 : vector<5x5xf32>
      %cst_86 = arith.constant dense<0xFF800000> : vector<5xf32>
      %233 = vector.multi_reduction <maximumf>, %232, %cst_86 [1] : vector<5x5xf32> to vector<5xf32>
      %234 = vector.shape_cast %233 : vector<5xf32> to vector<5x1xf32>
      %235 = vector.broadcast %234 : vector<5x1xf32> to vector<5x5xf32>
      %236 = arith.subf %232, %235 : vector<5x5xf32>
      %237 = math.exp %236 : vector<5x5xf32>
      %cst_87 = arith.constant dense<0.000000e+00> : vector<5xf32>
      %238 = vector.multi_reduction <add>, %237, %cst_87 [1] : vector<5x5xf32> to vector<5xf32>
      %239 = vector.shape_cast %238 : vector<5xf32> to vector<5x1xf32>
      %240 = tpu.reciprocal %239 {approx = true} : vector<5x1xf32> -> vector<5x1xf32>
      %241 = vector.broadcast %240 : vector<5x1xf32> to vector<5x5xf32>
      %242 = arith.mulf %237, %241 : vector<5x5xf32>
      %cst_88 = arith.constant dense<0.000000e+00> : vector<5x16xf32>
      %243 = tpu.matmul %242, %228, %cst_88 {dimension_numbers = #tpu.dot_dimension_numbers<[1], [0], [0], [1], [0, 0, 1, 1], [], []>} : vector<5x5xf32>, vector<5x16xf32>, vector<5x16xf32> -> vector<5x16xf32>
      %244 = arith.truncf %243 : vector<5x16xf32> to vector<5x16xbf16>
      %245 = vector.extract_strided_slice %14 {offsets = [0, 0], sizes = [16, 128], strides = [1, 1]} : vector<128x128xbf16> to vector<16x128xbf16>
      %cst_89 = arith.constant dense<0.000000e+00> : vector<5x128xf32>
      %246 = tpu.matmul %244, %245, %cst_89 {dimension_numbers = #tpu.dot_dimension_numbers<[1], [0], [0], [1], [0, 0, 1, 1], [], []>} : vector<5x16xbf16>, vector<16x128xbf16>, vector<5x128xf32> -> vector<5x128xf32>
      %247 = arith.addf %225, %246 : vector<5x128xf32>
      %248 = vector.extract_strided_slice %222 {offsets = [0, 16], sizes = [5, 16], strides = [1, 1]} : vector<5x128xf32> to vector<5x16xf32>
      %249 = vector.extract_strided_slice %223 {offsets = [0, 16], sizes = [5, 16], strides = [1, 1]} : vector<5x128xf32> to vector<5x16xf32>
      %250 = vector.extract_strided_slice %224 {offsets = [0, 16], sizes = [5, 16], strides = [1, 1]} : vector<5x128xf32> to vector<5x16xf32>
      %cst_90 = arith.constant dense<0.000000e+00> : vector<5x5xf32>
      %251 = tpu.matmul %248, %249, %cst_90 {dimension_numbers = #tpu.dot_dimension_numbers<[1], [1], [0], [0], [0, 0, 1, 0], [], []>} : vector<5x16xf32>, vector<5x16xf32>, vector<5x5xf32> -> vector<5x5xf32>
      %252 = vector.extract_strided_slice %34 {offsets = [1, 0], sizes = [1, 5], strides = [1, 1]} : vector<2x5xf32> to vector<1x5xf32>
      %253 = vector.broadcast %252 : vector<1x5xf32> to vector<5x5xf32>
      %254 = arith.addf %251, %253 : vector<5x5xf32>
      %cst_91 = arith.constant dense<0xFF800000> : vector<5xf32>
      %255 = vector.multi_reduction <maximumf>, %254, %cst_91 [1] : vector<5x5xf32> to vector<5xf32>
      %256 = vector.shape_cast %255 : vector<5xf32> to vector<5x1xf32>
      %257 = vector.broadcast %256 : vector<5x1xf32> to vector<5x5xf32>
      %258 = arith.subf %254, %257 : vector<5x5xf32>
      %259 = math.exp %258 : vector<5x5xf32>
      %cst_92 = arith.constant dense<0.000000e+00> : vector<5xf32>
      %260 = vector.multi_reduction <add>, %259, %cst_92 [1] : vector<5x5xf32> to vector<5xf32>
      %261 = vector.shape_cast %260 : vector<5xf32> to vector<5x1xf32>
      %262 = tpu.reciprocal %261 {approx = true} : vector<5x1xf32> -> vector<5x1xf32>
      %263 = vector.broadcast %262 : vector<5x1xf32> to vector<5x5xf32>
      %264 = arith.mulf %259, %263 : vector<5x5xf32>
      %cst_93 = arith.constant dense<0.000000e+00> : vector<5x16xf32>
      %265 = tpu.matmul %264, %250, %cst_93 {dimension_numbers = #tpu.dot_dimension_numbers<[1], [0], [0], [1], [0, 0, 1, 1], [], []>} : vector<5x5xf32>, vector<5x16xf32>, vector<5x16xf32> -> vector<5x16xf32>
      %266 = arith.truncf %265 : vector<5x16xf32> to vector<5x16xbf16>
      %267 = vector.extract_strided_slice %14 {offsets = [16, 0], sizes = [16, 128], strides = [1, 1]} : vector<128x128xbf16> to vector<16x128xbf16>
      %cst_94 = arith.constant dense<0.000000e+00> : vector<5x128xf32>
      %268 = tpu.matmul %266, %267, %cst_94 {dimension_numbers = #tpu.dot_dimension_numbers<[1], [0], [0], [1], [0, 0, 1, 1], [], []>} : vector<5x16xbf16>, vector<16x128xbf16>, vector<5x128xf32> -> vector<5x128xf32>
      %269 = arith.addf %247, %268 : vector<5x128xf32>
      %270 = vector.extract_strided_slice %222 {offsets = [0, 32], sizes = [5, 16], strides = [1, 1]} : vector<5x128xf32> to vector<5x16xf32>
      %271 = vector.extract_strided_slice %223 {offsets = [0, 32], sizes = [5, 16], strides = [1, 1]} : vector<5x128xf32> to vector<5x16xf32>
      %272 = vector.extract_strided_slice %224 {offsets = [0, 32], sizes = [5, 16], strides = [1, 1]} : vector<5x128xf32> to vector<5x16xf32>
      %cst_95 = arith.constant dense<0.000000e+00> : vector<5x5xf32>
      %273 = tpu.matmul %270, %271, %cst_95 {dimension_numbers = #tpu.dot_dimension_numbers<[1], [1], [0], [0], [0, 0, 1, 0], [], []>} : vector<5x16xf32>, vector<5x16xf32>, vector<5x5xf32> -> vector<5x5xf32>
      %274 = vector.extract_strided_slice %34 {offsets = [1, 0], sizes = [1, 5], strides = [1, 1]} : vector<2x5xf32> to vector<1x5xf32>
      %275 = vector.broadcast %274 : vector<1x5xf32> to vector<5x5xf32>
      %276 = arith.addf %273, %275 : vector<5x5xf32>
      %cst_96 = arith.constant dense<0xFF800000> : vector<5xf32>
      %277 = vector.multi_reduction <maximumf>, %276, %cst_96 [1] : vector<5x5xf32> to vector<5xf32>
      %278 = vector.shape_cast %277 : vector<5xf32> to vector<5x1xf32>
      %279 = vector.broadcast %278 : vector<5x1xf32> to vector<5x5xf32>
      %280 = arith.subf %276, %279 : vector<5x5xf32>
      %281 = math.exp %280 : vector<5x5xf32>
      %cst_97 = arith.constant dense<0.000000e+00> : vector<5xf32>
      %282 = vector.multi_reduction <add>, %281, %cst_97 [1] : vector<5x5xf32> to vector<5xf32>
      %283 = vector.shape_cast %282 : vector<5xf32> to vector<5x1xf32>
      %284 = tpu.reciprocal %283 {approx = true} : vector<5x1xf32> -> vector<5x1xf32>
      %285 = vector.broadcast %284 : vector<5x1xf32> to vector<5x5xf32>
      %286 = arith.mulf %281, %285 : vector<5x5xf32>
      %cst_98 = arith.constant dense<0.000000e+00> : vector<5x16xf32>
      %287 = tpu.matmul %286, %272, %cst_98 {dimension_numbers = #tpu.dot_dimension_numbers<[1], [0], [0], [1], [0, 0, 1, 1], [], []>} : vector<5x5xf32>, vector<5x16xf32>, vector<5x16xf32> -> vector<5x16xf32>
      %288 = arith.truncf %287 : vector<5x16xf32> to vector<5x16xbf16>
      %289 = vector.extract_strided_slice %14 {offsets = [32, 0], sizes = [16, 128], strides = [1, 1]} : vector<128x128xbf16> to vector<16x128xbf16>
      %cst_99 = arith.constant dense<0.000000e+00> : vector<5x128xf32>
      %290 = tpu.matmul %288, %289, %cst_99 {dimension_numbers = #tpu.dot_dimension_numbers<[1], [0], [0], [1], [0, 0, 1, 1], [], []>} : vector<5x16xbf16>, vector<16x128xbf16>, vector<5x128xf32> -> vector<5x128xf32>
      %291 = arith.addf %269, %290 : vector<5x128xf32>
      %292 = vector.extract_strided_slice %222 {offsets = [0, 48], sizes = [5, 16], strides = [1, 1]} : vector<5x128xf32> to vector<5x16xf32>
      %293 = vector.extract_strided_slice %223 {offsets = [0, 48], sizes = [5, 16], strides = [1, 1]} : vector<5x128xf32> to vector<5x16xf32>
      %294 = vector.extract_strided_slice %224 {offsets = [0, 48], sizes = [5, 16], strides = [1, 1]} : vector<5x128xf32> to vector<5x16xf32>
      %cst_100 = arith.constant dense<0.000000e+00> : vector<5x5xf32>
      %295 = tpu.matmul %292, %293, %cst_100 {dimension_numbers = #tpu.dot_dimension_numbers<[1], [1], [0], [0], [0, 0, 1, 0], [], []>} : vector<5x16xf32>, vector<5x16xf32>, vector<5x5xf32> -> vector<5x5xf32>
      %296 = vector.extract_strided_slice %34 {offsets = [1, 0], sizes = [1, 5], strides = [1, 1]} : vector<2x5xf32> to vector<1x5xf32>
      %297 = vector.broadcast %296 : vector<1x5xf32> to vector<5x5xf32>
      %298 = arith.addf %295, %297 : vector<5x5xf32>
      %cst_101 = arith.constant dense<0xFF800000> : vector<5xf32>
      %299 = vector.multi_reduction <maximumf>, %298, %cst_101 [1] : vector<5x5xf32> to vector<5xf32>
      %300 = vector.shape_cast %299 : vector<5xf32> to vector<5x1xf32>
      %301 = vector.broadcast %300 : vector<5x1xf32> to vector<5x5xf32>
      %302 = arith.subf %298, %301 : vector<5x5xf32>
      %303 = math.exp %302 : vector<5x5xf32>
      %cst_102 = arith.constant dense<0.000000e+00> : vector<5xf32>
      %304 = vector.multi_reduction <add>, %303, %cst_102 [1] : vector<5x5xf32> to vector<5xf32>
      %305 = vector.shape_cast %304 : vector<5xf32> to vector<5x1xf32>
      %306 = tpu.reciprocal %305 {approx = true} : vector<5x1xf32> -> vector<5x1xf32>
      %307 = vector.broadcast %306 : vector<5x1xf32> to vector<5x5xf32>
      %308 = arith.mulf %303, %307 : vector<5x5xf32>
      %cst_103 = arith.constant dense<0.000000e+00> : vector<5x16xf32>
      %309 = tpu.matmul %308, %294, %cst_103 {dimension_numbers = #tpu.dot_dimension_numbers<[1], [0], [0], [1], [0, 0, 1, 1], [], []>} : vector<5x5xf32>, vector<5x16xf32>, vector<5x16xf32> -> vector<5x16xf32>
      %310 = arith.truncf %309 : vector<5x16xf32> to vector<5x16xbf16>
      %311 = vector.extract_strided_slice %14 {offsets = [48, 0], sizes = [16, 128], strides = [1, 1]} : vector<128x128xbf16> to vector<16x128xbf16>
      %cst_104 = arith.constant dense<0.000000e+00> : vector<5x128xf32>
      %312 = tpu.matmul %310, %311, %cst_104 {dimension_numbers = #tpu.dot_dimension_numbers<[1], [0], [0], [1], [0, 0, 1, 1], [], []>} : vector<5x16xbf16>, vector<16x128xbf16>, vector<5x128xf32> -> vector<5x128xf32>
      %313 = arith.addf %291, %312 : vector<5x128xf32>
      %314 = vector.extract_strided_slice %222 {offsets = [0, 64], sizes = [5, 16], strides = [1, 1]} : vector<5x128xf32> to vector<5x16xf32>
      %315 = vector.extract_strided_slice %223 {offsets = [0, 64], sizes = [5, 16], strides = [1, 1]} : vector<5x128xf32> to vector<5x16xf32>
      %316 = vector.extract_strided_slice %224 {offsets = [0, 64], sizes = [5, 16], strides = [1, 1]} : vector<5x128xf32> to vector<5x16xf32>
      %cst_105 = arith.constant dense<0.000000e+00> : vector<5x5xf32>
      %317 = tpu.matmul %314, %315, %cst_105 {dimension_numbers = #tpu.dot_dimension_numbers<[1], [1], [0], [0], [0, 0, 1, 0], [], []>} : vector<5x16xf32>, vector<5x16xf32>, vector<5x5xf32> -> vector<5x5xf32>
      %318 = vector.extract_strided_slice %34 {offsets = [1, 0], sizes = [1, 5], strides = [1, 1]} : vector<2x5xf32> to vector<1x5xf32>
      %319 = vector.broadcast %318 : vector<1x5xf32> to vector<5x5xf32>
      %320 = arith.addf %317, %319 : vector<5x5xf32>
      %cst_106 = arith.constant dense<0xFF800000> : vector<5xf32>
      %321 = vector.multi_reduction <maximumf>, %320, %cst_106 [1] : vector<5x5xf32> to vector<5xf32>
      %322 = vector.shape_cast %321 : vector<5xf32> to vector<5x1xf32>
      %323 = vector.broadcast %322 : vector<5x1xf32> to vector<5x5xf32>
      %324 = arith.subf %320, %323 : vector<5x5xf32>
      %325 = math.exp %324 : vector<5x5xf32>
      %cst_107 = arith.constant dense<0.000000e+00> : vector<5xf32>
      %326 = vector.multi_reduction <add>, %325, %cst_107 [1] : vector<5x5xf32> to vector<5xf32>
      %327 = vector.shape_cast %326 : vector<5xf32> to vector<5x1xf32>
      %328 = tpu.reciprocal %327 {approx = true} : vector<5x1xf32> -> vector<5x1xf32>
      %329 = vector.broadcast %328 : vector<5x1xf32> to vector<5x5xf32>
      %330 = arith.mulf %325, %329 : vector<5x5xf32>
      %cst_108 = arith.constant dense<0.000000e+00> : vector<5x16xf32>
      %331 = tpu.matmul %330, %316, %cst_108 {dimension_numbers = #tpu.dot_dimension_numbers<[1], [0], [0], [1], [0, 0, 1, 1], [], []>} : vector<5x5xf32>, vector<5x16xf32>, vector<5x16xf32> -> vector<5x16xf32>
      %332 = arith.truncf %331 : vector<5x16xf32> to vector<5x16xbf16>
      %333 = vector.extract_strided_slice %14 {offsets = [64, 0], sizes = [16, 128], strides = [1, 1]} : vector<128x128xbf16> to vector<16x128xbf16>
      %cst_109 = arith.constant dense<0.000000e+00> : vector<5x128xf32>
      %334 = tpu.matmul %332, %333, %cst_109 {dimension_numbers = #tpu.dot_dimension_numbers<[1], [0], [0], [1], [0, 0, 1, 1], [], []>} : vector<5x16xbf16>, vector<16x128xbf16>, vector<5x128xf32> -> vector<5x128xf32>
      %335 = arith.addf %313, %334 : vector<5x128xf32>
      %336 = vector.extract_strided_slice %222 {offsets = [0, 80], sizes = [5, 16], strides = [1, 1]} : vector<5x128xf32> to vector<5x16xf32>
      %337 = vector.extract_strided_slice %223 {offsets = [0, 80], sizes = [5, 16], strides = [1, 1]} : vector<5x128xf32> to vector<5x16xf32>
      %338 = vector.extract_strided_slice %224 {offsets = [0, 80], sizes = [5, 16], strides = [1, 1]} : vector<5x128xf32> to vector<5x16xf32>
      %cst_110 = arith.constant dense<0.000000e+00> : vector<5x5xf32>
      %339 = tpu.matmul %336, %337, %cst_110 {dimension_numbers = #tpu.dot_dimension_numbers<[1], [1], [0], [0], [0, 0, 1, 0], [], []>} : vector<5x16xf32>, vector<5x16xf32>, vector<5x5xf32> -> vector<5x5xf32>
      %340 = vector.extract_strided_slice %34 {offsets = [1, 0], sizes = [1, 5], strides = [1, 1]} : vector<2x5xf32> to vector<1x5xf32>
      %341 = vector.broadcast %340 : vector<1x5xf32> to vector<5x5xf32>
      %342 = arith.addf %339, %341 : vector<5x5xf32>
      %cst_111 = arith.constant dense<0xFF800000> : vector<5xf32>
      %343 = vector.multi_reduction <maximumf>, %342, %cst_111 [1] : vector<5x5xf32> to vector<5xf32>
      %344 = vector.shape_cast %343 : vector<5xf32> to vector<5x1xf32>
      %345 = vector.broadcast %344 : vector<5x1xf32> to vector<5x5xf32>
      %346 = arith.subf %342, %345 : vector<5x5xf32>
      %347 = math.exp %346 : vector<5x5xf32>
      %cst_112 = arith.constant dense<0.000000e+00> : vector<5xf32>
      %348 = vector.multi_reduction <add>, %347, %cst_112 [1] : vector<5x5xf32> to vector<5xf32>
      %349 = vector.shape_cast %348 : vector<5xf32> to vector<5x1xf32>
      %350 = tpu.reciprocal %349 {approx = true} : vector<5x1xf32> -> vector<5x1xf32>
      %351 = vector.broadcast %350 : vector<5x1xf32> to vector<5x5xf32>
      %352 = arith.mulf %347, %351 : vector<5x5xf32>
      %cst_113 = arith.constant dense<0.000000e+00> : vector<5x16xf32>
      %353 = tpu.matmul %352, %338, %cst_113 {dimension_numbers = #tpu.dot_dimension_numbers<[1], [0], [0], [1], [0, 0, 1, 1], [], []>} : vector<5x5xf32>, vector<5x16xf32>, vector<5x16xf32> -> vector<5x16xf32>
      %354 = arith.truncf %353 : vector<5x16xf32> to vector<5x16xbf16>
      %355 = vector.extract_strided_slice %14 {offsets = [80, 0], sizes = [16, 128], strides = [1, 1]} : vector<128x128xbf16> to vector<16x128xbf16>
      %cst_114 = arith.constant dense<0.000000e+00> : vector<5x128xf32>
      %356 = tpu.matmul %354, %355, %cst_114 {dimension_numbers = #tpu.dot_dimension_numbers<[1], [0], [0], [1], [0, 0, 1, 1], [], []>} : vector<5x16xbf16>, vector<16x128xbf16>, vector<5x128xf32> -> vector<5x128xf32>
      %357 = arith.addf %335, %356 : vector<5x128xf32>
      %358 = vector.extract_strided_slice %222 {offsets = [0, 96], sizes = [5, 16], strides = [1, 1]} : vector<5x128xf32> to vector<5x16xf32>
      %359 = vector.extract_strided_slice %223 {offsets = [0, 96], sizes = [5, 16], strides = [1, 1]} : vector<5x128xf32> to vector<5x16xf32>
      %360 = vector.extract_strided_slice %224 {offsets = [0, 96], sizes = [5, 16], strides = [1, 1]} : vector<5x128xf32> to vector<5x16xf32>
      %cst_115 = arith.constant dense<0.000000e+00> : vector<5x5xf32>
      %361 = tpu.matmul %358, %359, %cst_115 {dimension_numbers = #tpu.dot_dimension_numbers<[1], [1], [0], [0], [0, 0, 1, 0], [], []>} : vector<5x16xf32>, vector<5x16xf32>, vector<5x5xf32> -> vector<5x5xf32>
      %362 = vector.extract_strided_slice %34 {offsets = [1, 0], sizes = [1, 5], strides = [1, 1]} : vector<2x5xf32> to vector<1x5xf32>
      %363 = vector.broadcast %362 : vector<1x5xf32> to vector<5x5xf32>
      %364 = arith.addf %361, %363 : vector<5x5xf32>
      %cst_116 = arith.constant dense<0xFF800000> : vector<5xf32>
      %365 = vector.multi_reduction <maximumf>, %364, %cst_116 [1] : vector<5x5xf32> to vector<5xf32>
      %366 = vector.shape_cast %365 : vector<5xf32> to vector<5x1xf32>
      %367 = vector.broadcast %366 : vector<5x1xf32> to vector<5x5xf32>
      %368 = arith.subf %364, %367 : vector<5x5xf32>
      %369 = math.exp %368 : vector<5x5xf32>
      %cst_117 = arith.constant dense<0.000000e+00> : vector<5xf32>
      %370 = vector.multi_reduction <add>, %369, %cst_117 [1] : vector<5x5xf32> to vector<5xf32>
      %371 = vector.shape_cast %370 : vector<5xf32> to vector<5x1xf32>
      %372 = tpu.reciprocal %371 {approx = true} : vector<5x1xf32> -> vector<5x1xf32>
      %373 = vector.broadcast %372 : vector<5x1xf32> to vector<5x5xf32>
      %374 = arith.mulf %369, %373 : vector<5x5xf32>
      %cst_118 = arith.constant dense<0.000000e+00> : vector<5x16xf32>
      %375 = tpu.matmul %374, %360, %cst_118 {dimension_numbers = #tpu.dot_dimension_numbers<[1], [0], [0], [1], [0, 0, 1, 1], [], []>} : vector<5x5xf32>, vector<5x16xf32>, vector<5x16xf32> -> vector<5x16xf32>
      %376 = arith.truncf %375 : vector<5x16xf32> to vector<5x16xbf16>
      %377 = vector.extract_strided_slice %14 {offsets = [96, 0], sizes = [16, 128], strides = [1, 1]} : vector<128x128xbf16> to vector<16x128xbf16>
      %cst_119 = arith.constant dense<0.000000e+00> : vector<5x128xf32>
      %378 = tpu.matmul %376, %377, %cst_119 {dimension_numbers = #tpu.dot_dimension_numbers<[1], [0], [0], [1], [0, 0, 1, 1], [], []>} : vector<5x16xbf16>, vector<16x128xbf16>, vector<5x128xf32> -> vector<5x128xf32>
      %379 = arith.addf %357, %378 : vector<5x128xf32>
      %380 = vector.extract_strided_slice %222 {offsets = [0, 112], sizes = [5, 16], strides = [1, 1]} : vector<5x128xf32> to vector<5x16xf32>
      %381 = vector.extract_strided_slice %223 {offsets = [0, 112], sizes = [5, 16], strides = [1, 1]} : vector<5x128xf32> to vector<5x16xf32>
      %382 = vector.extract_strided_slice %224 {offsets = [0, 112], sizes = [5, 16], strides = [1, 1]} : vector<5x128xf32> to vector<5x16xf32>
      %cst_120 = arith.constant dense<0.000000e+00> : vector<5x5xf32>
      %383 = tpu.matmul %380, %381, %cst_120 {dimension_numbers = #tpu.dot_dimension_numbers<[1], [1], [0], [0], [0, 0, 1, 0], [], []>} : vector<5x16xf32>, vector<5x16xf32>, vector<5x5xf32> -> vector<5x5xf32>
      %384 = vector.extract_strided_slice %34 {offsets = [1, 0], sizes = [1, 5], strides = [1, 1]} : vector<2x5xf32> to vector<1x5xf32>
      %385 = vector.broadcast %384 : vector<1x5xf32> to vector<5x5xf32>
      %386 = arith.addf %383, %385 : vector<5x5xf32>
      %cst_121 = arith.constant dense<0xFF800000> : vector<5xf32>
      %387 = vector.multi_reduction <maximumf>, %386, %cst_121 [1] : vector<5x5xf32> to vector<5xf32>
      %388 = vector.shape_cast %387 : vector<5xf32> to vector<5x1xf32>
      %389 = vector.broadcast %388 : vector<5x1xf32> to vector<5x5xf32>
      %390 = arith.subf %386, %389 : vector<5x5xf32>
      %391 = math.exp %390 : vector<5x5xf32>
      %cst_122 = arith.constant dense<0.000000e+00> : vector<5xf32>
      %392 = vector.multi_reduction <add>, %391, %cst_122 [1] : vector<5x5xf32> to vector<5xf32>
      %393 = vector.shape_cast %392 : vector<5xf32> to vector<5x1xf32>
      %394 = tpu.reciprocal %393 {approx = true} : vector<5x1xf32> -> vector<5x1xf32>
      %395 = vector.broadcast %394 : vector<5x1xf32> to vector<5x5xf32>
      %396 = arith.mulf %391, %395 : vector<5x5xf32>
      %cst_123 = arith.constant dense<0.000000e+00> : vector<5x16xf32>
      %397 = tpu.matmul %396, %382, %cst_123 {dimension_numbers = #tpu.dot_dimension_numbers<[1], [0], [0], [1], [0, 0, 1, 1], [], []>} : vector<5x5xf32>, vector<5x16xf32>, vector<5x16xf32> -> vector<5x16xf32>
      %398 = arith.truncf %397 : vector<5x16xf32> to vector<5x16xbf16>
      %399 = vector.extract_strided_slice %14 {offsets = [112, 0], sizes = [16, 128], strides = [1, 1]} : vector<128x128xbf16> to vector<16x128xbf16>
      %cst_124 = arith.constant dense<0.000000e+00> : vector<5x128xf32>
      %400 = tpu.matmul %398, %399, %cst_124 {dimension_numbers = #tpu.dot_dimension_numbers<[1], [0], [0], [1], [0, 0, 1, 1], [], []>} : vector<5x16xbf16>, vector<16x128xbf16>, vector<5x128xf32> -> vector<5x128xf32>
      %401 = arith.addf %379, %400 : vector<5x128xf32>
      %402 = tpu.concatenate %221, %401 in 0 : vector<5x128xf32>, vector<5x128xf32> -> vector<10x128xf32>
      %403 = vector.broadcast %16 : vector<1x128xf32> to vector<10x128xf32>
      %404 = arith.addf %402, %403 : vector<10x128xf32>
      %405 = arith.addf %33, %404 : vector<10x128xf32>
      %cst_125 = arith.constant dense<0.000000e+00> : vector<10xf32>
      %406 = vector.multi_reduction <add>, %405, %cst_125 [1] : vector<10x128xf32> to vector<10xf32>
      %407 = vector.shape_cast %406 : vector<10xf32> to vector<10x1xf32>
      %cst_126 = arith.constant 1.280000e+02 : f32
      %408 = vector.broadcast %cst_126 : f32 to vector<10x1xf32>
      %409 = arith.divf %407, %408 : vector<10x1xf32>
      %410 = vector.broadcast %409 : vector<10x1xf32> to vector<10x128xf32>
      %411 = arith.subf %405, %410 : vector<10x128xf32>
      %412 = arith.mulf %411, %411 : vector<10x128xf32>
      %cst_127 = arith.constant dense<0.000000e+00> : vector<10xf32>
      %413 = vector.multi_reduction <add>, %412, %cst_127 [1] : vector<10x128xf32> to vector<10xf32>
      %414 = vector.shape_cast %413 : vector<10xf32> to vector<10x1xf32>
      %cst_128 = arith.constant 1.280000e+02 : f32
      %415 = vector.broadcast %cst_128 : f32 to vector<10x1xf32>
      %416 = arith.divf %414, %415 : vector<10x1xf32>
      %cst_129 = arith.constant 9.99999974E-6 : f32
      %417 = vector.broadcast %cst_129 : f32 to vector<10x1xf32>
      %418 = arith.addf %416, %417 : vector<10x1xf32>
      %419 = math.rsqrt %418 : vector<10x1xf32>
      %420 = vector.broadcast %419 : vector<10x1xf32> to vector<10x128xf32>
      %421 = arith.mulf %411, %420 : vector<10x128xf32>
      %422 = vector.broadcast %18 : vector<1x128xf32> to vector<10x128xf32>
      %423 = arith.mulf %421, %422 : vector<10x128xf32>
      %424 = vector.broadcast %20 : vector<1x128xf32> to vector<10x128xf32>
      %425 = arith.addf %423, %424 : vector<10x128xf32>
      %426 = arith.truncf %425 : vector<10x128xf32> to vector<10x128xbf16>
      %cst_130 = arith.constant dense<0.000000e+00> : vector<10x2048xf32>
      %427 = tpu.matmul %426, %22, %cst_130 {dimension_numbers = #tpu.dot_dimension_numbers<[1], [0], [0], [1], [0, 0, 1, 1], [], []>} : vector<10x128xbf16>, vector<128x2048xbf16>, vector<10x2048xf32> -> vector<10x2048xf32>
      %428 = vector.broadcast %24 : vector<1x2048xf32> to vector<10x2048xf32>
      %429 = arith.addf %427, %428 : vector<10x2048xf32>
      %cst_131 = arith.constant 0.000000e+00 : f32
      %430 = vector.broadcast %cst_131 : f32 to vector<10x2048xf32>
      %431 = arith.maximumf %429, %430 : vector<10x2048xf32>
      %432 = arith.truncf %431 : vector<10x2048xf32> to vector<10x2048xbf16>
      %cst_132 = arith.constant dense<0.000000e+00> : vector<10x128xf32>
      %433 = tpu.matmul %432, %26, %cst_132 {dimension_numbers = #tpu.dot_dimension_numbers<[1], [0], [0], [1], [0, 0, 1, 1], [], []>} : vector<10x2048xbf16>, vector<2048x128xbf16>, vector<10x128xf32> -> vector<10x128xf32>
      %434 = vector.broadcast %28 : vector<1x128xf32> to vector<10x128xf32>
      %435 = arith.addf %433, %434 : vector<10x128xf32>
      %436 = arith.addf %425, %435 : vector<10x128xf32>
      %cst_133 = arith.constant dense<0.000000e+00> : vector<10xf32>
      %437 = vector.multi_reduction <add>, %436, %cst_133 [1] : vector<10x128xf32> to vector<10xf32>
      %438 = vector.shape_cast %437 : vector<10xf32> to vector<10x1xf32>
      %cst_134 = arith.constant 1.280000e+02 : f32
      %439 = vector.broadcast %cst_134 : f32 to vector<10x1xf32>
      %440 = arith.divf %438, %439 : vector<10x1xf32>
      %441 = vector.broadcast %440 : vector<10x1xf32> to vector<10x128xf32>
      %442 = arith.subf %436, %441 : vector<10x128xf32>
      %443 = arith.mulf %442, %442 : vector<10x128xf32>
      %cst_135 = arith.constant dense<0.000000e+00> : vector<10xf32>
      %444 = vector.multi_reduction <add>, %443, %cst_135 [1] : vector<10x128xf32> to vector<10xf32>
      %445 = vector.shape_cast %444 : vector<10xf32> to vector<10x1xf32>
      %cst_136 = arith.constant 1.280000e+02 : f32
      %446 = vector.broadcast %cst_136 : f32 to vector<10x1xf32>
      %447 = arith.divf %445, %446 : vector<10x1xf32>
      %cst_137 = arith.constant 9.99999974E-6 : f32
      %448 = vector.broadcast %cst_137 : f32 to vector<10x1xf32>
      %449 = arith.addf %447, %448 : vector<10x1xf32>
      %450 = math.rsqrt %449 : vector<10x1xf32>
      %451 = vector.broadcast %450 : vector<10x1xf32> to vector<10x128xf32>
      %452 = arith.mulf %442, %451 : vector<10x128xf32>
      %453 = vector.broadcast %30 : vector<1x128xf32> to vector<10x128xf32>
      %454 = arith.mulf %452, %453 : vector<10x128xf32>
      %455 = vector.broadcast %32 : vector<1x128xf32> to vector<10x128xf32>
      %456 = arith.addf %454, %455 : vector<10x128xf32>
      %c0_138 = arith.constant 0 : index
      %c0_139 = arith.constant 0 : index
      %457 = vector.load %arg26[%c0_138, %c0_139] : memref<10x128xf32, #tpu.memory_space<vmem>>, vector<10x128xf32>
      tpu.vector_store %arg26[%c0_138, %c0_139], %456 {strides = array<i32>} : memref<10x128xf32, #tpu.memory_space<vmem>>, vector<10x128xf32>,
    } else {
    }
    %c4_i32 = arith.constant 4 : i32
    %6 = arith.cmpi eq, %arg0, %c4_i32 : i32
    %7 = arith.extui %6 : i1 to i32
    %c0_i32_3 = arith.constant 0 : i32
    %8 = arith.cmpi ne, %7, %c0_i32_3 : i32
    scf.if %8 {
      %c0 = arith.constant 0 : index
      %c0_4 = arith.constant 0 : index
      %9 = vector.load %arg9[%c0, %c0_4] : memref<2x10xf32, #tpu.memory_space<vmem>>, vector<2x10xf32>
      %c0_5 = arith.constant 0 : index
      %c0_6 = arith.constant 0 : index
      %10 = vector.load %arg26[%c0_5, %c0_6] : memref<10x128xf32, #tpu.memory_space<vmem>>, vector<10x128xf32>
      %cst = arith.constant dense<0.000000e+00> : vector<2x128xf32>
      %11 = tpu.matmul %9, %10, %cst {dimension_numbers = #tpu.dot_dimension_numbers<[1], [0], [0], [1], [0, 0, 1, 1], [], []>} : vector<2x10xf32>, vector<10x128xf32>, vector<2x128xf32> -> vector<2x128xf32>
      %c0_7 = arith.constant 0 : index
      %c0_8 = arith.constant 0 : index
      %12 = vector.load %arg25[%c0_7, %c0_8] : memref<2x128xf32, #tpu.memory_space<vmem>>, vector<2x128xf32>
      %c0_9 = arith.constant 0 : index
      %c0_10 = arith.constant 0 : index
      %13 = vector.load %arg10[%c0_9, %c0_10] : memref<256x1xf32, #tpu.memory_space<vmem>>, vector<256x1xf32>
      %14 = vector.extract_strided_slice %13 {offsets = [0, 0], sizes = [128, 1], strides = [1, 1]} : vector<256x1xf32> to vector<128x1xf32>
      %cst_11 = arith.constant dense<0.000000e+00> : vector<2x1xf32>
      %15 = tpu.matmul %12, %14, %cst_11 {dimension_numbers = #tpu.dot_dimension_numbers<[1], [0], [0], [1], [0, 0, 1, 1], [], []>} : vector<2x128xf32>, vector<128x1xf32>, vector<2x1xf32> -> vector<2x1xf32>
      %16 = vector.extract_strided_slice %13 {offsets = [128, 0], sizes = [128, 1], strides = [1, 1]} : vector<256x1xf32> to vector<128x1xf32>
      %cst_12 = arith.constant dense<0.000000e+00> : vector<2x1xf32>
      %17 = tpu.matmul %11, %16, %cst_12 {dimension_numbers = #tpu.dot_dimension_numbers<[1], [0], [0], [1], [0, 0, 1, 1], [], []>} : vector<2x128xf32>, vector<128x1xf32>, vector<2x1xf32> -> vector<2x1xf32>
      %18 = arith.addf %15, %17 : vector<2x1xf32>
      %c0_13 = arith.constant 0 : index
      %c0_14 = arith.constant 0 : index
      %19 = vector.load %arg11[%c0_13, %c0_14] : memref<1x1xf32, #tpu.memory_space<vmem>>, vector<1x1xf32>
      %20 = vector.broadcast %19 : vector<1x1xf32> to vector<2x1xf32>
      %21 = arith.addf %18, %20 : vector<2x1xf32>
      %c0_15 = arith.constant 0 : index
      %c0_16 = arith.constant 0 : index
      %22 = vector.load %arg24[%c0_15, %c0_16] : memref<2x1xf32, #tpu.memory_space<vmem>>, vector<2x1xf32>
      tpu.vector_store %arg24[%c0_15, %c0_16], %21 {strides = array<i32>} : memref<2x1xf32, #tpu.memory_space<vmem>>, vector<2x1xf32>,
    } else {
    }
    return
  }
  func.func @transform_0(%arg0: i32) -> (i32, i32) {
    %c0_i32 = arith.constant 0 : i32
    %c0_i32_0 = arith.constant 0 : i32
    %c0_i32_1 = arith.constant 0 : i32
    return %c0_i32, %c0_i32_0 : i32, i32
  }
  func.func @transform_1(%arg0: i32) -> (i32, i32) {
    %c0_i32 = arith.constant 0 : i32
    %c0_i32_0 = arith.constant 0 : i32
    %c0_i32_1 = arith.constant 0 : i32
    return %c0_i32, %c0_i32_0 : i32, i32
  }
  func.func @transform_2(%arg0: i32) -> (i32, i32) {
    %c0_i32 = arith.constant 0 : i32
    %c0_i32_0 = arith.constant 0 : i32
    %c0_i32_1 = arith.constant 0 : i32
    return %c0_i32, %c0_i32_0 : i32, i32
  }
  func.func @transform_3(%arg0: i32) -> (i32, i32) {
    %c0_i32 = arith.constant 0 : i32
    %c0_i32_0 = arith.constant 0 : i32
    %c0_i32_1 = arith.constant 0 : i32
    return %c0_i32, %c0_i32_0 : i32, i32
  }
  func.func @transform_4(%arg0: i32) -> (i32, i32) {
    %c0_i32 = arith.constant 0 : i32
    %c0_i32_0 = arith.constant 0 : i32
    %c0_i32_1 = arith.constant 0 : i32
    return %c0_i32, %c0_i32_0 : i32, i32
  }
  func.func @transform_5(%arg0: i32) -> (i32, i32) {
    %c0_i32 = arith.constant 0 : i32
    %c0_i32_0 = arith.constant 0 : i32
    %c0_i32_1 = arith.constant 0 : i32
    return %c0_i32, %c0_i32_0 : i32, i32
  }
  func.func @transform_6(%arg0: i32) -> (i32, i32) {
    %c0_i32 = arith.constant 0 : i32
    %c0_i32_0 = arith.constant 0 : i32
    %c0_i32_1 = arith.constant 0 : i32
    return %c0_i32, %c0_i32_0 : i32, i32
  }
  func.func @transform_7(%arg0: i32) -> (i32, i32) {
    %c0_i32 = arith.constant 0 : i32
    %c0_i32_0 = arith.constant 0 : i32
    %c0_i32_1 = arith.constant 0 : i32
    return %c0_i32, %c0_i32_0 : i32, i32
  }
  func.func @transform_8(%arg0: i32) -> (i32, i32) {
    %c0_i32 = arith.constant 0 : i32
    %c0_i32_0 = arith.constant 0 : i32
    %c0_i32_1 = arith.constant 0 : i32
    return %c0_i32, %c0_i32_0 : i32, i32
  }
  func.func @transform_9(%arg0: i32) -> (i32, i32) {
    %c0_i32 = arith.constant 0 : i32
    %c0_i32_0 = arith.constant 0 : i32
    %c0_i32_1 = arith.constant 0 : i32
    return %c0_i32, %c0_i32_0 : i32, i32
  }
  func.func @transform_10(%arg0: i32) -> (i32, i32) {
    %c0_i32 = arith.constant 0 : i32
    %c0_i32_0 = arith.constant 0 : i32
    %c0_i32_1 = arith.constant 0 : i32
    return %c0_i32, %c0_i32_0 : i32, i32
  }
  func.func @transform_11(%arg0: i32) -> (i32, i32, i32) {
    %c0_i32 = arith.constant 0 : i32
    %c0_i32_0 = arith.constant 0 : i32
    %c0_i32_1 = arith.constant 0 : i32
    return %arg0, %c0_i32, %c0_i32_0 : i32, i32, i32
  }
  func.func @transform_12(%arg0: i32) -> (i32, i32, i32) {
    %c0_i32 = arith.constant 0 : i32
    %c0_i32_0 = arith.constant 0 : i32
    %c0_i32_1 = arith.constant 0 : i32
    return %arg0, %c0_i32, %c0_i32_0 : i32, i32, i32
  }
  func.func @transform_13(%arg0: i32) -> (i32, i32, i32) {
    %c0_i32 = arith.constant 0 : i32
    %c0_i32_0 = arith.constant 0 : i32
    %c0_i32_1 = arith.constant 0 : i32
    return %arg0, %c0_i32, %c0_i32_0 : i32, i32, i32
  }
  func.func @transform_14(%arg0: i32) -> (i32, i32, i32) {
    %c0_i32 = arith.constant 0 : i32
    %c0_i32_0 = arith.constant 0 : i32
    %c0_i32_1 = arith.constant 0 : i32
    return %arg0, %c0_i32, %c0_i32_0 : i32, i32, i32
  }
  func.func @transform_15(%arg0: i32) -> (i32, i32, i32) {
    %c0_i32 = arith.constant 0 : i32
    %c0_i32_0 = arith.constant 0 : i32
    %c0_i32_1 = arith.constant 0 : i32
    return %arg0, %c0_i32, %c0_i32_0 : i32, i32, i32
  }
  func.func @transform_16(%arg0: i32) -> (i32, i32, i32) {
    %c0_i32 = arith.constant 0 : i32
    %c0_i32_0 = arith.constant 0 : i32
    %c0_i32_1 = arith.constant 0 : i32
    return %arg0, %c0_i32, %c0_i32_0 : i32, i32, i32
  }
  func.func @transform_17(%arg0: i32) -> (i32, i32, i32) {
    %c0_i32 = arith.constant 0 : i32
    %c0_i32_0 = arith.constant 0 : i32
    %c0_i32_1 = arith.constant 0 : i32
    return %arg0, %c0_i32, %c0_i32_0 : i32, i32, i32
  }
  func.func @transform_18(%arg0: i32) -> (i32, i32, i32) {
    %c0_i32 = arith.constant 0 : i32
    %c0_i32_0 = arith.constant 0 : i32
    %c0_i32_1 = arith.constant 0 : i32
    return %arg0, %c0_i32, %c0_i32_0 : i32, i32, i32
  }
  func.func @transform_19(%arg0: i32) -> (i32, i32, i32) {
    %c0_i32 = arith.constant 0 : i32
    %c0_i32_0 = arith.constant 0 : i32
    %c0_i32_1 = arith.constant 0 : i32
    return %arg0, %c0_i32, %c0_i32_0 : i32, i32, i32
  }
  func.func @transform_20(%arg0: i32) -> (i32, i32, i32) {
    %c0_i32 = arith.constant 0 : i32
    %c0_i32_0 = arith.constant 0 : i32
    %c0_i32_1 = arith.constant 0 : i32
    return %arg0, %c0_i32, %c0_i32_0 : i32, i32, i32
  }
  func.func @transform_21(%arg0: i32) -> (i32, i32, i32) {
    %c0_i32 = arith.constant 0 : i32
    %c0_i32_0 = arith.constant 0 : i32
    %c0_i32_1 = arith.constant 0 : i32
    return %arg0, %c0_i32, %c0_i32_0 : i32, i32, i32
  }
  func.func @transform_22(%arg0: i32) -> (i32, i32, i32) {
    %c0_i32 = arith.constant 0 : i32
    %c0_i32_0 = arith.constant 0 : i32
    %c0_i32_1 = arith.constant 0 : i32
    return %arg0, %c0_i32, %c0_i32_0 : i32, i32, i32
  }
  func.func @transform_23(%arg0: i32) -> (i32, i32) {
    %c0_i32 = arith.constant 0 : i32
    %c0_i32_0 = arith.constant 0 : i32
    %c0_i32_1 = arith.constant 0 : i32
    return %c0_i32, %c0_i32_0 : i32, i32
  }
}

</mosaic_0001>

<bundles_post_ra>
// kernel: forward.1
= control target key start
LH: loop header
LB: loop body
LE: loop exit
PB: predicated region body
PF: predicated region fallthrough
CT: control target
= control target key end

     0   :  { %s19240_s0 = inlined_call_operand.hbm [shape: f32[8,64], index: 0, kind: input, shape index: {}]   ;;  %s19241_s1 = inlined_call_operand.hbm [shape: f32[8,8], index: 1, kind: input, shape index: {}]   ;;  %s19242_s2 = inlined_call_operand.hbm [shape: f32[64,64], index: 2, kind: input, shape index: {}]   ;;  %s19243_s3 = inlined_call_operand.hbm [shape: f32[1,64], index: 3, kind: input, shape index: {}]   ;;  %s19244_s4 = inlined_call_operand.hbm [shape: f32[64,64], index: 4, kind: input, shape index: {}]   ;;  %s19245_s5 = inlined_call_operand.hbm [shape: f32[1,64], index: 5, kind: input, shape index: {}]   ;;  %s19246_s6 = inlined_call_operand.hbm [shape: f32[12,8], index: 6, kind: input, shape index: {}]   ;;  %s19247_s7 = inlined_call_operand.hbm [shape: f32[2,5], index: 7, kind: input, shape index: {}]   ;;  %s19248_s8 = inlined_call_operand.hbm [shape: f32[2,10], index: 8, kind: input, shape index: {}]   ;;  %s19249_s9 = inlined_call_operand.vmem [shape: f32[256,1], index: 9, kind: input, shape index: {}]   ;;  %s19250_s10 = inlined_call_operand.<no memory space> [shape: f32[1,1], index: 10, kind: input, shape index: {}]   ;;  %s19251_s11 = inlined_call_operand.hbm [shape: bf16[5,128,384], index: 11, kind: input, shape index: {}]   ;;  %s19252_s12 = inlined_call_operand.hbm [shape: f32[5,1,384], index: 12, kind: input, shape index: {}]   ;;  %s19253_s13 = inlined_call_operand.hbm [shape: bf16[5,128,128], index: 13, kind: input, shape index: {}]   ;;  %s19254_s14 = inlined_call_operand.hbm [shape: f32[5,1,128], index: 14, kind: input, shape index: {}]   ;;  %s19255_s15 = inlined_call_operand.hbm [shape: f32[5,1,128], index: 15, kind: input, shape index: {}]   ;;  %s19256_s16 = inlined_call_operand.hbm [shape: f32[5,1,128], index: 16, kind: input, shape index: {}]   ;;  %s19257_s17 = inlined_call_operand.hbm [shape: bf16[5,128,2048], index: 17, kind: input, shape index: {}]   ;;  %s19258_s18 = inlined_call_operand.hbm [shape: f32[5,1,2048], index: 18, kind: input, shape index: {}]   ;;  %s19259_s19 = inlined_call_operand.hbm [shape: bf16[5,2048,128], index: 19, kind: input, shape index: {}]   ;;  %s19260_s20 = inlined_call_operand.hbm [shape: f32[5,1,128], index: 20, kind: input, shape index: {}]   ;;  %s19261_s21 = inlined_call_operand.hbm [shape: f32[5,1,128], index: 21, kind: input, shape index: {}]   ;;  %s19262_s22 = inlined_call_operand.hbm [shape: f32[5,1,128], index: 22, kind: input, shape index: {}]   ;;  %s19263_s23 = inlined_call_operand.vmem [shape: f32[2,1], index: 23, kind: output, shape index: {}]  }
   0x1   :  { %19305 = sst [smem:[#allocation53_spill]] %s19240_s0  ;;  %v28_v0 = vstv %s19250_s10 }
   0x2   :  { %19306 = sst [smem:[#allocation54_spill]] %s19241_s1  ;;  %29 = vst [vmem:[#allocation4] sm:$0x1] %v28_v0 }
   0x3   :  { %19307 = sst [smem:[#allocation55_spill]] %s19242_s2 }
   0x4   :  { %19308 = sst [smem:[#allocation56_spill]] %s19243_s3 }
   0x5   :  { %19309 = sst [smem:[#allocation57_spill]] %s19244_s4 }
   0x6   :  { %19310 = sst [smem:[#allocation58_spill]] %s19245_s5 }
   0x7   :  { %19311 = sst [smem:[#allocation59_spill]] %s19246_s6 }
   0x8   :  { %19312 = sst [smem:[#allocation60_spill]] %s19247_s7 }
   0x9   :  { %19313 = sst [smem:[#allocation61_spill]] %s19249_s9 }
   0xa   :  { %19314 = sst [smem:[#allocation62_spill]] %s19251_s11 }
   0xb   :  { %19315 = sst [smem:[#allocation63_spill]] %s19253_s13 }
   0xc   :  { %19316 = sst [smem:[#allocation64_spill]] %s19255_s15 }
   0xd   :  { %19317 = sst [smem:[#allocation65_spill]] %s19256_s16 }
   0xe   :  { %19318 = sst [smem:[#allocation66_spill]] %s19257_s17 }
   0xf   :  { %19319 = sst [smem:[#allocation67_spill]] %s19258_s18 }
  0x10   :  { %19320 = sst [smem:[#allocation68_spill]] %s19259_s19 }
  0x11   :  { %19321 = sst [smem:[#allocation69_spill]] %s19260_s20 }
  0x12   :  { %19322 = sst [smem:[#allocation70_spill]] %s19262_s22 }
  0x13   :  { %19323 = sst [smem:[#allocation71_spill]] %s19263_s23 }
  0x14   :  { %30 = vsyncpa [#allocation6], 0 }
  0x15   :  { %31 = vsyncpa [#allocation8], 0 }
  0x16   :  { %32 = vsyncpa [#allocation11], 0 }
  0x17   :  { %33 = vsyncpa [#allocation14], 0 }
  0x18   :  { %34 = vsyncpa [#allocation17], 0 }
  0x19   :  { %35 = vsyncpa [#allocation20], 0 }
  0x1a   :  { %37 = vsyncpa [#allocation20 + $0x1], 0 }
  0x1b   :  { %38 = vsyncpa [#allocation23], 0 }
  0x1c   :  { %40 = vsyncpa [#allocation23 + $0x1], 0 }
  0x1d   :  { %41 = vsyncpa [#allocation26], 0 }
  0x1e   :  { %43 = vsyncpa [#allocation26 + $0x1], 0 }
  0x1f   :  { %44 = vsyncpa [#allocation29], 0 }
  0x20   :  { %46 = vsyncpa [#allocation29 + $0x1], 0 }
  0x21   :  { %47 = vsyncpa [#allocation32], 0 }
  0x22   :  { %49 = vsyncpa [#allocation32 + $0x1], 0 }
  0x23   :  { %50 = vsyncpa [#allocation35], 0 }
  0x24   :  { %52 = vsyncpa [#allocation35 + $0x1], 0  ;;  %s16890_s24 = smov 0   ;;  %s16892_s10 = smov 0  }
  0x25   :  { %s16894_s25 = smov 0   ;;  %s16896_s5 = smov 0  }
  0x26 LB: > { %19324 = sst [smem:[#allocation48_spill]] %s16708_s25  ;;  %s16714_s1 = smov [#allocation7]   ;;  %s16712_s5 = sphi %s16896_s5, %s19388_s5   ;;  %s16708_s25 = sphi %s16894_s25, %s19390_s25   ;;  %s16704_s10 = sphi %s16892_s10, %s19392_s10   ;;  %s16700_s24 = sphi %s16890_s24, %s19391_s24  }
  0x27   : > { %s651_s26 = sshll.u32 %s16714_s1, 4  ;;  %s16911_s2 = sadd.s32 4294967295, %s16712_s5   ;;  %s16917_s26 = int_to_ptr.vmem [resolvable:$true] %s651_s26 }
  0x28   : > { %p13325_p0 = scmp.ge.s32.totalorder %s16712_s5, 1  ;;  %p19278_p1 = scmp.eq.s32.totalorder %s16911_s2, 0 }
  0x29   : > { %p627_p2 = scmp.lt.s32.totalorder %s16712_s5, 6  ;;  %s16715_s27 = smov [#allocation10]  }
  0x2a   : > { %s675_s7 = sshll.u32 %s16715_s27, 4  ;;  %s16716_s28 = smov [#allocation13]   ;;  %s16925_s7 = int_to_ptr.vmem [resolvable:$true] %s675_s7 }
  0x2b   : > { %p16919_p4 = pnand %p13325_p0, %p627_p2  ;;  %s699_s29 = sshll.u32 %s16716_s28, 4  ;;  %s16933_s29 = int_to_ptr.vmem [resolvable:$true] %s699_s29 }
  0x2c   : > { %s16717_s0 = smov [#allocation16]   ;;  %s19328_s23 = sld [smem:[#allocation54_spill]] }
  0x2d   : > { %s19325_s6 = scalar_select %p16919_p4, 1, 0 }
  0x2e   : > { %p15423_p5 = pneg %p16919_p4  ;;  %s16935_s4 = sshll.u32 %s16717_s0, 4  ;;  %s724_s4 = int_to_ptr.vmem [resolvable:$true] %s16935_s4 }
  0x2f   : > { %19326 = sst [smem:[#allocation49_spill]] %s19325_s6 }
  0x30   : > { %p16929_p6 = pnand %p15423_p5, %p19278_p1 }
  0x32   : > { %s19327_s3 = scalar_select %p16929_p6, 1, 0 }
  0x33   : > { %s16026_s9 = scalar_lea.hbm %s19328_s23, 128  ;;  %p16945_p8 = pneg %p16929_p6 }
  0x34   : > { %p16027_p7 = scmp.ne.s32.totalorder %s19328_s23, %s16026_s9  ;;  %p16033_p11 = scmp.lt.u32.totalorder %s16026_s9, %s19328_s23 }
  0x35   : > { %s19329_s28 = scalar_select %p16945_p8, 1, 0 }
  0x36   : > { %p16029_p9 = pnand %p16945_p8, %p16027_p7 }
  0x38   : > { %p16030_p10 = pneg %p16029_p9 }
  0x3a   : > { %p16035_p12 = pnand %p16033_p11, %p16030_p10 }
  0x3c   : > { %16038 = shalt.err (!%p16035_p12)
}
  0x3d   : > { %s16039_s6 = scalar_lea.vmem %s16917_s26, 128  ;;  %p16047_p5 = scmp.lt.s32.totalorder %s16917_s26, %s16917_s26 }
  0x3e   : > { %p16040_p13 = scmp.ne.s32.totalorder %s16917_s26, %s16039_s6  ;;  %p16048_p3 = scmp.lt.s32.totalorder %s16039_s6, %s16039_s6 }
  0x40   : > { %p16042_p0 = pnand %p16040_p13, %p16945_p8  ;;  %p16049_p7 = por %p16048_p3, %p16047_p5 }
  0x42   : > { %p16043_p2 = pneg %p16042_p0 }
  0x44   : > { %p16050_p9 = pnand %p16049_p7, %p16043_p2 }
  0x46   : > { %16053 = shalt.err (!%p16050_p9)
}
  0x47   : > { %15429 = dma.hbm_to_vmem [thread:$0]  (!%p16929_p6), %s19328_s23, 128, %s16917_s26, [#allocation8]  }
  0x48   : > { %s19330_s27 = sld [smem:[#allocation56_spill]] }
  0x4e   : > { %s16054_s0 = scalar_lea.hbm %s19330_s27, 16 }
  0x4f   : > { %p16055_p10 = scmp.ne.s32.totalorder %s19330_s27, %s16054_s0  ;;  %p16061_p12 = scmp.lt.u32.totalorder %s16054_s0, %s19330_s27 }
  0x51   : > { %p16057_p3 = pnand %p16055_p10, %p16945_p8 }
  0x53   : > { %p16058_p11 = pneg %p16057_p3 }
  0x55   : > { %p16063_p13 = pnand %p16061_p12, %p16058_p11 }
  0x57   : > { %16066 = shalt.err (!%p16063_p13)
}
  0x58   : > { %s16067_s26 = scalar_lea.vmem %s16925_s7, 16  ;;  %s16074_s18 = scalar_lea.vmem %s16925_s7, 32 }
  0x59   : > { %p16068_p0 = scmp.ne.s32.totalorder %s16925_s7, %s16067_s26  ;;  %p16075_p7 = scmp.lt.s32.totalorder %s16925_s7, %s16925_s7 }
  0x5a   : > { %p16076_p9 = scmp.lt.s32.totalorder %s16074_s18, %s16067_s26 }
  0x5b   : > { %p16070_p2 = pnand %p16068_p0, %p16945_p8 }
  0x5c   : > { %p16077_p10 = por %p16076_p9, %p16075_p7 }
  0x5d   : > { %p16071_p5 = pneg %p16070_p2 }
  0x5f   : > { %p16078_p3 = pnand %p16077_p10, %p16071_p5 }
  0x61   : > { %16081 = shalt.err (!%p16078_p3)
}
  0x62   : > { %15435 = dma.hbm_to_vmem [thread:$0]  (!%p16929_p6), %s19330_s27, 16, %s16925_s7, [#allocation11]  }
  0x63   : > { %s19331_s30 = sld [smem:[#allocation58_spill]] }
  0x69   : > { %s16082_s1 = scalar_lea.hbm %s19331_s30, 16 }
  0x6a   : > { %p16083_p11 = scmp.ne.s32.totalorder %s19331_s30, %s16082_s1  ;;  %p16089_p0 = scmp.lt.u32.totalorder %s16082_s1, %s19331_s30 }
  0x6c   : > { %p16085_p12 = pnand %p16083_p11, %p16945_p8 }
  0x6e   : > { %p16086_p13 = pneg %p16085_p12 }
  0x70   : > { %p16091_p2 = pnand %p16089_p0, %p16086_p13 }
  0x72   : > { %16094 = shalt.err (!%p16091_p2)
}
  0x73   : > { %s16095_s7 = scalar_lea.vmem %s16933_s29, 16  ;;  %s16102_s16 = scalar_lea.vmem %s16933_s29, 32 }
  0x74   : > { %p16096_p5 = scmp.ne.s32.totalorder %s16933_s29, %s16095_s7  ;;  %p16103_p10 = scmp.lt.s32.totalorder %s16933_s29, %s16933_s29 }
  0x75   : > { %p16104_p3 = scmp.lt.s32.totalorder %s16102_s16, %s16095_s7 }
  0x76   : > { %p16098_p7 = pnand %p16096_p5, %p16945_p8 }
  0x77   : > { %p16105_p11 = por %p16104_p3, %p16103_p10 }
  0x78   : > { %p16099_p9 = pneg %p16098_p7 }
  0x7a   : > { %p16106_p12 = pnand %p16105_p11, %p16099_p9 }
  0x7c   : > { %16109 = shalt.err (!%p16106_p12)
}
  0x7d   : > { %15441 = dma.hbm_to_vmem [thread:$0]  (!%p16929_p6), %s19331_s30, 16, %s16933_s29, [#allocation14]  }
  0x7e   : > { %s19332_s0 = sld [smem:[#allocation60_spill]] }
  0x84   : > { %s16110_s6 = scalar_lea.hbm %s19332_s0, 32 }
  0x85   : > { %p16111_p13 = scmp.ne.s32.totalorder %s19332_s0, %s16110_s6  ;;  %p16117_p5 = scmp.lt.u32.totalorder %s16110_s6, %s19332_s0 }
  0x87   : > { %p16113_p0 = pnand %p16111_p13, %p16945_p8 }
  0x89   : > { %p16114_p2 = pneg %p16113_p0 }
  0x8b   : > { %p16119_p7 = pnand %p16117_p5, %p16114_p2 }
  0x8d   : > { %16122 = shalt.err (!%p16119_p7)
}
  0x8e   : > { %s16123_s20 = scalar_lea.vmem %s724_s4, 32  ;;  %p16131_p11 = scmp.lt.s32.totalorder %s724_s4, %s724_s4 }
  0x8f   : > { %p16124_p9 = scmp.ne.s32.totalorder %s724_s4, %s16123_s20  ;;  %p16132_p12 = scmp.lt.s32.totalorder %s16123_s20, %s16123_s20 }
  0x91   : > { %p16126_p10 = pnand %p16124_p9, %p16945_p8  ;;  %p16133_p1 = por %p16132_p12, %p16131_p11 }
  0x93   : > { %p16127_p3 = pneg %p16126_p10 }
  0x95   : > { %p16134_p4 = pnand %p16133_p1, %p16127_p3 }
  0x97   : > { %16137 = shalt.err (!%p16134_p4)
}
  0x98   : > { %15447 = dma.hbm_to_vmem [thread:$0]  (!%p16929_p6), %s19332_s0, 32, %s724_s4, [#allocation17]  }
  0x99   : > { %s17034_s22 = sadd.s32 1, %s16712_s5   ;;  %s296_s1 = sadd.s32 1, %s16708_s25 }
  0x9a   : > { %19333 = sst [smem:[#allocation50_spill]] %s17034_s22  ;;  %s293_s6 = ssub.s32 %s16712_s5, %s17034_s22 }
  0x9b   : > { %p303_p1 = scmp.ne.s32.totalorder %s16708_s25, %s16704_s10  ;;  %p294_p4 = scmp.eq.s32.totalorder %s293_s6, 0 }
  0x9c   : > { %p304_p13 = scmp.eq.s32.totalorder %s16712_s5, 0  ;;  %p309_p0 = scmp.ne.s32.totalorder %s16704_s10, %s16700_s24 }
  0x9d   : > { %p15497_p2 = scmp.lt.s32.totalorder %s16712_s5, 5  ;;  %p19335_p7 = scmp.eq.s32.totalorder %s16911_s2, 0 }
  0x9e   : > { %s17046_s26 = scalar_select %p294_p4, %s16708_s25, %s296_s1  }
  0x9f   : > { %p305_p5 = por %p304_p13, %p303_p1  ;;  %p17050_p9 = por %p19335_p7, %p309_p0 }
  0xa0   : > { %19334 = sst [smem:[#allocation51_spill]] %s17046_s26  ;;  %s17055_s7 = sand.u32 1, %s16712_s5  }
  0xa1   : > { %s19336_s18 = scalar_select %p17050_p9, 1, 0 }
  0xa2   : > { %s17058_s4 = sand.u32 1, %s16708_s25   ;;  %s15358_s20 = smul.u32 3072, %s16712_s5 }
  0xa3   : > { %19337 = sst [smem:[#allocation52_spill]] %s19336_s18  ;;  %s15357_s16 = smul.u32 192, %s17058_s4 }
  0xa4   : > { %p17062_p10 = pnand %p15497_p2, %p305_p5  ;;  %s19339_s11 = sld [smem:[#allocation62_spill]] }
  0xa5   : > { %s755_s6 = scalar_lea.vmem [#allocation19], %s15357_s16 }
  0xa6   : > { %s19338_s29 = scalar_select %p17062_p10, 1, 0 }
  0xa7   : > { %s762_s0 = sshll.u32 %s755_s6, 4  ;;  %p17078_p11 = pneg %p17062_p10  ;;  %s17071_s0 = int_to_ptr.vmem [resolvable:$true] %s762_s0 }
  0xa9   : > { %s19340_s30 = scalar_select %p17078_p11, 1, 0 }
  0xaa   : > { %s17069_s1 = scalar_lea.hbm %s19339_s11, %s15358_s20  ;;  %s16143_s9 = scalar_lea.hbm %s19339_s11, 15360 }
  0xab   : > { %s16138_s27 = scalar_lea.hbm %s17069_s1, 3072  ;;  %p16144_p4 = scmp.lt.u32.totalorder %s17069_s1, %s19339_s11 }
  0xac   : > { %p16139_p3 = scmp.ne.s32.totalorder %s17069_s1, %s16138_s27  ;;  %p16145_p13 = scmp.lt.u32.totalorder %s16143_s9, %s16138_s27 }
  0xad   : > { %p16147_p2 = scmp.lt.u32.totalorder %s16138_s27, %s17069_s1 }
  0xae   : > { %p16141_p12 = pnand %p17078_p11, %p16139_p3  ;;  %p16146_p0 = por %p16145_p13, %p16144_p4 }
  0xb0   : > { %p16142_p1 = pneg %p16141_p12  ;;  %p16148_p5 = por %p16147_p2, %p16146_p0 }
  0xb2   : > { %p16149_p7 = pnand %p16148_p5, %p16142_p1 }
  0xb4   : > { %16152 = shalt.err (!%p16149_p7)
}
  0xb5   : > { %s16153_s23 = scalar_lea.vmem %s17071_s0, 3072  ;;  %s16718_s20 = smov [#allocation19]  }
  0xb6   : > { %p16154_p3 = scmp.ne.s32.totalorder %s17071_s0, %s16153_s23  ;;  %s16158_s24 = sshll.u32 %s16718_s20, 4  ;;  %s16159_s24 = int_to_ptr.vmem [resolvable:$false] %s16158_s24 }
  0xb7   : > { %s16160_s16 = scalar_lea.vmem %s16159_s24, 6144  ;;  %p16161_p6 = scmp.lt.s32.totalorder %s17071_s0, %s16159_s24 }
  0xb8   : > { %p16156_p12 = pnand %p16154_p3, %p17078_p11  ;;  %p16162_p8 = scmp.lt.s32.totalorder %s16160_s16, %s16153_s23 }
  0xba   : > { %p16157_p9 = pneg %p16156_p12  ;;  %p16163_p4 = por %p16162_p8, %p16161_p6 }
  0xbc   : > { %p16164_p13 = pnand %p16163_p4, %p16157_p9 }
  0xbe   : > { %16167 = shalt.err (!%p16164_p13)
}
  0xbf   : > { %s16719_s27 = smov 192   ;;  %s16720_s9 = smov 12  }
  0xc0   : > { %s19341_s6 = scalar_lea.sflag [#allocation20], %s17055_s7  ;;  %s13338_s20 = sshll.u32 %s17058_s4, 6 }
  0xc1   : > { %15454 = dma.hbm_to_vmem [thread:$0]  (!%p17062_p10), %s17069_s1, 3072, %s17071_s0, %s19341_s6, %s16719_s27, %s16719_s27, %s16720_s9  }
  0xc2   : > { %s14094_s11 = sshll.u32 %s16712_s5, 10  ;;  %s19342_s13 = sld [smem:[#allocation63_spill]] }
  0xc3   : > { %s795_s26 = scalar_lea.vmem [#allocation22], %s13338_s20  ;;  %s19294_s22 = scalar_lea.sflag [#allocation23], %s17055_s7 }
  0xc4   : > { %s802_s25 = sshll.u32 %s795_s26, 4  ;;  %s17110_s25 = int_to_ptr.vmem [resolvable:$true] %s802_s25 }
  0xc8   : > { %s17108_s16 = scalar_lea.hbm %s19342_s13, %s14094_s11  ;;  %s16173_s27 = scalar_lea.hbm %s19342_s13, 5120 }
  0xc9   : > { %s16168_s18 = scalar_lea.hbm %s17108_s16, 1024  ;;  %p16174_p1 = scmp.lt.u32.totalorder %s17108_s16, %s19342_s13 }
  0xca   : > { %p16169_p6 = scmp.ne.s32.totalorder %s17108_s16, %s16168_s18  ;;  %p16175_p0 = scmp.lt.u32.totalorder %s16173_s27, %s16168_s18 }
  0xcb   : > { %p16177_p5 = scmp.lt.u32.totalorder %s16168_s18, %s17108_s16 }
  0xcc   : > { %p16171_p8 = pnand %p16169_p6, %p17078_p11  ;;  %p16176_p2 = por %p16175_p0, %p16174_p1 }
  0xce   : > { %p16172_p9 = pneg %p16171_p8  ;;  %p16178_p7 = por %p16177_p5, %p16176_p2 }
  0xd0   : > { %p16179_p3 = pnand %p16178_p7, %p16172_p9 }
  0xd2   : > { %16182 = shalt.err (!%p16179_p3)
}
  0xd3   : > { %s16183_s26 = scalar_lea.vmem %s17110_s25, 1024  ;;  %s16721_s6 = smov [#allocation22]  }
  0xd4   : > { %p16184_p12 = scmp.ne.s32.totalorder %s17110_s25, %s16183_s26  ;;  %s16188_s20 = sshll.u32 %s16721_s6, 4  ;;  %s16189_s20 = int_to_ptr.vmem [resolvable:$false] %s16188_s20 }
  0xd5   : > { %s16190_s24 = scalar_lea.vmem %s16189_s20, 2048  ;;  %p16191_p6 = scmp.lt.s32.totalorder %s17110_s25, %s16189_s20 }
  0xd6   : > { %p16186_p4 = pnand %p16184_p12, %p17078_p11  ;;  %p16192_p8 = scmp.lt.s32.totalorder %s16190_s24, %s16183_s26 }
  0xd8   : > { %p16187_p13 = pneg %p16186_p4  ;;  %p16193_p1 = por %p16192_p8, %p16191_p6 }
  0xda   : > { %p16194_p0 = pnand %p16193_p1, %p16187_p13 }
  0xdc   : > { %16197 = shalt.err (!%p16194_p0)
}
  0xdd   : > { %s16722_s18 = smov 64   ;;  %s19295_s23 = smov 4  }
  0xde   : > { %15460 = dma.hbm_to_vmem [thread:$0]  (!%p17062_p10), %s17108_s16, 1024, %s17110_s25, %s19294_s22, %s16722_s18, %s16722_s18, %s19295_s23  }
  0xdf   : > { %s17140_s0 = sshll.u32 %s16712_s5, 4  ;;  %s19343_s15 = sld [smem:[#allocation64_spill]] }
  0xe0   : > { %s832_s9 = scalar_lea.vmem [#allocation25], %s17058_s4  ;;  %s13344_s6 = sshll.u32 %s17058_s4, 10 }
  0xe1   : > { %s839_s26 = sshll.u32 %s832_s9, 4  ;;  %s19296_s20 = scalar_lea.sflag [#allocation26], %s17055_s7  ;;  %s17149_s26 = int_to_ptr.vmem [resolvable:$true] %s839_s26 }
  0xe5   : > { %s17146_s11 = scalar_lea.hbm %s19343_s15, %s17140_s0  ;;  %s16203_s1 = scalar_lea.hbm %s19343_s15, 80 }
  0xe6   : > { %s16198_s24 = scalar_lea.hbm %s17146_s11, 16  ;;  %p16204_p7 = scmp.lt.u32.totalorder %s17146_s11, %s19343_s15 }
  0xe7   : > { %p16199_p9 = scmp.ne.s32.totalorder %s17146_s11, %s16198_s24  ;;  %p16205_p3 = scmp.lt.u32.totalorder %s16203_s1, %s16198_s24 }
  0xe8   : > { %p16207_p4 = scmp.lt.u32.totalorder %s16198_s24, %s17146_s11 }
  0xe9   : > { %p16201_p2 = pnand %p16199_p9, %p17078_p11  ;;  %p16206_p12 = por %p16205_p3, %p16204_p7 }
  0xeb   : > { %p16202_p5 = pneg %p16201_p2  ;;  %p16208_p13 = por %p16207_p4, %p16206_p12 }
  0xed   : > { %p16209_p6 = pnand %p16208_p13, %p16202_p5 }
  0xef   : > { %16212 = shalt.err (!%p16209_p6)
}
  0xf0   : > { %s16213_s9 = scalar_lea.vmem %s17149_s26, 16  ;;  %s16724_s25 = smov [#allocation25]  }
  0xf1   : > { %p16214_p8 = scmp.ne.s32.totalorder %s17149_s26, %s16213_s9  ;;  %s16218_s16 = sshll.u32 %s16724_s25, 4  ;;  %s16219_s16 = int_to_ptr.vmem [resolvable:$false] %s16218_s16 }
  0xf2   : > { %s16220_s22 = scalar_lea.vmem %s16219_s16, 32  ;;  %p16221_p9 = scmp.lt.s32.totalorder %s17149_s26, %s16219_s16 }
  0xf3   : > { %p16216_p1 = pnand %p16214_p8, %p17078_p11  ;;  %p16222_p2 = scmp.lt.s32.totalorder %s16220_s22, %s16213_s9 }
  0xf5   : > { %p16217_p0 = pneg %p16216_p1  ;;  %p16223_p7 = por %p16222_p2, %p16221_p9 }
  0xf7   : > { %p16224_p3 = pnand %p16223_p7, %p16217_p0 }
  0xf9   : > { %16227 = shalt.err (!%p16224_p3)
}
  0xfa   : > { %15466 = dma.hbm_to_vmem [thread:$0]  (!%p17062_p10), %s17146_s11, 16, %s17149_s26, %s19296_s20  }
  0xfb   : > { %s14095_s24 = sshll.u32 %s16712_s5, 14  ;;  %s19344_s17 = sld [smem:[#allocation66_spill]] }
  0xfc   : > { %s867_s25 = scalar_lea.vmem [#allocation28], %s13344_s6  ;;  %s19297_s22 = scalar_lea.sflag [#allocation29], %s17055_s7 }
  0xfd   : > { %s874_s16 = sshll.u32 %s867_s25, 4  ;;  %s17186_s16 = int_to_ptr.vmem [resolvable:$true] %s874_s16 }
 0x101   : > { %s17182_s9 = scalar_lea.hbm %s19344_s17, %s14095_s24  ;;  %s16233_s1 = scalar_lea.hbm %s19344_s17, 81920 }
 0x102   : > { %s16228_s23 = scalar_lea.hbm %s17182_s9, 16384  ;;  %p16234_p13 = scmp.lt.u32.totalorder %s17182_s9, %s19344_s17 }
 0x103   : > { %p16229_p5 = scmp.ne.s32.totalorder %s17182_s9, %s16228_s23  ;;  %p16235_p6 = scmp.lt.u32.totalorder %s16233_s1, %s16228_s23 }
 0x104   : > { %p16237_p1 = scmp.lt.u32.totalorder %s16228_s23, %s17182_s9 }
 0x105   : > { %p16231_p12 = pnand %p16229_p5, %p17078_p11  ;;  %p16236_p8 = por %p16235_p6, %p16234_p13 }
 0x107   : > { %p16232_p4 = pneg %p16231_p12  ;;  %p16238_p0 = por %p16237_p1, %p16236_p8 }
 0x109   : > { %p16239_p9 = pnand %p16238_p0, %p16232_p4 }
 0x10b   : > { %16242 = shalt.err (!%p16239_p9)
}
 0x10c   : > { %s16243_s25 = scalar_lea.vmem %s17186_s16, 16384  ;;  %s16725_s11 = smov [#allocation28]  }
 0x10d   : > { %p16244_p2 = scmp.ne.s32.totalorder %s17186_s16, %s16243_s25  ;;  %s16248_s26 = sshll.u32 %s16725_s11, 4  ;;  %s16249_s26 = int_to_ptr.vmem [resolvable:$false] %s16248_s26 }
 0x10e   : > { %s16250_s20 = scalar_lea.vmem %s16249_s26, 32768  ;;  %p16251_p5 = scmp.lt.s32.totalorder %s17186_s16, %s16249_s26 }
 0x10f   : > { %p16246_p7 = pnand %p16244_p2, %p17078_p11  ;;  %p16252_p12 = scmp.lt.s32.totalorder %s16250_s20, %s16243_s25 }
 0x111   : > { %p16247_p3 = pneg %p16246_p7  ;;  %p16253_p13 = por %p16252_p12, %p16251_p5 }
 0x113   : > { %p16254_p6 = pnand %p16253_p13, %p16247_p3 }
 0x115   : > { %16257 = shalt.err (!%p16254_p6)
}
 0x116   : > { %s16726_s23 = smov 1024   ;;  %s19345_s19 = sld [smem:[#allocation68_spill]] }
 0x117   : > { %15472 = dma.hbm_to_vmem [thread:$0]  (!%p17062_p10), %s17182_s9, 16384, %s17186_s16, %s19297_s22, %s16726_s23, %s16726_s23, %s16722_s18  }
 0x118   : > { %s907_s11 = scalar_lea.vmem [#allocation31], %s13344_s6  ;;  %s19301_s20 = scalar_lea.sflag [#allocation32], %s17055_s7 }
 0x119   : > { %s914_s26 = sshll.u32 %s907_s11, 4  ;;  %s17222_s26 = int_to_ptr.vmem [resolvable:$true] %s914_s26 }
 0x11c   : > { %s17218_s25 = scalar_lea.hbm %s19345_s19, %s14095_s24  ;;  %s16263_s24 = scalar_lea.hbm %s19345_s19, 81920 }
 0x11d   : > { %s16258_s13 = scalar_lea.hbm %s17218_s25, 16384  ;;  %p16264_p0 = scmp.lt.u32.totalorder %s17218_s25, %s19345_s19 }
 0x11e   : > { %p16259_p4 = scmp.ne.s32.totalorder %s17218_s25, %s16258_s13  ;;  %p16265_p9 = scmp.lt.u32.totalorder %s16263_s24, %s16258_s13 }
 0x11f   : > { %p16267_p7 = scmp.lt.u32.totalorder %s16258_s13, %s17218_s25 }
 0x120   : > { %p16261_p8 = pnand %p16259_p4, %p17078_p11  ;;  %p16266_p2 = por %p16265_p9, %p16264_p0 }
 0x122   : > { %p16262_p1 = pneg %p16261_p8  ;;  %p16268_p3 = por %p16267_p7, %p16266_p2 }
 0x124   : > { %p16269_p5 = pnand %p16268_p3, %p16262_p1 }
 0x126   : > { %16272 = shalt.err (!%p16269_p5)
}
 0x127   : > { %s16273_s6 = scalar_lea.vmem %s17222_s26, 16384  ;;  %s16727_s27 = smov [#allocation31]  }
 0x128   : > { %p16274_p12 = scmp.ne.s32.totalorder %s17222_s26, %s16273_s6  ;;  %s16278_s11 = sshll.u32 %s16727_s27, 4  ;;  %s16279_s11 = int_to_ptr.vmem [resolvable:$false] %s16278_s11 }
 0x129   : > { %s16280_s9 = scalar_lea.vmem %s16279_s11, 32768  ;;  %p16281_p4 = scmp.lt.s32.totalorder %s17222_s26, %s16279_s11 }
 0x12a   : > { %p16276_p13 = pnand %p16274_p12, %p17078_p11  ;;  %p16282_p8 = scmp.lt.s32.totalorder %s16280_s9, %s16273_s6 }
 0x12c   : > { %p16277_p6 = pneg %p16276_p13  ;;  %p16283_p0 = por %p16282_p8, %p16281_p4 }
 0x12e   : > { %p16284_p9 = pnand %p16283_p0, %p16277_p6 }
 0x130   : > { %16287 = shalt.err (!%p16284_p9)
}
 0x131   : > { %s19346_s13 = smov 4   ;;  %s17255_s23 = scalar_lea.hbm %s19261_s21, %s17140_s0 }
 0x132   : > { %15478 = dma.hbm_to_vmem [thread:$0]  (!%p17062_p10), %s17218_s25, 16384, %s17222_s26, %s19301_s20, %s16722_s18, %s16722_s18, %s19346_s13  }
 0x133   : > { %s944_s1 = scalar_lea.vmem [#allocation34], %s17058_s4  ;;  %s16728_s27 = smov [#allocation5]  }
 0x134   : > { %s951_s6 = sshll.u32 %s944_s1, 4  ;;  %s17260_s11 = sshll.u32 %s16728_s27, 4  ;;  %s17258_s6 = int_to_ptr.vmem [resolvable:$true] %s951_s6  ;;  %s641_s11 = int_to_ptr.vmem [resolvable:$true] %s17260_s11 }
 0x135   : > { %s19300_s9 = scalar_lea.sflag [#allocation35], %s17055_s7  ;;  %s16288_s22 = scalar_lea.hbm %s17255_s23, 16 }
 0x136   : > { %p16289_p1 = scmp.ne.s32.totalorder %s17255_s23, %s16288_s22  ;;  %s16293_s26 = scalar_lea.hbm %s19261_s21, 80 }
 0x137   : > { %p16294_p3 = scmp.lt.u32.totalorder %s17255_s23, %s19261_s21  ;;  %p16295_p5 = scmp.lt.u32.totalorder %s16293_s26, %s16288_s22 }
 0x138   : > { %p16291_p2 = pnand %p16289_p1, %p17078_p11  ;;  %p16297_p13 = scmp.lt.u32.totalorder %s16288_s22, %s17255_s23 }
 0x139   : > { %p16296_p12 = por %p16295_p5, %p16294_p3 }
 0x13a   : > { %p16292_p7 = pneg %p16291_p2 }
 0x13b   : > { %p16298_p6 = por %p16297_p13, %p16296_p12 }
 0x13d   : > { %p16299_p4 = pnand %p16298_p6, %p16292_p7 }
 0x13f   : > { %16302 = shalt.err (!%p16299_p4)
}
 0x140   : > { %s16303_s24 = scalar_lea.vmem %s17258_s6, 16  ;;  %s16729_s1 = smov [#allocation34]  }
 0x141   : > { %p16304_p8 = scmp.ne.s32.totalorder %s17258_s6, %s16303_s24  ;;  %s16308_s27 = sshll.u32 %s16729_s1, 4  ;;  %s16309_s27 = int_to_ptr.vmem [resolvable:$false] %s16308_s27 }
 0x142   : > { %s16310_s18 = scalar_lea.vmem %s16309_s27, 32  ;;  %p16311_p1 = scmp.lt.s32.totalorder %s17258_s6, %s16309_s27 }
 0x143   : > { %p16306_p0 = pnand %p16304_p8, %p17078_p11  ;;  %p16312_p2 = scmp.lt.s32.totalorder %s16310_s18, %s16303_s24 }
 0x145   : > { %p16307_p9 = pneg %p16306_p0  ;;  %p16313_p3 = por %p16312_p2, %p16311_p1 }
 0x147   : > { %p16314_p5 = pnand %p16313_p3, %p16307_p9 }
 0x149   : > { %16317 = shalt.err (!%p16314_p5)
}
 0x14a   : > { %15484 = dma.hbm_to_vmem [thread:$0]  (!%p17062_p10), %s17255_s23, 16, %s17258_s6, %s19300_s9  }
 0x14b   : > { %s19347_s26 = sld [smem:[#allocation53_spill]]  ;;  %p19348_p12 = scmp.ne.s32.totalorder %s19329_s28, 0 }
 0x151   : > { %s16318_s13 = scalar_lea.hbm %s19347_s26, 128 }
 0x152   : > { %p16319_p7 = scmp.ne.s32.totalorder %s19347_s26, %s16318_s13  ;;  %p16325_p4 = scmp.lt.u32.totalorder %s16318_s13, %s19347_s26 }
 0x154   : > { %p16321_p13 = pnand %p16319_p7, %p19348_p12 }
 0x156   : > { %p16322_p6 = pneg %p16321_p13 }
 0x158   : > { %p16327_p8 = pnand %p16325_p4, %p16322_p6 }
 0x15a   : > { %16330 = shalt.err (!%p16327_p8)
}
 0x15b   : > { %s16331_s18 = scalar_lea.vmem %s641_s11, 128  ;;  %p16339_p2 = scmp.lt.s32.totalorder %s641_s11, %s641_s11 }
 0x15c   : > { %p16332_p0 = scmp.ne.s32.totalorder %s641_s11, %s16331_s18  ;;  %p16340_p3 = scmp.lt.s32.totalorder %s16331_s18, %s16331_s18 }
 0x15e   : > { %p16334_p9 = pnand %p16332_p0, %p19348_p12  ;;  %p16341_p5 = por %p16340_p3, %p16339_p2 }
 0x160   : > { %p16335_p1 = pneg %p16334_p9 }
 0x162   : > { %p16342_p10 = pnand %p16341_p5, %p16335_p1 }
 0x164   : > { %16345 = shalt.err (!%p16342_p10)
}
 0x165   : > { %p19349_p7 = scmp.ne.s32.totalorder %s19327_s3, 0  ;;  %s16730_s22 = smov [#allocation9]  }
 0x166   : > { %s661_s25 = sshll.u32 %s16730_s22, 4  ;;  %s19350_s1 = sld [smem:[#allocation55_spill]]  ;;  %s662_s25 = int_to_ptr.vmem [resolvable:$true] %s661_s25 }
 0x167   : > { %15426 = dma.hbm_to_vmem [thread:$0]  (!%p19349_p7), %s19347_s26, 128, %s641_s11, [#allocation6]  }
 0x16c   : > { %s16346_s24 = scalar_lea.hbm %s19350_s1, 1024 }
 0x16d   : > { %p16347_p13 = scmp.ne.s32.totalorder %s19350_s1, %s16346_s24  ;;  %p16353_p4 = scmp.lt.u32.totalorder %s16346_s24, %s19350_s1 }
 0x16f   : > { %p16349_p10 = pnand %p16347_p13, %p19348_p12 }
 0x171   : > { %p16350_p6 = pneg %p16349_p10 }
 0x173   : > { %p16355_p8 = pnand %p16353_p4, %p16350_p6 }
 0x175   : > { %16358 = shalt.err (!%p16355_p8)
}
 0x176   : > { %s16359_s11 = scalar_lea.vmem %s662_s25, 1024  ;;  %p16367_p2 = scmp.lt.s32.totalorder %s662_s25, %s662_s25 }
 0x177   : > { %p16360_p0 = scmp.ne.s32.totalorder %s662_s25, %s16359_s11  ;;  %p16368_p3 = scmp.lt.s32.totalorder %s16359_s11, %s16359_s11 }
 0x179   : > { %p16362_p9 = pnand %p16360_p0, %p19348_p12  ;;  %p16369_p5 = por %p16368_p3, %p16367_p2 }
 0x17b   : > { %p16363_p1 = pneg %p16362_p9 }
 0x17d   : > { %p16370_p11 = pnand %p16369_p5, %p16363_p1 }
 0x17f   : > { %16373 = shalt.err (!%p16370_p11)
}
 0x180   : > { %s16731_s9 = smov 128   ;;  %s16732_s23 = smov 8  }
 0x181   : > { %15432 = dma.hbm_to_vmem [thread:$0]  (!%p19349_p7), %s19350_s1, 1024, %s662_s25, [#allocation8], %s16731_s9, %s16731_s9, %s16732_s23  }
 0x182   : > { %s16733_s22 = smov [#allocation12]   ;;  %s16734_s16 = smov [#allocation15]  }
 0x183   : > { %s685_s13 = sshll.u32 %s16733_s22, 4  ;;  %s709_s24 = sshll.u32 %s16734_s16, 4  ;;  %s686_s13 = int_to_ptr.vmem [resolvable:$true] %s685_s13  ;;  %s17326_s24 = int_to_ptr.vmem [resolvable:$true] %s709_s24 }
 0x184   : > { %s19351_s11 = sld [smem:[#allocation57_spill]] }
 0x18a   : > { %s16374_s15 = scalar_lea.hbm %s19351_s11, 1024 }
 0x18b   : > { %p16375_p11 = scmp.ne.s32.totalorder %s19351_s11, %s16374_s15  ;;  %p16381_p6 = scmp.lt.u32.totalorder %s16374_s15, %s19351_s11 }
 0x18d   : > { %p16377_p13 = pnand %p16375_p11, %p19348_p12 }
 0x18f   : > { %p16378_p10 = pneg %p16377_p13 }
 0x191   : > { %p16383_p4 = pnand %p16381_p6, %p16378_p10 }
 0x193   : > { %16386 = shalt.err (!%p16383_p4)
}
 0x194   : > { %s16387_s6 = scalar_lea.vmem %s686_s13, 1024  ;;  %p16395_p1 = scmp.lt.s32.totalorder %s686_s13, %s686_s13 }
 0x195   : > { %p16388_p8 = scmp.ne.s32.totalorder %s686_s13, %s16387_s6  ;;  %p16396_p2 = scmp.lt.s32.totalorder %s16387_s6, %s16387_s6 }
 0x197   : > { %p16390_p0 = pnand %p16388_p8, %p19348_p12  ;;  %p16397_p3 = por %p16396_p2, %p16395_p1 }
 0x199   : > { %p16391_p9 = pneg %p16390_p0 }
 0x19b   : > { %p16398_p5 = pnand %p16397_p3, %p16391_p9 }
 0x19d   : > { %16401 = shalt.err (!%p16398_p5)
}
 0x19e   : > { %15438 = dma.hbm_to_vmem [thread:$0]  (!%p19349_p7), %s19351_s11, 1024, %s686_s13, [#allocation11], %s16731_s9, %s16731_s9, %s16732_s23  }
 0x19f   : > { %s19352_s16 = sld [smem:[#allocation59_spill]] }
 0x1a5   : > { %s16402_s27 = scalar_lea.hbm %s19352_s16, 256 }
 0x1a6   : > { %p16403_p11 = scmp.ne.s32.totalorder %s19352_s16, %s16402_s27  ;;  %p16409_p6 = scmp.lt.u32.totalorder %s16402_s27, %s19352_s16 }
 0x1a8   : > { %p16405_p13 = pnand %p16403_p11, %p19348_p12 }
 0x1aa   : > { %p16406_p10 = pneg %p16405_p13 }
 0x1ac   : > { %p16411_p4 = pnand %p16409_p6, %p16406_p10 }
 0x1ae   : > { %16414 = shalt.err (!%p16411_p4)
}
 0x1af   : > { %s16415_s13 = scalar_lea.vmem %s17326_s24, 256  ;;  %p16423_p1 = scmp.lt.s32.totalorder %s17326_s24, %s17326_s24 }
 0x1b0   : > { %p16416_p8 = scmp.ne.s32.totalorder %s17326_s24, %s16415_s13  ;;  %p16424_p2 = scmp.lt.s32.totalorder %s16415_s13, %s16415_s13 }
 0x1b2   : > { %p16418_p0 = pnand %p16416_p8, %p19348_p12  ;;  %p16425_p3 = por %p16424_p2, %p16423_p1 }
 0x1b4   : > { %p16419_p9 = pneg %p16418_p0 }
 0x1b6   : > { %p16426_p5 = pnand %p16425_p3, %p16419_p9 }
 0x1b8   : > { %16429 = shalt.err (!%p16426_p5)
}
 0x1b9   : > { %15444 = dma.hbm_to_vmem [thread:$0]  (!%p19349_p7), %s19352_s16, 256, %s17326_s24, [#allocation14], %s16731_s9, %s16731_s9, %s16732_s23  }
 0x1ba   : > { %s15359_s19 = smul.u32 3, %s17058_s4  ;;  %s16735_s22 = smov [#allocation18]  }
 0x1bb   : > { %s734_s27 = sshll.u32 %s16735_s22, 4  ;;  %s15360_s18 = smul.u32 48, %s16712_s5  ;;  %s735_s27 = int_to_ptr.vmem [resolvable:$true] %s734_s27 }
 0x1bc   : > { %s16430_s6 = scalar_lea.hbm %s19248_s8, 32 }
 0x1bd   : > { %p16431_p11 = scmp.ne.s32.totalorder %s19248_s8, %s16430_s6  ;;  %p16437_p6 = scmp.lt.u32.totalorder %s16430_s6, %s19248_s8 }
 0x1bf   : > { %p16433_p13 = pnand %p16431_p11, %p19348_p12 }
 0x1c1   : > { %p16434_p10 = pneg %p16433_p13 }
 0x1c3   : > { %p16439_p4 = pnand %p16437_p6, %p16434_p10 }
 0x1c5   : > { %16442 = shalt.err (!%p16439_p4)
}
 0x1c6   : > { %s16443_s9 = scalar_lea.vmem %s735_s27, 32  ;;  %p16451_p1 = scmp.lt.s32.totalorder %s735_s27, %s735_s27 }
 0x1c7   : > { %p16444_p8 = scmp.ne.s32.totalorder %s735_s27, %s16443_s9  ;;  %p16452_p2 = scmp.lt.s32.totalorder %s16443_s9, %s16443_s9 }
 0x1c9   : > { %p16446_p0 = pnand %p16444_p8, %p19348_p12  ;;  %p16453_p3 = por %p16452_p2, %p16451_p1 }
 0x1cb   : > { %p16447_p9 = pneg %p16446_p0 }
 0x1cd   : > { %p16454_p5 = pnand %p16453_p3, %p16447_p9 }
 0x1cf   : > { %16457 = shalt.err (!%p16454_p5)
}
 0x1d0   : > { %15450 = dma.hbm_to_vmem [thread:$0]  (!%p19349_p7), %s19248_s8, 32, %s735_s27, [#allocation17]  }
 0x1d1   : > { %s17398_s20 = scalar_lea.hbm %s19252_s12, %s15360_s18  ;;  %s776_s28 = scalar_lea.vmem [#allocation21], %s15359_s19 }
 0x1d2   : > { %s784_s25 = sshll.u32 %s776_s28, 4  ;;  %s16458_s6 = scalar_lea.hbm %s17398_s20, 48  ;;  %s785_s25 = int_to_ptr.vmem [resolvable:$true] %s784_s25 }
 0x1d3   : > { %p16459_p12 = scmp.ne.s32.totalorder %s17398_s20, %s16458_s6  ;;  %p19353_p11 = scmp.ne.s32.totalorder %s19340_s30, 0 }
 0x1d4   : > { %s16463_s27 = scalar_lea.hbm %s19252_s12, 240  ;;  %p16464_p7 = scmp.lt.u32.totalorder %s17398_s20, %s19252_s12 }
 0x1d5   : > { %p16461_p13 = pnand %p16459_p12, %p19353_p11  ;;  %p16465_p6 = scmp.lt.u32.totalorder %s16463_s27, %s16458_s6 }
 0x1d6   : > { %p16467_p8 = scmp.lt.u32.totalorder %s16458_s6, %s17398_s20 }
 0x1d7   : > { %p16462_p10 = pneg %p16461_p13  ;;  %p16466_p4 = por %p16465_p6, %p16464_p7 }
 0x1d9   : > { %p16468_p0 = por %p16467_p8, %p16466_p4 }
 0x1db   : > { %p16469_p9 = pnand %p16468_p0, %p16462_p10 }
 0x1dd   : > { %16472 = shalt.err (!%p16469_p9)
}
 0x1de   : > { %s16473_s19 = scalar_lea.vmem %s785_s25, 48  ;;  %s16736_s18 = smov [#allocation21]  }
 0x1df   : > { %p16474_p1 = scmp.ne.s32.totalorder %s785_s25, %s16473_s19  ;;  %s16478_s9 = sshll.u32 %s16736_s18, 4  ;;  %s16479_s9 = int_to_ptr.vmem [resolvable:$false] %s16478_s9 }
 0x1e0   : > { %s16480_s1 = scalar_lea.vmem %s16479_s9, 96  ;;  %p16481_p5 = scmp.lt.s32.totalorder %s785_s25, %s16479_s9 }
 0x1e1   : > { %p16476_p2 = pnand %p16474_p1, %p19353_p11  ;;  %p16482_p12 = scmp.lt.s32.totalorder %s16480_s1, %s16473_s19 }
 0x1e3   : > { %p16477_p3 = pneg %p16476_p2  ;;  %p16483_p13 = por %p16482_p12, %p16481_p5 }
 0x1e5   : > { %p16484_p6 = pnand %p16483_p13, %p16477_p3 }
 0x1e7   : > { %16487 = shalt.err (!%p16484_p6)
}
 0x1e8   : > { %p19354_p7 = scmp.ne.s32.totalorder %s19338_s29, 0  ;;  %s19355_s23 = scalar_lea.sflag [#allocation20], %s17055_s7 }
 0x1e9   : > { %s17423_s28 = scalar_lea.hbm %s19254_s14, %s17140_s0  ;;  %s815_s6 = scalar_lea.vmem [#allocation24], %s17058_s4 }
 0x1ea   : > { %15457 = dma.hbm_to_vmem [thread:$0]  (!%p19354_p7), %s17398_s20, 48, %s785_s25, %s19355_s23  }
 0x1eb   : > { %s822_s3 = sshll.u32 %s815_s6, 4  ;;  %s16488_s13 = scalar_lea.hbm %s17423_s28, 16  ;;  %s823_s3 = int_to_ptr.vmem [resolvable:$true] %s822_s3 }
 0x1ec   : > { %p16489_p10 = scmp.ne.s32.totalorder %s17423_s28, %s16488_s13  ;;  %s16493_s20 = scalar_lea.hbm %s19254_s14, 80 }
 0x1ed   : > { %p16494_p0 = scmp.lt.u32.totalorder %s17423_s28, %s19254_s14  ;;  %p16495_p9 = scmp.lt.u32.totalorder %s16493_s20, %s16488_s13 }
 0x1ee   : > { %p16491_p4 = pnand %p16489_p10, %p19353_p11  ;;  %p16497_p2 = scmp.lt.u32.totalorder %s16488_s13, %s17423_s28 }
 0x1ef   : > { %p16496_p1 = por %p16495_p9, %p16494_p0 }
 0x1f0   : > { %p16492_p8 = pneg %p16491_p4 }
 0x1f1   : > { %p16498_p3 = por %p16497_p2, %p16496_p1 }
 0x1f3   : > { %p16499_p5 = pnand %p16498_p3, %p16492_p8 }
 0x1f5   : > { %16502 = shalt.err (!%p16499_p5)
}
 0x1f6   : > { %s16503_s19 = scalar_lea.vmem %s823_s3, 16  ;;  %s16737_s18 = smov [#allocation24]  }
 0x1f7   : > { %p16504_p12 = scmp.ne.s32.totalorder %s823_s3, %s16503_s19  ;;  %s16508_s9 = sshll.u32 %s16737_s18, 4  ;;  %s16509_s9 = int_to_ptr.vmem [resolvable:$false] %s16508_s9 }
 0x1f8   : > { %s16510_s1 = scalar_lea.vmem %s16509_s9, 32  ;;  %p16511_p10 = scmp.lt.s32.totalorder %s823_s3, %s16509_s9 }
 0x1f9   : > { %p16506_p13 = pnand %p16504_p12, %p19353_p11  ;;  %p16512_p4 = scmp.lt.s32.totalorder %s16510_s1, %s16503_s19 }
 0x1fb   : > { %p16507_p6 = pneg %p16506_p13  ;;  %p16513_p7 = por %p16512_p4, %p16511_p10 }
 0x1fd   : > { %p16514_p0 = pnand %p16513_p7, %p16507_p6 }
 0x1ff   : > { %16517 = shalt.err (!%p16514_p0)
}
 0x200   : > { %p19356_p9 = scmp.ne.s32.totalorder %s19338_s29, 0  ;;  %s19357_s23 = scalar_lea.sflag [#allocation23], %s17055_s7 }
 0x201   : > { %s19358_s6 = sld [smem:[#allocation65_spill]]  ;;  %s849_s27 = scalar_lea.vmem [#allocation27], %s17058_s4 }
 0x202   : > { %15463 = dma.hbm_to_vmem [thread:$0]  (!%p19356_p9), %s17423_s28, 16, %s823_s3, %s19357_s23  }
 0x203   : > { %s856_s17 = sshll.u32 %s849_s27, 4  ;;  %s13347_s20 = sshll.u32 %s17058_s4, 4  ;;  %s857_s17 = int_to_ptr.vmem [resolvable:$true] %s856_s17 }
 0x207   : > { %s17449_s13 = scalar_lea.hbm %s19358_s6, %s17140_s0  ;;  %s16523_s3 = scalar_lea.hbm %s19358_s6, 80 }
 0x208   : > { %s16518_s25 = scalar_lea.hbm %s17449_s13, 16  ;;  %p16524_p2 = scmp.lt.u32.totalorder %s17449_s13, %s19358_s6 }
 0x209   : > { %p16519_p7 = scmp.ne.s32.totalorder %s17449_s13, %s16518_s25  ;;  %p16525_p3 = scmp.lt.u32.totalorder %s16523_s3, %s16518_s25 }
 0x20a   : > { %p16527_p12 = scmp.lt.u32.totalorder %s16518_s25, %s17449_s13 }
 0x20b   : > { %p16521_p8 = pnand %p16519_p7, %p19353_p11  ;;  %p16526_p5 = por %p16525_p3, %p16524_p2 }
 0x20d   : > { %p16522_p1 = pneg %p16521_p8  ;;  %p16528_p13 = por %p16527_p12, %p16526_p5 }
 0x20f   : > { %p16529_p6 = pnand %p16528_p13, %p16522_p1 }
 0x211   : > { %16532 = shalt.err (!%p16529_p6)
}
 0x212   : > { %s16533_s9 = scalar_lea.vmem %s857_s17, 16  ;;  %s16738_s1 = smov [#allocation27]  }
 0x213   : > { %p16534_p10 = scmp.ne.s32.totalorder %s857_s17, %s16533_s9  ;;  %s16538_s23 = sshll.u32 %s16738_s1, 4  ;;  %s16539_s23 = int_to_ptr.vmem [resolvable:$false] %s16538_s23 }
 0x214   : > { %s16540_s24 = scalar_lea.vmem %s16539_s23, 32  ;;  %p16541_p7 = scmp.lt.s32.totalorder %s857_s17, %s16539_s23 }
 0x215   : > { %p16536_p4 = pnand %p16534_p10, %p19353_p11  ;;  %p16542_p8 = scmp.lt.s32.totalorder %s16540_s24, %s16533_s9 }
 0x217   : > { %p16537_p0 = pneg %p16536_p4  ;;  %p16543_p9 = por %p16542_p8, %p16541_p7 }
 0x219   : > { %p16544_p2 = pnand %p16543_p9, %p16537_p0 }
 0x21b   : > { %16547 = shalt.err (!%p16544_p2)
}
 0x21c   : > { %p19359_p3 = scmp.ne.s32.totalorder %s19338_s29, 0  ;;  %s19360_s22 = scalar_lea.sflag [#allocation26], %s17055_s7 }
 0x21d   : > { %s14096_s27 = sshll.u32 %s16712_s5, 8  ;;  %s19361_s28 = sld [smem:[#allocation67_spill]] }
 0x21e   : > { %15469 = dma.hbm_to_vmem [thread:$0]  (!%p19359_p3), %s17449_s13, 16, %s857_s17, %s19360_s22  }
 0x21f   : > { %s888_s19 = scalar_lea.vmem [#allocation30], %s13347_s20 }
 0x220   : > { %s896_s18 = sshll.u32 %s888_s19, 4  ;;  %s897_s18 = int_to_ptr.vmem [resolvable:$true] %s896_s18 }
 0x223   : > { %s17476_s3 = scalar_lea.hbm %s19361_s28, %s14096_s27  ;;  %s16553_s17 = scalar_lea.hbm %s19361_s28, 1280 }
 0x224   : > { %s16548_s9 = scalar_lea.hbm %s17476_s3, 256  ;;  %p16554_p12 = scmp.lt.u32.totalorder %s17476_s3, %s19361_s28 }
 0x225   : > { %p16549_p9 = scmp.ne.s32.totalorder %s17476_s3, %s16548_s9  ;;  %p16555_p13 = scmp.lt.u32.totalorder %s16553_s17, %s16548_s9 }
 0x226   : > { %p16557_p10 = scmp.lt.u32.totalorder %s16548_s9, %s17476_s3 }
 0x227   : > { %p16551_p1 = pnand %p16549_p9, %p19353_p11  ;;  %p16556_p6 = por %p16555_p13, %p16554_p12 }
 0x229   : > { %p16552_p5 = pneg %p16551_p1  ;;  %p16558_p4 = por %p16557_p10, %p16556_p6 }
 0x22b   : > { %p16559_p0 = pnand %p16558_p4, %p16552_p5 }
 0x22d   : > { %16562 = shalt.err (!%p16559_p0)
}
 0x22e   : > { %s16563_s20 = scalar_lea.vmem %s897_s18, 256  ;;  %s16739_s24 = smov [#allocation30]  }
 0x22f   : > { %p16564_p7 = scmp.ne.s32.totalorder %s897_s18, %s16563_s20  ;;  %s16568_s22 = sshll.u32 %s16739_s24, 4  ;;  %s16569_s22 = int_to_ptr.vmem [resolvable:$false] %s16568_s22 }
 0x230   : > { %s16570_s27 = scalar_lea.vmem %s16569_s22, 512  ;;  %p16571_p9 = scmp.lt.s32.totalorder %s897_s18, %s16569_s22 }
 0x231   : > { %p16566_p8 = pnand %p16564_p7, %p19353_p11  ;;  %p16572_p1 = scmp.lt.s32.totalorder %s16570_s27, %s16563_s20 }
 0x233   : > { %p16567_p2 = pneg %p16566_p8  ;;  %p16573_p3 = por %p16572_p1, %p16571_p9 }
 0x235   : > { %p16574_p12 = pnand %p16573_p3, %p16567_p2 }
 0x237   : > { %16577 = shalt.err (!%p16574_p12)
}
 0x238   : > { %p19362_p13 = scmp.ne.s32.totalorder %s19338_s29, 0  ;;  %s19363_s25 = scalar_lea.sflag [#allocation29], %s17055_s7 }
 0x239   : > { %s19364_s9 = sld [smem:[#allocation69_spill]]  ;;  %s927_s5 = scalar_lea.vmem [#allocation33], %s17058_s4 }
 0x23a   : > { %15475 = dma.hbm_to_vmem [thread:$0]  (!%p19362_p13), %s17476_s3, 256, %s897_s18, %s19363_s25  }
 0x23b   : > { %s934_s17 = sshll.u32 %s927_s5, 4  ;;  %s935_s17 = int_to_ptr.vmem [resolvable:$true] %s934_s17 }
 0x23f   : > { %s17503_s13 = scalar_lea.hbm %s19364_s9, %s17140_s0  ;;  %s16583_s3 = scalar_lea.hbm %s19364_s9, 80 }
 0x240   : > { %s16578_s1 = scalar_lea.hbm %s17503_s13, 16  ;;  %p16584_p10 = scmp.lt.u32.totalorder %s17503_s13, %s19364_s9 }
 0x241   : > { %p16579_p3 = scmp.ne.s32.totalorder %s17503_s13, %s16578_s1  ;;  %p16585_p4 = scmp.lt.u32.totalorder %s16583_s3, %s16578_s1 }
 0x242   : > { %p16587_p7 = scmp.lt.u32.totalorder %s16578_s1, %s17503_s13 }
 0x243   : > { %p16581_p5 = pnand %p16579_p3, %p19353_p11  ;;  %p16586_p0 = por %p16585_p4, %p16584_p10 }
 0x245   : > { %p16582_p6 = pneg %p16581_p5  ;;  %p16588_p8 = por %p16587_p7, %p16586_p0 }
 0x247   : > { %p16589_p2 = pnand %p16588_p8, %p16582_p6 }
 0x249   : > { %16592 = shalt.err (!%p16589_p2)
}
 0x24a   : > { %s16593_s22 = scalar_lea.vmem %s935_s17, 16  ;;  %s16740_s27 = smov [#allocation33]  }
 0x24b   : > { %p16594_p9 = scmp.ne.s32.totalorder %s935_s17, %s16593_s22  ;;  %s16598_s25 = sshll.u32 %s16740_s27, 4  ;;  %s16599_s25 = int_to_ptr.vmem [resolvable:$false] %s16598_s25 }
 0x24c   : > { %s16600_s15 = scalar_lea.vmem %s16599_s25, 32  ;;  %p16601_p3 = scmp.lt.s32.totalorder %s935_s17, %s16599_s25 }
 0x24d   : > { %p16596_p1 = pnand %p16594_p9, %p19353_p11  ;;  %p16602_p5 = scmp.lt.s32.totalorder %s16600_s15, %s16593_s22 }
 0x24f   : > { %p16597_p12 = pneg %p16596_p1  ;;  %p16603_p13 = por %p16602_p5, %p16601_p3 }
 0x251   : > { %p16604_p4 = pnand %p16603_p13, %p16597_p12 }
 0x253   : > { %16607 = shalt.err (!%p16604_p4)
}
 0x254   : > { %p19365_p10 = scmp.ne.s32.totalorder %s19338_s29, 0  ;;  %s19366_s19 = scalar_lea.sflag [#allocation32], %s17055_s7 }
 0x255   : > { %s19367_s23 = sld [smem:[#allocation70_spill]]  ;;  %s961_s3 = scalar_lea.vmem [#allocation36], %s17058_s4 }
 0x256   : > { %15481 = dma.hbm_to_vmem [thread:$0]  (!%p19365_p10), %s17503_s13, 16, %s935_s17, %s19366_s19  }
 0x257   : > { %s968_s18 = sshll.u32 %s961_s3, 4  ;;  %s969_s18 = int_to_ptr.vmem [resolvable:$true] %s968_s18 }
 0x25b   : > { %s17529_s20 = scalar_lea.hbm %s19367_s23, %s17140_s0  ;;  %s16613_s13 = scalar_lea.hbm %s19367_s23, 80 }
 0x25c   : > { %s16608_s24 = scalar_lea.hbm %s17529_s20, 16  ;;  %p16614_p7 = scmp.lt.u32.totalorder %s17529_s20, %s19367_s23 }
 0x25d   : > { %p16609_p13 = scmp.ne.s32.totalorder %s17529_s20, %s16608_s24  ;;  %p16615_p8 = scmp.lt.u32.totalorder %s16613_s13, %s16608_s24 }
 0x25e   : > { %p16617_p9 = scmp.lt.u32.totalorder %s16608_s24, %s17529_s20 }
 0x25f   : > { %p16611_p6 = pnand %p16609_p13, %p19353_p11  ;;  %p16616_p2 = por %p16615_p8, %p16614_p7 }
 0x261   : > { %p16612_p0 = pneg %p16611_p6  ;;  %p16618_p1 = por %p16617_p9, %p16616_p2 }
 0x263   : > { %p16619_p12 = pnand %p16618_p1, %p16612_p0 }
 0x265   : > { %16622 = shalt.err (!%p16619_p12)
}
 0x266   : > { %s16623_s4 = scalar_lea.vmem %s969_s18, 16  ;;  %s16741_s0 = smov [#allocation36]  }
 0x267   : > { %p16624_p3 = scmp.ne.s32.totalorder %s969_s18, %s16623_s4  ;;  %s16628_s15 = sshll.u32 %s16741_s0, 4  ;;  %s16629_s15 = int_to_ptr.vmem [resolvable:$false] %s16628_s15 }
 0x268   : > { %s16630_s19 = scalar_lea.vmem %s16629_s15, 32  ;;  %p16631_p13 = scmp.lt.s32.totalorder %s969_s18, %s16629_s15 }
 0x269   : > { %p16626_p5 = pnand %p16624_p3, %p19353_p11  ;;  %p16632_p6 = scmp.lt.s32.totalorder %s16630_s19, %s16623_s4 }
 0x26b   : > { %p16627_p4 = pneg %p16626_p5  ;;  %p16633_p10 = por %p16632_p6, %p16631_p13 }
 0x26d   : > { %p16634_p7 = pnand %p16633_p10, %p16627_p4 }
 0x26f   : > { %16637 = shalt.err (!%p16634_p7)
}
 0x270   : > { %p19368_p8 = scmp.ne.s32.totalorder %s19338_s29, 0  ;;  %s19369_s5 = scalar_lea.sflag [#allocation35], %s17055_s7 }
 0x271   : > { %s19370_s1 = sld [smem:[#allocation49_spill]] }
 0x272   : > { %15487 = dma.hbm_to_vmem [thread:$0]  (!%p19368_p8), %s17529_s20, 16, %s969_s18, %s19369_s5  }
 0x277   : > { %p19371_p0 = scmp.ne.s32.totalorder %s19370_s1, 0 }
 0x278   : > { %p19372_p11 = scmp.eq.s32.totalorder (!%p19371_p0), %s16911_s2, 0 }
 0x279   : > { %977 = sbr.rel (%p19371_p0) target bundleno = 18121 (0x46c9), region = 112 }
 0x280   : > { %16655 = dma.done.wait (%p19372_p11), [#allocation6], 128   ;;  %p19373_p2 = pmov %p19372_p11 }
 0x282   : > { %16657 = vsyncadd (%p19373_p2), [#allocation6], 4294967168  ;;  %p19374_p9 = pmov %p19373_p2 }
 0x283   : > { %p19375_p10 = pmov %p19373_p2 }
 0x284   : > { %16659 = dma.done.wait (%p19374_p9), [#allocation8], 1152  }
 0x285   : > { %16661 = vsyncadd (%p19375_p10), [#allocation8], 4294966144  ;;  %p19376_p1 = pmov %p19373_p2 }
 0x287   : > { %16663 = dma.done.wait (%p19376_p1), [#allocation11], 1040   ;;  %p19377_p12 = pmov %p19376_p1 }
 0x288   : > { %p19378_p3 = pmov %p19376_p1 }
 0x289   : > { %16665 = vsyncadd (%p19377_p12), [#allocation11], 4294966256 }
 0x28a   : > { %16667 = dma.done.wait (%p19378_p3), [#allocation14], 272   ;;  %p19379_p5 = pmov %p19376_p1 }
 0x28b   : > { %p19380_p4 = pmov %p19376_p1 }
 0x28c   : > { %16669 = vsyncadd (%p19379_p5), [#allocation14], 4294967024 }
 0x28d   : > { %16671 = dma.done.wait (%p19380_p4), [#allocation17], 64   ;;  %p19381_p13 = pmov %p19376_p1 }
 0x28e   : > { %s19382_s30 = sld [smem:[#allocation52_spill]]  ;;  %s17574_s7 = sand.u32 1, %s16911_s2  }
 0x28f   : > { %16673 = vsyncadd (%p19381_p13), [#allocation17], 4294967232  ;;  %s17577_s29 = sand.u32 1, %s16704_s10   ;;  %s1016_s3 = scalar_lea.sflag [#allocation20], %s17574_s7 }
 0x290   : > { %s15361_s20 = smul.u32 192, %s17577_s29 }
 0x292   : > { %s17581_s18 = scalar_lea.vmem [#allocation19], %s15361_s20 }
 0x294   : > { %p19383_p6 = scmp.ne.s32.totalorder %s19382_s30, 0 }
 0x296   : > { %16675 = dma.done.wait (%p19383_p6), %s1016_s3, 3120  }
 0x297   : > { %16677 = vsyncadd (%p19383_p6), %s1016_s3, 4294964176  ;;  %s15362_s24 = smul.u32 3, %s17577_s29  ;;  %s13366_s22 = sshll.u32 %s17577_s29, 6 }
 0x298   : > { %s1034_s13 = scalar_lea.sflag [#allocation23], %s17574_s7  ;;  %s17592_s17 = scalar_lea.vmem [#allocation22], %s13366_s22 }
 0x299   : > { %s17589_s27 = scalar_lea.vmem [#allocation21], %s15362_s24 }
 0x29a   : > { %16679 = dma.done.wait (%p19383_p6), %s1034_s13, 1040  }
 0x29b   : > { %16681 = vsyncadd (%p19383_p6), %s1034_s13, 4294966256  ;;  %s1045_s25 = scalar_lea.vmem [#allocation24], %s17577_s29  ;;  %s1051_s4 = scalar_lea.sflag [#allocation26], %s17574_s7 }
 0x29c   : > { %s1053_s0 = scalar_lea.vmem [#allocation25], %s17577_s29 }
 0x29d   : > { %16683 = dma.done.wait (%p19383_p6), %s1051_s4, 32  }
 0x29e   : > { %16685 = vsyncadd (%p19383_p6), %s1051_s4, 4294967264  ;;  %s13367_s15 = sshll.u32 %s17577_s29, 10  ;;  %s1061_s19 = scalar_lea.vmem [#allocation27], %s17577_s29 }
 0x29f   : > { %s1067_s5 = scalar_lea.sflag [#allocation29], %s17574_s7  ;;  %s17608_s1 = scalar_lea.vmem [#allocation28], %s13367_s15 }
 0x2a0   : > { %16687 = dma.done.wait (%p19383_p6), %s1067_s5, 16640  }
 0x2a1   : > { %16689 = vsyncadd (%p19383_p6), %s1067_s5, 4294950656  ;;  %s13368_s20 = sshll.u32 %s17577_s29, 4  ;;  %s1085_s24 = scalar_lea.sflag [#allocation32], %s17574_s7 }
 0x2a2   : > { %s17615_s3 = scalar_lea.vmem [#allocation30], %s13368_s20  ;;  %s17618_s22 = scalar_lea.vmem [#allocation31], %s13367_s15 }
 0x2a3   : > { %16691 = dma.done.wait (%p19383_p6), %s1085_s24, 16400  }
 0x2a4   : > { %16693 = vsyncadd (%p19383_p6), %s1085_s24, 4294950896  ;;  %s1096_s13 = scalar_lea.vmem [#allocation33], %s17577_s29  ;;  %s1102_s4 = scalar_lea.sflag [#allocation35], %s17574_s7 }
 0x2a5   : > { %s1104_s5 = scalar_lea.vmem [#allocation34], %s17577_s29 }
 0x2a6   : > { %16695 = dma.done.wait (%p19383_p6), %s1102_s4, 32  }
 0x2a7   : > { %16697 = vsyncadd (%p19383_p6), %s1102_s4, 4294967264  ;;  %s1112_s15 = scalar_lea.vmem [#allocation36], %s17577_s29  ;;  %p19384_p7 = scmp.ne.s32.totalorder %s16911_s2, 0 }
 0x2a8   : > { %v17634_v1 = vld [vmem:[#allocation5] sm:$0xff] (!%p19384_p7)  ;;  %v1225_v2 = vld [vmem:[#allocation7] sm:$0xff] (!%p19384_p7)  ;;  %vm1226_vm0 = vcmask (!%p19384_p7), 64512   ;;  %v16742_v3 = vmov (!%p19384_p7), 0.0   ;;  %vm16743_vm1 = vmmov (!%p19384_p7), 0   ;;  %v1300_v4 = vld [vmem:[#allocation9] sm:$0xff] (!%p19384_p7) }
 0x2a9   : > { %1223 = sbr.rel (%p19384_p7) target bundleno = 7726 (0x1e2e), region = 200  ;;  %14674 = vmatprep.subr.mxu0 (!%p19384_p7), %v16742_v3  ;;  %14676 = vmatprep.mubr.msk.f32.mxu0 (!%p19384_p7), %vm16743_vm1, %v16742_v3  ;;  %v1301_v5 = vld [vmem:[#allocation9 + $0x8] sm:$0xff] (!%p19384_p7)  ;;  %v1302_v6 = vld [vmem:[#allocation9 + $0x10] sm:$0xff] (!%p19384_p7)  ;;  %v16744_v7 = vmov (!%p19384_p7), 0.0|0.0   ;;  %v1303_v9 = vld [vmem:[#allocation9 + $0x18] sm:$0xff] (!%p19384_p7)  ;;  %vm1315_vm2 = vcmask (!%p19384_p7), 523264  }
 0x2aa   : > { %14675 = vmatpush3.msra.mxu0 (!%p19384_p7), %v17634_v1  ;;  %15228 = vmatprep.subr.bf16.mxu1 (!%p19384_p7), %v16744_v7  ;;  %v15229_v8 = vpack.c.bf16 (!%p19384_p7), %v1301_v5, %v1300_v4  ;;  %v1304_v10 = vld [vmem:[#allocation9 + $0x20] sm:$0xff] (!%p19384_p7)  ;;  %v1305_v11 = vld [vmem:[#allocation9 + $0x28] sm:$0xff] (!%p19384_p7)  ;;  %v15232_v12 = vpack.c.bf16 (!%p19384_p7), %v1303_v9, %v1302_v6  ;;  %v1306_v13 = vld [vmem:[#allocation9 + $0x30] sm:$0xff] (!%p19384_p7)  ;;  %s16745_s30 = smov (!%p19384_p7), 64   ;;  %vm2398_vm3 = vcmask (!%p19384_p7), 1041408   ;;  %vm2305_vm4 = vcmask (!%p19384_p7), 130048  }
 0x2ab   : > { %14677 = vmatmul.mubr.msk.f32.vlgmr.msra.gmra.mrb[0].mxu0 (!%p19384_p7), %vm1226_vm0, %v1225_v2  ;;  %14695 = vmatprep.mubr.msk.f32.mxu1 (!%p19384_p7), %vm16743_vm1, %v16742_v3  ;;  %v1307_v14 = vld [vmem:[#allocation9 + $0x38] sm:$0xff] (!%p19384_p7)  ;;  %v15235_v15 = vpack.c.bf16 (!%p19384_p7), %v1305_v11, %v1304_v10  ;;  %v13372_v19 = vld [vmem:[#allocation10] ss:$0 sm:$0xff] (!%p19384_p7)  ;;  %v1460_v21 = vld [vmem:[#allocation12] sm:$0xff] (!%p19384_p7)  ;;  %v2081_v11 = vlaneseq (!%p19384_p7)  ;;  %s16747_s7 = smov (!%p19384_p7), 112   ;;  %vm2382_vm5 = vcmask (!%p19384_p7), 9216  }
 0x2ac   : > { %15230 = vmatpush3.bf16.msra.mxu1 (!%p19384_p7), %v15229_v8  ;;  %14698 = vmatprep.subr.mxu0 (!%p19384_p7), %v16742_v3  ;;  %v15238_v16 = vpack.c.bf16 (!%p19384_p7), %v1307_v14, %v1306_v13  ;;  %v1461_v22 = vld [vmem:[#allocation12 + $0x8] sm:$0xff] (!%p19384_p7)  ;;  %v1462_v27 = vld [vmem:[#allocation12 + $0x10] sm:$0xff] (!%p19384_p7)  ;;  %v1463_v28 = vld [vmem:[#allocation12 + $0x18] sm:$0xff] (!%p19384_p7)  ;;  %s16748_s20 = smov (!%p19384_p7), 96   ;;  %vm2394_vm6 = vcmask (!%p19384_p7), 15360   ;;  %s16749_s24 = smov (!%p19384_p7), 80  }
 0x2ad   : > { %15231 = vmatprep.subr.bf16.mxu1 (!%p19384_p7), %v16744_v7  ;;  %14700 = vmatprep.mubr.msk.f32.mxu0 (!%p19384_p7), %vm16743_vm1, %v16742_v3  ;;  %v15241_v26 = vpack.c.bf16 (!%p19384_p7), %v1461_v22, %v1460_v21  ;;  %v15244_v29 = vpack.c.bf16 (!%p19384_p7), %v1463_v28, %v1462_v27  ;;  %v1464_v30 = vld [vmem:[#allocation12 + $0x20] sm:$0xff] (!%p19384_p7)  ;;  %v1465_v31 = vld [vmem:[#allocation12 + $0x28] sm:$0xff] (!%p19384_p7)  ;;  %v1466_v33 = vld [vmem:[#allocation12 + $0x30] sm:$0xff] (!%p19384_p7)  ;;  %s16750_s4 = smov (!%p19384_p7), 48  }
 0x2ae   : > { %v15247_v32 = vpack.c.bf16 (!%p19384_p7), %v1465_v31, %v1464_v30  ;;  %v1467_v34 = vld [vmem:[#allocation12 + $0x38] sm:$0xff] (!%p19384_p7)  ;;  %v1553_v38 = vld [vmem:[#allocation15] sm:$0xff] (!%p19384_p7)  ;;  %v13375_v40 = vld [vmem:[#allocation13] ss:$0 sm:$0xff] (!%p19384_p7) }
 0x2af   : > { %v15250_v35 = vpack.c.bf16 (!%p19384_p7), %v1467_v34, %v1466_v33  ;;  %v15583_v39 = vld [vmem:[%s17581_s18 + $0x8] ss:$12 sps:$4 sm:$0xff] (!%p19384_p7)   ;;  %v15587_v41 = vld [vmem:[%s17581_s18 + $0x20] ss:$12 sps:$4 sm:$0xff] (!%p19384_p7)   ;;  %v15591_v45 = vld [vmem:[%s17581_s18 + $0x38] ss:$12 sps:$4 sm:$0xff] (!%p19384_p7)  }
 0x2b0   : > { %15233 = vmatpush3.bf16.msra.mxu1 %v15232_v12  ;;  %v15595_v46 = vld [vmem:[%s17581_s18 + $0x50] ss:$12 sps:$4 sm:$0xff]   ;;  %v15599_v47 = vld [vmem:[%s17581_s18 + $0x68] ss:$12 sps:$4 sm:$0xff]   ;;  %v15603_v48 = vld [vmem:[%s17581_s18 + $0x80] ss:$12 sps:$4 sm:$0xff]  }
 0x2b1   : > { %15234 = vmatprep.subr.bf16.mxu1 %v16744_v7  ;;  %v15607_v49 = vld [vmem:[%s17581_s18 + $0x98] ss:$12 sps:$4 sm:$0xff]   ;;  %v1554_v53 = vld [vmem:[#allocation15 + $0x8] sm:$0xf]  ;;  %v15580_v54 = vld [vmem:[%s17581_s18] ss:$12 sps:$4 sm:$0xff]  }
 0x2b2   : > { %v15582_v51 = vld [vmem:[%s17581_s18 + $0x4] ss:$12 sps:$4 sm:$0xff]   ;;  %v15586_v55 = vld [vmem:[%s17581_s18 + $0x1c] ss:$12 sps:$4 sm:$0xff]   ;;  %v15590_v57 = vld [vmem:[%s17581_s18 + $0x34] ss:$12 sps:$4 sm:$0xff]  }
 0x2b3   : > { %v15584_v56 = vld [vmem:[%s17581_s18 + $0x18] ss:$12 sps:$4 sm:$0xff]   ;;  %v15588_v58 = vld [vmem:[%s17581_s18 + $0x30] ss:$12 sps:$4 sm:$0xff]   ;;  %v15592_v60 = vld [vmem:[%s17581_s18 + $0x48] ss:$12 sps:$4 sm:$0xff]  }
 0x2b4   : > { %15236 = vmatpush3.bf16.msra.mxu1 %v15235_v15  ;;  %v15594_v59 = vld [vmem:[%s17581_s18 + $0x4c] ss:$12 sps:$4 sm:$0xff]   ;;  %v15598_v61 = vld [vmem:[%s17581_s18 + $0x64] ss:$12 sps:$4 sm:$0xff]   ;;  %v15602_v63 = vld [vmem:[%s17581_s18 + $0x7c] ss:$12 sps:$4 sm:$0xff]  }
 0x2b5   : > { %15237 = vmatprep.subr.bf16.mxu1 %v16744_v7  ;;  %v15596_v62 = vld [vmem:[%s17581_s18 + $0x60] ss:$12 sps:$4 sm:$0xff]   ;;  %v15600_v0 = vld [vmem:[%s17581_s18 + $0x78] ss:$12 sps:$4 sm:$0xff]   ;;  %v15608_v5 = vld [vmem:[%s17581_s18 + $0xa8] ss:$12 sps:$4 sm:$0xff]  }
 0x2b6   : > { %v15610_v4 = vld [vmem:[%s17581_s18 + $0xac] ss:$12 sps:$4 sm:$0xff]   ;;  %v15611_v6 = vld [vmem:[%s17581_s18 + $0xb0] ss:$12 sps:$4 sm:$0xff]   ;;  %v17702_v12 = vshrl.u32 %v2081_v11, 7 }
 0x2b7   : > { %v1670_v15 = vld [vmem:[%s17589_s27] sm:$0x7] }
 0x2b8   : > { %15239 = vmatpush3.bf16.msra.mxu1 %v15238_v16  ;;  %v17705_v13 = vsub.s32 0, %v17702_v12  ;;  %v17708_v14 = vsub.s32 2, %v17702_v12  ;;  %v17712_v16 = vsub.s32 1, %v17702_v12 }
 0x37e   : > { %v1296_v17 = vpop.f32.mrb[0].mxu0 }
 0x37f   : > { %v14678_v18 = vpop.f32.mrb[1].mxu0  ;;  %14696 = vmatmul.mubr.msk.f32.vlgmr.msra.gmra.mrb[0].mxu1 %vm1315_vm2, %v1296_v17  ;;  %v2084_v17 = vrot.slane %v1670_v15, %v17705_v13 }
 0x380   : > { %14724 = vmatprep.mubr.msk.f32.mxu1 %vm1226_vm0, %v1553_v38  ;;  %v2092_v18 = vrot.slane %v1670_v15, %v17708_v14 }
 0x452   : > { %v1385_v20 = vpop.f32.mrb[0].mxu1 }
 0x453   : > { %v1386_v23 = vadd.f32 %v13372_v19, %v1385_v20  ;;  %v14697_v24 = vpop.f32.mrb[1].mxu1  ;;  %v2088_v19 = vrot.slane %v1670_v15, %v17712_v16 }
 0x455   : > { %v1389_v25 = vmax.f32 %v1386_v23, 0.0 }
 0x457   : > { %14699 = vmatpush3.msra.mxu0 %v1389_v25 }
 0x458   : > { %14701 = vmatmul.mubr.msk.f32.vlgmr.msra.gmra.mrb[2].mxu0 %vm1226_vm0, %v1225_v2  ;;  %15240 = vmatprep.subr.bf16.mxu0 %v16744_v7  ;;  %v15604_v2 = vld [vmem:[%s17581_s18 + $0x90] ss:$12 sps:$4 sm:$0xff]  }
 0x459   : > { %15242 = vmatpush3.bf16.msra.mxu0 %v15241_v26  ;;  %14719 = vmatprep.mubr.msk.f32.mxu0 %vm16743_vm1, %v16742_v3 }
 0x45a   : > { %15243 = vmatprep.subr.bf16.mxu0 %v16744_v7 }
 0x45d   : > { %15245 = vmatpush3.bf16.msra.mxu0 %v15244_v29 }
 0x45e   : > { %15246 = vmatprep.subr.bf16.mxu0 %v16744_v7 }
 0x461   : > { %15248 = vmatpush3.bf16.msra.mxu0 %v15247_v32 }
 0x462   : > { %15249 = vmatprep.subr.bf16.mxu0 %v16744_v7  ;;  %v16746_v7 = vmov 0  }
 0x465   : > { %15251 = vmatpush3.bf16.msra.mxu0 %v15250_v35 }
 0x466   : > { %14727 = vmatprep.subr.bf16.mxu0 %v16742_v3 }
 0x52b   : > { %v1456_v36 = vpop.f32.mrb[2].mxu0 }
 0x52c   : > { %v14702_v37 = vpop.f32.mrb[3].mxu0  ;;  %14720 = vmatmul.mubr.msk.f32.vlgmr.msra.gmra.mrb[4].mxu0 %vm1315_vm2, %v1456_v36 }
 0x52d   : > { %14743 = vmatprep.mubr.msk.bf16.mxu0 %vm16743_vm1, %v16742_v3  ;;  %14728 = vmatpush3.bf16.msra.mxu0 %v15583_v39 }
 0x52e   : > { %14729 = vmatprep.subr.bf16.mxu0 %v16742_v3 }
 0x531   : > { %14730 = vmatpush3.bf16.msra.mxu0 %v15587_v41 }
 0x532   : > { %14731 = vmatprep.subr.bf16.mxu0 %v16742_v3 }
 0x535   : > { %14732 = vmatpush3.bf16.msra.mxu0 %v15591_v45 }
 0x536   : > { %14733 = vmatprep.subr.bf16.mxu0 %v16742_v3 }
 0x539   : > { %14734 = vmatpush3.bf16.msra.mxu0 %v15595_v46 }
 0x53a   : > { %14735 = vmatprep.subr.bf16.mxu0 %v16742_v3 }
 0x53d   : > { %14736 = vmatpush3.bf16.msra.mxu0 %v15599_v47 }
 0x53e   : > { %14737 = vmatprep.subr.bf16.mxu0 %v16742_v3 }
 0x541   : > { %14738 = vmatpush3.bf16.msra.mxu0 %v15603_v48 }
 0x542   : > { %14739 = vmatprep.subr.bf16.mxu0 %v16742_v3 }
 0x545   : > { %14740 = vmatpush3.bf16.msra.mxu0 %v15607_v49 }
 0x546   : > { %14741 = vmatprep.subr.bf16.mxu0 %v16742_v3 }
 0x549   : > { %14742 = vmatpush3.bf16.msra.mxu0 %v15611_v6 }
 0x54a   : > { %14752 = vmatprep.subr.mxu0 %v16742_v3 }
 0x5ff   : > { %v1544_v42 = vpop.f32.mrb[4].mxu0 }
 0x600   : > { %v1545_v43 = vadd.f32 %v13375_v40, %v1544_v42  ;;  %v14721_v44 = vpop.f32.mrb[5].mxu0 }
 0x602   : > { %1549 = vrot.lane.b32.xlu0 %v1545_v43, %s16745_s30 }
 0x674   : > { %v1550_v50 = vpop.permute.xlu0 %1549 }
 0x675   : > { %v1552_v52 = vsel %vm1315_vm2, %v17634_v1, %v1550_v50  ;;  %v15606_v1 = vld [vmem:[%s17581_s18 + $0x94] ss:$12 sps:$4 sm:$0xff]  }
 0x676   : > { %14722 = vmatprep.subr.mxu1 %v1552_v52 }
 0x677   : > { %14723 = vmatpush3.msra.mxu1 %v1552_v52 }
 0x678   : > { %14725 = vmatmul.mubr.msk.f32.vlgmr.msra.gmra.mrb[2].mxu1 %vm1226_vm0, %v1554_v53  ;;  %2224 = vmatprep.subr.bf16.mxu1 %v15582_v51  ;;  %v15613_v53 = vld [vmem:[%s17592_s17 + $0x8] sm:$0xff]  }
 0x679   : > { %2225 = vmatpush1.bf16.msra.mxu1 %v15580_v54  ;;  %2256 = vmatprep.mubr.bf16.mxu1 %v16746_v7 }
 0x67a   : > { %2226 = vmatprep.subr.bf16.mxu1 %v15586_v55 }
 0x67d   : > { %2227 = vmatpush1.bf16.msra.mxu1 %v15584_v56  ;;  %v15612_v56 = vld [vmem:[%s17592_s17] sm:$0xff]  }
 0x67e   : > { %2228 = vmatprep.subr.bf16.mxu1 %v15590_v57 }
 0x681   : > { %2229 = vmatpush1.bf16.msra.mxu1 %v15588_v58 }
 0x682   : > { %2230 = vmatprep.subr.bf16.mxu1 %v15594_v59 }
 0x685   : > { %2231 = vmatpush1.bf16.msra.mxu1 %v15592_v60 }
 0x686   : > { %2232 = vmatprep.subr.bf16.mxu1 %v15598_v61 }
 0x689   : > { %2233 = vmatpush1.bf16.msra.mxu1 %v15596_v62 }
 0x68a   : > { %2234 = vmatprep.subr.bf16.mxu1 %v15602_v63 }
 0x68d   : > { %2235 = vmatpush1.bf16.msra.mxu1 %v15600_v0 }
 0x68e   : > { %2236 = vmatprep.subr.bf16.mxu1 %v15606_v1 }
 0x691   : > { %2237 = vmatpush1.bf16.msra.mxu1 %v15604_v2 }
 0x692   : > { %2238 = vmatprep.subr.bf16.mxu1 %v15610_v4 }
 0x695   : > { %2239 = vmatpush1.bf16.msra.mxu1 %v15608_v5 }
 0x696   : > { %14747 = vmatprep.subr.mxu1 %v16742_v3 }
 0x74b   : > { %v14726_v8 = vpop.f32.mrb[2].mxu1 }
 0x74c   : > { %1637 = vst [vmem:[#allocation3 + $0x6] sm:$0xf] %v14726_v8  ;;  %v17693_v9 = vpop.f32.mrb[3].mxu1 }
 0x74d   : > { %1636 = vst [vmem:[#allocation3 - $0x2] sm:$0xfc] %v17693_v9  ;;  %v2079_v10 = vpack.c.bf16 %v17693_v9, %v17693_v9 }
 0x74f   : > { %2257 = vmatmul.mubr.bf16.vlgmr.msra.gmra.mrb[4].mxu1 %v2079_v10  ;;  %14744 = vmatmul.mubr.bf16.vlgmr.msra.gmra.mrb[8].mxu0 %v2079_v10 }
 0x750   : > { %14749 = vmatprep.mubr.msk.f32.mxu1 %vm16743_vm1, %v16742_v3  ;;  %14754 = vmatprep.mubr.msk.f32.mxu0 %vm16743_vm1, %v16742_v3 }
 0x822   : > { %v2258_v20 = vpop.f32.mrb[4].mxu1  ;;  %v2299_v21 = vpop.f32.mrb[8].mxu0 }
 0x823   : > { %v17717_v22 = vadd.f32 %v2258_v20, %v2084_v17  ;;  %v17719_v23 = vadd.f32 %v2299_v21, %v2092_v18  ;;  %v2260_v24 = vpop.f32.mrb[5].mxu1  ;;  %v14745_v25 = vpop.f32.mrb[9].mxu0 }
 0x824   : > { %v17721_v26 = vadd.f32 %v2260_v24, %v2088_v19  ;;  %v2262_v27 = vpop.f32.mrb[6].mxu1  ;;  %v2302_v28 = vpop.f32.mrb[10].mxu0 }
 0x825   : > { %v2263_v29 = vpop.f32.mrb[7].mxu1  ;;  %v14746_v30 = vpop.f32.mrb[11].mxu0  ;;  %2473 = vrot.lane.b32.xlu1 %v17717_v22, %s16747_s7  ;;  %14753 = vmatpush3.msk.msra.mxu0 %vm2398_vm3, %v17719_v23 }
 0x826   : > { %2475 = vrot.lane.b32.xlu0 %v17721_v26, %s16747_s7  ;;  %14748 = vmatpush3.xpose.msk.msra.mxu1 %vm2305_vm4, %v17721_v26 }
 0x827   : > { %14757 = vmatprep.subr.mxu1 %v16742_v3  ;;  %14762 = vmatprep.subr.mxu0 %v16742_v3 }
 0x829   : > { %14750 = vmatmul.mubr.msk.f32.vlgmr.msra.gmra.mrb[8].mxu1 %vm2305_vm4, %v17717_v22 }
 0x82a   : > { %14759 = vmatprep.mubr.msk.f32.mxu1 %vm16743_vm1, %v16742_v3 }
 0x897   : > { %v2474_v32 = vpop.permute.xlu1 %2473 }
 0x898   : > { %v2476_v31 = vpop.permute.xlu0 %2475 }
 0x899   : > { %14758 = vmatpush3.xpose.msk.msra.mxu1 %vm2305_vm4, %v2476_v31 }
 0x89a   : > { %14767 = vmatprep.subr.bf16.mxu1 %v16742_v3 }
 0x89c   : > { %14760 = vmatmul.mubr.msk.f32.vlgmr.msra.gmra.mrb[10].mxu1 %vm2305_vm4, %v2474_v32 }
 0x89d   : > { %14769 = vmatprep.mubr.msk.bf16.mxu1 %vm16743_vm1, %v16742_v3  ;;  %14768 = vmatpush3.bf16.msra.mxu1 %v15613_v53 }
 0x89e   : > { %14779 = vmatprep.subr.mxu1 %v16742_v3 }
 0x8fc   : > { %v2378_v33 = vpop.f32.mrb[8].mxu1 }
 0x8fd   : > { %v14751_v34 = vpop.f32.mrb[9].mxu1  ;;  %v2383_v35 = vsel %vm2382_vm5, %v2378_v33, -inf }
 0x8fe   : > { %2384 = vmax.xlane.f32.xlu1 %v2383_v35  ;;  %v15614_v35 = vld [vmem:[%s17592_s17 + $0x10] sm:$0xff]  }
 0x96f   : > { %v2547_v36 = vpop.f32.mrb[10].mxu1 }
 0x970   : > { %v14761_v37 = vpop.f32.mrb[11].mxu1  ;;  %v2551_v38 = vsel %vm2382_vm5, %v2547_v36, -inf }
 0x971   : > { %2552 = vmax.xlane.f32.xlu0 %v2551_v38 }
 0x98b   : > { %v2385_v39 = vpop.xlane.xlu1 %2384 }
 0x98c   : > { %v2386_v40 = vsub.f32 %v2378_v33, %v2385_v39 }
 0x98e   : > { %v2387_v41 = vmul.f32 1.442695, %v2386_v40 }
 0x990   : > { %15748 = vpow2.f32 %v2387_v41 }
 0x99a   : > { %v15749_v42 = vpop.eup %15748 }
 0x99b   : > { %v2389_v43 = vsel %vm2382_vm5, %v15749_v42, 0.0 }
 0x99c   : > { %2390 = vadd.xlane.f32.xlu0 %v2389_v43 }
 0x9b2   : > { %2562 = vrot.lane.b32.xlu0 %v17719_v23, %s16747_s7  ;;  %s16752_s7 = smov 16  }
 0x9fe   : > { %v2553_v44 = vpop.xlane.xlu0 %2552 }
 0x9ff   : > { %v2554_v45 = vsub.f32 %v2547_v36, %v2553_v44 }
 0xa01   : > { %v2555_v46 = vmul.f32 1.442695, %v2554_v45 }
 0xa03   : > { %15750 = vpow2.f32 %v2555_v46 }
 0xa0d   : > { %v15751_v47 = vpop.eup %15750 }
 0xa0e   : > { %v2557_v48 = vsel %vm2382_vm5, %v15751_v47, 0.0 }
 0xa0f   : > { %2558 = vadd.xlane.f32.xlu1 %v2557_v48 }
 0xa20   : > { %2740 = vrot.lane.b32.xlu1 %v17721_v26, %s16748_s20 }
 0xa24   : > { %2738 = vrot.lane.b32.xlu1 %v17717_v22, %s16748_s20 }
 0xa29   : > { %v2391_v49 = vpop.xlane.xlu0 %2390 }
 0xa2a   : > { %15752 = vrcp.f32 %v2391_v49 }
 0xa2d   : > { %v2563_v52 = vpop.permute.xlu0 %2562 }
 0xa34   : > { %v15753_v50 = vpop.eup %15752 }
 0xa35   : > { %v2393_v51 = vmul.f32 %v15753_v50, %v15749_v42 }
 0xa37   : > { %14755 = vmatmul.mubr.msk.f32.vlgmr.msra.gmra.mrb[6].mxu0 %vm2394_vm6, %v2393_v51 }
 0xa38   : > { %14763 = vmatpush3.msk.msra.mxu0 %vm2398_vm3, %v2563_v52  ;;  %14764 = vmatprep.mubr.msk.f32.mxu0 %vm16743_vm1, %v16742_v3 }
 0xa39   : > { %14773 = vmatprep.subr.bf16.mxu0 %v16742_v3 }
 0xa9c   : > { %v2559_v54 = vpop.xlane.xlu1 %2558 }
 0xa9d   : > { %15754 = vrcp.f32 %v2559_v54 }
 0xaa0   : > { %v2741_v0 = vpop.permute.xlu1 %2740 }
 0xaa4   : > { %v2739_v1 = vpop.permute.xlu1 %2738 }
 0xaa7   : > { %v15755_v55 = vpop.eup %15754 }
 0xaa8   : > { %v2561_v57 = vmul.f32 %v15755_v55, %v15751_v47 }
 0xaaa   : > { %14765 = vmatmul.mubr.msk.f32.vlgmr.msra.gmra.mrb[12].mxu0 %vm2394_vm6, %v2561_v57 }
 0xaab   : > { %14774 = vmatpush3.bf16.msra.mxu0 %v15612_v56  ;;  %14775 = vmatprep.mubr.msk.bf16.mxu0 %vm16743_vm1, %v16742_v3 }
 0xaac   : > { %14784 = vmatprep.subr.mxu0 %v16742_v3 }
 0xb0a   : > { %v2468_v58 = vpop.f32.mrb[6].mxu0 }
 0xb0b   : > { %v2472_v59 = vpack.c.bf16 %v2468_v58, %v2468_v58  ;;  %v14756_v60 = vpop.f32.mrb[7].mxu0  ;;  %v15615_v58 = vld [vmem:[%s17592_s17 + $0x18] sm:$0xff]  }
 0xb0d   : > { %14776 = vmatmul.mubr.msk.bf16.vlgmr.msra.gmra.mrb[16].mxu0 %vm2305_vm4, %v2472_v59 }
 0xb0e   : > { %14786 = vmatprep.mubr.msk.f32.mxu0 %vm16743_vm1, %v16742_v3 }
 0xb7d   : > { %v2635_v61 = vpop.f32.mrb[12].mxu0 }
 0xb7e   : > { %v2639_v62 = vpack.c.bf16 %v2635_v61, %v2635_v61  ;;  %v14766_v63 = vpop.f32.mrb[13].mxu0 }
 0xb80   : > { %14770 = vmatmul.mubr.msk.bf16.vlgmr.msra.gmra.mrb[12].mxu1 %vm2305_vm4, %v2639_v62 }
 0xb81   : > { %14780 = vmatpush3.xpose.msk.msra.mxu1 %vm2305_vm4, %v2741_v0  ;;  %14781 = vmatprep.mubr.msk.f32.mxu1 %vm16743_vm1, %v16742_v3 }
 0xb82   : > { %14789 = vmatprep.subr.bf16.mxu1 %v16742_v3 }
 0xb88   : > { %14782 = vmatmul.mubr.msk.f32.vlgmr.msra.gmra.mrb[16].mxu1 %vm2305_vm4, %v2739_v1 }
 0xb89   : > { %14791 = vmatprep.mubr.msk.bf16.mxu1 %vm16743_vm1, %v16742_v3  ;;  %14790 = vmatpush3.bf16.msra.mxu1 %v15614_v35 }
 0xb8a   : > { %14805 = vmatprep.subr.bf16.mxu1 %v16742_v3 }
 0xbe0   : > { %v2732_v2 = vpop.f32.mrb[16].mxu0 }
 0xbe1   : > { %v14777_v4 = vpop.f32.mrb[17].mxu0 }
 0xbe2   : > { %v2735_v5 = vpop.f32.mrb[18].mxu0 }
 0xbe3   : > { %v14778_v6 = vpop.f32.mrb[19].mxu0 }
 0xc53   : > { %v2683_v8 = vpop.f32.mrb[12].mxu1 }
 0xc54   : > { %v2733_v10 = vadd.f32 %v2732_v2, %v2683_v8  ;;  %v14771_v11 = vpop.f32.mrb[13].mxu1 }
 0xc55   : > { %v2686_v15 = vpop.f32.mrb[14].mxu1 }
 0xc56   : > { %v14772_v17 = vpop.f32.mrb[15].mxu1 }
 0xc5b   : > { %v2812_v18 = vpop.f32.mrb[16].mxu1 }
 0xc5c   : > { %v14783_v19 = vpop.f32.mrb[17].mxu1  ;;  %v2816_v20 = vsel %vm2382_vm5, %v2812_v18, -inf }
 0xc5d   : > { %2817 = vmax.xlane.f32.xlu0 %v2816_v20 }
 0xc73   : > { %2827 = vrot.lane.b32.xlu0 %v17719_v23, %s16748_s20 }
 0xc77   : > { %2955 = vrot.lane.b32.xlu0 %v17717_v22, %s16749_s24 }
 0xcea   : > { %v2818_v21 = vpop.xlane.xlu0 %2817 }
 0xceb   : > { %v2819_v24 = vsub.f32 %v2812_v18, %v2818_v21 }
 0xced   : > { %v2820_v25 = vmul.f32 1.442695, %v2819_v24 }
 0xcee   : > { %v2828_v27 = vpop.permute.xlu0 %2827 }
 0xcef   : > { %15756 = vpow2.f32 %v2820_v25  ;;  %14785 = vmatpush3.msk.msra.mxu0 %vm2398_vm3, %v2828_v27  ;;  %v15616_v27 = vld [vmem:[%s17592_s17 + $0x20] sm:$0xff]  }
 0xcf0   : > { %14795 = vmatprep.subr.mxu0 %v16742_v3 }
 0xcf2   : > { %v2956_v34 = vpop.permute.xlu0 %2955 }
 0xcf9   : > { %v15757_v28 = vpop.eup %15756 }
 0xcfa   : > { %v2822_v29 = vsel %vm2382_vm5, %v15757_v28, 0.0 }
 0xcfb   : > { %2823 = vadd.xlane.f32.xlu1 %v2822_v29 }
 0xd0c   : > { %2957 = vrot.lane.b32.xlu1 %v17721_v26, %s16749_s24 }
 0xd88   : > { %v2824_v30 = vpop.xlane.xlu1 %2823 }
 0xd89   : > { %15758 = vrcp.f32 %v2824_v30 }
 0xd8c   : > { %v2958_v33 = vpop.permute.xlu1 %2957 }
 0xd93   : > { %v15759_v31 = vpop.eup %15758 }
 0xd94   : > { %v2826_v32 = vmul.f32 %v15759_v31, %v15757_v28 }
 0xd96   : > { %14787 = vmatmul.mubr.msk.f32.vlgmr.msra.gmra.mrb[14].mxu0 %vm2394_vm6, %v2826_v32 }
 0xd97   : > { %14796 = vmatpush3.xpose.msk.msra.mxu0 %vm2305_vm4, %v2958_v33  ;;  %14797 = vmatprep.mubr.msk.f32.mxu0 %vm16743_vm1, %v16742_v3 }
 0xd98   : > { %14800 = vmatprep.subr.mxu0 %v16742_v3 }
 0xd9a   : > { %14798 = vmatmul.mubr.msk.f32.vlgmr.msra.gmra.mrb[20].mxu0 %vm2305_vm4, %v2956_v34 }
 0xd9b   : > { %14802 = vmatprep.mubr.msk.f32.mxu0 %vm16743_vm1, %v16742_v3 }
 0xe69   : > { %v2900_v36 = vpop.f32.mrb[14].mxu0 }
 0xe6a   : > { %v2904_v37 = vpack.c.bf16 %v2900_v36, %v2900_v36  ;;  %v14788_v38 = vpop.f32.mrb[15].mxu0 }
 0xe6c   : > { %14792 = vmatmul.mubr.msk.bf16.vlgmr.msra.gmra.mrb[20].mxu1 %vm2305_vm4, %v2904_v37 }
 0xe6d   : > { %v3029_v39 = vpop.f32.mrb[20].mxu0  ;;  %14807 = vmatprep.mubr.msk.bf16.mxu1 %vm16743_vm1, %v16742_v3  ;;  %14806 = vmatpush3.bf16.msra.mxu1 %v15615_v58 }
 0xe6e   : > { %v14799_v40 = vpop.f32.mrb[21].mxu0  ;;  %v3033_v41 = vsel %vm2382_vm5, %v3029_v39, -inf  ;;  %14821 = vmatprep.subr.bf16.mxu1 %v16742_v3 }
 0xe6f   : > { %3034 = vmax.xlane.f32.xlu1 %v3033_v41 }
 0xe80   : > { %3174 = vrot.lane.b32.xlu1 %v17721_v26, %s16745_s30 }
 0xe84   : > { %3172 = vrot.lane.b32.xlu1 %v17717_v22, %s16745_s30 }
 0xefc   : > { %v3035_v42 = vpop.xlane.xlu1 %3034 }
 0xefd   : > { %v3036_v43 = vsub.f32 %v3029_v39, %v3035_v42 }
 0xeff   : > { %v3037_v44 = vmul.f32 1.442695, %v3036_v43 }
 0xf00   : > { %v3175_v55 = vpop.permute.xlu1 %3174 }
 0xf01   : > { %15760 = vpow2.f32 %v3037_v44 }
 0xf04   : > { %v3173_v57 = vpop.permute.xlu1 %3172 }
 0xf0b   : > { %v15761_v45 = vpop.eup %15760 }
 0xf0c   : > { %v3039_v46 = vsel %vm2382_vm5, %v15761_v45, 0.0 }
 0xf0d   : > { %3040 = vadd.xlane.f32.xlu0 %v3039_v46 }
 0xf23   : > { %3044 = vrot.lane.b32.xlu0 %v17719_v23, %s16749_s24 }
 0xf3f   : > { %v2948_v47 = vpop.f32.mrb[20].mxu1 }
 0xf40   : > { %v2954_v48 = vadd.f32 %v2948_v47, %v2733_v10  ;;  %v14793_v49 = vpop.f32.mrb[21].mxu1 }
 0xf41   : > { %v2951_v50 = vpop.f32.mrb[22].mxu1 }
 0xf42   : > { %v14794_v51 = vpop.f32.mrb[23].mxu1  ;;  %v15617_v50 = vld [vmem:[%s17592_s17 + $0x28] sm:$0xff]  }
 0xf9a   : > { %v3041_v52 = vpop.xlane.xlu0 %3040 }
 0xf9b   : > { %15762 = vrcp.f32 %v3041_v52 }
 0xf9e   : > { %v3045_v53 = vpop.permute.xlu0 %3044 }
 0xf9f   : > { %14801 = vmatpush3.msk.msra.mxu0 %vm2398_vm3, %v3045_v53 }
 0xfa0   : > { %14811 = vmatprep.subr.mxu0 %v16742_v3 }
 0xfa5   : > { %v15763_v54 = vpop.eup %15762 }
 0xfa6   : > { %v3043_v56 = vmul.f32 %v15763_v54, %v15761_v45 }
 0xfa8   : > { %14803 = vmatmul.mubr.msk.f32.vlgmr.msra.gmra.mrb[22].mxu0 %vm2394_vm6, %v3043_v56 }
 0xfa9   : > { %14812 = vmatpush3.xpose.msk.msra.mxu0 %vm2305_vm4, %v3175_v55  ;;  %14813 = vmatprep.mubr.msk.f32.mxu0 %vm16743_vm1, %v16742_v3 }
 0xfaa   : > { %14816 = vmatprep.subr.mxu0 %v16742_v3 }
 0xfac   : > { %14814 = vmatmul.mubr.msk.f32.vlgmr.msra.gmra.mrb[24].mxu0 %vm2305_vm4, %v3173_v57 }
 0xfad   : > { %14818 = vmatprep.mubr.msk.f32.mxu0 %vm16743_vm1, %v16742_v3 }
0x107b   : > { %v3117_v59 = vpop.f32.mrb[22].mxu0 }
0x107c   : > { %v3121_v60 = vpack.c.bf16 %v3117_v59, %v3117_v59  ;;  %v14804_v61 = vpop.f32.mrb[23].mxu0 }
0x107e   : > { %14808 = vmatmul.mubr.msk.bf16.vlgmr.msra.gmra.mrb[24].mxu1 %vm2305_vm4, %v3121_v60 }
0x107f   : > { %v3246_v62 = vpop.f32.mrb[24].mxu0  ;;  %14823 = vmatprep.mubr.msk.bf16.mxu1 %vm16743_vm1, %v16742_v3  ;;  %14822 = vmatpush3.bf16.msra.mxu1 %v15616_v27 }
0x1080   : > { %v14815_v63 = vpop.f32.mrb[25].mxu0  ;;  %v3250_v0 = vsel %vm2382_vm5, %v3246_v62, -inf  ;;  %14837 = vmatprep.subr.bf16.mxu1 %v16742_v3 }
0x1081   : > { %3251 = vmax.xlane.f32.xlu0 %v3250_v0 }
0x1097   : > { %3261 = vrot.lane.b32.xlu0 %v17719_v23, %s16745_s30  ;;  %s16751_s30 = smov 32  }
0x109b   : > { %3389 = vrot.lane.b32.xlu0 %v17717_v22, %s16750_s4 }
0x110e   : > { %v3252_v1 = vpop.xlane.xlu0 %3251 }
0x110f   : > { %v3253_v2 = vsub.f32 %v3246_v62, %v3252_v1 }
0x1111   : > { %v3254_v4 = vmul.f32 1.442695, %v3253_v2 }
0x1112   : > { %v3262_v5 = vpop.permute.xlu0 %3261 }
0x1113   : > { %15764 = vpow2.f32 %v3254_v4  ;;  %14817 = vmatpush3.msk.msra.mxu0 %vm2398_vm3, %v3262_v5 }
0x1114   : > { %14827 = vmatprep.subr.mxu0 %v16742_v3 }
0x1116   : > { %v3390_v25 = vpop.permute.xlu0 %3389 }
0x111d   : > { %v15765_v6 = vpop.eup %15764 }
0x111e   : > { %v3256_v8 = vsel %vm2382_vm5, %v15765_v6, 0.0 }
0x111f   : > { %3257 = vadd.xlane.f32.xlu1 %v3256_v8 }
0x1130   : > { %3391 = vrot.lane.b32.xlu1 %v17721_v26, %s16750_s4 }
0x1151   : > { %v3165_v10 = vpop.f32.mrb[24].mxu1 }
0x1152   : > { %v3171_v11 = vadd.f32 %v3165_v10, %v2954_v48  ;;  %v14809_v15 = vpop.f32.mrb[25].mxu1  ;;  %v15618_v10 = vld [vmem:[%s17592_s17 + $0x30] sm:$0xff]  }
0x1153   : > { %v3168_v17 = vpop.f32.mrb[26].mxu1 }
0x1154   : > { %v14810_v18 = vpop.f32.mrb[27].mxu1 }
0x11ac   : > { %v3258_v19 = vpop.xlane.xlu1 %3257 }
0x11ad   : > { %15766 = vrcp.f32 %v3258_v19 }
0x11b0   : > { %v3392_v24 = vpop.permute.xlu1 %3391 }
0x11b7   : > { %v15767_v20 = vpop.eup %15766 }
0x11b8   : > { %v3260_v21 = vmul.f32 %v15767_v20, %v15765_v6 }
0x11ba   : > { %14819 = vmatmul.mubr.msk.f32.vlgmr.msra.gmra.mrb[26].mxu0 %vm2394_vm6, %v3260_v21 }
0x11bb   : > { %14828 = vmatpush3.xpose.msk.msra.mxu0 %vm2305_vm4, %v3392_v24  ;;  %14829 = vmatprep.mubr.msk.f32.mxu0 %vm16743_vm1, %v16742_v3 }
0x11bc   : > { %14832 = vmatprep.subr.mxu0 %v16742_v3 }
0x11be   : > { %14830 = vmatmul.mubr.msk.f32.vlgmr.msra.gmra.mrb[28].mxu0 %vm2305_vm4, %v3390_v25 }
0x11bf   : > { %14834 = vmatprep.mubr.msk.f32.mxu0 %vm16743_vm1, %v16742_v3 }
0x128d   : > { %v3334_v28 = vpop.f32.mrb[26].mxu0 }
0x128e   : > { %v3338_v29 = vpack.c.bf16 %v3334_v28, %v3334_v28  ;;  %v14820_v30 = vpop.f32.mrb[27].mxu0 }
0x1290   : > { %14824 = vmatmul.mubr.msk.bf16.vlgmr.msra.gmra.mrb[28].mxu1 %vm2305_vm4, %v3338_v29  ;;  %v15619_v29 = vld [vmem:[%s17592_s17 + $0x38] sm:$0xff]  }
0x1291   : > { %v3463_v31 = vpop.f32.mrb[28].mxu0  ;;  %14839 = vmatprep.mubr.msk.bf16.mxu1 %vm16743_vm1, %v16742_v3  ;;  %14838 = vmatpush3.bf16.msra.mxu1 %v15617_v50  ;;  %v1698_v50 = vld [vmem:[%s17608_s1 + $0x40] sm:$0xff] }
0x1292   : > { %v14831_v32 = vpop.f32.mrb[29].mxu0  ;;  %v3467_v33 = vsel %vm2382_vm5, %v3463_v31, -inf  ;;  %14853 = vmatprep.subr.bf16.mxu1 %v16742_v3 }
0x1293   : > { %3468 = vmax.xlane.f32.xlu1 %v3467_v33 }
0x12a4   : > { %3608 = vrot.lane.b32.xlu1 %v17721_v26, %s16751_s30 }
0x12a8   : > { %3606 = vrot.lane.b32.xlu1 %v17717_v22, %s16751_s30 }
0x1320   : > { %v3469_v34 = vpop.xlane.xlu1 %3468 }
0x1321   : > { %v3470_v35 = vsub.f32 %v3463_v31, %v3469_v34 }
0x1323   : > { %v3471_v36 = vmul.f32 1.442695, %v3470_v35 }
0x1324   : > { %v3609_v47 = vpop.permute.xlu1 %3608 }
0x1325   : > { %15768 = vpow2.f32 %v3471_v36 }
0x1328   : > { %v3607_v49 = vpop.permute.xlu1 %3606 }
0x132f   : > { %v15769_v37 = vpop.eup %15768 }
0x1330   : > { %v3473_v38 = vsel %vm2382_vm5, %v15769_v37, 0.0 }
0x1331   : > { %3474 = vadd.xlane.f32.xlu0 %v3473_v38 }
0x1347   : > { %3478 = vrot.lane.b32.xlu0 %v17719_v23, %s16750_s4 }
0x1363   : > { %v3382_v39 = vpop.f32.mrb[28].mxu1 }
0x1364   : > { %v3388_v40 = vadd.f32 %v3382_v39, %v3171_v11  ;;  %v14825_v41 = vpop.f32.mrb[29].mxu1 }
0x1365   : > { %v3385_v42 = vpop.f32.mrb[30].mxu1 }
0x1366   : > { %v14826_v43 = vpop.f32.mrb[31].mxu1 }
0x13be   : > { %v3475_v44 = vpop.xlane.xlu0 %3474 }
0x13bf   : > { %15770 = vrcp.f32 %v3475_v44 }
0x13c2   : > { %v3479_v45 = vpop.permute.xlu0 %3478 }
0x13c3   : > { %14833 = vmatpush3.msk.msra.mxu0 %vm2398_vm3, %v3479_v45 }
0x13c4   : > { %14843 = vmatprep.subr.mxu0 %v16742_v3 }
0x13c9   : > { %v15771_v46 = vpop.eup %15770 }
0x13ca   : > { %v3477_v48 = vmul.f32 %v15771_v46, %v15769_v37 }
0x13cc   : > { %14835 = vmatmul.mubr.msk.f32.vlgmr.msra.gmra.mrb[30].mxu0 %vm2394_vm6, %v3477_v48 }
0x13cd   : > { %14844 = vmatpush3.xpose.msk.msra.mxu0 %vm2305_vm4, %v3609_v47  ;;  %14845 = vmatprep.mubr.msk.f32.mxu0 %vm16743_vm1, %v16742_v3 }
0x13ce   : > { %14848 = vmatprep.subr.mxu0 %v16742_v3 }
0x13d0   : > { %14846 = vmatmul.mubr.msk.f32.vlgmr.msra.gmra.mrb[32].mxu0 %vm2305_vm4, %v3607_v49  ;;  %v1690_v49 = vld [vmem:[%s17608_s1] sm:$0xff] }
0x13d1   : > { %14850 = vmatprep.mubr.msk.f32.mxu0 %vm16743_vm1, %v16742_v3 }
0x149f   : > { %v3551_v51 = vpop.f32.mrb[30].mxu0 }
0x14a0   : > { %v3555_v52 = vpack.c.bf16 %v3551_v51, %v3551_v51  ;;  %v14836_v53 = vpop.f32.mrb[31].mxu0  ;;  %v1691_v51 = vld [vmem:[%s17608_s1 + $0x8] sm:$0xff] }
0x14a1   : > { %v13455_v53 = vcombine.high %v1690_v49, %v1698_v50 }
0x14a2   : > { %14840 = vmatmul.mubr.msk.bf16.vlgmr.msra.gmra.mrb[32].mxu1 %vm2305_vm4, %v3555_v52  ;;  %v13454_v52 = vcombine.low %v1690_v49, %v1698_v50 }
0x14a3   : > { %v3680_v54 = vpop.f32.mrb[32].mxu0  ;;  %14855 = vmatprep.mubr.msk.bf16.mxu1 %vm16743_vm1, %v16742_v3  ;;  %14854 = vmatpush3.bf16.msra.mxu1 %v15618_v10 }
0x14a4   : > { %v14847_v55 = vpop.f32.mrb[33].mxu0  ;;  %v3684_v56 = vsel %vm2382_vm5, %v3680_v54, -inf  ;;  %14869 = vmatprep.subr.bf16.mxu1 %v16742_v3 }
0x14a5   : > { %3685 = vmax.xlane.f32.xlu0 %v3684_v56  ;;  %v1706_v55 = vld [vmem:[%s17608_s1 + $0x80] sm:$0xff] }
0x14a6   : > { %v1714_v56 = vld [vmem:[%s17608_s1 + $0xc0] sm:$0xff] }
0x14bb   : > { %3695 = vrot.lane.b32.xlu0 %v17719_v23, %s16751_s30 }
0x14bf   : > { %3823 = vrot.lane.b32.xlu0 %v17717_v22, %s16752_s7 }
0x1532   : > { %v3686_v57 = vpop.xlane.xlu0 %3685 }
0x1533   : > { %v3687_v58 = vsub.f32 %v3680_v54, %v3686_v57  ;;  %v1699_v54 = vld [vmem:[%s17608_s1 + $0x48] sm:$0xff] }
0x1534   : > { %v13456_v57 = vcombine.low %v1691_v51, %v1699_v54 }
0x1535   : > { %v3688_v59 = vmul.f32 1.442695, %v3687_v58  ;;  %v13457_v58 = vcombine.high %v1691_v51, %v1699_v54  ;;  %v1802_v51 = vld [vmem:[%s17608_s1 + $0x380] sm:$0xff] }
0x1536   : > { %v3696_v60 = vpop.permute.xlu0 %3695 }
0x1537   : > { %15772 = vpow2.f32 %v3688_v59  ;;  %14849 = vmatpush3.msk.msra.mxu0 %vm2398_vm3, %v3696_v60  ;;  %v13471_v59 = vcombine.high %v1706_v55, %v1714_v56  ;;  %v1707_v60 = vld [vmem:[%s17608_s1 + $0x88] sm:$0xff] }
0x1538   : > { %14859 = vmatprep.subr.mxu0 %v16742_v3 }
0x1541   : > { %v15773_v61 = vpop.eup %15772 }
0x1542   : > { %v3690_v62 = vsel %vm2382_vm5, %v15773_v61, 0.0 }
0x1543   : > { %3691 = vadd.xlane.f32.xlu1 %v3690_v62 }
0x1554   : > { %3825 = vrot.lane.b32.xlu1 %v17721_v26, %s16752_s7  ;;  %v3824_v26 = vpop.permute.xlu0 %3823 }
0x1575   : > { %v3599_v63 = vpop.f32.mrb[32].mxu1 }
0x1576   : > { %v3605_v0 = vadd.f32 %v3599_v63, %v3388_v40  ;;  %v14841_v22 = vpop.f32.mrb[33].mxu1  ;;  %v13451_v40 = vld [vmem:[%s1045_s25] ss:$0 sm:$0xff]  ;;  %v1730_v63 = vld [vmem:[%s17608_s1 + $0x140] sm:$0xff] }
0x1577   : > { %v3602_v1 = vpop.f32.mrb[34].mxu1  ;;  %v1731_v22 = vld [vmem:[%s17608_s1 + $0x148] sm:$0xff] }
0x1578   : > { %v14842_v2 = vpop.f32.mrb[35].mxu1  ;;  %v13470_v1 = vcombine.low %v1706_v55, %v1714_v56  ;;  %v1811_v55 = vld [vmem:[%s17608_s1 + $0x3c8] sm:$0xff] }
0x15d0   : > { %v3692_v4 = vpop.xlane.xlu1 %3691 }
0x15d1   : > { %15774 = vrcp.f32 %v3692_v4 }
0x15d4   : > { %v3826_v8 = vpop.permute.xlu1 %3825 }
0x15db   : > { %v15775_v5 = vpop.eup %15774 }
0x15dc   : > { %v3694_v6 = vmul.f32 %v15775_v5, %v15773_v61  ;;  %v1722_v61 = vld [vmem:[%s17608_s1 + $0x100] sm:$0xff] }
0x15dd   : > { %v13487_v4 = vcombine.high %v1722_v61, %v1730_v63 }
0x15de   : > { %14851 = vmatmul.mubr.msk.f32.vlgmr.msra.gmra.mrb[34].mxu0 %vm2394_vm6, %v3694_v6  ;;  %v13486_v6 = vcombine.low %v1722_v61, %v1730_v63  ;;  %v1701_v63 = vld [vmem:[%s17608_s1 + $0x58] sm:$0xff] }
0x15df   : > { %14860 = vmatpush3.xpose.msk.msra.mxu0 %vm2305_vm4, %v3826_v8  ;;  %14861 = vmatprep.mubr.msk.f32.mxu0 %vm16743_vm1, %v16742_v3 }
0x15e0   : > { %14864 = vmatprep.subr.mxu0 %v16742_v3 }
0x15e2   : > { %14862 = vmatmul.mubr.msk.f32.vlgmr.msra.gmra.mrb[36].mxu0 %vm2305_vm4, %v3824_v26 }
0x15e3   : > { %14866 = vmatprep.mubr.msk.f32.mxu0 %vm16743_vm1, %v16742_v3 }
0x16b1   : > { %v3768_v11 = vpop.f32.mrb[34].mxu0 }
0x16b2   : > { %v3772_v15 = vpack.c.bf16 %v3768_v11, %v3768_v11  ;;  %v14852_v17 = vpop.f32.mrb[35].mxu0 }
0x16b4   : > { %14856 = vmatmul.mubr.msk.bf16.vlgmr.msra.gmra.mrb[36].mxu1 %vm2305_vm4, %v3772_v15 }
0x16b5   : > { %v3897_v18 = vpop.f32.mrb[36].mxu0  ;;  %14871 = vmatprep.mubr.msk.bf16.mxu1 %vm16743_vm1, %v16742_v3  ;;  %14870 = vmatpush3.bf16.msra.mxu1 %v15619_v29  ;;  %v1754_v29 = vld [vmem:[%s17608_s1 + $0x200] sm:$0xff] }
0x16b6   : > { %v14863_v19 = vpop.f32.mrb[37].mxu0  ;;  %v3901_v20 = vsel %vm2382_vm5, %v3897_v18, -inf  ;;  %4840 = vmatprep.subr.bf16.mxu1 %v13457_v58 }
0x16b7   : > { %3902 = vmax.xlane.f32.xlu1 %v3901_v20  ;;  %v1746_v19 = vld [vmem:[%s17608_s1 + $0x1c0] sm:$0xff]  ;;  %v1739_v20 = vld [vmem:[%s17608_s1 + $0x188] sm:$0xff] }
0x1744   : > { %v3903_v21 = vpop.xlane.xlu1 %3902 }
0x1745   : > { %v3904_v24 = vsub.f32 %v3897_v18, %v3903_v21  ;;  %v1738_v18 = vld [vmem:[%s17608_s1 + $0x180] sm:$0xff] }
0x1746   : > { %v13503_v21 = vcombine.high %v1738_v18, %v1746_v19 }
0x1747   : > { %v3905_v25 = vmul.f32 1.442695, %v3904_v24  ;;  %v1747_v24 = vld [vmem:[%s17608_s1 + $0x1c8] sm:$0xff] }
0x1749   : > { %15776 = vpow2.f32 %v3905_v25  ;;  %v13502_v25 = vcombine.low %v1738_v18, %v1746_v19  ;;  %v1709_v18 = vld [vmem:[%s17608_s1 + $0x98] sm:$0xff] }
0x174a   : > { %v1717_v19 = vld [vmem:[%s17608_s1 + $0xd8] sm:$0xff] }
0x1753   : > { %v15777_v27 = vpop.eup %15776 }
0x1754   : > { %v3907_v28 = vsel %vm2382_vm5, %v15777_v27, 0.0 }
0x1755   : > { %3908 = vadd.xlane.f32.xlu0 %v3907_v28  ;;  %v13505_v28 = vcombine.high %v1739_v20, %v1747_v24 }
0x176b   : > { %3912 = vrot.lane.b32.xlu0 %v17719_v23, %s16752_s7 }
0x1787   : > { %v3816_v30 = vpop.f32.mrb[36].mxu1 }
0x1788   : > { %v3822_v31 = vadd.f32 %v3816_v30, %v3605_v0  ;;  %v14857_v3 = vpop.f32.mrb[37].mxu1  ;;  %v1723_v0 = vld [vmem:[%s17608_s1 + $0x108] sm:$0xff]  ;;  %v1762_v30 = vld [vmem:[%s17608_s1 + $0x240] sm:$0xff] }
0x1789   : > { %v3819_v32 = vpop.f32.mrb[38].mxu1  ;;  %v13489_v5 = vcombine.high %v1723_v0, %v1731_v22  ;;  %v13488_v8 = vcombine.low %v1723_v0, %v1731_v22  ;;  %v13519_v3 = vcombine.high %v1754_v29, %v1762_v30 }
0x178a   : > { %v14858_v33 = vpop.f32.mrb[39].mxu1  ;;  %v1763_v32 = vld [vmem:[%s17608_s1 + $0x248] sm:$0xff] }
0x178b   : > { %v13518_v33 = vcombine.low %v1754_v29, %v1762_v30  ;;  %v1733_v29 = vld [vmem:[%s17608_s1 + $0x158] sm:$0xff] }
0x17e2   : > { %v3909_v34 = vpop.xlane.xlu0 %3908 }
0x17e3   : > { %15778 = vrcp.f32 %v3909_v34 }
0x17e6   : > { %v3913_v35 = vpop.permute.xlu0 %3912 }
0x17e7   : > { %14865 = vmatpush3.msk.msra.mxu0 %vm2398_vm3, %v3913_v35 }
0x17e8   : > { %4799 = vmatprep.subr.bf16.mxu0 %v13455_v53  ;;  %v1803_v53 = vld [vmem:[%s17608_s1 + $0x388] sm:$0xff] }
0x17e9   : > { %v13569_v58 = vcombine.high %v1803_v53, %v1811_v55 }
0x17ed   : > { %v15779_v36 = vpop.eup %15778 }
0x17ee   : > { %v3911_v37 = vmul.f32 %v15779_v36, %v15777_v27  ;;  %v13504_v27 = vcombine.low %v1739_v20, %v1747_v24  ;;  %v1770_v36 = vld [vmem:[%s17608_s1 + $0x280] sm:$0xff] }
0x17f0   : > { %14867 = vmatmul.mubr.msk.f32.vlgmr.msra.gmra.mrb[38].mxu0 %vm2394_vm6, %v3911_v37  ;;  %v1778_v37 = vld [vmem:[%s17608_s1 + $0x2c0] sm:$0xff] }
0x17f1   : > { %4831 = vmatprep.mubr.bf16.mxu0 %v16746_v7  ;;  %4800 = vmatpush1.bf16.msra.mxu0 %v13454_v52  ;;  %v1810_v52 = vld [vmem:[%s17608_s1 + $0x3c0] sm:$0xff] }
0x17f2   : > { %4801 = vmatprep.subr.bf16.mxu0 %v13471_v59  ;;  %v13567_v54 = vcombine.high %v1802_v51, %v1810_v52  ;;  %v13566_v56 = vcombine.low %v1802_v51, %v1810_v52  ;;  %v1692_v59 = vld [vmem:[%s17608_s1 + $0x10] sm:$0xff]  ;;  %v1781_v51 = vld [vmem:[%s17608_s1 + $0x2d8] sm:$0xff] }
0x17f5   : > { %4802 = vmatpush1.bf16.msra.mxu0 %v13470_v1 }
0x17f6   : > { %4803 = vmatprep.subr.bf16.mxu0 %v13487_v4 }
0x17f9   : > { %4804 = vmatpush1.bf16.msra.mxu0 %v13486_v6  ;;  %v13452_v6 = vld [vmem:[%s1053_s0] ss:$0 sm:$0xff] }
0x17fa   : > { %4805 = vmatprep.subr.bf16.mxu0 %v13503_v21 }
0x17fd   : > { %4806 = vmatpush1.bf16.msra.mxu0 %v13502_v25  ;;  %v13477_v25 = vcombine.high %v1709_v18, %v1717_v19 }
0x17fe   : > { %4807 = vmatprep.subr.bf16.mxu0 %v13519_v3 }
0x1801   : > { %4808 = vmatpush1.bf16.msra.mxu0 %v13518_v33  ;;  %v1740_v33 = vld [vmem:[%s17608_s1 + $0x190] sm:$0xff] }
0x18c3   : > { %v3985_v23 = vpop.f32.mrb[38].mxu0 }
0x18c4   : > { %v3989_v38 = vpack.c.bf16 %v3985_v23, %v3985_v23  ;;  %v14868_v39 = vpop.f32.mrb[39].mxu0  ;;  %v1771_v23 = vld [vmem:[%s17608_s1 + $0x288] sm:$0xff] }
0x18c5   : > { %v1779_v39 = vld [vmem:[%s17608_s1 + $0x2c8] sm:$0xff] }
0x18c6   : > { %14872 = vmatmul.mubr.msk.bf16.vlgmr.msra.gmra.mrb[40].mxu1 %vm2305_vm4, %v3989_v38  ;;  %v13535_v38 = vcombine.high %v1770_v36, %v1778_v37 }
0x18c7   : > { %4872 = vmatprep.mubr.bf16.mxu1 %v16746_v7  ;;  %4841 = vmatpush1.bf16.msra.mxu1 %v13456_v57  ;;  %v13568_v57 = vcombine.low %v1803_v53, %v1811_v55 }
0x18c8   : > { %4809 = vmatprep.subr.bf16.mxu0 %v13535_v38 }
0x1999   : > { %v4033_v41 = vpop.f32.mrb[40].mxu1 }
0x199a   : > { %v4039_v42 = vadd.f32 %v4033_v41, %v3822_v31  ;;  %v14873_v43 = vpop.f32.mrb[41].mxu1  ;;  %v1755_v31 = vld [vmem:[%s17608_s1 + $0x208] sm:$0xff]  ;;  %v13536_v41 = vcombine.low %v1771_v23, %v1779_v39 }
0x199b   : > { %v4036_v44 = vpop.f32.mrb[42].mxu1  ;;  %v13520_v34 = vcombine.low %v1755_v31, %v1763_v32  ;;  %v13521_v35 = vcombine.high %v1755_v31, %v1763_v32  ;;  %v1786_v43 = vld [vmem:[%s17608_s1 + $0x300] sm:$0xff]  ;;  %v13476_v31 = vcombine.low %v1709_v18, %v1717_v19 }
0x199c   : > { %v4046_v45 = vadd.f32 %v13451_v40, %v4039_v42  ;;  %v14874_v46 = vpop.f32.mrb[43].mxu1  ;;  %v13534_v40 = vcombine.low %v1770_v36, %v1778_v37  ;;  %v13537_v42 = vcombine.high %v1771_v23, %v1779_v39  ;;  %v1794_v44 = vld [vmem:[%s17608_s1 + $0x340] sm:$0xff]  ;;  %v1749_v36 = vld [vmem:[%s17608_s1 + $0x1d8] sm:$0xff] }
0x199d   : > { %v13551_v46 = vcombine.high %v1786_v43, %v1794_v44 }
0x199e   : > { %v4047_v47 = vadd.f32 %v4046_v45, %v17693_v9  ;;  %v1715_v9 = vld [vmem:[%s17608_s1 + $0xc8] sm:$0xff]  ;;  %4810 = vmatpush1.bf16.msra.mxu0 %v13534_v40  ;;  %v1756_v40 = vld [vmem:[%s17608_s1 + $0x210] sm:$0xff] }
0x199f   : > { %v13473_v62 = vcombine.high %v1707_v60, %v1715_v9  ;;  %v13472_v2 = vcombine.low %v1707_v60, %v1715_v9  ;;  %v1787_v45 = vld [vmem:[%s17608_s1 + $0x308] sm:$0xff]  ;;  %4811 = vmatprep.subr.bf16.mxu0 %v13551_v46  ;;  %v1700_v60 = vld [vmem:[%s17608_s1 + $0x50] sm:$0xff]  ;;  %v1693_v9 = vld [vmem:[%s17608_s1 + $0x18] sm:$0xff] }
0x19a0   : > { %v4048_v48 = vsel %vm2398_vm3, %v4047_v47, 0.0  ;;  %v13458_v61 = vcombine.low %v1692_v59, %v1700_v60  ;;  %v13460_v0 = vcombine.low %v1693_v9, %v1701_v63  ;;  %v13461_v22 = vcombine.high %v1693_v9, %v1701_v63  ;;  %v1804_v63 = vld [vmem:[%s17608_s1 + $0x390] sm:$0xff] }
0x19a1   : > { %4049 = vadd.xlane.f32.xlu1 %v4048_v48  ;;  %4842 = vmatprep.subr.bf16.mxu1 %v13473_v62  ;;  %v13550_v48 = vcombine.low %v1786_v43, %v1794_v44  ;;  %v13459_v62 = vcombine.high %v1692_v59, %v1700_v60  ;;  %v1765_v43 = vld [vmem:[%s17608_s1 + $0x258] sm:$0xff] }
0x19a2   : > { %4843 = vmatpush1.bf16.msra.mxu1 %v13472_v2  ;;  %v1797_v59 = vld [vmem:[%s17608_s1 + $0x358] sm:$0xff] }
0x19a3   : > { %4844 = vmatprep.subr.bf16.mxu1 %v13489_v5  ;;  %4812 = vmatpush1.bf16.msra.mxu0 %v13550_v48  ;;  %v1772_v48 = vld [vmem:[%s17608_s1 + $0x290] sm:$0xff] }
0x19a4   : > { %4813 = vmatprep.subr.bf16.mxu0 %v13567_v54 }
0x19a6   : > { %4845 = vmatpush1.bf16.msra.mxu1 %v13488_v8 }
0x19a7   : > { %4846 = vmatprep.subr.bf16.mxu1 %v13505_v28  ;;  %4814 = vmatpush1.bf16.msra.mxu0 %v13566_v56  ;;  %v1725_v28 = vld [vmem:[%s17608_s1 + $0x118] sm:$0xff]  ;;  %v1788_v56 = vld [vmem:[%s17608_s1 + $0x310] sm:$0xff] }
0x19a8   : > { %4881 = vmatprep.subr.bf16.mxu0 %v13459_v62  ;;  %v13493_v32 = vcombine.high %v1725_v28, %v1733_v29  ;;  %v13492_v23 = vcombine.low %v1725_v28, %v1733_v29  ;;  %v1719_v28 = vld [vmem:[%s17608_s1 + $0xe8] sm:$0xff] }
0x19aa   : > { %4847 = vmatpush1.bf16.msra.mxu1 %v13504_v27  ;;  %v1724_v27 = vld [vmem:[%s17608_s1 + $0x110] sm:$0xff] }
0x19ab   : > { %4848 = vmatprep.subr.bf16.mxu1 %v13521_v35  ;;  %v1741_v35 = vld [vmem:[%s17608_s1 + $0x198] sm:$0xff] }
0x19ac   : > { %v13509_v39 = vcombine.high %v1741_v35, %v1749_v36 }
0x19ae   : > { %4849 = vmatpush1.bf16.msra.mxu1 %v13520_v34  ;;  %v1748_v34 = vld [vmem:[%s17608_s1 + $0x1d0] sm:$0xff] }
0x19af   : > { %4850 = vmatprep.subr.bf16.mxu1 %v13537_v42  ;;  %v13507_v38 = vcombine.high %v1740_v33, %v1748_v34  ;;  %v1757_v42 = vld [vmem:[%s17608_s1 + $0x218] sm:$0xff]  ;;  %v13506_v44 = vcombine.low %v1740_v33, %v1748_v34  ;;  %v1734_v33 = vld [vmem:[%s17608_s1 + $0x160] sm:$0xff]  ;;  %v1727_v34 = vld [vmem:[%s17608_s1 + $0x128] sm:$0xff] }
0x19b0   : > { %v13524_v53 = vcombine.low %v1757_v42, %v1765_v43 }
0x19b2   : > { %4851 = vmatpush1.bf16.msra.mxu1 %v13536_v41  ;;  %v1764_v41 = vld [vmem:[%s17608_s1 + $0x250] sm:$0xff] }
0x19b3   : > { %v13523_v46 = vcombine.high %v1756_v40, %v1764_v41  ;;  %v13522_v52 = vcombine.low %v1756_v40, %v1764_v41  ;;  %v1750_v40 = vld [vmem:[%s17608_s1 + $0x1e0] sm:$0xff]  ;;  %v1743_v41 = vld [vmem:[%s17608_s1 + $0x1a8] sm:$0xff] }
0x1a2e   : > { %v4050_v26 = vpop.xlane.xlu1 %4049 }
0x1a2f   : > { %v4052_v10 = vmul.f32 0.0078125, %v4050_v26  ;;  %v13453_v26 = vld [vmem:[%s1061_s19] ss:$0 sm:$0xff] }
0x1a31   : > { %v17916_v11 = vsub.f32 %v4047_v47, %v4052_v10  ;;  %v1795_v47 = vld [vmem:[%s17608_s1 + $0x348] sm:$0xff] }
0x1a32   : > { %v13552_v49 = vcombine.low %v1787_v45, %v1795_v47  ;;  %v13553_v50 = vcombine.high %v1787_v45, %v1795_v47  ;;  %v13508_v45 = vcombine.low %v1741_v35, %v1749_v36  ;;  %v13525_v47 = vcombine.high %v1757_v42, %v1765_v43  ;;  %v1735_v35 = vld [vmem:[%s17608_s1 + $0x168] sm:$0xff] }
0x1a33   : > { %v4054_v15 = vmul.f32 %v17916_v11, %v17916_v11  ;;  %v1751_v42 = vld [vmem:[%s17608_s1 + $0x1e8] sm:$0xff] }
0x1a34   : > { %4852 = vmatprep.subr.bf16.mxu1 %v13553_v50  ;;  %v1773_v50 = vld [vmem:[%s17608_s1 + $0x298] sm:$0xff] }
0x1a35   : > { %v4055_v17 = vsel %vm2398_vm3, %v4054_v15, 0.0  ;;  %4853 = vmatpush1.bf16.msra.mxu1 %v13552_v49  ;;  %v1708_v15 = vld [vmem:[%s17608_s1 + $0x90] sm:$0xff]  ;;  %v13541_v55 = vcombine.high %v1773_v50, %v1781_v51  ;;  %v13540_v9 = vcombine.low %v1773_v50, %v1781_v51  ;;  %v1767_v50 = vld [vmem:[%s17608_s1 + $0x268] sm:$0xff] }
0x1a36   : > { %4056 = vadd.xlane.f32.xlu1 %v4055_v17  ;;  %4854 = vmatprep.subr.bf16.mxu1 %v13569_v58  ;;  %v1716_v17 = vld [vmem:[%s17608_s1 + $0xd0] sm:$0xff]  ;;  %v1789_v58 = vld [vmem:[%s17608_s1 + $0x318] sm:$0xff] }
0x1a37   : > { %v13475_v24 = vcombine.high %v1708_v15, %v1716_v17  ;;  %v13474_v30 = vcombine.low %v1708_v15, %v1716_v17  ;;  %v1780_v49 = vld [vmem:[%s17608_s1 + $0x2d0] sm:$0xff]  ;;  %v13557_v62 = vcombine.high %v1789_v58, %v1797_v59  ;;  %v1703_v15 = vld [vmem:[%s17608_s1 + $0x68] sm:$0xff] }
0x1a38   : > { %v13539_v54 = vcombine.high %v1772_v48, %v1780_v49  ;;  %v13538_v60 = vcombine.low %v1772_v48, %v1780_v49  ;;  %v1766_v48 = vld [vmem:[%s17608_s1 + $0x260] sm:$0xff]  ;;  %v1759_v49 = vld [vmem:[%s17608_s1 + $0x228] sm:$0xff] }
0x1a39   : > { %4855 = vmatpush1.bf16.msra.mxu1 %v13568_v57  ;;  %v1796_v57 = vld [vmem:[%s17608_s1 + $0x350] sm:$0xff] }
0x1a3a   : > { %4922 = vmatprep.subr.bf16.mxu1 %v13461_v22  ;;  %v1805_v22 = vld [vmem:[%s17608_s1 + $0x398] sm:$0xff] }
0x1ac3   : > { %v4057_v1 = vpop.xlane.xlu1 %4056 }
0x1ac4   : > { %v4058_v2 = vmul.f32 0.0078125, %v4057_v1  ;;  %v1813_v1 = vld [vmem:[%s17608_s1 + $0x3d8] sm:$0xff] }
0x1ac5   : > { %v13572_v18 = vcombine.low %v1805_v22, %v1813_v1 }
0x1ac6   : > { %v4059_v4 = vadd.f32 1e-05, %v4058_v2  ;;  %v13554_v2 = vcombine.low %v1788_v56, %v1796_v57 }
0x1ac8   : > { %15780 = vrsqrt.f32 %v4059_v4  ;;  %v13556_v4 = vcombine.low %v1789_v58, %v1797_v59  ;;  %v1783_v58 = vld [vmem:[%s17608_s1 + $0x2e8] sm:$0xff] }
0x1ad2   : > { %v15781_v5 = vpop.eup %15780 }
0x1ad3   : > { %v4061_v8 = vmul.f32 %v15781_v5, %v17916_v11  ;;  %v1732_v11 = vld [vmem:[%s17608_s1 + $0x150] sm:$0xff] }
0x1ad4   : > { %v13491_v3 = vcombine.high %v1724_v27, %v1732_v11  ;;  %v13490_v37 = vcombine.low %v1724_v27, %v1732_v11  ;;  %v1718_v27 = vld [vmem:[%s17608_s1 + $0xe0] sm:$0xff]  ;;  %v1711_v11 = vld [vmem:[%s17608_s1 + $0xa8] sm:$0xff] }
0x1ad5   : > { %v4068_v10 = vmul.f32 %v13452_v6, %v4061_v8  ;;  %v13573_v6 = vcombine.high %v1805_v22, %v1813_v1  ;;  %v1694_v8 = vld [vmem:[%s17608_s1 + $0x20] sm:$0xff]  ;;  %v1799_v22 = vld [vmem:[%s17608_s1 + $0x368] sm:$0xff] }
0x1ad7   : > { %v17954_v20 = vadd.f32 %v13453_v26, %v4068_v10  ;;  %v1702_v26 = vld [vmem:[%s17608_s1 + $0x60] sm:$0xff]  ;;  %v1695_v10 = vld [vmem:[%s17608_s1 + $0x28] sm:$0xff] }
0x1ad8   : > { %v13463_v19 = vcombine.high %v1694_v8, %v1702_v26  ;;  %v13462_v29 = vcombine.low %v1694_v8, %v1702_v26  ;;  %v1814_v8 = vld [vmem:[%s17608_s1 + $0x3e0] sm:$0xff]  ;;  %v1807_v26 = vld [vmem:[%s17608_s1 + $0x3a8] sm:$0xff] }
0x1ad9   : > { %v17958_v21 = vpack.c.bf16 %v17954_v20, %v17954_v20 }
0x1adb   : > { %4832 = vmatmul.mubr.bf16.vlgmr.msra.gmra.mrb[40].mxu0 %v17958_v21  ;;  %4873 = vmatmul.mubr.bf16.vlgmr.msra.gmra.mrb[44].mxu1 %v17958_v21 }
0x1adc   : > { %4882 = vmatpush1.bf16.msra.mxu0 %v13458_v61  ;;  %4923 = vmatpush1.bf16.msra.mxu1 %v13460_v0  ;;  %v13555_v61 = vcombine.high %v1788_v56, %v1796_v57  ;;  %v1812_v0 = vld [vmem:[%s17608_s1 + $0x3d0] sm:$0xff]  ;;  %v1782_v56 = vld [vmem:[%s17608_s1 + $0x2e0] sm:$0xff]  ;;  %v1775_v57 = vld [vmem:[%s17608_s1 + $0x2a8] sm:$0xff] }
0x1add   : > { %4883 = vmatprep.subr.bf16.mxu0 %v13475_v24  ;;  %4924 = vmatprep.subr.bf16.mxu1 %v13477_v25  ;;  %v13571_v5 = vcombine.high %v1804_v63, %v1812_v0  ;;  %v13570_v17 = vcombine.low %v1804_v63, %v1812_v0  ;;  %v13465_v24 = vcombine.high %v1695_v10, %v1703_v15  ;;  %v1710_v25 = vld [vmem:[%s17608_s1 + $0xa0] sm:$0xff]  ;;  %v1791_v0 = vld [vmem:[%s17608_s1 + $0x328] sm:$0xff] }
0x1ade   : > { %4913 = vmatprep.mubr.bf16.mxu0 %v16746_v7  ;;  %4954 = vmatprep.mubr.bf16.mxu1 %v16746_v7  ;;  %v13478_v36 = vcombine.low %v1710_v25, %v1718_v27  ;;  %v1798_v63 = vld [vmem:[%s17608_s1 + $0x360] sm:$0xff] }
0x1ae0   : > { %4884 = vmatpush1.bf16.msra.mxu0 %v13474_v30  ;;  %4925 = vmatpush1.bf16.msra.mxu1 %v13476_v31  ;;  %v13464_v30 = vcombine.low %v1695_v10, %v1703_v15  ;;  %v13479_v31 = vcombine.high %v1710_v25, %v1718_v27  ;;  %v1815_v10 = vld [vmem:[%s17608_s1 + $0x3e8] sm:$0xff]  ;;  %v1704_v25 = vld [vmem:[%s17608_s1 + $0x70] sm:$0xff]  ;;  %v1697_v27 = vld [vmem:[%s17608_s1 + $0x38] sm:$0xff] }
0x1ae1   : > { %4885 = vmatprep.subr.bf16.mxu0 %v13491_v3  ;;  %4926 = vmatprep.subr.bf16.mxu1 %v13493_v32  ;;  %v13481_v3 = vcombine.high %v1711_v11, %v1719_v28  ;;  %v1726_v32 = vld [vmem:[%s17608_s1 + $0x120] sm:$0xff] }
0x1ae2   : > { %v13494_v43 = vcombine.low %v1726_v32, %v1734_v33 }
0x1ae4   : > { %4886 = vmatpush1.bf16.msra.mxu0 %v13490_v37  ;;  %4927 = vmatpush1.bf16.msra.mxu1 %v13492_v23  ;;  %v13480_v37 = vcombine.low %v1711_v11, %v1719_v28  ;;  %v13495_v23 = vcombine.high %v1726_v32, %v1734_v33  ;;  %v1705_v11 = vld [vmem:[%s17608_s1 + $0x78] sm:$0xff]  ;;  %v1720_v32 = vld [vmem:[%s17608_s1 + $0xf0] sm:$0xff] }
0x1ae5   : > { %4887 = vmatprep.subr.bf16.mxu0 %v13507_v38  ;;  %4928 = vmatprep.subr.bf16.mxu1 %v13509_v39  ;;  %v13497_v38 = vcombine.high %v1727_v34, %v1735_v35  ;;  %v1742_v39 = vld [vmem:[%s17608_s1 + $0x1a0] sm:$0xff]  ;;  %v1713_v33 = vld [vmem:[%s17608_s1 + $0xb8] sm:$0xff] }
0x1ae6   : > { %v13510_v51 = vcombine.low %v1742_v39, %v1750_v40 }
0x1ae8   : > { %4888 = vmatpush1.bf16.msra.mxu0 %v13506_v44  ;;  %4929 = vmatpush1.bf16.msra.mxu1 %v13508_v45  ;;  %v13496_v44 = vcombine.low %v1727_v34, %v1735_v35  ;;  %v13511_v45 = vcombine.high %v1742_v39, %v1750_v40  ;;  %v1721_v34 = vld [vmem:[%s17608_s1 + $0xf8] sm:$0xff]  ;;  %v1736_v39 = vld [vmem:[%s17608_s1 + $0x170] sm:$0xff] }
0x1ae9   : > { %4889 = vmatprep.subr.bf16.mxu0 %v13523_v46  ;;  %4930 = vmatprep.subr.bf16.mxu1 %v13525_v47  ;;  %v13513_v46 = vcombine.high %v1743_v41, %v1751_v42  ;;  %v1758_v47 = vld [vmem:[%s17608_s1 + $0x220] sm:$0xff]  ;;  %v1729_v40 = vld [vmem:[%s17608_s1 + $0x138] sm:$0xff] }
0x1aea   : > { %v13526_v59 = vcombine.low %v1758_v47, %v1766_v48 }
0x1aec   : > { %4890 = vmatpush1.bf16.msra.mxu0 %v13522_v52  ;;  %4931 = vmatpush1.bf16.msra.mxu1 %v13524_v53  ;;  %v13512_v52 = vcombine.low %v1743_v41, %v1751_v42  ;;  %v13527_v53 = vcombine.high %v1758_v47, %v1766_v48  ;;  %v1737_v41 = vld [vmem:[%s17608_s1 + $0x178] sm:$0xff]  ;;  %v1752_v47 = vld [vmem:[%s17608_s1 + $0x1f0] sm:$0xff] }
0x1aed   : > { %4891 = vmatprep.subr.bf16.mxu0 %v13539_v54  ;;  %4932 = vmatprep.subr.bf16.mxu1 %v13541_v55  ;;  %v13529_v54 = vcombine.high %v1759_v49, %v1767_v50  ;;  %v1774_v55 = vld [vmem:[%s17608_s1 + $0x2a0] sm:$0xff]  ;;  %v1745_v48 = vld [vmem:[%s17608_s1 + $0x1b8] sm:$0xff] }
0x1aee   : > { %v13542_v1 = vcombine.low %v1774_v55, %v1782_v56 }
0x1af0   : > { %4892 = vmatpush1.bf16.msra.mxu0 %v13538_v60  ;;  %4933 = vmatpush1.bf16.msra.mxu1 %v13540_v9  ;;  %v13528_v60 = vcombine.low %v1759_v49, %v1767_v50  ;;  %v13543_v9 = vcombine.high %v1774_v55, %v1782_v56  ;;  %v1753_v49 = vld [vmem:[%s17608_s1 + $0x1f8] sm:$0xff]  ;;  %v1768_v55 = vld [vmem:[%s17608_s1 + $0x270] sm:$0xff] }
0x1af1   : > { %4893 = vmatprep.subr.bf16.mxu0 %v13555_v61  ;;  %4934 = vmatprep.subr.bf16.mxu1 %v13557_v62  ;;  %v13545_v61 = vcombine.high %v1775_v57, %v1783_v58  ;;  %v1790_v62 = vld [vmem:[%s17608_s1 + $0x320] sm:$0xff]  ;;  %v1761_v56 = vld [vmem:[%s17608_s1 + $0x238] sm:$0xff] }
0x1af2   : > { %v13558_v15 = vcombine.low %v1790_v62, %v1798_v63 }
0x1af4   : > { %4894 = vmatpush1.bf16.msra.mxu0 %v13554_v2  ;;  %4935 = vmatpush1.bf16.msra.mxu1 %v13556_v4  ;;  %v13544_v2 = vcombine.low %v1775_v57, %v1783_v58  ;;  %v13559_v4 = vcombine.high %v1790_v62, %v1798_v63  ;;  %v1769_v57 = vld [vmem:[%s17608_s1 + $0x278] sm:$0xff] }
0x1af5   : > { %4895 = vmatprep.subr.bf16.mxu0 %v13571_v5  ;;  %4936 = vmatprep.subr.bf16.mxu1 %v13573_v6  ;;  %v13561_v5 = vcombine.high %v1791_v0, %v1799_v22  ;;  %v1806_v6 = vld [vmem:[%s17608_s1 + $0x3a0] sm:$0xff]  ;;  %v1777_v62 = vld [vmem:[%s17608_s1 + $0x2b8] sm:$0xff] }
0x1af6   : > { %v13574_v28 = vcombine.low %v1806_v6, %v1814_v8  ;;  %v1785_v63 = vld [vmem:[%s17608_s1 + $0x2f8] sm:$0xff] }
0x1af8   : > { %4896 = vmatpush1.bf16.msra.mxu0 %v13570_v17  ;;  %4937 = vmatpush1.bf16.msra.mxu1 %v13572_v18  ;;  %v13560_v17 = vcombine.low %v1791_v0, %v1799_v22  ;;  %v13575_v18 = vcombine.high %v1806_v6, %v1814_v8  ;;  %v13532_v22 = vcombine.low %v1761_v56, %v1769_v57  ;;  %v1793_v6 = vld [vmem:[%s17608_s1 + $0x338] sm:$0xff] }
0x1af9   : > { %4963 = vmatprep.subr.bf16.mxu0 %v13463_v19  ;;  %5004 = vmatprep.subr.bf16.mxu1 %v13465_v24  ;;  %v13577_v19 = vcombine.high %v1807_v26, %v1815_v10  ;;  %v1696_v24 = vld [vmem:[%s17608_s1 + $0x30] sm:$0xff]  ;;  %v1801_v8 = vld [vmem:[%s17608_s1 + $0x378] sm:$0xff] }
0x1afa   : > { %v13466_v35 = vcombine.low %v1696_v24, %v1704_v25 }
0x1afb   : > { %4914 = vmatmul.mubr.bf16.vlgmr.msra.gmra.mrb[44].mxu0 %v17958_v21  ;;  %4955 = vmatmul.mubr.bf16.vlgmr.msra.gmra.mrb[48].mxu1 %v17958_v21 }
0x1afc   : > { %4964 = vmatpush1.bf16.msra.mxu0 %v13462_v29  ;;  %5005 = vmatpush1.bf16.msra.mxu1 %v13464_v30  ;;  %v13576_v29 = vcombine.low %v1807_v26, %v1815_v10  ;;  %v13467_v30 = vcombine.high %v1696_v24, %v1704_v25  ;;  %v13548_v10 = vcombine.low %v1777_v62, %v1785_v63  ;;  %v1809_v24 = vld [vmem:[%s17608_s1 + $0x3b8] sm:$0xff] }
0x1afd   : > { %4965 = vmatprep.subr.bf16.mxu0 %v13479_v31  ;;  %5006 = vmatprep.subr.bf16.mxu1 %v13481_v3  ;;  %v13469_v31 = vcombine.high %v1697_v27, %v1705_v11  ;;  %v1712_v3 = vld [vmem:[%s17608_s1 + $0xb0] sm:$0xff]  ;;  %v1817_v25 = vld [vmem:[%s17608_s1 + $0x3f8] sm:$0xff] }
0x1afe   : > { %4995 = vmatprep.mubr.bf16.mxu0 %v16746_v7  ;;  %5036 = vmatprep.mubr.bf16.mxu1 %v16746_v7  ;;  %v13482_v42 = vcombine.low %v1712_v3, %v1720_v32 }
0x1b00   : > { %4966 = vmatpush1.bf16.msra.mxu0 %v13478_v36  ;;  %5007 = vmatpush1.bf16.msra.mxu1 %v13480_v37  ;;  %v13468_v36 = vcombine.low %v1697_v27, %v1705_v11  ;;  %v13483_v37 = vcombine.high %v1712_v3, %v1720_v32  ;;  %v13564_v11 = vcombine.low %v1793_v6, %v1801_v8  ;;  %v15620_v3 = vld [vmem:[%s17618_s22 + $0x40] sm:$0xff]  }
0x1b01   : > { %4967 = vmatprep.subr.bf16.mxu0 %v13495_v23  ;;  %5008 = vmatprep.subr.bf16.mxu1 %v13497_v38  ;;  %v13485_v23 = vcombine.high %v1713_v33, %v1721_v34  ;;  %v1728_v38 = vld [vmem:[%s17608_s1 + $0x130] sm:$0xff]  ;;  %v15621_v32 = vld [vmem:[%s17618_s22 + $0xc0] sm:$0xff]  }
0x1b02   : > { %v13498_v50 = vcombine.low %v1728_v38, %v1736_v39 }
0x1b04   : > { %4968 = vmatpush1.bf16.msra.mxu0 %v13494_v43  ;;  %5009 = vmatpush1.bf16.msra.mxu1 %v13496_v44  ;;  %v13484_v43 = vcombine.low %v1713_v33, %v1721_v34  ;;  %v13499_v44 = vcombine.high %v1728_v38, %v1736_v39  ;;  %v15622_v33 = vld [vmem:[%s17618_s22] sm:$0xff]   ;;  %v15628_v38 = vld [vmem:[%s17618_s22 + $0x50] sm:$0xff]  }
0x1b05   : > { %4969 = vmatprep.subr.bf16.mxu0 %v13511_v45  ;;  %5010 = vmatprep.subr.bf16.mxu1 %v13513_v46  ;;  %v13501_v45 = vcombine.high %v1729_v40, %v1737_v41  ;;  %v1744_v46 = vld [vmem:[%s17608_s1 + $0x1b0] sm:$0xff]  ;;  %v15623_v34 = vld [vmem:[%s17618_s22 + $0x80] sm:$0xff]  }
0x1b06   : > { %v13514_v58 = vcombine.low %v1744_v46, %v1752_v47  ;;  %v15629_v39 = vld [vmem:[%s17618_s22 + $0xd0] sm:$0xff]  }
0x1b08   : > { %4970 = vmatpush1.bf16.msra.mxu0 %v13510_v51  ;;  %5011 = vmatpush1.bf16.msra.mxu1 %v13512_v52  ;;  %v13500_v51 = vcombine.low %v1729_v40, %v1737_v41  ;;  %v13515_v52 = vcombine.high %v1744_v46, %v1752_v47  ;;  %v15630_v40 = vld [vmem:[%s17618_s22 + $0x10] sm:$0xff]   ;;  %v15637_v46 = vld [vmem:[%s17618_s22 + $0xe0] sm:$0xff]  }
0x1b09   : > { %4971 = vmatprep.subr.bf16.mxu0 %v13527_v53  ;;  %5012 = vmatprep.subr.bf16.mxu1 %v13529_v54  ;;  %v13517_v53 = vcombine.high %v1745_v48, %v1753_v49  ;;  %v1760_v54 = vld [vmem:[%s17608_s1 + $0x230] sm:$0xff]  ;;  %v15638_v47 = vld [vmem:[%s17618_s22 + $0x20] sm:$0xff]  }
0x1b0a   : > { %v13530_v0 = vcombine.low %v1760_v54, %v1768_v55  ;;  %v15631_v41 = vld [vmem:[%s17618_s22 + $0x90] sm:$0xff]  }
0x1b0c   : > { %4972 = vmatpush1.bf16.msra.mxu0 %v13526_v59  ;;  %5013 = vmatpush1.bf16.msra.mxu1 %v13528_v60  ;;  %v13531_v59 = vcombine.high %v1760_v54, %v1768_v55  ;;  %v13533_v60 = vcombine.high %v1761_v56, %v1769_v57  ;;  %v15645_v54 = vld [vmem:[%s17618_s22 + $0xf0] sm:$0xff]   ;;  %v15648_v57 = vld [vmem:[%s17618_s22 + $0x78] sm:$0xff]  }
0x1b0d   : > { %4973 = vmatprep.subr.bf16.mxu0 %v13543_v9  ;;  %5014 = vmatprep.subr.bf16.mxu1 %v13545_v61  ;;  %v1776_v9 = vld [vmem:[%s17608_s1 + $0x2b0] sm:$0xff] }
0x1b0e   : > { %v1784_v61 = vld [vmem:[%s17608_s1 + $0x2f0] sm:$0xff] }
0x1b0f   : > { %v13546_v26 = vcombine.low %v1776_v9, %v1784_v61  ;;  %v15646_v55 = vld [vmem:[%s17618_s22 + $0x30] sm:$0xff]  }
0x1b10   : > { %4974 = vmatpush1.bf16.msra.mxu0 %v13542_v1  ;;  %5015 = vmatpush1.bf16.msra.mxu1 %v13544_v2  ;;  %v13547_v1 = vcombine.high %v1776_v9, %v1784_v61  ;;  %v13549_v2 = vcombine.high %v1777_v62, %v1785_v63  ;;  %v15647_v56 = vld [vmem:[%s17618_s22 + $0xb0] sm:$0xff]   ;;  %v15653_v9 = vld [vmem:[%s17618_s22 + $0x1c0] sm:$0xff]   ;;  %v4093_v62 = vsub.s32 3, %v17702_v12 }
0x1b11   : > { %4975 = vmatprep.subr.bf16.mxu0 %v13559_v4  ;;  %5016 = vmatprep.subr.bf16.mxu1 %v13561_v5  ;;  %v1792_v4 = vld [vmem:[%s17608_s1 + $0x330] sm:$0xff] }
0x1b12   : > { %v1800_v5 = vld [vmem:[%s17608_s1 + $0x370] sm:$0xff] }
0x1b13   : > { %v13562_v27 = vcombine.low %v1792_v4, %v1800_v5  ;;  %v18097_v61 = vld [vmem:[%s17615_s3] sm:$0xff] }
0x1b14   : > { %4976 = vmatpush1.bf16.msra.mxu0 %v13558_v15  ;;  %5017 = vmatpush1.bf16.msra.mxu1 %v13560_v17  ;;  %v13563_v15 = vcombine.high %v1792_v4, %v1800_v5  ;;  %v13565_v17 = vcombine.high %v1793_v6, %v1801_v8  ;;  %v4082_v63 = vrot.slane %v18097_v61, %v17705_v13 }
0x1b15   : > { %4977 = vmatprep.subr.bf16.mxu0 %v13575_v18  ;;  %5018 = vmatprep.subr.bf16.mxu1 %v13577_v19  ;;  %v1808_v18 = vld [vmem:[%s17608_s1 + $0x3b0] sm:$0xff] }
0x1b16   : > { %v1816_v19 = vld [vmem:[%s17608_s1 + $0x3f0] sm:$0xff] }
0x1b18   : > { %4978 = vmatpush1.bf16.msra.mxu0 %v13574_v28  ;;  %5019 = vmatpush1.bf16.msra.mxu1 %v13576_v29  ;;  %v13579_v28 = vcombine.high %v1808_v18, %v1816_v19  ;;  %v13581_v29 = vcombine.high %v1809_v24, %v1817_v25 }
0x1b19   : > { %5045 = vmatprep.subr.bf16.mxu0 %v13467_v30  ;;  %5086 = vmatprep.subr.bf16.mxu1 %v13469_v31  ;;  %v13578_v30 = vcombine.low %v1808_v18, %v1816_v19  ;;  %v13580_v31 = vcombine.low %v1809_v24, %v1817_v25 }
0x1b1b   : > { %4996 = vmatmul.mubr.bf16.vlgmr.msra.gmra.mrb[48].mxu0 %v17958_v21  ;;  %5037 = vmatmul.mubr.bf16.vlgmr.msra.gmra.mrb[52].mxu1 %v17958_v21 }
0x1b1c   : > { %5046 = vmatpush1.bf16.msra.mxu0 %v13466_v35  ;;  %5087 = vmatpush1.bf16.msra.mxu1 %v13468_v36  ;;  %v15624_v35 = vld [vmem:[%s17618_s22 + $0x48] sm:$0xff]  }
0x1b1d   : > { %5047 = vmatprep.subr.bf16.mxu0 %v13483_v37  ;;  %5088 = vmatprep.subr.bf16.mxu1 %v13485_v23  ;;  %v15625_v36 = vld [vmem:[%s17618_s22 + $0xc8] sm:$0xff]  }
0x1b1e   : > { %5077 = vmatprep.mubr.bf16.mxu0 %v16746_v7  ;;  %5118 = vmatprep.mubr.bf16.mxu1 %v16746_v7  ;;  %v13516_v7 = vcombine.low %v1745_v48, %v1753_v49  ;;  %v15626_v37 = vld [vmem:[%s17618_s22 + $0x8] sm:$0xff]   ;;  %v15639_v48 = vld [vmem:[%s17618_s22 + $0xa0] sm:$0xff]  }
0x1b1f   : > { %v15627_v23 = vld [vmem:[%s17618_s22 + $0x88] sm:$0xff]  }
0x1b20   : > { %5048 = vmatpush1.bf16.msra.mxu0 %v13482_v42  ;;  %5089 = vmatpush1.bf16.msra.mxu1 %v13484_v43  ;;  %v15633_v42 = vld [vmem:[%s17618_s22 + $0xd8] sm:$0xff]   ;;  %v15640_v49 = vld [vmem:[%s17618_s22 + $0x68] sm:$0xff]  }
0x1b21   : > { %5049 = vmatprep.subr.bf16.mxu0 %v13499_v44  ;;  %5090 = vmatprep.subr.bf16.mxu1 %v13501_v45  ;;  %v15634_v43 = vld [vmem:[%s17618_s22 + $0x18] sm:$0xff]   ;;  %v15636_v45 = vld [vmem:[%s17618_s22 + $0x60] sm:$0xff]  }
0x1b22   : > { %v15635_v44 = vld [vmem:[%s17618_s22 + $0x98] sm:$0xff]  }
0x1b24   : > { %5050 = vmatpush1.bf16.msra.mxu0 %v13498_v50  ;;  %5091 = vmatpush1.bf16.msra.mxu1 %v13500_v51  ;;  %v15641_v50 = vld [vmem:[%s17618_s22 + $0xe8] sm:$0xff]  }
0x1b25   : > { %5051 = vmatprep.subr.bf16.mxu0 %v13515_v52  ;;  %5092 = vmatprep.subr.bf16.mxu1 %v13517_v53  ;;  %v15642_v51 = vld [vmem:[%s17618_s22 + $0x28] sm:$0xff]   ;;  %v15644_v53 = vld [vmem:[%s17618_s22 + $0x70] sm:$0xff]  }
0x1b26   : > { %v15643_v52 = vld [vmem:[%s17618_s22 + $0xa8] sm:$0xff]  }
0x1b28   : > { %5052 = vmatpush1.bf16.msra.mxu0 %v13514_v58  ;;  %5093 = vmatpush1.bf16.msra.mxu1 %v13516_v7  ;;  %v15649_v58 = vld [vmem:[%s17618_s22 + $0xf8] sm:$0xff]  }
0x1b29   : > { %5053 = vmatprep.subr.bf16.mxu0 %v13531_v59  ;;  %5094 = vmatprep.subr.bf16.mxu1 %v13533_v60  ;;  %v15650_v7 = vld [vmem:[%s17618_s22 + $0x38] sm:$0xff]   ;;  %v15652_v60 = vld [vmem:[%s17618_s22 + $0x140] sm:$0xff]  }
0x1b2a   : > { %v15651_v59 = vld [vmem:[%s17618_s22 + $0xb8] sm:$0xff]  }
0x1b2c   : > { %5054 = vmatpush1.bf16.msra.mxu0 %v13530_v0  ;;  %5095 = vmatpush1.bf16.msra.mxu1 %v13532_v22  ;;  %v4090_v0 = vrot.slane %v18097_v61, %v17708_v14  ;;  %v4086_v22 = vrot.slane %v18097_v61, %v17712_v16 }
0x1b2d   : > { %5055 = vmatprep.subr.bf16.mxu0 %v13547_v1  ;;  %5096 = vmatprep.subr.bf16.mxu1 %v13549_v2  ;;  %v4094_v1 = vrot.slane %v18097_v61, %v4093_v62 }
0x1b30   : > { %5056 = vmatpush1.bf16.msra.mxu0 %v13546_v26  ;;  %5097 = vmatpush1.bf16.msra.mxu1 %v13548_v10 }
0x1b31   : > { %5057 = vmatprep.subr.bf16.mxu0 %v13563_v15  ;;  %5098 = vmatprep.subr.bf16.mxu1 %v13565_v17 }
0x1b34   : > { %5058 = vmatpush1.bf16.msra.mxu0 %v13562_v27  ;;  %5099 = vmatpush1.bf16.msra.mxu1 %v13564_v11 }
0x1b35   : > { %5059 = vmatprep.subr.bf16.mxu0 %v13579_v28  ;;  %5100 = vmatprep.subr.bf16.mxu1 %v13581_v29 }
0x1b38   : > { %5060 = vmatpush1.bf16.msra.mxu0 %v13578_v30  ;;  %5101 = vmatpush1.bf16.msra.mxu1 %v13580_v31  ;;  %v15654_v31 = vld [vmem:[%s17618_s22 + $0x100] sm:$0xff]  }
0x1b39   : > { %14180 = vmatprep.subr.bf16.mxu0 %v15620_v3  ;;  %14202 = vmatprep.subr.bf16.mxu1 %v15621_v32  ;;  %v15655_v3 = vld [vmem:[%s17618_s22 + $0x180] sm:$0xff]  }
0x1b3b   : > { %5078 = vmatmul.mubr.bf16.vlgmr.msra.gmra.mrb[52].mxu0 %v17958_v21  ;;  %5119 = vmatmul.mubr.bf16.vlgmr.msra.gmra.mrb[56].mxu1 %v17958_v21  ;;  %v15632_v21 = vld [vmem:[%s17618_s22 + $0x58] sm:$0xff]  }
0x1b3c   : > { %14181 = vmatpush3.bf16.msra.mxu0 %v15622_v33  ;;  %14203 = vmatpush3.bf16.msra.mxu1 %v15623_v34  ;;  %v15656_v34 = vld [vmem:[%s17618_s22 + $0x148] sm:$0xff]  }
0x1b3d   : > { %14182 = vmatprep.subr.bf16.mxu0 %v15624_v35  ;;  %14204 = vmatprep.subr.bf16.mxu1 %v15625_v36  ;;  %v15657_v35 = vld [vmem:[%s17618_s22 + $0x1c8] sm:$0xff]  }
0x1b3e   : > { %v15658_v36 = vld [vmem:[%s17618_s22 + $0x108] sm:$0xff]  }
0x1b40   : > { %14183 = vmatpush3.bf16.msra.mxu0 %v15626_v37  ;;  %14205 = vmatpush3.bf16.msra.mxu1 %v15627_v23  ;;  %v15659_v37 = vld [vmem:[%s17618_s22 + $0x188] sm:$0xff]   ;;  %v15660_v23 = vld [vmem:[%s17618_s22 + $0x150] sm:$0xff]  }
0x1b41   : > { %14184 = vmatprep.subr.bf16.mxu0 %v15628_v38  ;;  %14206 = vmatprep.subr.bf16.mxu1 %v15629_v39  ;;  %v15661_v38 = vld [vmem:[%s17618_s22 + $0x1d0] sm:$0xff]  }
0x1b42   : > { %v15662_v39 = vld [vmem:[%s17618_s22 + $0x110] sm:$0xff]  }
0x1b44   : > { %14185 = vmatpush3.bf16.msra.mxu0 %v15630_v40  ;;  %14207 = vmatpush3.bf16.msra.mxu1 %v15631_v41  ;;  %v15663_v40 = vld [vmem:[%s17618_s22 + $0x190] sm:$0xff]   ;;  %v15664_v41 = vld [vmem:[%s17618_s22 + $0x158] sm:$0xff]  }
0x1b45   : > { %14186 = vmatprep.subr.bf16.mxu0 %v15632_v21  ;;  %14208 = vmatprep.subr.bf16.mxu1 %v15633_v42  ;;  %v15665_v21 = vld [vmem:[%s17618_s22 + $0x1d8] sm:$0xff]  }
0x1b46   : > { %v15666_v42 = vld [vmem:[%s17618_s22 + $0x118] sm:$0xff]  }
0x1b48   : > { %14187 = vmatpush3.bf16.msra.mxu0 %v15634_v43  ;;  %14209 = vmatpush3.bf16.msra.mxu1 %v15635_v44  ;;  %v15667_v43 = vld [vmem:[%s17618_s22 + $0x198] sm:$0xff]   ;;  %v15668_v44 = vld [vmem:[%s17618_s22 + $0x160] sm:$0xff]  }
0x1b49   : > { %14188 = vmatprep.subr.bf16.mxu0 %v15636_v45  ;;  %14210 = vmatprep.subr.bf16.mxu1 %v15637_v46  ;;  %v15669_v45 = vld [vmem:[%s17618_s22 + $0x1e0] sm:$0xff]  }
0x1b4a   : > { %v15670_v46 = vld [vmem:[%s17618_s22 + $0x120] sm:$0xff]  }
0x1b4c   : > { %14189 = vmatpush3.bf16.msra.mxu0 %v15638_v47  ;;  %14211 = vmatpush3.bf16.msra.mxu1 %v15639_v48  ;;  %v15671_v47 = vld [vmem:[%s17618_s22 + $0x1a0] sm:$0xff]   ;;  %v15672_v48 = vld [vmem:[%s17618_s22 + $0x168] sm:$0xff]  }
0x1b4d   : > { %14190 = vmatprep.subr.bf16.mxu0 %v15640_v49  ;;  %14212 = vmatprep.subr.bf16.mxu1 %v15641_v50  ;;  %v15673_v49 = vld [vmem:[%s17618_s22 + $0x1e8] sm:$0xff]   ;;  %v4097_v50 = vsub.s32 4, %v17702_v12 }
0x1b50   : > { %14191 = vmatpush3.bf16.msra.mxu0 %v15642_v51  ;;  %14213 = vmatpush3.bf16.msra.mxu1 %v15643_v52  ;;  %v4105_v51 = vsub.s32 6, %v17702_v12  ;;  %v15674_v52 = vld [vmem:[%s17618_s22 + $0x128] sm:$0xff]  }
0x1b51   : > { %14192 = vmatprep.subr.bf16.mxu0 %v15644_v53  ;;  %14214 = vmatprep.subr.bf16.mxu1 %v15645_v54  ;;  %v15675_v53 = vld [vmem:[%s17618_s22 + $0x1a8] sm:$0xff]   ;;  %v4101_v54 = vsub.s32 5, %v17702_v12 }
0x1b54   : > { %14193 = vmatpush3.bf16.msra.mxu0 %v15646_v55  ;;  %14215 = vmatpush3.bf16.msra.mxu1 %v15647_v56  ;;  %v4109_v55 = vsub.s32 7, %v17702_v12  ;;  %v15676_v56 = vld [vmem:[%s17618_s22 + $0x170] sm:$0xff]  }
0x1b55   : > { %14194 = vmatprep.subr.bf16.mxu0 %v15648_v57  ;;  %14216 = vmatprep.subr.bf16.mxu1 %v15649_v58  ;;  %v15677_v57 = vld [vmem:[%s17618_s22 + $0x1f0] sm:$0xff]   ;;  %v4098_v58 = vrot.slane %v18097_v61, %v4097_v50 }
0x1b58   : > { %14195 = vmatpush3.bf16.msra.mxu0 %v15650_v7  ;;  %14217 = vmatpush3.bf16.msra.mxu1 %v15651_v59  ;;  %v4106_v7 = vrot.slane %v18097_v61, %v4105_v51  ;;  %v4102_v59 = vrot.slane %v18097_v61, %v4101_v54 }
0x1b59   : > { %14224 = vmatprep.subr.bf16.mxu0 %v15652_v60  ;;  %14246 = vmatprep.subr.bf16.mxu1 %v15653_v9  ;;  %v4110_v60 = vrot.slane %v18097_v61, %v4109_v55  ;;  %v15678_v9 = vld [vmem:[%s17618_s22 + $0x130] sm:$0xff]  }
0x1bae   : > { %v4833_v2 = vpop.f32.mrb[40].mxu0  ;;  %v4874_v4 = vpop.f32.mrb[44].mxu1 }
0x1baf   : > { %v4834_v5 = vadd.f32 %v4833_v2, %v4082_v63  ;;  %v4875_v6 = vadd.f32 %v4874_v4, %v4090_v0  ;;  %v4835_v8 = vpop.f32.mrb[41].mxu0  ;;  %v4876_v26 = vpop.f32.mrb[45].mxu1  ;;  %v15679_v63 = vld [vmem:[%s17618_s22 + $0x1b0] sm:$0xff]   ;;  %v15680_v0 = vld [vmem:[%s17618_s22 + $0x178] sm:$0xff]  }
0x1bb0   : > { %v4836_v10 = vadd.f32 %v4835_v8, %v4086_v22  ;;  %v4877_v15 = vadd.f32 %v4876_v26, %v4094_v1  ;;  %v4837_v17 = vpop.f32.mrb[42].mxu0  ;;  %v4878_v18 = vpop.f32.mrb[46].mxu1  ;;  %v15681_v22 = vld [vmem:[%s17618_s22 + $0x1f8] sm:$0xff]  }
0x1bb1   : > { %v5127_v19 = vmax.f32 %v4834_v5, 0.0  ;;  %v5129_v24 = vmax.f32 %v4875_v6, 0.0  ;;  %v4838_v25 = vpop.f32.mrb[43].mxu0  ;;  %v4879_v27 = vpop.f32.mrb[47].mxu1  ;;  %v15682_v17 = vld [vmem:[%s17618_s22 + $0x138] sm:$0xff]  }
0x1bb2   : > { %v5128_v11 = vmax.f32 %v4836_v10, 0.0  ;;  %v5130_v28 = vmax.f32 %v4877_v15, 0.0  ;;  %v15683_v18 = vld [vmem:[%s17618_s22 + $0x1b8] sm:$0xff]  }
0x1bb3   : > { %v5143_v32 = vpack.c.bf16 %v5127_v19, %v5127_v19  ;;  %v5145_v33 = vpack.c.bf16 %v5129_v24, %v5129_v24 }
0x1bb4   : > { %v5144_v29 = vpack.c.bf16 %v5128_v11, %v5128_v11  ;;  %v5146_v30 = vpack.c.bf16 %v5130_v28, %v5130_v28  ;;  %v15684_v11 = vld [vmem:[%s17618_s22 + $0x240] sm:$0xff]  }
0x1bb5   : > { %v15685_v28 = vld [vmem:[%s17618_s22 + $0x2c0] sm:$0xff]  }
0x1bb6   : > { %5965 = vmatprep.mubr.bf16.mxu0 %v5144_v29  ;;  %6005 = vmatprep.mubr.bf16.mxu1 %v5146_v30 }
0x1bb7   : > { %5966 = vmatmul.mubr.bf16.vlgmr.msra.gmra.mrb[56].mxu0 %v5143_v32  ;;  %6006 = vmatmul.mubr.bf16.vlgmr.msra.gmra.mrb[60].mxu1 %v5145_v33  ;;  %v15686_v32 = vld [vmem:[%s17618_s22 + $0x200] sm:$0xff]  }
0x1bb8   : > { %14225 = vmatpush3.bf16.msra.mxu0 %v15654_v31  ;;  %14247 = vmatpush3.bf16.msra.mxu1 %v15655_v3  ;;  %v15687_v33 = vld [vmem:[%s17618_s22 + $0x280] sm:$0xff]  }
0x1bb9   : > { %14226 = vmatprep.subr.bf16.mxu0 %v15656_v34  ;;  %14248 = vmatprep.subr.bf16.mxu1 %v15657_v35 }
0x1bbc   : > { %14227 = vmatpush3.bf16.msra.mxu0 %v15658_v36  ;;  %14249 = vmatpush3.bf16.msra.mxu1 %v15659_v37  ;;  %v15688_v36 = vld [vmem:[%s17618_s22 + $0x248] sm:$0xff]  }
0x1bbd   : > { %14228 = vmatprep.subr.bf16.mxu0 %v15660_v23  ;;  %14250 = vmatprep.subr.bf16.mxu1 %v15661_v38  ;;  %v15689_v37 = vld [vmem:[%s17618_s22 + $0x2c8] sm:$0xff]  }
0x1bbe   : > { %v15690_v23 = vld [vmem:[%s17618_s22 + $0x208] sm:$0xff]  }
0x1bbf   : > { %v15691_v38 = vld [vmem:[%s17618_s22 + $0x288] sm:$0xff]  }
0x1bc0   : > { %14229 = vmatpush3.bf16.msra.mxu0 %v15662_v39  ;;  %14251 = vmatpush3.bf16.msra.mxu1 %v15663_v40  ;;  %v15692_v39 = vld [vmem:[%s17618_s22 + $0x250] sm:$0xff]  }
0x1bc1   : > { %14230 = vmatprep.subr.bf16.mxu0 %v15664_v41  ;;  %14252 = vmatprep.subr.bf16.mxu1 %v15665_v21  ;;  %v15693_v40 = vld [vmem:[%s17618_s22 + $0x2d0] sm:$0xff]  }
0x1bc2   : > { %v15694_v41 = vld [vmem:[%s17618_s22 + $0x210] sm:$0xff]  }
0x1bc3   : > { %v15695_v21 = vld [vmem:[%s17618_s22 + $0x290] sm:$0xff]  }
0x1bc4   : > { %14231 = vmatpush3.bf16.msra.mxu0 %v15666_v42  ;;  %14253 = vmatpush3.bf16.msra.mxu1 %v15667_v43  ;;  %v15696_v42 = vld [vmem:[%s17618_s22 + $0x258] sm:$0xff]  }
0x1bc5   : > { %14232 = vmatprep.subr.bf16.mxu0 %v15668_v44  ;;  %14254 = vmatprep.subr.bf16.mxu1 %v15669_v45  ;;  %v15697_v43 = vld [vmem:[%s17618_s22 + $0x2d8] sm:$0xff]  }
0x1bc6   : > { %v15698_v44 = vld [vmem:[%s17618_s22 + $0x218] sm:$0xff]  }
0x1bc7   : > { %v15699_v45 = vld [vmem:[%s17618_s22 + $0x298] sm:$0xff]  }
0x1bc8   : > { %14233 = vmatpush3.bf16.msra.mxu0 %v15670_v46  ;;  %14255 = vmatpush3.bf16.msra.mxu1 %v15671_v47  ;;  %v15700_v46 = vld [vmem:[%s17618_s22 + $0x260] sm:$0xff]  }
0x1bc9   : > { %14234 = vmatprep.subr.bf16.mxu0 %v15672_v48  ;;  %14256 = vmatprep.subr.bf16.mxu1 %v15673_v49  ;;  %v15701_v47 = vld [vmem:[%s17618_s22 + $0x2e0] sm:$0xff]  }
0x1bca   : > { %v15702_v48 = vld [vmem:[%s17618_s22 + $0x220] sm:$0xff]  }
0x1bcb   : > { %v15703_v49 = vld [vmem:[%s17618_s22 + $0x2a0] sm:$0xff]  }
0x1bcc   : > { %14235 = vmatpush3.bf16.msra.mxu0 %v15674_v52  ;;  %14257 = vmatpush3.bf16.msra.mxu1 %v15675_v53  ;;  %v15704_v52 = vld [vmem:[%s17618_s22 + $0x268] sm:$0xff]  }
0x1bcd   : > { %14236 = vmatprep.subr.bf16.mxu0 %v15676_v56  ;;  %14258 = vmatprep.subr.bf16.mxu1 %v15677_v57  ;;  %v15705_v53 = vld [vmem:[%s17618_s22 + $0x2e8] sm:$0xff]  }
0x1bce   : > { %v4915_v1 = vpop.f32.mrb[44].mxu0  ;;  %v4956_v2 = vpop.f32.mrb[48].mxu1  ;;  %v15706_v56 = vld [vmem:[%s17618_s22 + $0x228] sm:$0xff]  }
0x1bcf   : > { %v4916_v4 = vadd.f32 %v4915_v1, %v4098_v58  ;;  %v4957_v5 = vadd.f32 %v4956_v2, %v4106_v7  ;;  %v4917_v6 = vpop.f32.mrb[45].mxu0  ;;  %v4958_v8 = vpop.f32.mrb[49].mxu1  ;;  %v15707_v57 = vld [vmem:[%s17618_s22 + $0x2a8] sm:$0xff]   ;;  %v15708_v7 = vld [vmem:[%s17618_s22 + $0x270] sm:$0xff]   ;;  %v15712_v2 = vld [vmem:[%s17618_s22 + $0x278] sm:$0xff]  }
0x1bd0   : > { %v4918_v26 = vadd.f32 %v4917_v6, %v4102_v59  ;;  %v4959_v10 = vadd.f32 %v4958_v8, %v4110_v60  ;;  %v4919_v15 = vpop.f32.mrb[46].mxu0  ;;  %v4960_v61 = vpop.f32.mrb[50].mxu1  ;;  %14237 = vmatpush3.bf16.msra.mxu0 %v15678_v9  ;;  %14259 = vmatpush3.bf16.msra.mxu1 %v15679_v63  ;;  %v18180_v58 = vld [vmem:[%s17615_s3 + $0x8] sm:$0xff]  ;;  %v15709_v59 = vld [vmem:[%s17618_s22 + $0x2f0] sm:$0xff]  }
0x1bd1   : > { %v5131_v19 = vmax.f32 %v4916_v4, 0.0  ;;  %v5133_v24 = vmax.f32 %v4957_v5, 0.0  ;;  %v4920_v25 = vpop.f32.mrb[47].mxu0  ;;  %v4961_v27 = vpop.f32.mrb[51].mxu1  ;;  %14238 = vmatprep.subr.bf16.mxu0 %v15680_v0  ;;  %14260 = vmatprep.subr.bf16.mxu1 %v15681_v22  ;;  %v4114_v60 = vrot.slane %v18180_v58, %v17705_v13  ;;  %v4122_v9 = vrot.slane %v18180_v58, %v17708_v14  ;;  %v15710_v22 = vld [vmem:[%s17618_s22 + $0x230] sm:$0xff]   ;;  %v15713_v13 = vld [vmem:[%s17618_s22 + $0x2f8] sm:$0xff]  }
0x1bd2   : > { %v5132_v29 = vmax.f32 %v4918_v26, 0.0  ;;  %v5134_v30 = vmax.f32 %v4959_v10, 0.0  ;;  %v4118_v63 = vrot.slane %v18180_v58, %v17712_v16  ;;  %v4126_v0 = vrot.slane %v18180_v58, %v4093_v62  ;;  %v15711_v1 = vld [vmem:[%s17618_s22 + $0x2b0] sm:$0xff]   ;;  %v15714_v61 = vld [vmem:[%s17618_s22 + $0x238] sm:$0xff]   ;;  %v15716_v27 = vld [vmem:[%s17618_s22 + $0x340] sm:$0xff]  }
0x1bd3   : > { %v5147_v34 = vpack.c.bf16 %v5131_v19, %v5131_v19  ;;  %v5149_v35 = vpack.c.bf16 %v5133_v24, %v5133_v24 }
0x1bd4   : > { %v5148_v31 = vpack.c.bf16 %v5132_v29, %v5132_v29  ;;  %v5150_v3 = vpack.c.bf16 %v5134_v30, %v5134_v30  ;;  %14239 = vmatpush3.bf16.msra.mxu0 %v15682_v17  ;;  %14261 = vmatpush3.bf16.msra.mxu1 %v15683_v18  ;;  %v15715_v17 = vld [vmem:[%s17618_s22 + $0x2b8] sm:$0xff]  }
0x1bd5   : > { %14268 = vmatprep.subr.bf16.mxu0 %v15684_v11  ;;  %14290 = vmatprep.subr.bf16.mxu1 %v15685_v28  ;;  %v15717_v11 = vld [vmem:[%s17618_s22 + $0x3c0] sm:$0xff]  }
0x1bd6   : > { %6045 = vmatprep.mubr.bf16.mxu0 %v5148_v31  ;;  %6085 = vmatprep.mubr.bf16.mxu1 %v5150_v3  ;;  %v15718_v3 = vld [vmem:[%s17618_s22 + $0x300] sm:$0xff]  }
0x1bd7   : > { %6046 = vmatmul.mubr.bf16.vlgmr.msra.gmra.mrb[60].mxu0 %v5147_v34  ;;  %6086 = vmatmul.mubr.bf16.vlgmr.msra.gmra.mrb[64].mxu1 %v5149_v35  ;;  %v15720_v35 = vld [vmem:[%s17618_s22 + $0x348] sm:$0xff]  }
0x1bd8   : > { %14269 = vmatpush3.bf16.msra.mxu0 %v15686_v32  ;;  %14291 = vmatpush3.bf16.msra.mxu1 %v15687_v33  ;;  %v15719_v32 = vld [vmem:[%s17618_s22 + $0x380] sm:$0xff]  }
0x1bd9   : > { %14270 = vmatprep.subr.bf16.mxu0 %v15688_v36  ;;  %14292 = vmatprep.subr.bf16.mxu1 %v15689_v37  ;;  %v15721_v36 = vld [vmem:[%s17618_s22 + $0x3c8] sm:$0xff]  }
0x1bda   : > { %v15722_v37 = vld [vmem:[%s17618_s22 + $0x308] sm:$0xff]  }
0x1bdc   : > { %14271 = vmatpush3.bf16.msra.mxu0 %v15690_v23  ;;  %14293 = vmatpush3.bf16.msra.mxu1 %v15691_v38  ;;  %v15723_v23 = vld [vmem:[%s17618_s22 + $0x388] sm:$0xff]   ;;  %v15724_v38 = vld [vmem:[%s17618_s22 + $0x350] sm:$0xff]  }
0x1bdd   : > { %14272 = vmatprep.subr.bf16.mxu0 %v15692_v39  ;;  %14294 = vmatprep.subr.bf16.mxu1 %v15693_v40  ;;  %v15725_v39 = vld [vmem:[%s17618_s22 + $0x3d0] sm:$0xff]  }
0x1bde   : > { %v15726_v40 = vld [vmem:[%s17618_s22 + $0x310] sm:$0xff]  }
0x1be0   : > { %14273 = vmatpush3.bf16.msra.mxu0 %v15694_v41  ;;  %14295 = vmatpush3.bf16.msra.mxu1 %v15695_v21  ;;  %v15727_v41 = vld [vmem:[%s17618_s22 + $0x390] sm:$0xff]   ;;  %v15728_v21 = vld [vmem:[%s17618_s22 + $0x358] sm:$0xff]  }
0x1be1   : > { %14274 = vmatprep.subr.bf16.mxu0 %v15696_v42  ;;  %14296 = vmatprep.subr.bf16.mxu1 %v15697_v43  ;;  %v15729_v42 = vld [vmem:[%s17618_s22 + $0x3d8] sm:$0xff]  }
0x1be2   : > { %v15730_v43 = vld [vmem:[%s17618_s22 + $0x318] sm:$0xff]  }
0x1be4   : > { %14275 = vmatpush3.bf16.msra.mxu0 %v15698_v44  ;;  %14297 = vmatpush3.bf16.msra.mxu1 %v15699_v45  ;;  %v15731_v44 = vld [vmem:[%s17618_s22 + $0x398] sm:$0xff]   ;;  %v15732_v45 = vld [vmem:[%s17618_s22 + $0x360] sm:$0xff]  }
0x1be5   : > { %14276 = vmatprep.subr.bf16.mxu0 %v15700_v46  ;;  %14298 = vmatprep.subr.bf16.mxu1 %v15701_v47  ;;  %v15733_v46 = vld [vmem:[%s17618_s22 + $0x3e0] sm:$0xff]  }
0x1be6   : > { %v15734_v47 = vld [vmem:[%s17618_s22 + $0x320] sm:$0xff]  }
0x1be8   : > { %14277 = vmatpush3.bf16.msra.mxu0 %v15702_v48  ;;  %14299 = vmatpush3.bf16.msra.mxu1 %v15703_v49  ;;  %v15735_v48 = vld [vmem:[%s17618_s22 + $0x3a0] sm:$0xff]   ;;  %v15736_v49 = vld [vmem:[%s17618_s22 + $0x368] sm:$0xff]  }
0x1be9   : > { %14278 = vmatprep.subr.bf16.mxu0 %v15704_v52  ;;  %14300 = vmatprep.subr.bf16.mxu1 %v15705_v53  ;;  %v15737_v52 = vld [vmem:[%s17618_s22 + $0x3e8] sm:$0xff]  }
0x1bea   : > { %v15738_v53 = vld [vmem:[%s17618_s22 + $0x328] sm:$0xff]  }
0x1bec   : > { %14279 = vmatpush3.bf16.msra.mxu0 %v15706_v56  ;;  %14301 = vmatpush3.bf16.msra.mxu1 %v15707_v57  ;;  %v15739_v56 = vld [vmem:[%s17618_s22 + $0x3a8] sm:$0xff]   ;;  %v15740_v57 = vld [vmem:[%s17618_s22 + $0x370] sm:$0xff]  }
0x1bed   : > { %14280 = vmatprep.subr.bf16.mxu0 %v15708_v7  ;;  %14302 = vmatprep.subr.bf16.mxu1 %v15709_v59  ;;  %v15741_v7 = vld [vmem:[%s17618_s22 + $0x3f0] sm:$0xff]   ;;  %v4130_v59 = vrot.slane %v18180_v58, %v4097_v50  ;;  %v15744_v50 = vld [vmem:[%s17618_s22 + $0x378] sm:$0xff]  }
0x1bee   : > { %v4997_v4 = vpop.f32.mrb[48].mxu0  ;;  %v5038_v5 = vpop.f32.mrb[52].mxu1 }
0x1bef   : > { %v4998_v14 = vadd.f32 %v4997_v4, %v4114_v60  ;;  %v5039_v6 = vadd.f32 %v5038_v5, %v4122_v9  ;;  %v4999_v8 = vpop.f32.mrb[49].mxu0  ;;  %v5040_v26 = vpop.f32.mrb[53].mxu1  ;;  %v4138_v60 = vrot.slane %v18180_v58, %v4105_v51  ;;  %v4134_v9 = vrot.slane %v18180_v58, %v4101_v54 }
0x1bf0   : > { %v5000_v16 = vadd.f32 %v4999_v8, %v4118_v63  ;;  %v5041_v10 = vadd.f32 %v5040_v26, %v4126_v0  ;;  %v5001_v15 = vpop.f32.mrb[50].mxu0  ;;  %v5042_v62 = vpop.f32.mrb[54].mxu1  ;;  %14281 = vmatpush3.bf16.msra.mxu0 %v15710_v22  ;;  %14303 = vmatpush3.bf16.msra.mxu1 %v15711_v1  ;;  %v4142_v63 = vrot.slane %v18180_v58, %v4109_v55  ;;  %v15742_v0 = vld [vmem:[%s17618_s22 + $0x330] sm:$0xff]   ;;  %v15745_v1 = vld [vmem:[%s17618_s22 + $0x3f8] sm:$0xff]  }
0x1bf1   : > { %v5135_v18 = vmax.f32 %v4998_v14, 0.0  ;;  %v5137_v19 = vmax.f32 %v5039_v6, 0.0  ;;  %v5002_v24 = vpop.f32.mrb[51].mxu0  ;;  %v5043_v25 = vpop.f32.mrb[55].mxu1  ;;  %14282 = vmatprep.subr.bf16.mxu0 %v15712_v2  ;;  %14304 = vmatprep.subr.bf16.mxu1 %v15713_v13  ;;  %v15743_v22 = vld [vmem:[%s17618_s22 + $0x3b0] sm:$0xff]   ;;  %v15746_v55 = vld [vmem:[%s17618_s22 + $0x338] sm:$0xff]  }
0x1bf2   : > { %v5136_v28 = vmax.f32 %v5000_v16, 0.0  ;;  %v5138_v29 = vmax.f32 %v5041_v10, 0.0  ;;  %v15747_v58 = vld [vmem:[%s17618_s22 + $0x3b8] sm:$0xff]  }
0x1bf3   : > { %v5151_v33 = vpack.c.bf16 %v5135_v18, %v5135_v18  ;;  %v5153_v34 = vpack.c.bf16 %v5137_v19, %v5137_v19 }
0x1bf4   : > { %v5152_v30 = vpack.c.bf16 %v5136_v28, %v5136_v28  ;;  %v5154_v31 = vpack.c.bf16 %v5138_v29, %v5138_v29  ;;  %14283 = vmatpush3.bf16.msra.mxu0 %v15714_v61  ;;  %14305 = vmatpush3.bf16.msra.mxu1 %v15715_v17 }
0x1bf5   : > { %14312 = vmatprep.subr.bf16.mxu0 %v15716_v27  ;;  %14334 = vmatprep.subr.bf16.mxu1 %v15717_v11  ;;  %v13582_v11 = vld [vmem:[%s1096_s13] ss:$0 sm:$0xff] }
0x1bf6   : > { %6125 = vmatprep.mubr.bf16.mxu0 %v5152_v30  ;;  %6165 = vmatprep.mubr.bf16.mxu1 %v5154_v31 }
0x1bf7   : > { %6126 = vmatmul.mubr.bf16.vlgmr.msra.gmra.mrb[64].mxu0 %v5151_v33  ;;  %6166 = vmatmul.mubr.bf16.vlgmr.msra.gmra.mrb[68].mxu1 %v5153_v34 }
0x1bf8   : > { %14313 = vmatpush3.bf16.msra.mxu0 %v15718_v3  ;;  %14335 = vmatpush3.bf16.msra.mxu1 %v15719_v32 }
0x1bf9   : > { %14314 = vmatprep.subr.bf16.mxu0 %v15720_v35  ;;  %14336 = vmatprep.subr.bf16.mxu1 %v15721_v36 }
0x1bfc   : > { %14315 = vmatpush3.bf16.msra.mxu0 %v15722_v37  ;;  %14337 = vmatpush3.bf16.msra.mxu1 %v15723_v23 }
0x1bfd   : > { %14316 = vmatprep.subr.bf16.mxu0 %v15724_v38  ;;  %14338 = vmatprep.subr.bf16.mxu1 %v15725_v39 }
0x1c00   : > { %14317 = vmatpush3.bf16.msra.mxu0 %v15726_v40  ;;  %14339 = vmatpush3.bf16.msra.mxu1 %v15727_v41 }
0x1c01   : > { %14318 = vmatprep.subr.bf16.mxu0 %v15728_v21  ;;  %14340 = vmatprep.subr.bf16.mxu1 %v15729_v42 }
0x1c04   : > { %14319 = vmatpush3.bf16.msra.mxu0 %v15730_v43  ;;  %14341 = vmatpush3.bf16.msra.mxu1 %v15731_v44 }
0x1c05   : > { %14320 = vmatprep.subr.bf16.mxu0 %v15732_v45  ;;  %14342 = vmatprep.subr.bf16.mxu1 %v15733_v46 }
0x1c08   : > { %14321 = vmatpush3.bf16.msra.mxu0 %v15734_v47  ;;  %14343 = vmatpush3.bf16.msra.mxu1 %v15735_v48 }
0x1c09   : > { %14322 = vmatprep.subr.bf16.mxu0 %v15736_v49  ;;  %14344 = vmatprep.subr.bf16.mxu1 %v15737_v52 }
0x1c0c   : > { %14323 = vmatpush3.bf16.msra.mxu0 %v15738_v53  ;;  %14345 = vmatpush3.bf16.msra.mxu1 %v15739_v56 }
0x1c0d   : > { %14324 = vmatprep.subr.bf16.mxu0 %v15740_v57  ;;  %14346 = vmatprep.subr.bf16.mxu1 %v15741_v7 }
0x1c0e   : > { %v5079_v2 = vpop.f32.mrb[52].mxu0  ;;  %v5120_v51 = vpop.f32.mrb[56].mxu1 }
0x1c0f   : > { %v5080_v13 = vadd.f32 %v5079_v2, %v4130_v59  ;;  %v5121_v4 = vadd.f32 %v5120_v51, %v4138_v60  ;;  %v5081_v5 = vpop.f32.mrb[53].mxu0  ;;  %v5122_v14 = vpop.f32.mrb[57].mxu1 }
0x1c10   : > { %v5082_v6 = vadd.f32 %v5081_v5, %v4134_v9  ;;  %v5123_v54 = vadd.f32 %v5122_v14, %v4142_v63  ;;  %v5083_v8 = vpop.f32.mrb[54].mxu0  ;;  %v5124_v12 = vpop.f32.mrb[58].mxu1  ;;  %14325 = vmatpush3.bf16.msra.mxu0 %v15742_v0  ;;  %14347 = vmatpush3.bf16.msra.mxu1 %v15743_v22 }
0x1c11   : > { %v5139_v26 = vmax.f32 %v5080_v13, 0.0  ;;  %v5141_v16 = vmax.f32 %v5121_v4, 0.0  ;;  %v5084_v10 = vpop.f32.mrb[55].mxu0  ;;  %v5125_v15 = vpop.f32.mrb[59].mxu1  ;;  %14326 = vmatprep.subr.bf16.mxu0 %v15744_v50  ;;  %14348 = vmatprep.subr.bf16.mxu1 %v15745_v1 }
0x1c12   : > { %v5140_v62 = vmax.f32 %v5082_v6, 0.0  ;;  %v5142_v61 = vmax.f32 %v5123_v54, 0.0 }
0x1c13   : > { %v5155_v19 = vpack.c.bf16 %v5139_v26, %v5139_v26  ;;  %v5157_v24 = vpack.c.bf16 %v5141_v16, %v5141_v16 }
0x1c14   : > { %v5156_v17 = vpack.c.bf16 %v5140_v62, %v5140_v62  ;;  %v5158_v18 = vpack.c.bf16 %v5142_v61, %v5142_v61  ;;  %14327 = vmatpush3.bf16.msra.mxu0 %v15746_v55  ;;  %14349 = vmatpush3.bf16.msra.mxu1 %v15747_v58 }
0x1c16   : > { %6205 = vmatprep.mubr.bf16.mxu0 %v5156_v17  ;;  %6245 = vmatprep.mubr.bf16.mxu1 %v5158_v18  ;;  %v13711_v18 = vld [vmem:[%s1104_s5] ss:$0 sm:$0xff] }
0x1c17   : > { %6206 = vmatmul.mubr.bf16.vlgmr.msra.gmra.mrb[68].mxu0 %v5155_v19  ;;  %6246 = vmatmul.mubr.bf16.vlgmr.msra.gmra.mrb[72].mxu1 %v5157_v24 }
0x1c8a   : > { %v14196_v25 = vpop.f32.mrb[56].mxu0  ;;  %v14218_v27 = vpop.f32.mrb[60].mxu1 }
0x1c8b   : > { %v14197_v28 = vpop.f32.mrb[57].mxu0  ;;  %v14219_v29 = vpop.f32.mrb[61].mxu1 }
0x1c8c   : > { %v14198_v30 = vadd.f32 %v14197_v28, %v14196_v25  ;;  %v14220_v31 = vadd.f32 %v14219_v29, %v14218_v27  ;;  %v14199_v3 = vpop.f32.mrb[58].mxu0  ;;  %v14221_v32 = vpop.f32.mrb[62].mxu1 }
0x1c8d   : > { %v14200_v33 = vpop.f32.mrb[59].mxu0  ;;  %v14222_v34 = vpop.f32.mrb[63].mxu1 }
0x1c8e   : > { %v5968_v35 = vadd.f32 %v14198_v30, %v13582_v11 }
0x1c90   : > { %v6008_v36 = vadd.f32 %v14220_v31, %v5968_v35 }
0x1caa   : > { %v14240_v37 = vpop.f32.mrb[60].mxu0  ;;  %v14262_v23 = vpop.f32.mrb[64].mxu1 }
0x1cab   : > { %v14241_v38 = vpop.f32.mrb[61].mxu0  ;;  %v14263_v39 = vpop.f32.mrb[65].mxu1 }
0x1cac   : > { %v14242_v40 = vadd.f32 %v14241_v38, %v14240_v37  ;;  %v14264_v41 = vadd.f32 %v14263_v39, %v14262_v23  ;;  %v14243_v21 = vpop.f32.mrb[62].mxu0  ;;  %v14265_v42 = vpop.f32.mrb[66].mxu1 }
0x1cad   : > { %v14244_v43 = vpop.f32.mrb[63].mxu0  ;;  %v14266_v44 = vpop.f32.mrb[67].mxu1 }
0x1cae   : > { %v6048_v45 = vadd.f32 %v14242_v40, %v6008_v36 }
0x1cb0   : > { %v6088_v46 = vadd.f32 %v14264_v41, %v6048_v45 }
0x1cca   : > { %v14284_v47 = vpop.f32.mrb[64].mxu0  ;;  %v14306_v48 = vpop.f32.mrb[68].mxu1 }
0x1ccb   : > { %v14285_v49 = vpop.f32.mrb[65].mxu0  ;;  %v14307_v52 = vpop.f32.mrb[69].mxu1 }
0x1ccc   : > { %v14286_v53 = vadd.f32 %v14285_v49, %v14284_v47  ;;  %v14308_v56 = vadd.f32 %v14307_v52, %v14306_v48  ;;  %v14287_v57 = vpop.f32.mrb[66].mxu0  ;;  %v14309_v7 = vpop.f32.mrb[70].mxu1 }
0x1ccd   : > { %v14288_v59 = vpop.f32.mrb[67].mxu0  ;;  %v14310_v60 = vpop.f32.mrb[71].mxu1 }
0x1cce   : > { %v6128_v9 = vadd.f32 %v14286_v53, %v6088_v46 }
0x1cd0   : > { %v6168_v63 = vadd.f32 %v14308_v56, %v6128_v9 }
0x1cea   : > { %v14328_v0 = vpop.f32.mrb[68].mxu0  ;;  %v14350_v22 = vpop.f32.mrb[72].mxu1 }
0x1ceb   : > { %v14329_v50 = vpop.f32.mrb[69].mxu0  ;;  %v14351_v1 = vpop.f32.mrb[73].mxu1 }
0x1cec   : > { %v14330_v2 = vadd.f32 %v14329_v50, %v14328_v0  ;;  %v14352_v51 = vadd.f32 %v14351_v1, %v14350_v22  ;;  %v14331_v13 = vpop.f32.mrb[70].mxu0  ;;  %v14353_v4 = vpop.f32.mrb[74].mxu1 }
0x1ced   : > { %v14332_v5 = vpop.f32.mrb[71].mxu0  ;;  %v14354_v14 = vpop.f32.mrb[75].mxu1 }
0x1cee   : > { %v6208_v6 = vadd.f32 %v14330_v2, %v6168_v63 }
0x1cf0   : > { %v6248_v54 = vadd.f32 %v14352_v51, %v6208_v6 }
0x1cf2   : > { %v6253_v8 = vadd.f32 %v6248_v54, %v17954_v20  ;;  %v13712_v20 = vld [vmem:[%s1112_s15] ss:$0 sm:$0xff] }
0x1cf4   : > { %v6254_v12 = vsel %vm2398_vm3, %v6253_v8, 0.0 }
0x1cf5   : > { %6255 = vadd.xlane.f32.xlu1 %v6254_v12 }
0x1d82   : > { %v6256_v55 = vpop.xlane.xlu1 %6255 }
0x1d83   : > { %v6257_v58 = vmul.f32 0.0078125, %v6256_v55 }
0x1d85   : > { %v6258_v26 = vsub.f32 %v6253_v8, %v6257_v58 }
0x1d87   : > { %v6259_v16 = vmul.f32 %v6258_v26, %v6258_v26 }
0x1d89   : > { %v6260_v10 = vsel %vm2398_vm3, %v6259_v16, 0.0 }
0x1d8a   : > { %6261 = vadd.xlane.f32.xlu1 %v6260_v10 }
0x1e17   : > { %v6262_v15 = vpop.xlane.xlu1 %6261 }
0x1e18   : > { %v6263_v62 = vmul.f32 0.0078125, %v6262_v15 }
0x1e1a   : > { %v6264_v61 = vadd.f32 1e-05, %v6263_v62 }
0x1e1c   : > { %15782 = vrsqrt.f32 %v6264_v61 }
0x1e26   : > { %v15783_v17 = vpop.eup %15782 }
0x1e27   : > { %v6266_v19 = vmul.f32 %v15783_v17, %v6258_v26 }
0x1e29   : > { %v6273_v24 = vmul.f32 %v13711_v18, %v6266_v19 }
0x1e2b   : > { %v6280_v25 = vadd.f32 %v13712_v20, %v6273_v24 }
0x1e2d   : > { %6281 = vst [vmem:[#allocation2] sm:$0x3] %v6280_v25 }
0x1e2e PF: > { %p13713_p8 = scmp.le.s32.totalorder %s16911_s2, 0 }
0x1e2f   : > { %v15784_v27 = vld [vmem:[%s17581_s18 + $0x4] ss:$12 sps:$4 sm:$0xff] (!%p13713_p8)   ;;  %v15786_v11 = vld [vmem:[%s17581_s18] ss:$12 sps:$4 sm:$0xff] (!%p13713_p8)   ;;  %v16753_v28 = vmov (!%p13713_p8), 0   ;;  %v16754_v43 = vmov (!%p13713_p8), 0.0   ;;  %v6732_v47 = vlaneseq (!%p13713_p8) }
0x1e30   : > { %6285 = sbr.rel (%p13713_p8) target bundleno = 17680 (0x4510), region = 204  ;;  %6907 = vmatprep.mubr.bf16.mxu0 (!%p13713_p8), %v16753_v28  ;;  %6875 = vmatprep.subr.bf16.mxu0 (!%p13713_p8), %v15784_v27  ;;  %v15787_v29 = vld [vmem:[%s17581_s18 + $0x1c] ss:$12 sps:$4 sm:$0xff] (!%p13713_p8)   ;;  %v15789_v30 = vld [vmem:[%s17581_s18 + $0x18] ss:$12 sps:$4 sm:$0xff] (!%p13713_p8)   ;;  %vm16755_vm7 = vmmov (!%p13713_p8), 0  }
0x1e31   : > { %6876 = vmatpush1.bf16.msra.mxu0 (!%p13713_p8), %v15786_v11  ;;  %v15790_v31 = vld [vmem:[%s17581_s18 + $0x34] ss:$12 sps:$4 sm:$0xff] (!%p13713_p8)   ;;  %v15792_v3 = vld [vmem:[%s17581_s18 + $0x30] ss:$12 sps:$4 sm:$0xff] (!%p13713_p8)   ;;  %v15793_v32 = vld [vmem:[%s17581_s18 + $0x4c] ss:$12 sps:$4 sm:$0xff] (!%p13713_p8)   ;;  %14875 = vmatprep.subr.bf16.mxu1 (!%p13713_p8), %v16754_v43 }
0x1e32   : > { %6877 = vmatprep.subr.bf16.mxu0 (!%p13713_p8), %v15787_v29  ;;  %v15795_v33 = vld [vmem:[%s17581_s18 + $0x48] ss:$12 sps:$4 sm:$0xff] (!%p13713_p8)   ;;  %v15796_v34 = vld [vmem:[%s17581_s18 + $0x64] ss:$12 sps:$4 sm:$0xff] (!%p13713_p8)   ;;  %v15798_v35 = vld [vmem:[%s17581_s18 + $0x60] ss:$12 sps:$4 sm:$0xff] (!%p13713_p8)   ;;  %14891 = vmatprep.mubr.msk.bf16.mxu1 (!%p13713_p8), %vm16755_vm7, %v16754_v43 }
0x1e33   : > { %v15799_v36 = vld [vmem:[%s17581_s18 + $0x7c] ss:$12 sps:$4 sm:$0xff] (!%p13713_p8)   ;;  %v15801_v37 = vld [vmem:[%s17581_s18 + $0x78] ss:$12 sps:$4 sm:$0xff] (!%p13713_p8)   ;;  %v15802_v23 = vld [vmem:[%s17581_s18 + $0x94] ss:$12 sps:$4 sm:$0xff] (!%p13713_p8)  }
0x1e34   : > { %v15804_v38 = vld [vmem:[%s17581_s18 + $0x90] ss:$12 sps:$4 sm:$0xff] (!%p13713_p8)   ;;  %v15805_v39 = vld [vmem:[%s17581_s18 + $0xac] ss:$12 sps:$4 sm:$0xff] (!%p13713_p8)   ;;  %v15807_v40 = vld [vmem:[%s17581_s18 + $0xa8] ss:$12 sps:$4 sm:$0xff] (!%p13713_p8)  }
0x1e35   : > { %6878 = vmatpush1.bf16.msra.mxu0 (!%p13713_p8), %v15789_v30  ;;  %v6727_v41 = vld [vmem:[#allocation3] sm:$0xff] (!%p13713_p8)  ;;  %v6728_v21 = vld [vmem:[#allocation3 + $0x8] sm:$0x3] (!%p13713_p8)  ;;  %v18282_v48 = vshrl.u32 (!%p13713_p8), %v6732_v47, 7  ;;  %v6318_v53 = vld [vmem:[%s17589_s27] sm:$0x7] (!%p13713_p8) }
0x1e36   : > { %6879 = vmatprep.subr.bf16.mxu0 (!%p13713_p8), %v15790_v31  ;;  %v6730_v42 = vpack.c.bf16 (!%p13713_p8), %v6728_v21, %v6727_v41  ;;  %v15808_v44 = vld [vmem:[%s17581_s18 + $0x8] ss:$12 sps:$4 sm:$0xff] (!%p13713_p8)   ;;  %v15809_v45 = vld [vmem:[%s17581_s18 + $0x20] ss:$12 sps:$4 sm:$0xff] (!%p13713_p8)   ;;  %v15810_v46 = vld [vmem:[%s17581_s18 + $0x38] ss:$12 sps:$4 sm:$0xff] (!%p13713_p8)  }
0x1e37   : > { %14876 = vmatpush3.bf16.msra.mxu1 %v15808_v44  ;;  %v15811_v49 = vld [vmem:[%s17581_s18 + $0x50] ss:$12 sps:$4 sm:$0xff]   ;;  %v18286_v52 = vsub.s32 1, %v18282_v48  ;;  %v15812_v56 = vld [vmem:[%s17581_s18 + $0x68] ss:$12 sps:$4 sm:$0xff]   ;;  %v18292_v57 = vsub.s32 0, %v18282_v48 }
0x1e38   : > { %14877 = vmatprep.subr.bf16.mxu1 %v16754_v43  ;;  %v15813_v7 = vld [vmem:[%s17581_s18 + $0x80] ss:$12 sps:$4 sm:$0xff]   ;;  %vm6963_vm8 = vcmask 130048   ;;  %v15814_v0 = vld [vmem:[%s17581_s18 + $0x98] ss:$12 sps:$4 sm:$0xff]   ;;  %s16756_s27 = smov 112  }
0x1e39   : > { %6880 = vmatpush1.bf16.msra.mxu0 %v15792_v3  ;;  %v6739_v59 = vrot.slane %v6318_v53, %v18286_v52  ;;  %v6735_v9 = vrot.slane %v6318_v53, %v18292_v57  ;;  %v15815_v4 = vld [vmem:[%s17581_s18 + $0xb0] ss:$12 sps:$4 sm:$0xff]   ;;  %vm7040_vm9 = vcmask 36864   ;;  %v18338_v10 = vsub.s32 2, %v18282_v48  ;;  %s16757_s18 = smov 96   ;;  %s16758_s20 = smov 80  }
0x1e3a   : > { %6881 = vmatprep.subr.bf16.mxu0 %v15793_v32  ;;  %v18329_v6 = vld [vmem:[#allocation16] sm:$0x3]  ;;  %vm7056_vm10 = vcmask 1044480   ;;  %vm7052_vm11 = vcmask 39936   ;;  %s16759_s24 = smov 64   ;;  %s16760_s4 = smov 48  }
0x1e3b   : > { %14878 = vmatpush3.bf16.msra.mxu1 %v15809_v45  ;;  %v18333_v54 = vrot.slane %v18329_v6, %v18292_v57  ;;  %v6743_v15 = vrot.slane %v6318_v53, %v18338_v10  ;;  %v18378_v45 = vld [vmem:[%s17592_s17 + $0x8] sm:$0xff]   ;;  %v18383_v53 = vld [vmem:[%s17592_s17] sm:$0xff]   ;;  %s16761_s30 = smov 32   ;;  %s16762_s7 = smov 16   ;;  %vm8703_vm12 = vcmask 1042432   ;;  %vm10411_vm13 = vcmask 1041408  }
0x1e3c   : > { %14879 = vmatprep.subr.bf16.mxu1 %v16754_v43 }
0x1e3d   : > { %6882 = vmatpush1.bf16.msra.mxu0 %v15795_v33 }
0x1e3e   : > { %6883 = vmatprep.subr.bf16.mxu0 %v15796_v34 }
0x1e3f   : > { %14880 = vmatpush3.bf16.msra.mxu1 %v15810_v46 }
0x1e40   : > { %14881 = vmatprep.subr.bf16.mxu1 %v16754_v43 }
0x1e41   : > { %6884 = vmatpush1.bf16.msra.mxu0 %v15798_v35 }
0x1e42   : > { %6885 = vmatprep.subr.bf16.mxu0 %v15799_v36 }
0x1e43   : > { %14882 = vmatpush3.bf16.msra.mxu1 %v15811_v49 }
0x1e44   : > { %14883 = vmatprep.subr.bf16.mxu1 %v16754_v43 }
0x1e45   : > { %6886 = vmatpush1.bf16.msra.mxu0 %v15801_v37 }
0x1e46   : > { %6887 = vmatprep.subr.bf16.mxu0 %v15802_v23 }
0x1e47   : > { %14884 = vmatpush3.bf16.msra.mxu1 %v15812_v56 }
0x1e48   : > { %14885 = vmatprep.subr.bf16.mxu1 %v16754_v43 }
0x1e49   : > { %6888 = vmatpush1.bf16.msra.mxu0 %v15804_v38 }
0x1e4a   : > { %6889 = vmatprep.subr.bf16.mxu0 %v15805_v39 }
0x1e4b   : > { %14886 = vmatpush3.bf16.msra.mxu1 %v15813_v7 }
0x1e4c   : > { %14887 = vmatprep.subr.bf16.mxu1 %v16754_v43 }
0x1e4d   : > { %6890 = vmatpush1.bf16.msra.mxu0 %v15807_v40 }
0x1e4e   : > { %14895 = vmatprep.subr.mxu0 %v16754_v43 }
0x1e4f   : > { %14888 = vmatpush3.bf16.msra.mxu1 %v15814_v0 }
0x1e50   : > { %6908 = vmatmul.mubr.bf16.vlgmr.msra.gmra.mrb[0].mxu0 %v6730_v42  ;;  %14889 = vmatprep.subr.bf16.mxu1 %v16754_v43 }
0x1e51   : > { %14897 = vmatprep.mubr.msk.f32.mxu0 %vm16755_vm7, %v16754_v43 }
0x1e53   : > { %14890 = vmatpush3.bf16.msra.mxu1 %v15815_v4 }
0x1e54   : > { %14900 = vmatprep.subr.mxu1 %v16754_v43 }
0x1e56   : > { %14892 = vmatmul.mubr.bf16.vlgmr.msra.gmra.mrb[0].mxu1 %v6730_v42 }
0x1e57   : > { %14902 = vmatprep.mubr.msk.f32.mxu1 %vm16755_vm7, %v16754_v43 }
0x1f23   : > { %v6909_v60 = vpop.f32.mrb[0].mxu0 }
0x1f24   : > { %v6911_v63 = vpop.f32.mrb[1].mxu0  ;;  %v18310_v13 = vadd.f32 %v6909_v60, %v6735_v9 }
0x1f25   : > { %v18299_v22 = vadd.f32 %v6911_v63, %v6739_v59  ;;  %v6913_v50 = vpop.f32.mrb[2].mxu0 }
0x1f26   : > { %v18302_v1 = vadd.f32 %v6913_v50, %v6735_v9  ;;  %v6915_v2 = vpop.f32.mrb[3].mxu0 }
0x1f27   : > { %v18304_v51 = vadd.f32 %v6915_v2, %v6739_v59  ;;  %7133 = vrot.lane.b32.xlu0 %v18299_v22, %s16756_s27  ;;  %14896 = vmatpush3.xpose.msk.msra.mxu0 %vm6963_vm8, %v18299_v22 }
0x1f28   : > { %14905 = vmatprep.subr.mxu0 %v16754_v43 }
0x1f29   : > { %v6952_v26 = vpop.f32.mrb[0].mxu1 }
0x1f2a   : > { %14898 = vmatmul.mubr.msk.f32.vlgmr.msra.gmra.mrb[4].mxu0 %vm6963_vm8, %v18310_v13  ;;  %v14893_v16 = vpop.f32.mrb[1].mxu1  ;;  %v18341_v62 = vadd.f32 %v6952_v26, %v6743_v15 }
0x1f2b   : > { %7131 = vrot.lane.b32.xlu0 %v18310_v13, %s16756_s27  ;;  %14907 = vmatprep.mubr.msk.f32.mxu0 %vm16755_vm7, %v16754_v43  ;;  %v6955_v61 = vpop.f32.mrb[2].mxu1 }
0x1f2c   : > { %v18343_v17 = vadd.f32 %v6955_v61, %v6743_v15  ;;  %v14894_v18 = vpop.f32.mrb[3].mxu1  ;;  %14901 = vmatpush3.msk.msra.mxu1 %vm7056_vm10, %v18341_v62  ;;  %v18413_v15 = vld [vmem:[%s17592_s17 + $0x10] sm:$0xff]  }
0x1f2d   : > { %14910 = vmatprep.subr.mxu1 %v16754_v43 }
0x1f99   : > { %v7134_v5 = vpop.permute.xlu0 %7133 }
0x1f9a   : > { %14906 = vmatpush3.xpose.msk.msra.mxu0 %vm6963_vm8, %v7134_v5 }
0x1f9b   : > { %14915 = vmatprep.subr.bf16.mxu0 %v16754_v43 }
0x1f9d   : > { %v7132_v14 = vpop.permute.xlu0 %7131 }
0x1f9e   : > { %14908 = vmatmul.mubr.msk.f32.vlgmr.msra.gmra.mrb[6].mxu0 %vm6963_vm8, %v7132_v14 }
0x1f9f   : > { %14917 = vmatprep.mubr.msk.bf16.mxu0 %vm16755_vm7, %v16754_v43  ;;  %14916 = vmatpush3.bf16.msra.mxu0 %v18378_v45 }
0x1fa0   : > { %14921 = vmatprep.subr.bf16.mxu0 %v16754_v43 }
0x1ffd   : > { %v7036_v8 = vpop.f32.mrb[4].mxu0 }
0x1ffe   : > { %v7037_v12 = vadd.f32 %v7036_v8, %v18333_v54  ;;  %v14899_v55 = vpop.f32.mrb[5].mxu0 }
0x2000   : > { %v7041_v58 = vsel %vm7040_vm9, %v7037_v12, -inf }
0x2001   : > { %7042 = vmax.xlane.f32.xlu1 %v7041_v58 }
0x2071   : > { %v7205_v19 = vpop.f32.mrb[6].mxu0 }
0x2072   : > { %v7206_v20 = vadd.f32 %v7205_v19, %v18333_v54  ;;  %v14909_v24 = vpop.f32.mrb[7].mxu0 }
0x2074   : > { %v7209_v25 = vsel %vm7040_vm9, %v7206_v20, -inf }
0x2075   : > { %7210 = vmax.xlane.f32.xlu1 %v7209_v25 }
0x2086   : > { %7220 = vrot.lane.b32.xlu1 %v18341_v62, %s16756_s27 }
0x208a   : > { %7398 = vrot.lane.b32.xlu1 %v18299_v22, %s16757_s18 }
0x208e   : > { %v7043_v27 = vpop.xlane.xlu1 %7042 }
0x208f   : > { %v7044_v11 = vsub.f32 %v7037_v12, %v7043_v27 }
0x2091   : > { %v7045_v29 = vmul.f32 1.442695, %v7044_v11 }
0x2093   : > { %15952 = vpow2.f32 %v7045_v29 }
0x209d   : > { %v15953_v30 = vpop.eup %15952 }
0x209e   : > { %v7047_v31 = vsel %vm7040_vm9, %v15953_v30, 0.0 }
0x209f   : > { %7048 = vadd.xlane.f32.xlu0 %v7047_v31 }
0x20b5   : > { %7485 = vrot.lane.b32.xlu0 %v18341_v62, %s16757_s18 }
0x20b9   : > { %7615 = vrot.lane.b32.xlu0 %v18299_v22, %s16758_s20 }
0x2102   : > { %v7211_v3 = vpop.xlane.xlu1 %7210 }
0x2103   : > { %v7212_v32 = vsub.f32 %v7206_v20, %v7211_v3 }
0x2105   : > { %v7213_v33 = vmul.f32 1.442695, %v7212_v32 }
0x2106   : > { %v7221_v38 = vpop.permute.xlu1 %7220 }
0x2107   : > { %15954 = vpow2.f32 %v7213_v33 }
0x210a   : > { %v7399_v39 = vpop.permute.xlu1 %7398 }
0x2111   : > { %v15955_v34 = vpop.eup %15954 }
0x2112   : > { %v7215_v35 = vsel %vm7040_vm9, %v15955_v34, 0.0 }
0x2113   : > { %7216 = vadd.xlane.f32.xlu1 %v7215_v35 }
0x2124   : > { %7396 = vrot.lane.b32.xlu1 %v18310_v13, %s16757_s18 }
0x212c   : > { %v7049_v36 = vpop.xlane.xlu0 %7048 }
0x212d   : > { %15956 = vrcp.f32 %v7049_v36 }
0x2130   : > { %v7486_v44 = vpop.permute.xlu0 %7485 }
0x2134   : > { %v7616_v8 = vpop.permute.xlu0 %7615 }
0x2137   : > { %v15957_v37 = vpop.eup %15956 }
0x2138   : > { %v7051_v23 = vmul.f32 %v15957_v37, %v15953_v30 }
0x213a   : > { %14903 = vmatmul.mubr.msk.f32.vlgmr.msra.gmra.mrb[4].mxu1 %vm7052_vm11, %v7051_v23  ;;  %v18440_v23 = vld [vmem:[%s17592_s17 + $0x18] sm:$0xff]  }
0x213b   : > { %14911 = vmatpush3.msk.msra.mxu1 %vm7056_vm10, %v7221_v38  ;;  %14912 = vmatprep.mubr.msk.f32.mxu1 %vm16755_vm7, %v16754_v43 }
0x213c   : > { %14927 = vmatprep.subr.mxu1 %v16754_v43 }
0x21a0   : > { %v7217_v40 = vpop.xlane.xlu1 %7216 }
0x21a1   : > { %15958 = vrcp.f32 %v7217_v40 }
0x21a4   : > { %v7397_v42 = vpop.permute.xlu1 %7396 }
0x21ab   : > { %v15959_v41 = vpop.eup %15958 }
0x21ac   : > { %v7219_v21 = vmul.f32 %v15959_v41, %v15955_v34 }
0x21ae   : > { %14913 = vmatmul.mubr.msk.f32.vlgmr.msra.gmra.mrb[6].mxu1 %vm7052_vm11, %v7219_v21 }
0x21af   : > { %14928 = vmatpush3.xpose.msk.msra.mxu1 %vm6963_vm8, %v7399_v39  ;;  %14929 = vmatprep.mubr.msk.f32.mxu1 %vm16755_vm7, %v16754_v43 }
0x21b0   : > { %14932 = vmatprep.subr.mxu1 %v16754_v43 }
0x21b2   : > { %14930 = vmatmul.mubr.msk.f32.vlgmr.msra.gmra.mrb[8].mxu1 %vm6963_vm8, %v7397_v42 }
0x21b3   : > { %14933 = vmatpush3.msk.msra.mxu1 %vm7056_vm10, %v7486_v44  ;;  %14934 = vmatprep.mubr.msk.f32.mxu1 %vm16755_vm7, %v16754_v43 }
0x21b4   : > { %14943 = vmatprep.subr.mxu1 %v16754_v43 }
0x220d   : > { %v7126_v46 = vpop.f32.mrb[4].mxu1 }
0x220e   : > { %v14904_v47 = vpop.f32.mrb[5].mxu1  ;;  %v7130_v0 = vpack.c.bf16 %v7126_v46, %v7126_v46 }
0x2281   : > { %v7293_v49 = vpop.f32.mrb[6].mxu1 }
0x2282   : > { %v7297_v56 = vpack.c.bf16 %v7293_v49, %v7293_v49  ;;  %v14914_v7 = vpop.f32.mrb[7].mxu1 }
0x2284   : > { %14918 = vmatmul.mubr.msk.bf16.vlgmr.msra.gmra.mrb[8].mxu0 %vm6963_vm8, %v7297_v56 }
0x2285   : > { %v7470_v59 = vpop.f32.mrb[8].mxu1  ;;  %14922 = vmatpush3.bf16.msra.mxu0 %v18383_v53  ;;  %14923 = vmatprep.mubr.msk.bf16.mxu0 %vm16755_vm7, %v16754_v43 }
0x2286   : > { %v7471_v60 = vadd.f32 %v7470_v59, %v18333_v54  ;;  %v14931_v9 = vpop.f32.mrb[9].mxu1  ;;  %14937 = vmatprep.subr.bf16.mxu0 %v16754_v43 }
0x2288   : > { %v7474_v63 = vsel %vm7040_vm9, %v7471_v60, -inf }
0x2289   : > { %7475 = vmax.xlane.f32.xlu1 %v7474_v63 }
0x2290   : > { %14924 = vmatmul.mubr.msk.bf16.vlgmr.msra.gmra.mrb[8].mxu0 %vm6963_vm8, %v7130_v0 }
0x2291   : > { %14939 = vmatprep.mubr.msk.bf16.mxu0 %vm16755_vm7, %v16754_v43  ;;  %14938 = vmatpush3.bf16.msra.mxu0 %v18413_v15 }
0x2292   : > { %14953 = vmatprep.subr.bf16.mxu0 %v16754_v43 }
0x229a   : > { %7702 = vrot.lane.b32.xlu1 %v18341_v62, %s16758_s20 }
0x229e   : > { %7832 = vrot.lane.b32.xlu1 %v18299_v22, %s16759_s24 }
0x2316   : > { %v7476_v50 = vpop.xlane.xlu1 %7475 }
0x2317   : > { %v7477_v2 = vsub.f32 %v7471_v60, %v7476_v50 }
0x2319   : > { %v7478_v4 = vmul.f32 1.442695, %v7477_v2  ;;  %v18467_v2 = vld [vmem:[%s17592_s17 + $0x20] sm:$0xff]  }
0x231a   : > { %v7703_v16 = vpop.permute.xlu1 %7702 }
0x231b   : > { %15960 = vpow2.f32 %v7478_v4 }
0x231e   : > { %v7833_v32 = vpop.permute.xlu1 %7832 }
0x2325   : > { %v15961_v5 = vpop.eup %15960 }
0x2326   : > { %v7480_v14 = vsel %vm7040_vm9, %v15961_v5, 0.0 }
0x2327   : > { %7481 = vadd.xlane.f32.xlu0 %v7480_v14 }
0x233d   : > { %7613 = vrot.lane.b32.xlu0 %v18310_v13, %s16758_s20 }
0x23b4   : > { %v7482_v12 = vpop.xlane.xlu0 %7481 }
0x23b5   : > { %15962 = vrcp.f32 %v7482_v12 }
0x23b8   : > { %v7614_v26 = vpop.permute.xlu0 %7613 }
0x23bf   : > { %v15963_v55 = vpop.eup %15962 }
0x23c0   : > { %v7484_v58 = vmul.f32 %v15963_v55, %v15961_v5 }
0x23c2   : > { %14935 = vmatmul.mubr.msk.f32.vlgmr.msra.gmra.mrb[10].mxu1 %vm7052_vm11, %v7484_v58 }
0x23c3   : > { %14944 = vmatpush3.xpose.msk.msra.mxu1 %vm6963_vm8, %v7616_v8  ;;  %14945 = vmatprep.mubr.msk.f32.mxu1 %vm16755_vm7, %v16754_v43 }
0x23c4   : > { %14948 = vmatprep.subr.mxu1 %v16754_v43 }
0x23c6   : > { %14946 = vmatmul.mubr.msk.f32.vlgmr.msra.gmra.mrb[12].mxu1 %vm6963_vm8, %v7614_v26 }
0x23c7   : > { %14949 = vmatpush3.msk.msra.mxu1 %vm7056_vm10, %v7703_v16  ;;  %14950 = vmatprep.mubr.msk.f32.mxu1 %vm16755_vm7, %v16754_v43 }
0x23c8   : > { %14959 = vmatprep.subr.mxu1 %v16754_v43 }
0x2495   : > { %v7558_v61 = vpop.f32.mrb[10].mxu1 }
0x2496   : > { %v7562_v18 = vpack.c.bf16 %v7558_v61, %v7558_v61  ;;  %v14936_v19 = vpop.f32.mrb[11].mxu1 }
0x2498   : > { %14940 = vmatmul.mubr.msk.bf16.vlgmr.msra.gmra.mrb[8].mxu0 %vm6963_vm8, %v7562_v18 }
0x2499   : > { %v7687_v20 = vpop.f32.mrb[12].mxu1  ;;  %14955 = vmatprep.mubr.msk.bf16.mxu0 %vm16755_vm7, %v16754_v43  ;;  %14954 = vmatpush3.bf16.msra.mxu0 %v18440_v23 }
0x249a   : > { %v7688_v24 = vadd.f32 %v7687_v20, %v18333_v54  ;;  %v14947_v25 = vpop.f32.mrb[13].mxu1  ;;  %14969 = vmatprep.subr.bf16.mxu0 %v16754_v43 }
0x249c   : > { %v7691_v27 = vsel %vm7040_vm9, %v7688_v24, -inf }
0x249d   : > { %7692 = vmax.xlane.f32.xlu0 %v7691_v27 }
0x24b3   : > { %7919 = vrot.lane.b32.xlu0 %v18341_v62, %s16759_s24 }
0x24b7   : > { %8049 = vrot.lane.b32.xlu0 %v18299_v22, %s16760_s4 }
0x252a   : > { %v7693_v11 = vpop.xlane.xlu0 %7692 }
0x252b   : > { %v7694_v29 = vsub.f32 %v7688_v24, %v7693_v11 }
0x252d   : > { %v7695_v30 = vmul.f32 1.442695, %v7694_v29 }
0x252e   : > { %v7920_v37 = vpop.permute.xlu0 %7919 }
0x252f   : > { %15964 = vpow2.f32 %v7695_v30  ;;  %v18494_v30 = vld [vmem:[%s17592_s17 + $0x28] sm:$0xff]  }
0x2532   : > { %v8050_v59 = vpop.permute.xlu0 %8049 }
0x2539   : > { %v15965_v31 = vpop.eup %15964 }
0x253a   : > { %v7697_v3 = vsel %vm7040_vm9, %v15965_v31, 0.0 }
0x253b   : > { %7698 = vadd.xlane.f32.xlu1 %v7697_v3 }
0x254c   : > { %7830 = vrot.lane.b32.xlu1 %v18310_v13, %s16759_s24 }
0x25c8   : > { %v7699_v33 = vpop.xlane.xlu1 %7698 }
0x25c9   : > { %15966 = vrcp.f32 %v7699_v33 }
0x25cc   : > { %v7831_v36 = vpop.permute.xlu1 %7830 }
0x25d3   : > { %v15967_v34 = vpop.eup %15966 }
0x25d4   : > { %v7701_v35 = vmul.f32 %v15967_v34, %v15965_v31 }
0x25d6   : > { %14951 = vmatmul.mubr.msk.f32.vlgmr.msra.gmra.mrb[14].mxu1 %vm7052_vm11, %v7701_v35 }
0x25d7   : > { %14960 = vmatpush3.xpose.msk.msra.mxu1 %vm6963_vm8, %v7833_v32  ;;  %14961 = vmatprep.mubr.msk.f32.mxu1 %vm16755_vm7, %v16754_v43 }
0x25d8   : > { %14964 = vmatprep.subr.mxu1 %v16754_v43 }
0x25da   : > { %14962 = vmatmul.mubr.msk.f32.vlgmr.msra.gmra.mrb[16].mxu1 %vm6963_vm8, %v7831_v36 }
0x25db   : > { %14965 = vmatpush3.msk.msra.mxu1 %vm7056_vm10, %v7920_v37  ;;  %14966 = vmatprep.mubr.msk.f32.mxu1 %vm16755_vm7, %v16754_v43 }
0x25dc   : > { %14975 = vmatprep.subr.mxu1 %v16754_v43 }
0x26a9   : > { %v7775_v38 = vpop.f32.mrb[14].mxu1 }
0x26aa   : > { %v7779_v39 = vpack.c.bf16 %v7775_v38, %v7775_v38  ;;  %v14952_v40 = vpop.f32.mrb[15].mxu1 }
0x26ac   : > { %14956 = vmatmul.mubr.msk.bf16.vlgmr.msra.gmra.mrb[8].mxu0 %vm6963_vm8, %v7779_v39 }
0x26ad   : > { %v7904_v41 = vpop.f32.mrb[16].mxu1  ;;  %14971 = vmatprep.mubr.msk.bf16.mxu0 %vm16755_vm7, %v16754_v43  ;;  %14970 = vmatpush3.bf16.msra.mxu0 %v18467_v2 }
0x26ae   : > { %v7905_v21 = vadd.f32 %v7904_v41, %v18333_v54  ;;  %v14963_v42 = vpop.f32.mrb[17].mxu1  ;;  %14985 = vmatprep.subr.bf16.mxu0 %v16754_v43 }
0x26b0   : > { %v7908_v44 = vsel %vm7040_vm9, %v7905_v21, -inf }
0x26b1   : > { %7909 = vmax.xlane.f32.xlu1 %v7908_v44 }
0x26c2   : > { %8136 = vrot.lane.b32.xlu1 %v18341_v62, %s16760_s4 }
0x26c6   : > { %8266 = vrot.lane.b32.xlu1 %v18299_v22, %s16761_s30 }
0x273e   : > { %v7910_v46 = vpop.xlane.xlu1 %7909 }
0x273f   : > { %v7911_v47 = vsub.f32 %v7905_v21, %v7910_v46 }
0x2741   : > { %v7912_v49 = vmul.f32 1.442695, %v7911_v47 }
0x2742   : > { %v8137_v50 = vpop.permute.xlu1 %8136 }
0x2743   : > { %15968 = vpow2.f32 %v7912_v49  ;;  %v18515_v49 = vld [vmem:[%s17592_s17 + $0x30] sm:$0xff]  }
0x2746   : > { %v8267_v20 = vpop.permute.xlu1 %8266 }
0x274d   : > { %v15969_v56 = vpop.eup %15968 }
0x274e   : > { %v7914_v7 = vsel %vm7040_vm9, %v15969_v56, 0.0 }
0x274f   : > { %7915 = vadd.xlane.f32.xlu0 %v7914_v7 }
0x2765   : > { %8047 = vrot.lane.b32.xlu0 %v18310_v13, %s16760_s4 }
0x27dc   : > { %v7916_v60 = vpop.xlane.xlu0 %7915 }
0x27dd   : > { %15970 = vrcp.f32 %v7916_v60 }
0x27e0   : > { %v8048_v0 = vpop.permute.xlu0 %8047 }
0x27e7   : > { %v15971_v9 = vpop.eup %15970 }
0x27e8   : > { %v7918_v63 = vmul.f32 %v15971_v9, %v15969_v56 }
0x27ea   : > { %14967 = vmatmul.mubr.msk.f32.vlgmr.msra.gmra.mrb[18].mxu1 %vm7052_vm11, %v7918_v63 }
0x27eb   : > { %14976 = vmatpush3.xpose.msk.msra.mxu1 %vm6963_vm8, %v8050_v59  ;;  %14977 = vmatprep.mubr.msk.f32.mxu1 %vm16755_vm7, %v16754_v43 }
0x27ec   : > { %14980 = vmatprep.subr.mxu1 %v16754_v43 }
0x27ee   : > { %14978 = vmatmul.mubr.msk.f32.vlgmr.msra.gmra.mrb[20].mxu1 %vm6963_vm8, %v8048_v0 }
0x27ef   : > { %14981 = vmatpush3.msk.msra.mxu1 %vm7056_vm10, %v8137_v50  ;;  %14982 = vmatprep.mubr.msk.f32.mxu1 %vm16755_vm7, %v16754_v43  ;;  %v8709_v50 = vrot.slane %v18304_v51, 5 }
0x27f0   : > { %14991 = vmatprep.subr.mxu1 %v16754_v43 }
0x28bd   : > { %v7992_v4 = vpop.f32.mrb[18].mxu1 }
0x28be   : > { %v7996_v5 = vpack.c.bf16 %v7992_v4, %v7992_v4  ;;  %v14968_v14 = vpop.f32.mrb[19].mxu1  ;;  %v8708_v4 = vrot.slane %v18299_v22, 5 }
0x28c0   : > { %14972 = vmatmul.mubr.msk.bf16.vlgmr.msra.gmra.mrb[8].mxu0 %vm6963_vm8, %v7996_v5  ;;  %v18527_v5 = vsel %vm8703_vm12, %v8708_v4, %v8709_v50 }
0x28c1   : > { %v8121_v8 = vpop.f32.mrb[20].mxu1  ;;  %14987 = vmatprep.mubr.msk.bf16.mxu0 %vm16755_vm7, %v16754_v43  ;;  %14986 = vmatpush3.bf16.msra.mxu0 %v18494_v30 }
0x28c2   : > { %v8122_v12 = vadd.f32 %v8121_v8, %v18333_v54  ;;  %v14979_v55 = vpop.f32.mrb[21].mxu1  ;;  %15001 = vmatprep.subr.bf16.mxu0 %v16754_v43 }
0x28c4   : > { %v8125_v58 = vsel %vm7040_vm9, %v8122_v12, -inf }
0x28c5   : > { %8126 = vmax.xlane.f32.xlu0 %v8125_v58 }
0x28db   : > { %8353 = vrot.lane.b32.xlu0 %v18341_v62, %s16761_s30 }
0x28df   : > { %8483 = vrot.lane.b32.xlu0 %v18299_v22, %s16762_s7 }
0x2952   : > { %v8127_v26 = vpop.xlane.xlu0 %8126 }
0x2953   : > { %v8128_v16 = vsub.f32 %v8122_v12, %v8127_v26 }
0x2955   : > { %v8129_v61 = vmul.f32 1.442695, %v8128_v16  ;;  %v8705_v16 = vrot.slane %v18302_v1, 5 }
0x2956   : > { %v8354_v29 = vpop.permute.xlu0 %8353 }
0x2957   : > { %15972 = vpow2.f32 %v8129_v61  ;;  %v8797_v61 = vrot.slane %v18341_v62, 5 }
0x295a   : > { %v8484_v21 = vpop.permute.xlu0 %8483 }
0x2961   : > { %v15973_v18 = vpop.eup %15972 }
0x2962   : > { %v8131_v19 = vsel %vm7040_vm9, %v15973_v18, 0.0 }
0x2963   : > { %8132 = vadd.xlane.f32.xlu1 %v8131_v19  ;;  %v8704_v19 = vrot.slane %v18310_v13, 5 }
0x2974   : > { %8264 = vrot.lane.b32.xlu1 %v18310_v13, %s16761_s30 }
0x29f0   : > { %v8133_v24 = vpop.xlane.xlu1 %8132 }
0x29f1   : > { %15974 = vrcp.f32 %v8133_v24 }
0x29f4   : > { %v8265_v11 = vpop.permute.xlu1 %8264 }
0x29fb   : > { %v15975_v25 = vpop.eup %15974 }
0x29fc   : > { %v8135_v27 = vmul.f32 %v15975_v25, %v15973_v18  ;;  %v8798_v18 = vrot.slane %v18343_v17, 5  ;;  %v18566_v17 = vrot.slane %v18329_v6, %v18286_v52 }
0x29fe   : > { %14983 = vmatmul.mubr.msk.f32.vlgmr.msra.gmra.mrb[22].mxu1 %vm7052_vm11, %v8135_v27  ;;  %v18550_v1 = vsel %vm8703_vm12, %v8797_v61, %v8798_v18 }
0x29ff   : > { %14992 = vmatpush3.xpose.msk.msra.mxu1 %vm6963_vm8, %v8267_v20  ;;  %14993 = vmatprep.mubr.msk.f32.mxu1 %vm16755_vm7, %v16754_v43  ;;  %v18547_v20 = vsel %vm8703_vm12, %v8704_v19, %v8705_v16 }
0x2a00   : > { %14996 = vmatprep.subr.mxu1 %v16754_v43 }
0x2a02   : > { %14994 = vmatmul.mubr.msk.f32.vlgmr.msra.gmra.mrb[24].mxu1 %vm6963_vm8, %v8265_v11 }
0x2a03   : > { %14997 = vmatpush3.msk.msra.mxu1 %vm7056_vm10, %v8354_v29  ;;  %14998 = vmatprep.mubr.msk.f32.mxu1 %vm16755_vm7, %v16754_v43 }
0x2a04   : > { %15007 = vmatprep.subr.mxu1 %v16754_v43 }
0x2ad1   : > { %v8209_v31 = vpop.f32.mrb[22].mxu1 }
0x2ad2   : > { %v8213_v3 = vpack.c.bf16 %v8209_v31, %v8209_v31  ;;  %v14984_v32 = vpop.f32.mrb[23].mxu1 }
0x2ad4   : > { %14988 = vmatmul.mubr.msk.bf16.vlgmr.msra.gmra.mrb[8].mxu0 %vm6963_vm8, %v8213_v3 }
0x2ad5   : > { %v8338_v33 = vpop.f32.mrb[24].mxu1  ;;  %15003 = vmatprep.mubr.msk.bf16.mxu0 %vm16755_vm7, %v16754_v43  ;;  %15002 = vmatpush3.bf16.msra.mxu0 %v18515_v49 }
0x2ad6   : > { %v8339_v34 = vadd.f32 %v8338_v33, %v18333_v54  ;;  %v14995_v35 = vpop.f32.mrb[25].mxu1  ;;  %15017 = vmatprep.subr.bf16.mxu0 %v16754_v43 }
0x2ad8   : > { %v8342_v36 = vsel %vm7040_vm9, %v8339_v34, -inf }
0x2ad9   : > { %8343 = vmax.xlane.f32.xlu1 %v8342_v36 }
0x2b66   : > { %v8344_v37 = vpop.xlane.xlu1 %8343 }
0x2b67   : > { %v8345_v38 = vsub.f32 %v8339_v34, %v8344_v37 }
0x2b69   : > { %v8346_v39 = vmul.f32 1.442695, %v8345_v38 }
0x2b6b   : > { %15976 = vpow2.f32 %v8346_v39 }
0x2b75   : > { %v15977_v40 = vpop.eup %15976 }
0x2b76   : > { %v8348_v41 = vsel %vm7040_vm9, %v15977_v40, 0.0 }
0x2b77   : > { %8349 = vadd.xlane.f32.xlu0 %v8348_v41 }
0x2b8d   : > { %8481 = vrot.lane.b32.xlu0 %v18310_v13, %s16762_s7  ;;  %v18560_v13 = vld [vmem:[%s17592_s17 + $0x38] sm:$0xff]  }
0x2c04   : > { %v8350_v42 = vpop.xlane.xlu0 %8349 }
0x2c05   : > { %15978 = vrcp.f32 %v8350_v42 }
0x2c08   : > { %v8482_v47 = vpop.permute.xlu0 %8481 }
0x2c0f   : > { %v15979_v44 = vpop.eup %15978 }
0x2c10   : > { %v8352_v46 = vmul.f32 %v15979_v44, %v15977_v40 }
0x2c12   : > { %14999 = vmatmul.mubr.msk.f32.vlgmr.msra.gmra.mrb[26].mxu1 %vm7052_vm11, %v8352_v46 }
0x2c13   : > { %15008 = vmatpush3.xpose.msk.msra.mxu1 %vm6963_vm8, %v8484_v21  ;;  %15009 = vmatprep.mubr.msk.f32.mxu1 %vm16755_vm7, %v16754_v43 }
0x2c14   : > { %15012 = vmatprep.subr.mxu1 %v16754_v43 }
0x2c16   : > { %15010 = vmatmul.mubr.msk.f32.vlgmr.msra.gmra.mrb[28].mxu1 %vm6963_vm8, %v8482_v47 }
0x2c17   : > { %15014 = vmatprep.mubr.msk.f32.mxu1 %vm16755_vm7, %v16754_v43 }
0x2ce5   : > { %v8426_v56 = vpop.f32.mrb[26].mxu1 }
0x2ce6   : > { %v8430_v7 = vpack.c.bf16 %v8426_v56, %v8426_v56  ;;  %v15000_v59 = vpop.f32.mrb[27].mxu1 }
0x2ce8   : > { %15004 = vmatmul.mubr.msk.bf16.vlgmr.msra.gmra.mrb[8].mxu0 %vm6963_vm8, %v8430_v7 }
0x2ce9   : > { %v8555_v60 = vpop.f32.mrb[28].mxu1  ;;  %15019 = vmatprep.mubr.msk.bf16.mxu0 %vm16755_vm7, %v16754_v43  ;;  %15018 = vmatpush3.bf16.msra.mxu0 %v18560_v13 }
0x2cea   : > { %v8556_v9 = vadd.f32 %v8555_v60, %v18333_v54  ;;  %v15011_v63 = vpop.f32.mrb[29].mxu1  ;;  %15043 = vmatprep.subr.bf16.mxu0 %v16754_v43 }
0x2cec   : > { %v8559_v0 = vsel %vm7040_vm9, %v8556_v9, -inf }
0x2ced   : > { %8560 = vmax.xlane.f32.xlu0 %v8559_v0 }
0x2d03   : > { %8878 = vrot.lane.b32.xlu0 %v18527_v5, %s16756_s27 }
0x2d7a   : > { %v8561_v14 = vpop.xlane.xlu0 %8560 }
0x2d7b   : > { %v8562_v8 = vsub.f32 %v8556_v9, %v8561_v14 }
0x2d7d   : > { %v8563_v12 = vmul.f32 1.442695, %v8562_v8 }
0x2d7e   : > { %v8879_v38 = vpop.permute.xlu0 %8878 }
0x2d7f   : > { %15980 = vpow2.f32 %v8563_v12 }
0x2d89   : > { %v15981_v54 = vpop.eup %15980 }
0x2d8a   : > { %v8565_v55 = vsel %vm7040_vm9, %v15981_v54, 0.0 }
0x2d8b   : > { %8566 = vadd.xlane.f32.xlu1 %v8565_v55 }
0x2d9c   : > { %8570 = vrot.lane.b32.xlu1 %v18341_v62, %s16762_s7 }
0x2e18   : > { %v8567_v51 = vpop.xlane.xlu1 %8566 }
0x2e19   : > { %15982 = vrcp.f32 %v8567_v51 }
0x2e1c   : > { %v8571_v22 = vpop.permute.xlu1 %8570 }
0x2e1d   : > { %15013 = vmatpush3.msk.msra.mxu1 %vm7056_vm10, %v8571_v22 }
0x2e1e   : > { %15023 = vmatprep.subr.mxu1 %v16754_v43 }
0x2e23   : > { %v15983_v58 = vpop.eup %15982 }
0x2e24   : > { %v8569_v26 = vmul.f32 %v15983_v58, %v15981_v54 }
0x2e26   : > { %15015 = vmatmul.mubr.msk.f32.vlgmr.msra.gmra.mrb[30].mxu1 %vm7052_vm11, %v8569_v26 }
0x2e27   : > { %15024 = vmatpush3.xpose.msk.msra.mxu1 %vm6963_vm8, %v18527_v5  ;;  %15025 = vmatprep.mubr.msk.f32.mxu1 %vm16755_vm7, %v16754_v43 }
0x2e28   : > { %15028 = vmatprep.subr.mxu1 %v16754_v43 }
0x2e2a   : > { %15026 = vmatmul.mubr.msk.f32.vlgmr.msra.gmra.mrb[32].mxu1 %vm6963_vm8, %v18547_v20 }
0x2e2b   : > { %15029 = vmatpush3.msk.msra.mxu1 %vm7056_vm10, %v18550_v1  ;;  %15030 = vmatprep.mubr.msk.f32.mxu1 %vm16755_vm7, %v16754_v43 }
0x2e2c   : > { %15033 = vmatprep.subr.mxu1 %v16754_v43 }
0x2ef9   : > { %v8643_v62 = vpop.f32.mrb[30].mxu1 }
0x2efa   : > { %v8647_v24 = vpack.c.bf16 %v8643_v62, %v8643_v62  ;;  %v15016_v25 = vpop.f32.mrb[31].mxu1 }
0x2efc   : > { %15020 = vmatmul.mubr.msk.bf16.vlgmr.msra.gmra.mrb[8].mxu0 %vm6963_vm8, %v8647_v24 }
0x2efd   : > { %v8781_v27 = vpop.f32.mrb[32].mxu1  ;;  %15044 = vmatpush3.bf16.msra.mxu0 %v18378_v45  ;;  %15045 = vmatprep.mubr.msk.bf16.mxu0 %vm16755_vm7, %v16754_v43 }
0x2efe   : > { %v8782_v11 = vadd.f32 %v8781_v27, %v18566_v17  ;;  %v15027_v29 = vpop.f32.mrb[33].mxu1  ;;  %15049 = vmatprep.subr.bf16.mxu0 %v16754_v43 }
0x2f00   : > { %v8785_v31 = vsel %vm7040_vm9, %v8782_v11, -inf }
0x2f01   : > { %8786 = vmax.xlane.f32.xlu1 %v8785_v31 }
0x2f8e   : > { %v8787_v6 = vpop.xlane.xlu1 %8786 }
0x2f8f   : > { %v8788_v3 = vsub.f32 %v8782_v11, %v8787_v6 }
0x2f91   : > { %v8789_v32 = vmul.f32 1.442695, %v8788_v3 }
0x2f93   : > { %15984 = vpow2.f32 %v8789_v32 }
0x2f9d   : > { %v15985_v33 = vpop.eup %15984 }
0x2f9e   : > { %v8791_v34 = vsel %vm7040_vm9, %v15985_v33, 0.0 }
0x2f9f   : > { %8792 = vadd.xlane.f32.xlu0 %v8791_v34 }
0x2fb5   : > { %8876 = vrot.lane.b32.xlu0 %v18547_v20, %s16756_s27 }
0x2fcf   : > { %v18578_v45 = vpop.f32.mrb[8].mxu0 }
0x2fd0   : > { %v15021_v35 = vpop.f32.mrb[9].mxu0 }
0x2fd1   : > { %v8694_v36 = vpop.f32.mrb[10].mxu0 }
0x2fd2   : > { %v15022_v37 = vpop.f32.mrb[11].mxu0 }
0x302c   : > { %v8793_v39 = vpop.xlane.xlu0 %8792 }
0x302d   : > { %15986 = vrcp.f32 %v8793_v39 }
0x3030   : > { %v8877_v21 = vpop.permute.xlu0 %8876 }
0x3037   : > { %v15987_v40 = vpop.eup %15986 }
0x3038   : > { %v8795_v41 = vmul.f32 %v15987_v40, %v15985_v33 }
0x303a   : > { %15031 = vmatmul.mubr.msk.f32.vlgmr.msra.gmra.mrb[34].mxu1 %vm7052_vm11, %v8795_v41 }
0x303b   : > { %15034 = vmatpush3.xpose.msk.msra.mxu1 %vm6963_vm8, %v8879_v38  ;;  %15035 = vmatprep.mubr.msk.f32.mxu1 %vm16755_vm7, %v16754_v43 }
0x303c   : > { %15038 = vmatprep.subr.mxu1 %v16754_v43 }
0x303e   : > { %15036 = vmatmul.mubr.msk.f32.vlgmr.msra.gmra.mrb[36].mxu1 %vm6963_vm8, %v8877_v21 }
0x303f   : > { %15040 = vmatprep.mubr.msk.f32.mxu1 %vm16755_vm7, %v16754_v43 }
0x310d   : > { %v8871_v42 = vpop.f32.mrb[34].mxu1 }
0x310e   : > { %v15032_v44 = vpop.f32.mrb[35].mxu1  ;;  %v8875_v19 = vpack.c.bf16 %v8871_v42, %v8871_v42 }
0x3111   : > { %v8950_v46 = vpop.f32.mrb[36].mxu1 }
0x3112   : > { %v8951_v47 = vadd.f32 %v8950_v46, %v18566_v17  ;;  %v15037_v56 = vpop.f32.mrb[37].mxu1 }
0x3114   : > { %v8954_v7 = vsel %vm7040_vm9, %v8951_v47, -inf }
0x3115   : > { %8955 = vmax.xlane.f32.xlu1 %v8954_v7 }
0x3126   : > { %8965 = vrot.lane.b32.xlu1 %v18550_v1, %s16756_s27 }
0x312a   : > { %9131 = vrot.lane.b32.xlu1 %v18527_v5, %s16757_s18 }
0x312e   : > { %9129 = vrot.lane.b32.xlu1 %v18547_v20, %s16757_s18 }
0x31a2   : > { %v8956_v59 = vpop.xlane.xlu1 %8955 }
0x31a3   : > { %v8957_v60 = vsub.f32 %v8951_v47, %v8956_v59 }
0x31a5   : > { %v8958_v9 = vmul.f32 1.442695, %v8957_v60 }
0x31a6   : > { %v8966_v63 = vpop.permute.xlu1 %8965 }
0x31a7   : > { %15988 = vpow2.f32 %v8958_v9  ;;  %15039 = vmatpush3.msk.msra.mxu1 %vm7056_vm10, %v8966_v63 }
0x31a8   : > { %15055 = vmatprep.subr.mxu1 %v16754_v43 }
0x31aa   : > { %v9132_v8 = vpop.permute.xlu1 %9131 }
0x31ae   : > { %v9130_v54 = vpop.permute.xlu1 %9129 }
0x31b1   : > { %v15989_v0 = vpop.eup %15988 }
0x31b2   : > { %v8960_v50 = vsel %vm7040_vm9, %v15989_v0, 0.0 }
0x31b3   : > { %8961 = vadd.xlane.f32.xlu0 %v8960_v50 }
0x31c9   : > { %9218 = vrot.lane.b32.xlu0 %v18550_v1, %s16757_s18 }
0x31cd   : > { %9342 = vrot.lane.b32.xlu0 %v18527_v5, %s16758_s20 }
0x3240   : > { %v8962_v4 = vpop.xlane.xlu0 %8961 }
0x3241   : > { %15990 = vrcp.f32 %v8962_v4 }
0x3244   : > { %v9219_v55 = vpop.permute.xlu0 %9218 }
0x3248   : > { %v9343_v11 = vpop.permute.xlu0 %9342 }
0x324b   : > { %v15991_v14 = vpop.eup %15990 }
0x324c   : > { %v8964_v12 = vmul.f32 %v15991_v14, %v15989_v0 }
0x324e   : > { %15041 = vmatmul.mubr.msk.f32.vlgmr.msra.gmra.mrb[38].mxu1 %vm7052_vm11, %v8964_v12 }
0x324f   : > { %15056 = vmatpush3.xpose.msk.msra.mxu1 %vm6963_vm8, %v9132_v8  ;;  %15057 = vmatprep.mubr.msk.f32.mxu1 %vm16755_vm7, %v16754_v43 }
0x3250   : > { %15060 = vmatprep.subr.mxu1 %v16754_v43 }
0x3252   : > { %15058 = vmatmul.mubr.msk.f32.vlgmr.msra.gmra.mrb[40].mxu1 %vm6963_vm8, %v9130_v54 }
0x3253   : > { %15061 = vmatpush3.msk.msra.mxu1 %vm7056_vm10, %v9219_v55  ;;  %15062 = vmatprep.mubr.msk.f32.mxu1 %vm16755_vm7, %v16754_v43 }
0x3254   : > { %15071 = vmatprep.subr.mxu1 %v16754_v43 }
0x3321   : > { %v9038_v51 = vpop.f32.mrb[38].mxu1 }
0x3322   : > { %v9042_v22 = vpack.c.bf16 %v9038_v51, %v9038_v51  ;;  %v15042_v58 = vpop.f32.mrb[39].mxu1 }
0x3324   : > { %15046 = vmatmul.mubr.msk.bf16.vlgmr.msra.gmra.mrb[12].mxu0 %vm6963_vm8, %v9042_v22 }
0x3325   : > { %v9203_v26 = vpop.f32.mrb[40].mxu1  ;;  %15050 = vmatpush3.bf16.msra.mxu0 %v18383_v53  ;;  %15051 = vmatprep.mubr.msk.bf16.mxu0 %vm16755_vm7, %v16754_v43 }
0x3326   : > { %v9204_v16 = vadd.f32 %v9203_v26, %v18566_v17  ;;  %v15059_v61 = vpop.f32.mrb[41].mxu1  ;;  %15065 = vmatprep.subr.bf16.mxu0 %v16754_v43 }
0x3328   : > { %v9207_v18 = vsel %vm7040_vm9, %v9204_v16, -inf }
0x3329   : > { %9208 = vmax.xlane.f32.xlu1 %v9207_v18 }
0x3330   : > { %15052 = vmatmul.mubr.msk.bf16.vlgmr.msra.gmra.mrb[12].mxu0 %vm6963_vm8, %v8875_v19 }
0x3331   : > { %15066 = vmatpush3.bf16.msra.mxu0 %v18413_v15  ;;  %15067 = vmatprep.mubr.msk.bf16.mxu0 %vm16755_vm7, %v16754_v43 }
0x3332   : > { %15081 = vmatprep.subr.bf16.mxu0 %v16754_v43 }
0x33b6   : > { %v9209_v53 = vpop.xlane.xlu1 %9208 }
0x33b7   : > { %v9210_v62 = vsub.f32 %v9204_v16, %v9209_v53 }
0x33b9   : > { %v9211_v24 = vmul.f32 1.442695, %v9210_v62 }
0x33bb   : > { %15992 = vpow2.f32 %v9211_v24 }
0x33c5   : > { %v15993_v25 = vpop.eup %15992 }
0x33c6   : > { %v9213_v27 = vsel %vm7040_vm9, %v15993_v25, 0.0 }
0x33c7   : > { %9214 = vadd.xlane.f32.xlu0 %v9213_v27 }
0x33dd   : > { %9340 = vrot.lane.b32.xlu0 %v18547_v20, %s16758_s20 }
0x3454   : > { %v9215_v29 = vpop.xlane.xlu0 %9214 }
0x3455   : > { %15994 = vrcp.f32 %v9215_v29 }
0x3458   : > { %v9341_v6 = vpop.permute.xlu0 %9340 }
0x345f   : > { %v15995_v15 = vpop.eup %15994 }
0x3460   : > { %v9217_v31 = vmul.f32 %v15995_v15, %v15993_v25 }
0x3462   : > { %15063 = vmatmul.mubr.msk.f32.vlgmr.msra.gmra.mrb[42].mxu1 %vm7052_vm11, %v9217_v31 }
0x3463   : > { %15072 = vmatpush3.xpose.msk.msra.mxu1 %vm6963_vm8, %v9343_v11  ;;  %15073 = vmatprep.mubr.msk.f32.mxu1 %vm16755_vm7, %v16754_v43 }
0x3464   : > { %15076 = vmatprep.subr.mxu1 %v16754_v43 }
0x3466   : > { %15074 = vmatmul.mubr.msk.f32.vlgmr.msra.gmra.mrb[44].mxu1 %vm6963_vm8, %v9341_v6 }
0x3467   : > { %15078 = vmatprep.mubr.msk.f32.mxu1 %vm16755_vm7, %v16754_v43 }
0x3535   : > { %v9291_v3 = vpop.f32.mrb[42].mxu1 }
0x3536   : > { %v9295_v32 = vpack.c.bf16 %v9291_v3, %v9291_v3  ;;  %v15064_v33 = vpop.f32.mrb[43].mxu1 }
0x3538   : > { %15068 = vmatmul.mubr.msk.bf16.vlgmr.msra.gmra.mrb[12].mxu0 %vm6963_vm8, %v9295_v32 }
0x3539   : > { %v9414_v34 = vpop.f32.mrb[44].mxu1  ;;  %15082 = vmatpush3.bf16.msra.mxu0 %v18440_v23  ;;  %15083 = vmatprep.mubr.msk.bf16.mxu0 %vm16755_vm7, %v16754_v43 }
0x353a   : > { %v9415_v35 = vadd.f32 %v9414_v34, %v18566_v17  ;;  %v15075_v36 = vpop.f32.mrb[45].mxu1  ;;  %15097 = vmatprep.subr.bf16.mxu0 %v16754_v43 }
0x353c   : > { %v9418_v37 = vsel %vm7040_vm9, %v9415_v35, -inf }
0x353d   : > { %9419 = vmax.xlane.f32.xlu1 %v9418_v37 }
0x354e   : > { %9429 = vrot.lane.b32.xlu1 %v18550_v1, %s16758_s20 }
0x3552   : > { %9553 = vrot.lane.b32.xlu1 %v18527_v5, %s16759_s24 }
0x3556   : > { %9551 = vrot.lane.b32.xlu1 %v18547_v20, %s16759_s24 }
0x35ca   : > { %v9420_v23 = vpop.xlane.xlu1 %9419 }
0x35cb   : > { %v9421_v38 = vsub.f32 %v9415_v35, %v9420_v23 }
0x35cd   : > { %v9422_v39 = vmul.f32 1.442695, %v9421_v38 }
0x35ce   : > { %v9430_v40 = vpop.permute.xlu1 %9429 }
0x35cf   : > { %15996 = vpow2.f32 %v9422_v39  ;;  %15077 = vmatpush3.msk.msra.mxu1 %vm7056_vm10, %v9430_v40 }
0x35d0   : > { %15087 = vmatprep.subr.mxu1 %v16754_v43 }
0x35d2   : > { %v9554_v46 = vpop.permute.xlu1 %9553 }
0x35d6   : > { %v9552_v56 = vpop.permute.xlu1 %9551 }
0x35d9   : > { %v15997_v41 = vpop.eup %15996 }
0x35da   : > { %v9424_v21 = vsel %vm7040_vm9, %v15997_v41, 0.0 }
0x35db   : > { %9425 = vadd.xlane.f32.xlu0 %v9424_v21 }
0x35f1   : > { %9640 = vrot.lane.b32.xlu0 %v18550_v1, %s16759_s24 }
0x35f5   : > { %9764 = vrot.lane.b32.xlu0 %v18527_v5, %s16760_s4 }
0x3668   : > { %v9426_v42 = vpop.xlane.xlu0 %9425 }
0x3669   : > { %15998 = vrcp.f32 %v9426_v42 }
0x366c   : > { %v9641_v7 = vpop.permute.xlu0 %9640 }
0x3673   : > { %v15999_v44 = vpop.eup %15998 }
0x3674   : > { %v9428_v47 = vmul.f32 %v15999_v44, %v15997_v41 }
0x3676   : > { %15079 = vmatmul.mubr.msk.f32.vlgmr.msra.gmra.mrb[46].mxu1 %vm7052_vm11, %v9428_v47 }
0x3677   : > { %15088 = vmatpush3.xpose.msk.msra.mxu1 %vm6963_vm8, %v9554_v46  ;;  %15089 = vmatprep.mubr.msk.f32.mxu1 %vm16755_vm7, %v16754_v43 }
0x3678   : > { %15092 = vmatprep.subr.mxu1 %v16754_v43 }
0x367a   : > { %15090 = vmatmul.mubr.msk.f32.vlgmr.msra.gmra.mrb[48].mxu1 %vm6963_vm8, %v9552_v56 }
0x367b   : > { %15093 = vmatpush3.msk.msra.mxu1 %vm7056_vm10, %v9641_v7  ;;  %15094 = vmatprep.mubr.msk.f32.mxu1 %vm16755_vm7, %v16754_v43 }
0x367c   : > { %15103 = vmatprep.subr.mxu1 %v16754_v43 }
0x3749   : > { %v9502_v59 = vpop.f32.mrb[46].mxu1 }
0x374a   : > { %v9506_v60 = vpack.c.bf16 %v9502_v59, %v9502_v59  ;;  %v15080_v9 = vpop.f32.mrb[47].mxu1 }
0x374c   : > { %15084 = vmatmul.mubr.msk.bf16.vlgmr.msra.gmra.mrb[12].mxu0 %vm6963_vm8, %v9506_v60 }
0x374d   : > { %v9625_v63 = vpop.f32.mrb[48].mxu1  ;;  %15098 = vmatpush3.bf16.msra.mxu0 %v18467_v2  ;;  %15099 = vmatprep.mubr.msk.bf16.mxu0 %vm16755_vm7, %v16754_v43  ;;  %v9765_v2 = vpop.permute.xlu0 %9764 }
0x374e   : > { %v9626_v0 = vadd.f32 %v9625_v63, %v18566_v17  ;;  %v15091_v50 = vpop.f32.mrb[49].mxu1  ;;  %15113 = vmatprep.subr.bf16.mxu0 %v16754_v43 }
0x3750   : > { %v9629_v4 = vsel %vm7040_vm9, %v9626_v0, -inf }
0x3751   : > { %9630 = vmax.xlane.f32.xlu1 %v9629_v4 }
0x37de   : > { %v9631_v14 = vpop.xlane.xlu1 %9630 }
0x37df   : > { %v9632_v8 = vsub.f32 %v9626_v0, %v9631_v14 }
0x37e1   : > { %v9633_v12 = vmul.f32 1.442695, %v9632_v8 }
0x37e3   : > { %16000 = vpow2.f32 %v9633_v12 }
0x37ed   : > { %v16001_v54 = vpop.eup %16000 }
0x37ee   : > { %v9635_v55 = vsel %vm7040_vm9, %v16001_v54, 0.0 }
0x37ef   : > { %9636 = vadd.xlane.f32.xlu0 %v9635_v55 }
0x3805   : > { %9762 = vrot.lane.b32.xlu0 %v18547_v20, %s16760_s4 }
0x387c   : > { %v9637_v51 = vpop.xlane.xlu0 %9636 }
0x387d   : > { %16002 = vrcp.f32 %v9637_v51 }
0x3880   : > { %v9763_v26 = vpop.permute.xlu0 %9762 }
0x3887   : > { %v16003_v22 = vpop.eup %16002 }
0x3888   : > { %v9639_v58 = vmul.f32 %v16003_v22, %v16001_v54 }
0x388a   : > { %15095 = vmatmul.mubr.msk.f32.vlgmr.msra.gmra.mrb[50].mxu1 %vm7052_vm11, %v9639_v58 }
0x388b   : > { %15104 = vmatpush3.xpose.msk.msra.mxu1 %vm6963_vm8, %v9765_v2  ;;  %15105 = vmatprep.mubr.msk.f32.mxu1 %vm16755_vm7, %v16754_v43 }
0x388c   : > { %15108 = vmatprep.subr.mxu1 %v16754_v43 }
0x388e   : > { %15106 = vmatmul.mubr.msk.f32.vlgmr.msra.gmra.mrb[52].mxu1 %vm6963_vm8, %v9763_v26 }
0x388f   : > { %15110 = vmatprep.mubr.msk.f32.mxu1 %vm16755_vm7, %v16754_v43 }
0x395d   : > { %v9713_v16 = vpop.f32.mrb[50].mxu1 }
0x395e   : > { %v9717_v61 = vpack.c.bf16 %v9713_v16, %v9713_v16  ;;  %v15096_v18 = vpop.f32.mrb[51].mxu1 }
0x3960   : > { %15100 = vmatmul.mubr.msk.bf16.vlgmr.msra.gmra.mrb[12].mxu0 %vm6963_vm8, %v9717_v61 }
0x3961   : > { %v9836_v19 = vpop.f32.mrb[52].mxu1  ;;  %15114 = vmatpush3.bf16.msra.mxu0 %v18494_v30  ;;  %15115 = vmatprep.mubr.msk.bf16.mxu0 %vm16755_vm7, %v16754_v43 }
0x3962   : > { %v9837_v53 = vadd.f32 %v9836_v19, %v18566_v17  ;;  %v15107_v62 = vpop.f32.mrb[53].mxu1  ;;  %15129 = vmatprep.subr.bf16.mxu0 %v16754_v43 }
0x3964   : > { %v9840_v24 = vsel %vm7040_vm9, %v9837_v53, -inf }
0x3965   : > { %9841 = vmax.xlane.f32.xlu1 %v9840_v24  ;;  %v13826_v24 = vld [vmem:[%s1045_s25] ss:$0 sm:$0xff] }
0x3976   : > { %9851 = vrot.lane.b32.xlu1 %v18550_v1, %s16760_s4 }
0x397a   : > { %9975 = vrot.lane.b32.xlu1 %v18527_v5, %s16761_s30 }
0x397e   : > { %9973 = vrot.lane.b32.xlu1 %v18547_v20, %s16761_s30 }
0x39f2   : > { %v9842_v30 = vpop.xlane.xlu1 %9841 }
0x39f3   : > { %v9843_v25 = vsub.f32 %v9837_v53, %v9842_v30 }
0x39f5   : > { %v9844_v27 = vmul.f32 1.442695, %v9843_v25 }
0x39f6   : > { %v9852_v11 = vpop.permute.xlu1 %9851 }
0x39f7   : > { %16004 = vpow2.f32 %v9844_v27  ;;  %15109 = vmatpush3.msk.msra.mxu1 %vm7056_vm10, %v9852_v11 }
0x39f8   : > { %15119 = vmatprep.subr.mxu1 %v16754_v43 }
0x39fa   : > { %v9976_v3 = vpop.permute.xlu1 %9975 }
0x39fe   : > { %v9974_v33 = vpop.permute.xlu1 %9973 }
0x3a01   : > { %v16005_v29 = vpop.eup %16004 }
0x3a02   : > { %v9846_v15 = vsel %vm7040_vm9, %v16005_v29, 0.0 }
0x3a03   : > { %9847 = vadd.xlane.f32.xlu0 %v9846_v15 }
0x3a19   : > { %10062 = vrot.lane.b32.xlu0 %v18550_v1, %s16761_s30 }
0x3a1d   : > { %10186 = vrot.lane.b32.xlu0 %v18527_v5, %s16762_s7 }
0x3a90   : > { %v9848_v31 = vpop.xlane.xlu0 %9847 }
0x3a91   : > { %16006 = vrcp.f32 %v9848_v31  ;;  %v16025_v31 = vld [vmem:[#allocation3] sm:$0xff] }
0x3a94   : > { %v10063_v34 = vpop.permute.xlu0 %10062 }
0x3a9b   : > { %v16007_v6 = vpop.eup %16006 }
0x3a9c   : > { %v9850_v32 = vmul.f32 %v16007_v6, %v16005_v29  ;;  %v16024_v29 = vld [vmem:[#allocation3 + $0x8] sm:$0x3] }
0x3a9e   : > { %15111 = vmatmul.mubr.msk.f32.vlgmr.msra.gmra.mrb[54].mxu1 %vm7052_vm11, %v9850_v32  ;;  %v6338_v32 = vld [vmem:[%s17608_s1] sm:$0xff] }
0x3a9f   : > { %15120 = vmatpush3.xpose.msk.msra.mxu1 %vm6963_vm8, %v9976_v3  ;;  %15121 = vmatprep.mubr.msk.f32.mxu1 %vm16755_vm7, %v16754_v43 }
0x3aa0   : > { %15124 = vmatprep.subr.mxu1 %v16754_v43 }
0x3aa2   : > { %15122 = vmatmul.mubr.msk.f32.vlgmr.msra.gmra.mrb[56].mxu1 %vm6963_vm8, %v9974_v33  ;;  %v6346_v33 = vld [vmem:[%s17608_s1 + $0x40] sm:$0xff] }
0x3aa3   : > { %15125 = vmatpush3.msk.msra.mxu1 %vm7056_vm10, %v10063_v34  ;;  %15126 = vmatprep.mubr.msk.f32.mxu1 %vm16755_vm7, %v16754_v43  ;;  %v6339_v34 = vld [vmem:[%s17608_s1 + $0x8] sm:$0xff] }
0x3aa4   : > { %15135 = vmatprep.subr.mxu1 %v16754_v43 }
0x3b71   : > { %v9924_v5 = vpop.f32.mrb[54].mxu1 }
0x3b72   : > { %v9928_v35 = vpack.c.bf16 %v9924_v5, %v9924_v5  ;;  %v15112_v36 = vpop.f32.mrb[55].mxu1  ;;  %v13829_v5 = vcombine.low %v6338_v32, %v6346_v33 }
0x3b73   : > { %v6354_v36 = vld [vmem:[%s17608_s1 + $0x80] sm:$0xff] }
0x3b74   : > { %15116 = vmatmul.mubr.msk.bf16.vlgmr.msra.gmra.mrb[12].mxu0 %vm6963_vm8, %v9928_v35  ;;  %v13830_v35 = vcombine.high %v6338_v32, %v6346_v33  ;;  %v6435_v32 = vld [vmem:[%s17608_s1 + $0x308] sm:$0xff] }
0x3b75   : > { %v10047_v37 = vpop.f32.mrb[56].mxu1  ;;  %15130 = vmatpush3.bf16.msra.mxu0 %v18515_v49  ;;  %15131 = vmatprep.mubr.msk.bf16.mxu0 %vm16755_vm7, %v16754_v43  ;;  %v10187_v49 = vpop.permute.xlu0 %10186 }
0x3b76   : > { %v10048_v23 = vadd.f32 %v10047_v37, %v18566_v17  ;;  %v15123_v38 = vpop.f32.mrb[57].mxu1  ;;  %v6362_v37 = vld [vmem:[%s17608_s1 + $0xc0] sm:$0xff] }
0x3b78   : > { %v10051_v39 = vsel %vm7040_vm9, %v10048_v23, -inf }
0x3b79   : > { %10052 = vmax.xlane.f32.xlu1 %v10051_v39  ;;  %v13846_v39 = vcombine.high %v6354_v36, %v6362_v37 }
0x3c06   : > { %v10053_v40 = vpop.xlane.xlu1 %10052 }
0x3c07   : > { %v10054_v41 = vsub.f32 %v10048_v23, %v10053_v40  ;;  %v6355_v40 = vld [vmem:[%s17608_s1 + $0x88] sm:$0xff] }
0x3c09   : > { %v10055_v21 = vmul.f32 1.442695, %v10054_v41  ;;  %v6363_v41 = vld [vmem:[%s17608_s1 + $0xc8] sm:$0xff] }
0x3c0b   : > { %16008 = vpow2.f32 %v10055_v21  ;;  %v13848_v21 = vcombine.high %v6355_v40, %v6363_v41 }
0x3c15   : > { %v16009_v42 = vpop.eup %16008 }
0x3c16   : > { %v10057_v44 = vsel %vm7040_vm9, %v16009_v42, 0.0 }
0x3c17   : > { %10058 = vadd.xlane.f32.xlu0 %v10057_v44  ;;  %v13847_v44 = vcombine.low %v6355_v40, %v6363_v41 }
0x3c2d   : > { %10184 = vrot.lane.b32.xlu0 %v18547_v20, %s16762_s7 }
0x3ca4   : > { %v10059_v46 = vpop.xlane.xlu0 %10058 }
0x3ca5   : > { %16010 = vrcp.f32 %v10059_v46 }
0x3ca8   : > { %v10185_v7 = vpop.permute.xlu0 %10184 }
0x3caf   : > { %v16011_v47 = vpop.eup %16010 }
0x3cb0   : > { %v10061_v56 = vmul.f32 %v16011_v47, %v16009_v42  ;;  %v13845_v42 = vcombine.low %v6354_v36, %v6362_v37  ;;  %v6450_v36 = vld [vmem:[%s17608_s1 + $0x380] sm:$0xff] }
0x3cb1   : > { %v6458_v37 = vld [vmem:[%s17608_s1 + $0x3c0] sm:$0xff] }
0x3cb2   : > { %15127 = vmatmul.mubr.msk.f32.vlgmr.msra.gmra.mrb[58].mxu1 %vm7052_vm11, %v10061_v56  ;;  %v13941_v40 = vcombine.low %v6450_v36, %v6458_v37 }
0x3cb3   : > { %15136 = vmatpush3.xpose.msk.msra.mxu1 %vm6963_vm8, %v10187_v49  ;;  %15137 = vmatprep.mubr.msk.f32.mxu1 %vm16755_vm7, %v16754_v43 }
0x3cb4   : > { %15140 = vmatprep.subr.mxu1 %v16754_v43 }
0x3cb6   : > { %15138 = vmatmul.mubr.msk.f32.vlgmr.msra.gmra.mrb[60].mxu1 %vm6963_vm8, %v10185_v7 }
0x3cb7   : > { %15142 = vmatprep.mubr.msk.f32.mxu1 %vm16755_vm7, %v16754_v43 }
0x3d85   : > { %v10135_v20 = vpop.f32.mrb[58].mxu1 }
0x3d86   : > { %v10139_v59 = vpack.c.bf16 %v10135_v20, %v10135_v20  ;;  %v15128_v60 = vpop.f32.mrb[59].mxu1 }
0x3d88   : > { %15132 = vmatmul.mubr.msk.bf16.vlgmr.msra.gmra.mrb[12].mxu0 %vm6963_vm8, %v10139_v59 }
0x3d89   : > { %v10258_v9 = vpop.f32.mrb[60].mxu1  ;;  %11249 = vmatprep.mubr.bf16.mxu0 %v16753_v28 }
0x3d8a   : > { %v10259_v63 = vadd.f32 %v10258_v9, %v18566_v17  ;;  %v15139_v0 = vpop.f32.mrb[61].mxu1 }
0x3d8b   : > { %v6378_v0 = vld [vmem:[%s17608_s1 + $0x140] sm:$0xff] }
0x3d8c   : > { %v10262_v50 = vsel %vm7040_vm9, %v10259_v63, -inf }
0x3d8d   : > { %10263 = vmax.xlane.f32.xlu1 %v10262_v50  ;;  %v6371_v50 = vld [vmem:[%s17608_s1 + $0x108] sm:$0xff] }
0x3d9e   : > { %10273 = vrot.lane.b32.xlu1 %v18550_v1, %s16762_s7 }
0x3e1a   : > { %v10264_v4 = vpop.xlane.xlu1 %10263 }
0x3e1b   : > { %v10265_v14 = vsub.f32 %v10259_v63, %v10264_v4  ;;  %v6370_v63 = vld [vmem:[%s17608_s1 + $0x100] sm:$0xff] }
0x3e1c   : > { %v13862_v4 = vcombine.high %v6370_v63, %v6378_v0 }
0x3e1d   : > { %v10266_v8 = vmul.f32 1.442695, %v10265_v14  ;;  %v6379_v14 = vld [vmem:[%s17608_s1 + $0x148] sm:$0xff] }
0x3e1e   : > { %v10274_v12 = vpop.permute.xlu1 %10273 }
0x3e1f   : > { %16012 = vpow2.f32 %v10266_v8  ;;  %15141 = vmatpush3.msk.msra.mxu1 %vm7056_vm10, %v10274_v12  ;;  %v13861_v8 = vcombine.low %v6370_v63, %v6378_v0  ;;  %v13863_v12 = vcombine.low %v6371_v50, %v6379_v14 }
0x3e20   : > { %15145 = vmatprep.subr.bf16.mxu1 %v16754_v43 }
0x3e29   : > { %v16013_v54 = vpop.eup %16012 }
0x3e2a   : > { %v10268_v55 = vsel %vm7040_vm9, %v16013_v54, 0.0 }
0x3e2b   : > { %10269 = vadd.xlane.f32.xlu0 %v10268_v55  ;;  %v6386_v55 = vld [vmem:[%s17608_s1 + $0x180] sm:$0xff] }
0x3e5b   : > { %v10177_v17 = vpop.f32.mrb[12].mxu0 }
0x3e5c   : > { %v15133_v2 = vpop.f32.mrb[13].mxu0 }
0x3e5d   : > { %v10180_v51 = vpop.f32.mrb[14].mxu0  ;;  %v6387_v2 = vld [vmem:[%s17608_s1 + $0x188] sm:$0xff] }
0x3e5e   : > { %v15134_v22 = vpop.f32.mrb[15].mxu0 }
0x3e5f   : > { %v6395_v22 = vld [vmem:[%s17608_s1 + $0x1c8] sm:$0xff] }
0x3eb8   : > { %v10270_v58 = vpop.xlane.xlu0 %10269 }
0x3eb9   : > { %16014 = vrcp.f32 %v10270_v58 }
0x3ec3   : > { %v16015_v1 = vpop.eup %16014 }
0x3ec4   : > { %v10272_v26 = vmul.f32 %v16015_v1, %v16013_v54  ;;  %v13864_v54 = vcombine.high %v6371_v50, %v6379_v14  ;;  %v13879_v1 = vcombine.low %v6387_v2, %v6395_v22 }
0x3ec6   : > { %15143 = vmatmul.mubr.msk.f32.vlgmr.msra.gmra.mrb[62].mxu1 %vm7052_vm11, %v10272_v26  ;;  %v13880_v26 = vcombine.high %v6387_v2, %v6395_v22 }
0x3ec7   : > { %15146 = vmatpush3.bf16.msra.mxu1 %v18560_v13  ;;  %15147 = vmatprep.mubr.msk.bf16.mxu1 %vm16755_vm7, %v16754_v43 }
0x3ec8   : > { %11174 = vmatprep.subr.bf16.mxu1 %v13830_v35 }
0x3f99   : > { %v10346_v16 = vpop.f32.mrb[62].mxu1 }
0x3f9a   : > { %v10350_v61 = vpack.c.bf16 %v10346_v16, %v10346_v16  ;;  %v15144_v18 = vpop.f32.mrb[63].mxu1  ;;  %v6402_v16 = vld [vmem:[%s17608_s1 + $0x200] sm:$0xff] }
0x3f9b   : > { %v6403_v18 = vld [vmem:[%s17608_s1 + $0x208] sm:$0xff] }
0x3f9c   : > { %15148 = vmatmul.mubr.msk.bf16.vlgmr.msra.gmra.mrb[64].mxu1 %vm6963_vm8, %v10350_v61  ;;  %v6410_v61 = vld [vmem:[%s17608_s1 + $0x240] sm:$0xff] }
0x3f9d   : > { %11206 = vmatprep.mubr.bf16.mxu1 %v16753_v28  ;;  %11175 = vmatpush1.bf16.msra.mxu1 %v13829_v5 }
0x3f9e   : > { %11176 = vmatprep.subr.bf16.mxu1 %v13846_v39  ;;  %v6459_v39 = vld [vmem:[%s17608_s1 + $0x3c8] sm:$0xff] }
0x3fa1   : > { %11177 = vmatpush1.bf16.msra.mxu1 %v13845_v42  ;;  %v6340_v42 = vld [vmem:[%s17608_s1 + $0x10] sm:$0xff] }
0x3fa2   : > { %11178 = vmatprep.subr.bf16.mxu1 %v13862_v4 }
0x3fa5   : > { %11179 = vmatpush1.bf16.msra.mxu1 %v13861_v8 }
0x406f   : > { %v10388_v19 = vpop.f32.mrb[64].mxu1 }
0x4070   : > { %v15304_v53 = vadd.f32 %v10388_v19, %v10177_v17  ;;  %v15149_v62 = vpop.f32.mrb[65].mxu1  ;;  %v6394_v17 = vld [vmem:[%s17608_s1 + $0x1c0] sm:$0xff]  ;;  %v13894_v19 = vcombine.high %v6402_v16, %v6410_v61 }
0x4071   : > { %v10391_v30 = vpop.f32.mrb[66].mxu1  ;;  %v13878_v51 = vcombine.high %v6386_v55, %v6394_v17  ;;  %v13877_v58 = vcombine.low %v6386_v55, %v6394_v17  ;;  %v13893_v62 = vcombine.low %v6402_v16, %v6410_v61  ;;  %v6365_v16 = vld [vmem:[%s17608_s1 + $0xd8] sm:$0xff] }
0x4072   : > { %v10396_v13 = vrot.slane %v15304_v53, 3  ;;  %v15150_v25 = vpop.f32.mrb[67].mxu1  ;;  %v6411_v53 = vld [vmem:[%s17608_s1 + $0x248] sm:$0xff] }
0x4073   : > { %11180 = vmatprep.subr.bf16.mxu1 %v13878_v51  ;;  %v13896_v30 = vcombine.high %v6403_v18, %v6411_v53  ;;  %v6426_v25 = vld [vmem:[%s17608_s1 + $0x2c0] sm:$0xff]  ;;  %v13828_v51 = vld [vmem:[%s1061_s19] ss:$0 sm:$0xff] }
0x4074   : > { %v10406_v27 = vadd.f32 %v13826_v24, %v10396_v13  ;;  %v10398_v43 = vsel %vm7056_vm10, %v18578_v45, %v10396_v13  ;;  %v6347_v45 = vld [vmem:[%s17608_s1 + $0x48] sm:$0xff]  ;;  %11181 = vmatpush1.bf16.msra.mxu1 %v13877_v58  ;;  %v6418_v13 = vld [vmem:[%s17608_s1 + $0x280] sm:$0xff]  ;;  %v6356_v58 = vld [vmem:[%s17608_s1 + $0x90] sm:$0xff] }
0x4075   : > { %v10405_v11 = vadd.f32 %v13826_v24, %v10398_v43  ;;  %v13831_v23 = vcombine.low %v6339_v34, %v6347_v45  ;;  %v13832_v38 = vcombine.high %v6339_v34, %v6347_v45  ;;  %v13895_v24 = vcombine.low %v6403_v18, %v6411_v53  ;;  %11182 = vmatprep.subr.bf16.mxu1 %v13894_v19  ;;  %v6443_v34 = vld [vmem:[%s17608_s1 + $0x348] sm:$0xff] }
0x4076   : > { %v10408_v15 = vadd.f32 %v16024_v29, %v10406_v27  ;;  %v6419_v27 = vld [vmem:[%s17608_s1 + $0x288] sm:$0xff]  ;;  %v13910_v43 = vcombine.high %v6418_v13, %v6426_v25  ;;  %v13909_v29 = vcombine.low %v6418_v13, %v6426_v25  ;;  %v13927_v35 = vcombine.low %v6435_v32, %v6443_v34 }
0x4077   : > { %v10407_v6 = vadd.f32 %v16025_v31, %v10405_v11  ;;  %11217 = vmatprep.subr.bf16.mxu0 %v13832_v38  ;;  %v6427_v11 = vld [vmem:[%s17608_s1 + $0x2c8] sm:$0xff]  ;;  %v13928_v45 = vcombine.high %v6435_v32, %v6443_v34  ;;  %v13942_v38 = vcombine.high %v6450_v36, %v6458_v37  ;;  %v6404_v34 = vld [vmem:[%s17608_s1 + $0x210] sm:$0xff] }
0x4078   : > { %v10412_v3 = vsel %vm10411_vm13, %v10408_v15, 0.0  ;;  %11218 = vmatpush1.bf16.msra.mxu0 %v13831_v23  ;;  %11183 = vmatpush1.bf16.msra.mxu1 %v13893_v62  ;;  %v13912_v31 = vcombine.high %v6419_v27, %v6427_v11  ;;  %v6451_v23 = vld [vmem:[%s17608_s1 + $0x388] sm:$0xff]  ;;  %v6380_v62 = vld [vmem:[%s17608_s1 + $0x150] sm:$0xff] }
0x4079   : > { %10413 = vadd.xlane.f32.xlu1 %v10412_v3  ;;  %10409 = vadd.xlane.f32.xlu0 %v10407_v6  ;;  %v6442_v3 = vld [vmem:[%s17608_s1 + $0x340] sm:$0xff]  ;;  %v13943_v41 = vcombine.low %v6451_v23, %v6459_v39 }
0x407a   : > { %11219 = vmatprep.subr.bf16.mxu0 %v13848_v21  ;;  %11184 = vmatprep.subr.bf16.mxu1 %v13910_v43  ;;  %v13944_v21 = vcombine.high %v6451_v23, %v6459_v39  ;;  %v6420_v39 = vld [vmem:[%s17608_s1 + $0x290] sm:$0xff] }
0x407c   : > { %11220 = vmatpush1.bf16.msra.mxu0 %v13847_v44  ;;  %11185 = vmatpush1.bf16.msra.mxu1 %v13909_v29  ;;  %v6348_v44 = vld [vmem:[%s17608_s1 + $0x50] sm:$0xff] }
0x407d   : > { %11221 = vmatprep.subr.bf16.mxu0 %v13864_v54  ;;  %v13827_v54 = vld [vmem:[%s1053_s0] ss:$0 sm:$0xff]  ;;  %v6396_v29 = vld [vmem:[%s17608_s1 + $0x1d0] sm:$0xff] }
0x4080   : > { %11222 = vmatpush1.bf16.msra.mxu0 %v13863_v12 }
0x4081   : > { %11223 = vmatprep.subr.bf16.mxu0 %v13880_v26  ;;  %v6357_v26 = vld [vmem:[%s17608_s1 + $0x98] sm:$0xff] }
0x4082   : > { %v13852_v53 = vcombine.high %v6357_v26, %v6365_v16  ;;  %v13851_v25 = vcombine.low %v6357_v26, %v6365_v16 }
0x4084   : > { %11224 = vmatpush1.bf16.msra.mxu0 %v13879_v1  ;;  %v6364_v1 = vld [vmem:[%s17608_s1 + $0xd0] sm:$0xff] }
0x4085   : > { %11225 = vmatprep.subr.bf16.mxu0 %v13896_v30  ;;  %v13850_v19 = vcombine.high %v6356_v58, %v6364_v1  ;;  %v6381_v30 = vld [vmem:[%s17608_s1 + $0x158] sm:$0xff]  ;;  %v13849_v13 = vcombine.low %v6356_v58, %v6364_v1  ;;  %v6343_v58 = vld [vmem:[%s17608_s1 + $0x28] sm:$0xff] }
0x4086   : > { %v6351_v1 = vld [vmem:[%s17608_s1 + $0x68] sm:$0xff] }
0x4088   : > { %11226 = vmatpush1.bf16.msra.mxu0 %v13895_v24  ;;  %v6373_v24 = vld [vmem:[%s17608_s1 + $0x118] sm:$0xff] }
0x4089   : > { %11227 = vmatprep.subr.bf16.mxu0 %v13912_v31  ;;  %v13868_v43 = vcombine.high %v6373_v24, %v6381_v30  ;;  %v6397_v31 = vld [vmem:[%s17608_s1 + $0x1d8] sm:$0xff] }
0x4106   : > { %v10414_v49 = vpop.xlane.xlu1 %10413  ;;  %v10410_v46 = vpop.xlane.xlu0 %10409 }
0x4107   : > { %v10417_v47 = vmul.f32 0.0078125, %v10414_v49  ;;  %v10416_v56 = vmul.f32 0.0078125, %v10410_v46  ;;  %v6341_v49 = vld [vmem:[%s17608_s1 + $0x18] sm:$0xff]  ;;  %v13833_v46 = vcombine.low %v6340_v42, %v6348_v44 }
0x4109   : > { %v18759_v7 = vsub.f32 %v10408_v15, %v10417_v47  ;;  %v18761_v20 = vsub.f32 %v10407_v6, %v10416_v56  ;;  %v13911_v15 = vcombine.low %v6419_v27, %v6427_v11  ;;  %v6434_v6 = vld [vmem:[%s17608_s1 + $0x300] sm:$0xff]  ;;  %v13834_v47 = vcombine.high %v6340_v42, %v6348_v44  ;;  %v6349_v56 = vld [vmem:[%s17608_s1 + $0x58] sm:$0xff]  ;;  %v6388_v11 = vld [vmem:[%s17608_s1 + $0x190] sm:$0xff] }
0x410a   : > { %v13926_v33 = vcombine.high %v6434_v6, %v6442_v3  ;;  %v13925_v5 = vcombine.low %v6434_v6, %v6442_v3  ;;  %v13867_v3 = vcombine.low %v6373_v24, %v6381_v30  ;;  %v13882_v32 = vcombine.high %v6388_v11, %v6396_v29  ;;  %v6359_v24 = vld [vmem:[%s17608_s1 + $0xa8] sm:$0xff] }
0x410b   : > { %v10420_v59 = vmul.f32 %v18761_v20, %v18761_v20  ;;  %v10421_v60 = vmul.f32 %v18759_v7, %v18759_v7  ;;  %11228 = vmatpush1.bf16.msra.mxu0 %v13911_v15  ;;  %v6389_v15 = vld [vmem:[%s17608_s1 + $0x198] sm:$0xff]  ;;  %v13881_v36 = vcombine.low %v6388_v11, %v6396_v29  ;;  %v6367_v30 = vld [vmem:[%s17608_s1 + $0xe8] sm:$0xff]  ;;  %v6374_v11 = vld [vmem:[%s17608_s1 + $0x120] sm:$0xff] }
0x410c   : > { %11186 = vmatprep.subr.bf16.mxu1 %v13926_v33  ;;  %11229 = vmatprep.subr.bf16.mxu0 %v13928_v45  ;;  %v13884_v33 = vcombine.high %v6389_v15, %v6397_v31  ;;  %v6413_v45 = vld [vmem:[%s17608_s1 + $0x258] sm:$0xff]  ;;  %v13883_v37 = vcombine.low %v6389_v15, %v6397_v31  ;;  %v6382_v29 = vld [vmem:[%s17608_s1 + $0x160] sm:$0xff]  ;;  %v6375_v15 = vld [vmem:[%s17608_s1 + $0x128] sm:$0xff] }
0x410d   : > { %10422 = vadd.xlane.f32.xlu0 %v10420_v59  ;;  %v10424_v9 = vsel %vm10411_vm13, %v10421_v60, 0.0  ;;  %11187 = vmatpush1.bf16.msra.mxu1 %v13925_v5  ;;  %v13835_v59 = vcombine.low %v6341_v49, %v6349_v56  ;;  %v13836_v60 = vcombine.high %v6341_v49, %v6349_v56  ;;  %v6412_v5 = vld [vmem:[%s17608_s1 + $0x250] sm:$0xff]  ;;  %v6383_v31 = vld [vmem:[%s17608_s1 + $0x168] sm:$0xff] }
0x410e   : > { %11188 = vmatprep.subr.bf16.mxu1 %v13942_v38  ;;  %v13898_v23 = vcombine.high %v6404_v34, %v6412_v5  ;;  %v13897_v42 = vcombine.low %v6404_v34, %v6412_v5  ;;  %v6444_v56 = vld [vmem:[%s17608_s1 + $0x350] sm:$0xff]  ;;  %v6390_v34 = vld [vmem:[%s17608_s1 + $0x1a0] sm:$0xff] }
0x410f   : > { %11230 = vmatpush1.bf16.msra.mxu0 %v13927_v35  ;;  %v6405_v35 = vld [vmem:[%s17608_s1 + $0x218] sm:$0xff]  ;;  %v6398_v5 = vld [vmem:[%s17608_s1 + $0x1e0] sm:$0xff] }
0x4110   : > { %11231 = vmatprep.subr.bf16.mxu0 %v13944_v21  ;;  %v13900_v38 = vcombine.high %v6405_v35, %v6413_v45  ;;  %v6429_v21 = vld [vmem:[%s17608_s1 + $0x2d8] sm:$0xff]  ;;  %v13899_v44 = vcombine.low %v6405_v35, %v6413_v45  ;;  %v6391_v35 = vld [vmem:[%s17608_s1 + $0x1a8] sm:$0xff] }
0x4111   : > { %10425 = vadd.xlane.f32.xlu0 %v10424_v9  ;;  %11189 = vmatpush1.bf16.msra.mxu1 %v13941_v40  ;;  %v6428_v40 = vld [vmem:[%s17608_s1 + $0x2d0] sm:$0xff]  ;;  %v6399_v45 = vld [vmem:[%s17608_s1 + $0x1e8] sm:$0xff] }
0x4112   : > { %11260 = vmatprep.subr.bf16.mxu1 %v13834_v47  ;;  %v13914_v49 = vcombine.high %v6420_v39, %v6428_v40  ;;  %v6436_v47 = vld [vmem:[%s17608_s1 + $0x310] sm:$0xff] }
0x4113   : > { %11232 = vmatpush1.bf16.msra.mxu0 %v13943_v41  ;;  %v6421_v41 = vld [vmem:[%s17608_s1 + $0x298] sm:$0xff] }
0x4114   : > { %11303 = vmatprep.subr.bf16.mxu0 %v13836_v60  ;;  %v6445_v60 = vld [vmem:[%s17608_s1 + $0x358] sm:$0xff] }
0x419a   : > { %v10423_v9 = vpop.xlane.xlu0 %10422 }
0x419b   : > { %v10427_v63 = vmul.f32 0.0078125, %v10423_v9  ;;  %v13913_v9 = vcombine.low %v6420_v39, %v6428_v40  ;;  %v6406_v39 = vld [vmem:[%s17608_s1 + $0x220] sm:$0xff] }
0x419c   : > { %v6414_v40 = vld [vmem:[%s17608_s1 + $0x260] sm:$0xff] }
0x419d   : > { %v10429_v0 = vadd.f32 1e-05, %v10427_v63  ;;  %v13915_v63 = vcombine.low %v6421_v41, %v6429_v21 }
0x419e   : > { %v10426_v50 = vpop.xlane.xlu0 %10425 }
0x419f   : > { %16016 = vrsqrt.f32 %v10429_v0  ;;  %v10428_v4 = vmul.f32 0.0078125, %v10426_v50  ;;  %v13930_v0 = vcombine.high %v6436_v47, %v6444_v56 }
0x41a1   : > { %v10430_v14 = vadd.f32 1e-05, %v10428_v4  ;;  %v6452_v4 = vld [vmem:[%s17608_s1 + $0x390] sm:$0xff] }
0x41a3   : > { %16018 = vrsqrt.f32 %v10430_v14  ;;  %v6460_v14 = vld [vmem:[%s17608_s1 + $0x3d0] sm:$0xff] }
0x41a4   : > { %v13945_v26 = vcombine.low %v6452_v4, %v6460_v14 }
0x41a9   : > { %v16017_v8 = vpop.eup %16016 }
0x41aa   : > { %v10433_v12 = vmul.f32 %v16017_v8, %v18761_v20  ;;  %v6453_v8 = vld [vmem:[%s17608_s1 + $0x398] sm:$0xff] }
0x41ac   : > { %v10441_v17 = vmul.f32 %v13827_v54, %v10433_v12  ;;  %v6461_v12 = vld [vmem:[%s17608_s1 + $0x3d8] sm:$0xff] }
0x41ad   : > { %v16019_v55 = vpop.eup %16018  ;;  %v13947_v16 = vcombine.low %v6453_v8, %v6461_v12 }
0x41ae   : > { %v10434_v2 = vmul.f32 %v16019_v55, %v18759_v7  ;;  %v18806_v61 = vadd.f32 %v13828_v51, %v10441_v17  ;;  %v6372_v7 = vld [vmem:[%s17608_s1 + $0x110] sm:$0xff]  ;;  %v13946_v17 = vcombine.high %v6452_v4, %v6460_v14  ;;  %v6438_v4 = vld [vmem:[%s17608_s1 + $0x320] sm:$0xff] }
0x41af   : > { %v13866_v27 = vcombine.high %v6372_v7, %v6380_v62  ;;  %v13865_v6 = vcombine.low %v6372_v7, %v6380_v62  ;;  %v6358_v7 = vld [vmem:[%s17608_s1 + $0xa0] sm:$0xff] }
0x41b0   : > { %v10442_v22 = vmul.f32 %v13827_v54, %v10434_v2  ;;  %v13929_v54 = vcombine.low %v6436_v47, %v6444_v56  ;;  %v13948_v2 = vcombine.high %v6453_v8, %v6461_v12  ;;  %v6366_v62 = vld [vmem:[%s17608_s1 + $0xe0] sm:$0xff]  ;;  %v6439_v8 = vld [vmem:[%s17608_s1 + $0x328] sm:$0xff] }
0x41b1   : > { %v6422_v47 = vld [vmem:[%s17608_s1 + $0x2a0] sm:$0xff]  ;;  %v6447_v12 = vld [vmem:[%s17608_s1 + $0x368] sm:$0xff] }
0x41b2   : > { %v18808_v20 = vadd.f32 %v13828_v51, %v10442_v22  ;;  %v6342_v51 = vld [vmem:[%s17608_s1 + $0x20] sm:$0xff] }
0x41b3   : > { %v6350_v22 = vld [vmem:[%s17608_s1 + $0x60] sm:$0xff] }
0x41b4   : > { %v18812_v18 = vpack.c.bf16 %v18808_v20, %v18806_v61  ;;  %v6430_v56 = vld [vmem:[%s17608_s1 + $0x2e0] sm:$0xff] }
0x41b5   : > { %v6446_v14 = vld [vmem:[%s17608_s1 + $0x360] sm:$0xff] }
0x41b6   : > { %11207 = vmatmul.mubr.bf16.vlgmr.msra.gmra.mrb[68].mxu1 %v18812_v18  ;;  %11250 = vmatmul.mubr.bf16.vlgmr.msra.gmra.mrb[16].mxu0 %v18812_v18 }
0x41b7   : > { %11261 = vmatpush1.bf16.msra.mxu1 %v13833_v46  ;;  %11304 = vmatpush1.bf16.msra.mxu0 %v13835_v59  ;;  %v13916_v46 = vcombine.high %v6421_v41, %v6429_v21  ;;  %v6437_v59 = vld [vmem:[%s17608_s1 + $0x318] sm:$0xff]  ;;  %v6407_v41 = vld [vmem:[%s17608_s1 + $0x228] sm:$0xff] }
0x41b8   : > { %11262 = vmatprep.subr.bf16.mxu1 %v13850_v19  ;;  %11305 = vmatprep.subr.bf16.mxu0 %v13852_v53  ;;  %v13932_v50 = vcombine.high %v6437_v59, %v6445_v60  ;;  %v13931_v55 = vcombine.low %v6437_v59, %v6445_v60  ;;  %v13838_v19 = vcombine.high %v6342_v51, %v6350_v22  ;;  %v6415_v21 = vld [vmem:[%s17608_s1 + $0x268] sm:$0xff] }
0x41b9   : > { %11292 = vmatprep.mubr.bf16.mxu1 %v16753_v28  ;;  %11335 = vmatprep.mubr.bf16.mxu0 %v16753_v28  ;;  %v13840_v53 = vcombine.high %v6343_v58, %v6351_v1  ;;  %v6423_v59 = vld [vmem:[%s17608_s1 + $0x2a8] sm:$0xff] }
0x41ba   : > { %v6431_v60 = vld [vmem:[%s17608_s1 + $0x2e8] sm:$0xff] }
0x41bb   : > { %11263 = vmatpush1.bf16.msra.mxu1 %v13849_v13  ;;  %11306 = vmatpush1.bf16.msra.mxu0 %v13851_v25  ;;  %v13837_v13 = vcombine.low %v6342_v51, %v6350_v22  ;;  %v13839_v25 = vcombine.low %v6343_v58, %v6351_v1  ;;  %v6454_v51 = vld [vmem:[%s17608_s1 + $0x3a0] sm:$0xff]  ;;  %v6455_v58 = vld [vmem:[%s17608_s1 + $0x3a8] sm:$0xff] }
0x41bc   : > { %11264 = vmatprep.subr.bf16.mxu1 %v13866_v27  ;;  %11307 = vmatprep.subr.bf16.mxu0 %v13868_v43  ;;  %v13854_v27 = vcombine.high %v6358_v7, %v6366_v62  ;;  %v13856_v43 = vcombine.high %v6359_v24, %v6367_v30  ;;  %v6462_v22 = vld [vmem:[%s17608_s1 + $0x3e0] sm:$0xff]  ;;  %v6463_v1 = vld [vmem:[%s17608_s1 + $0x3e8] sm:$0xff] }
0x41bf   : > { %11265 = vmatpush1.bf16.msra.mxu1 %v13865_v6  ;;  %11308 = vmatpush1.bf16.msra.mxu0 %v13867_v3  ;;  %v13853_v6 = vcombine.low %v6358_v7, %v6366_v62  ;;  %v13855_v3 = vcombine.low %v6359_v24, %v6367_v30  ;;  %v6344_v7 = vld [vmem:[%s17608_s1 + $0x30] sm:$0xff]  ;;  %v6345_v24 = vld [vmem:[%s17608_s1 + $0x38] sm:$0xff] }
0x41c0   : > { %11266 = vmatprep.subr.bf16.mxu1 %v13882_v32  ;;  %11309 = vmatprep.subr.bf16.mxu0 %v13884_v33  ;;  %v13870_v32 = vcombine.high %v6374_v11, %v6382_v29  ;;  %v13872_v33 = vcombine.high %v6375_v15, %v6383_v31  ;;  %v6352_v62 = vld [vmem:[%s17608_s1 + $0x70] sm:$0xff]  ;;  %v6353_v30 = vld [vmem:[%s17608_s1 + $0x78] sm:$0xff] }
0x41c3   : > { %11267 = vmatpush1.bf16.msra.mxu1 %v13881_v36  ;;  %11310 = vmatpush1.bf16.msra.mxu0 %v13883_v37  ;;  %v13869_v36 = vcombine.low %v6374_v11, %v6382_v29  ;;  %v13871_v37 = vcombine.low %v6375_v15, %v6383_v31  ;;  %v6360_v11 = vld [vmem:[%s17608_s1 + $0xb0] sm:$0xff]  ;;  %v6361_v15 = vld [vmem:[%s17608_s1 + $0xb8] sm:$0xff] }
0x41c4   : > { %11268 = vmatprep.subr.bf16.mxu1 %v13898_v23  ;;  %11311 = vmatprep.subr.bf16.mxu0 %v13900_v38  ;;  %v13886_v23 = vcombine.high %v6390_v34, %v6398_v5  ;;  %v13888_v38 = vcombine.high %v6391_v35, %v6399_v45  ;;  %v6368_v29 = vld [vmem:[%s17608_s1 + $0xf0] sm:$0xff]  ;;  %v6369_v31 = vld [vmem:[%s17608_s1 + $0xf8] sm:$0xff] }
0x41c7   : > { %11269 = vmatpush1.bf16.msra.mxu1 %v13897_v42  ;;  %11312 = vmatpush1.bf16.msra.mxu0 %v13899_v44  ;;  %v13885_v42 = vcombine.low %v6390_v34, %v6398_v5  ;;  %v13887_v44 = vcombine.low %v6391_v35, %v6399_v45  ;;  %v6376_v34 = vld [vmem:[%s17608_s1 + $0x130] sm:$0xff]  ;;  %v6377_v35 = vld [vmem:[%s17608_s1 + $0x138] sm:$0xff] }
0x41c8   : > { %11270 = vmatprep.subr.bf16.mxu1 %v13914_v49  ;;  %11313 = vmatprep.subr.bf16.mxu0 %v13916_v46  ;;  %v13902_v49 = vcombine.high %v6406_v39, %v6414_v40  ;;  %v13904_v46 = vcombine.high %v6407_v41, %v6415_v21  ;;  %v6384_v5 = vld [vmem:[%s17608_s1 + $0x170] sm:$0xff]  ;;  %v6385_v45 = vld [vmem:[%s17608_s1 + $0x178] sm:$0xff] }
0x41cb   : > { %11271 = vmatpush1.bf16.msra.mxu1 %v13913_v9  ;;  %11314 = vmatpush1.bf16.msra.mxu0 %v13915_v63  ;;  %v13901_v9 = vcombine.low %v6406_v39, %v6414_v40  ;;  %v13903_v63 = vcombine.low %v6407_v41, %v6415_v21  ;;  %v6392_v39 = vld [vmem:[%s17608_s1 + $0x1b0] sm:$0xff]  ;;  %v6393_v41 = vld [vmem:[%s17608_s1 + $0x1b8] sm:$0xff] }
0x41cc   : > { %11272 = vmatprep.subr.bf16.mxu1 %v13930_v0  ;;  %11315 = vmatprep.subr.bf16.mxu0 %v13932_v50  ;;  %v13918_v0 = vcombine.high %v6422_v47, %v6430_v56  ;;  %v13920_v50 = vcombine.high %v6423_v59, %v6431_v60  ;;  %v6400_v40 = vld [vmem:[%s17608_s1 + $0x1f0] sm:$0xff]  ;;  %v6401_v21 = vld [vmem:[%s17608_s1 + $0x1f8] sm:$0xff] }
0x41cf   : > { %11273 = vmatpush1.bf16.msra.mxu1 %v13929_v54  ;;  %11316 = vmatpush1.bf16.msra.mxu0 %v13931_v55  ;;  %v13917_v54 = vcombine.low %v6422_v47, %v6430_v56  ;;  %v13919_v55 = vcombine.low %v6423_v59, %v6431_v60  ;;  %v6408_v47 = vld [vmem:[%s17608_s1 + $0x230] sm:$0xff]  ;;  %v6409_v59 = vld [vmem:[%s17608_s1 + $0x238] sm:$0xff] }
0x41d0   : > { %11274 = vmatprep.subr.bf16.mxu1 %v13946_v17  ;;  %11317 = vmatprep.subr.bf16.mxu0 %v13948_v2  ;;  %v13934_v17 = vcombine.high %v6438_v4, %v6446_v14  ;;  %v13936_v2 = vcombine.high %v6439_v8, %v6447_v12  ;;  %v6416_v56 = vld [vmem:[%s17608_s1 + $0x270] sm:$0xff]  ;;  %v6417_v60 = vld [vmem:[%s17608_s1 + $0x278] sm:$0xff] }
0x41d3   : > { %11275 = vmatpush1.bf16.msra.mxu1 %v13945_v26  ;;  %11318 = vmatpush1.bf16.msra.mxu0 %v13947_v16  ;;  %v13933_v26 = vcombine.low %v6438_v4, %v6446_v14  ;;  %v13935_v16 = vcombine.low %v6439_v8, %v6447_v12  ;;  %v6432_v4 = vld [vmem:[%s17608_s1 + $0x2f0] sm:$0xff]  ;;  %v6425_v14 = vld [vmem:[%s17608_s1 + $0x2b8] sm:$0xff]  ;;  %v13905_v12 = vcombine.low %v6408_v47, %v6416_v56 }
0x41d4   : > { %11346 = vmatprep.subr.bf16.mxu1 %v13838_v19  ;;  %11389 = vmatprep.subr.bf16.mxu0 %v13840_v53  ;;  %v13950_v19 = vcombine.high %v6454_v51, %v6462_v22  ;;  %v13952_v53 = vcombine.high %v6455_v58, %v6463_v1  ;;  %v6433_v8 = vld [vmem:[%s17608_s1 + $0x2f8] sm:$0xff] }
0x41d6   : > { %11293 = vmatmul.mubr.bf16.vlgmr.msra.gmra.mrb[72].mxu1 %v18812_v18  ;;  %11336 = vmatmul.mubr.bf16.vlgmr.msra.gmra.mrb[20].mxu0 %v18812_v18 }
0x41d7   : > { %11347 = vmatpush1.bf16.msra.mxu1 %v13837_v13  ;;  %11390 = vmatpush1.bf16.msra.mxu0 %v13839_v25  ;;  %v13949_v13 = vcombine.low %v6454_v51, %v6462_v22  ;;  %v13951_v25 = vcombine.low %v6455_v58, %v6463_v1  ;;  %v6448_v51 = vld [vmem:[%s17608_s1 + $0x370] sm:$0xff]  ;;  %v6441_v22 = vld [vmem:[%s17608_s1 + $0x338] sm:$0xff] }
0x41d8   : > { %11348 = vmatprep.subr.bf16.mxu1 %v13854_v27  ;;  %11391 = vmatprep.subr.bf16.mxu0 %v13856_v43  ;;  %v13842_v27 = vcombine.high %v6344_v7, %v6352_v62  ;;  %v13844_v43 = vcombine.high %v6345_v24, %v6353_v30  ;;  %v6449_v58 = vld [vmem:[%s17608_s1 + $0x378] sm:$0xff] }
0x41d9   : > { %11378 = vmatprep.mubr.bf16.mxu1 %v16753_v28  ;;  %11421 = vmatprep.mubr.bf16.mxu0 %v16753_v28 }
0x41db   : > { %11349 = vmatpush1.bf16.msra.mxu1 %v13853_v6  ;;  %11392 = vmatpush1.bf16.msra.mxu0 %v13855_v3  ;;  %v13841_v6 = vcombine.low %v6344_v7, %v6352_v62  ;;  %v13843_v3 = vcombine.low %v6345_v24, %v6353_v30  ;;  %v6464_v7 = vld [vmem:[%s17608_s1 + $0x3f0] sm:$0xff]  ;;  %v6457_v62 = vld [vmem:[%s17608_s1 + $0x3b8] sm:$0xff] }
0x41dc   : > { %11350 = vmatprep.subr.bf16.mxu1 %v13870_v32  ;;  %11393 = vmatprep.subr.bf16.mxu0 %v13872_v33  ;;  %v13858_v32 = vcombine.high %v6360_v11, %v6368_v29  ;;  %v13860_v33 = vcombine.high %v6361_v15, %v6369_v31  ;;  %v6465_v24 = vld [vmem:[%s17608_s1 + $0x3f8] sm:$0xff] }
0x41df   : > { %11351 = vmatpush1.bf16.msra.mxu1 %v13869_v36  ;;  %11394 = vmatpush1.bf16.msra.mxu0 %v13871_v37  ;;  %v13857_v36 = vcombine.low %v6360_v11, %v6368_v29  ;;  %v13859_v37 = vcombine.low %v6361_v15, %v6369_v31  ;;  %v13955_v11 = vcombine.low %v6457_v62, %v6465_v24  ;;  %v15824_v29 = vld [vmem:[%s17618_s22 + $0x40] sm:$0xff]  }
0x41e0   : > { %11352 = vmatprep.subr.bf16.mxu1 %v13886_v23  ;;  %11395 = vmatprep.subr.bf16.mxu0 %v13888_v38  ;;  %v13874_v23 = vcombine.high %v6376_v34, %v6384_v5  ;;  %v13876_v38 = vcombine.high %v6377_v35, %v6385_v45  ;;  %v15825_v15 = vld [vmem:[%s17618_s22 + $0xc0] sm:$0xff]  }
0x41e1   : > { %v15826_v31 = vld [vmem:[%s17618_s22] sm:$0xff]  }
0x41e3   : > { %11353 = vmatpush1.bf16.msra.mxu1 %v13885_v42  ;;  %11396 = vmatpush1.bf16.msra.mxu0 %v13887_v44  ;;  %v13873_v42 = vcombine.low %v6376_v34, %v6384_v5  ;;  %v13875_v44 = vcombine.low %v6377_v35, %v6385_v45  ;;  %v15831_v34 = vld [vmem:[%s17618_s22 + $0x88] sm:$0xff]   ;;  %v15832_v5 = vld [vmem:[%s17618_s22 + $0x50] sm:$0xff]  }
0x41e4   : > { %11354 = vmatprep.subr.bf16.mxu1 %v13902_v49  ;;  %11397 = vmatprep.subr.bf16.mxu0 %v13904_v46  ;;  %v13890_v49 = vcombine.high %v6392_v39, %v6400_v40  ;;  %v13892_v46 = vcombine.high %v6393_v41, %v6401_v21  ;;  %v15833_v35 = vld [vmem:[%s17618_s22 + $0xd0] sm:$0xff]  }
0x41e5   : > { %v15834_v45 = vld [vmem:[%s17618_s22 + $0x10] sm:$0xff]  }
0x41e7   : > { %11355 = vmatpush1.bf16.msra.mxu1 %v13901_v9  ;;  %11398 = vmatpush1.bf16.msra.mxu0 %v13903_v63  ;;  %v13889_v9 = vcombine.low %v6392_v39, %v6400_v40  ;;  %v13906_v63 = vcombine.high %v6408_v47, %v6416_v56  ;;  %v15840_v39 = vld [vmem:[%s17618_s22 + $0x60] sm:$0xff]   ;;  %v15848_v47 = vld [vmem:[%s17618_s22 + $0x70] sm:$0xff]  }
0x41e8   : > { %11356 = vmatprep.subr.bf16.mxu1 %v13918_v0  ;;  %11399 = vmatprep.subr.bf16.mxu0 %v13920_v50  ;;  %v13908_v0 = vcombine.high %v6409_v59, %v6417_v60  ;;  %v6424_v50 = vld [vmem:[%s17608_s1 + $0x2b0] sm:$0xff]  ;;  %v15841_v40 = vld [vmem:[%s17618_s22 + $0xe0] sm:$0xff]  }
0x41e9   : > { %v13921_v1 = vcombine.low %v6424_v50, %v6432_v4  ;;  %v15849_v56 = vld [vmem:[%s17618_s22 + $0xf0] sm:$0xff]  }
0x41eb   : > { %11357 = vmatpush1.bf16.msra.mxu1 %v13917_v54  ;;  %11400 = vmatpush1.bf16.msra.mxu0 %v13919_v55  ;;  %v13907_v54 = vcombine.low %v6409_v59, %v6417_v60  ;;  %v13922_v55 = vcombine.high %v6424_v50, %v6432_v4  ;;  %v15850_v59 = vld [vmem:[%s17618_s22 + $0x30] sm:$0xff]   ;;  %v15856_v50 = vld [vmem:[%s17618_s22 + $0x140] sm:$0xff]  }
0x41ec   : > { %11358 = vmatprep.subr.bf16.mxu1 %v13934_v17  ;;  %11401 = vmatprep.subr.bf16.mxu0 %v13936_v2  ;;  %v13924_v17 = vcombine.high %v6425_v14, %v6433_v8  ;;  %v6440_v2 = vld [vmem:[%s17608_s1 + $0x330] sm:$0xff]  ;;  %v15857_v4 = vld [vmem:[%s17618_s22 + $0x1c0] sm:$0xff]  }
0x41ed   : > { %v13937_v30 = vcombine.low %v6440_v2, %v6448_v51  ;;  %v15851_v60 = vld [vmem:[%s17618_s22 + $0xb0] sm:$0xff]  }
0x41ef   : > { %11359 = vmatpush1.bf16.msra.mxu1 %v13933_v26  ;;  %11402 = vmatpush1.bf16.msra.mxu0 %v13935_v16  ;;  %v13923_v26 = vcombine.low %v6425_v14, %v6433_v8  ;;  %v13938_v16 = vcombine.high %v6440_v2, %v6448_v51  ;;  %v18951_v14 = vld [vmem:[%s17615_s3] sm:$0xff]  ;;  %v10468_v8 = vsub.s32 3, %v18282_v48 }
0x41f0   : > { %11360 = vmatprep.subr.bf16.mxu1 %v13950_v19  ;;  %11403 = vmatprep.subr.bf16.mxu0 %v13952_v53  ;;  %v13940_v19 = vcombine.high %v6441_v22, %v6449_v58  ;;  %v6456_v53 = vld [vmem:[%s17608_s1 + $0x3b0] sm:$0xff] }
0x41f3   : > { %11361 = vmatpush1.bf16.msra.mxu1 %v13949_v13  ;;  %11404 = vmatpush1.bf16.msra.mxu0 %v13951_v25  ;;  %v13939_v13 = vcombine.low %v6441_v22, %v6449_v58  ;;  %v13954_v25 = vcombine.high %v6456_v53, %v6464_v7 }
0x41f4   : > { %11432 = vmatprep.subr.bf16.mxu1 %v13842_v27  ;;  %11475 = vmatprep.subr.bf16.mxu0 %v13844_v43  ;;  %v13956_v27 = vcombine.high %v6457_v62, %v6465_v24  ;;  %v13953_v43 = vcombine.low %v6456_v53, %v6464_v7 }
0x41f6   : > { %11379 = vmatmul.mubr.bf16.vlgmr.msra.gmra.mrb[76].mxu1 %v18812_v18  ;;  %11422 = vmatmul.mubr.bf16.vlgmr.msra.gmra.mrb[24].mxu0 %v18812_v18 }
0x41f7   : > { %11433 = vmatpush1.bf16.msra.mxu1 %v13841_v6  ;;  %11476 = vmatpush1.bf16.msra.mxu0 %v13843_v3  ;;  %v15827_v6 = vld [vmem:[%s17618_s22 + $0x80] sm:$0xff]   ;;  %v15828_v3 = vld [vmem:[%s17618_s22 + $0x48] sm:$0xff]  }
0x41f8   : > { %11434 = vmatprep.subr.bf16.mxu1 %v13858_v32  ;;  %11477 = vmatprep.subr.bf16.mxu0 %v13860_v33  ;;  %v15829_v32 = vld [vmem:[%s17618_s22 + $0xc8] sm:$0xff]  }
0x41f9   : > { %11464 = vmatprep.mubr.bf16.mxu1 %v16753_v28  ;;  %11507 = vmatprep.mubr.bf16.mxu0 %v16753_v28  ;;  %v13891_v28 = vcombine.low %v6393_v41, %v6401_v21  ;;  %v15830_v33 = vld [vmem:[%s17618_s22 + $0x8] sm:$0xff]   ;;  %v15842_v41 = vld [vmem:[%s17618_s22 + $0x20] sm:$0xff]  }
0x41fa   : > { %v15843_v21 = vld [vmem:[%s17618_s22 + $0xa0] sm:$0xff]  }
0x41fb   : > { %11435 = vmatpush1.bf16.msra.mxu1 %v13857_v36  ;;  %11478 = vmatpush1.bf16.msra.mxu0 %v13859_v37  ;;  %v15835_v36 = vld [vmem:[%s17618_s22 + $0x90] sm:$0xff]   ;;  %v15837_v37 = vld [vmem:[%s17618_s22 + $0xd8] sm:$0xff]  }
0x41fc   : > { %11436 = vmatprep.subr.bf16.mxu1 %v13874_v23  ;;  %11479 = vmatprep.subr.bf16.mxu0 %v13876_v38  ;;  %v15838_v23 = vld [vmem:[%s17618_s22 + $0x18] sm:$0xff]  }
0x41fd   : > { %v15839_v38 = vld [vmem:[%s17618_s22 + $0x98] sm:$0xff]  }
0x41ff   : > { %11437 = vmatpush1.bf16.msra.mxu1 %v13873_v42  ;;  %11480 = vmatpush1.bf16.msra.mxu0 %v13875_v44  ;;  %v15844_v42 = vld [vmem:[%s17618_s22 + $0x68] sm:$0xff]  }
0x4200   : > { %11438 = vmatprep.subr.bf16.mxu1 %v13890_v49  ;;  %11481 = vmatprep.subr.bf16.mxu0 %v13892_v46  ;;  %v15845_v44 = vld [vmem:[%s17618_s22 + $0xe8] sm:$0xff]  }
0x4201   : > { %v15846_v49 = vld [vmem:[%s17618_s22 + $0x28] sm:$0xff]  }
0x4202   : > { %v15847_v46 = vld [vmem:[%s17618_s22 + $0xa8] sm:$0xff]  }
0x4203   : > { %11439 = vmatpush1.bf16.msra.mxu1 %v13889_v9  ;;  %11482 = vmatpush1.bf16.msra.mxu0 %v13891_v28  ;;  %v15852_v9 = vld [vmem:[%s17618_s22 + $0x78] sm:$0xff]  }
0x4204   : > { %11440 = vmatprep.subr.bf16.mxu1 %v13906_v63  ;;  %11483 = vmatprep.subr.bf16.mxu0 %v13908_v0  ;;  %v15853_v28 = vld [vmem:[%s17618_s22 + $0xf8] sm:$0xff]  }
0x4205   : > { %v15854_v63 = vld [vmem:[%s17618_s22 + $0x38] sm:$0xff]  }
0x4206   : > { %v15855_v0 = vld [vmem:[%s17618_s22 + $0xb8] sm:$0xff]  }
0x4207   : > { %11441 = vmatpush1.bf16.msra.mxu1 %v13905_v12  ;;  %11484 = vmatpush1.bf16.msra.mxu0 %v13907_v54  ;;  %v10457_v12 = vrot.slane %v18951_v14, %v18292_v57  ;;  %v10465_v54 = vrot.slane %v18951_v14, %v18338_v10 }
0x4208   : > { %11442 = vmatprep.subr.bf16.mxu1 %v13922_v55  ;;  %11485 = vmatprep.subr.bf16.mxu0 %v13924_v17  ;;  %v10461_v55 = vrot.slane %v18951_v14, %v18286_v52  ;;  %v10469_v17 = vrot.slane %v18951_v14, %v10468_v8 }
0x420b   : > { %11443 = vmatpush1.bf16.msra.mxu1 %v13921_v1  ;;  %11486 = vmatpush1.bf16.msra.mxu0 %v13923_v26 }
0x420c   : > { %11444 = vmatprep.subr.bf16.mxu1 %v13938_v16  ;;  %11487 = vmatprep.subr.bf16.mxu0 %v13940_v19 }
0x420f   : > { %11445 = vmatpush1.bf16.msra.mxu1 %v13937_v30  ;;  %11488 = vmatpush1.bf16.msra.mxu0 %v13939_v13 }
0x4210   : > { %11446 = vmatprep.subr.bf16.mxu1 %v13954_v25  ;;  %11489 = vmatprep.subr.bf16.mxu0 %v13956_v27 }
0x4213   : > { %11447 = vmatpush1.bf16.msra.mxu1 %v13953_v43  ;;  %11490 = vmatpush1.bf16.msra.mxu0 %v13955_v11 }
0x4214   : > { %14461 = vmatprep.subr.bf16.mxu1 %v15824_v29  ;;  %14483 = vmatprep.subr.bf16.mxu0 %v15825_v15 }
0x4216   : > { %11465 = vmatmul.mubr.bf16.vlgmr.msra.gmra.mrb[80].mxu1 %v18812_v18  ;;  %11508 = vmatmul.mubr.bf16.vlgmr.msra.gmra.mrb[28].mxu0 %v18812_v18  ;;  %v15836_v18 = vld [vmem:[%s17618_s22 + $0x58] sm:$0xff]  }
0x4217   : > { %14462 = vmatpush3.bf16.msra.mxu1 %v15826_v31  ;;  %14484 = vmatpush3.bf16.msra.mxu0 %v15827_v6 }
0x4218   : > { %14463 = vmatprep.subr.bf16.mxu1 %v15828_v3  ;;  %14485 = vmatprep.subr.bf16.mxu0 %v15829_v32 }
0x421b   : > { %14464 = vmatpush3.bf16.msra.mxu1 %v15830_v33  ;;  %14486 = vmatpush3.bf16.msra.mxu0 %v15831_v34 }
0x421c   : > { %14465 = vmatprep.subr.bf16.mxu1 %v15832_v5  ;;  %14487 = vmatprep.subr.bf16.mxu0 %v15833_v35 }
0x421f   : > { %14466 = vmatpush3.bf16.msra.mxu1 %v15834_v45  ;;  %14488 = vmatpush3.bf16.msra.mxu0 %v15835_v36  ;;  %v15858_v45 = vld [vmem:[%s17618_s22 + $0x100] sm:$0xff]  }
0x4220   : > { %14467 = vmatprep.subr.bf16.mxu1 %v15836_v18  ;;  %14489 = vmatprep.subr.bf16.mxu0 %v15837_v37  ;;  %v15859_v36 = vld [vmem:[%s17618_s22 + $0x180] sm:$0xff]   ;;  %v15860_v18 = vld [vmem:[%s17618_s22 + $0x148] sm:$0xff]  }
0x4221   : > { %v15861_v37 = vld [vmem:[%s17618_s22 + $0x1c8] sm:$0xff]  }
0x4223   : > { %14468 = vmatpush3.bf16.msra.mxu1 %v15838_v23  ;;  %14490 = vmatpush3.bf16.msra.mxu0 %v15839_v38  ;;  %v15862_v23 = vld [vmem:[%s17618_s22 + $0x108] sm:$0xff]  }
0x4224   : > { %14469 = vmatprep.subr.bf16.mxu1 %v15840_v39  ;;  %14491 = vmatprep.subr.bf16.mxu0 %v15841_v40  ;;  %v15863_v38 = vld [vmem:[%s17618_s22 + $0x188] sm:$0xff]   ;;  %v15864_v39 = vld [vmem:[%s17618_s22 + $0x150] sm:$0xff]  }
0x4225   : > { %v15865_v40 = vld [vmem:[%s17618_s22 + $0x1d0] sm:$0xff]  }
0x4227   : > { %14470 = vmatpush3.bf16.msra.mxu1 %v15842_v41  ;;  %14492 = vmatpush3.bf16.msra.mxu0 %v15843_v21  ;;  %v15866_v41 = vld [vmem:[%s17618_s22 + $0x110] sm:$0xff]  }
0x4228   : > { %14471 = vmatprep.subr.bf16.mxu1 %v15844_v42  ;;  %14493 = vmatprep.subr.bf16.mxu0 %v15845_v44  ;;  %v15867_v21 = vld [vmem:[%s17618_s22 + $0x190] sm:$0xff]   ;;  %v15868_v42 = vld [vmem:[%s17618_s22 + $0x158] sm:$0xff]  }
0x4229   : > { %v15869_v44 = vld [vmem:[%s17618_s22 + $0x1d8] sm:$0xff]  }
0x422b   : > { %14472 = vmatpush3.bf16.msra.mxu1 %v15846_v49  ;;  %14494 = vmatpush3.bf16.msra.mxu0 %v15847_v46  ;;  %v15870_v49 = vld [vmem:[%s17618_s22 + $0x118] sm:$0xff]  }
0x422c   : > { %14473 = vmatprep.subr.bf16.mxu1 %v15848_v47  ;;  %14495 = vmatprep.subr.bf16.mxu0 %v15849_v56  ;;  %v15871_v46 = vld [vmem:[%s17618_s22 + $0x198] sm:$0xff]   ;;  %v15872_v47 = vld [vmem:[%s17618_s22 + $0x160] sm:$0xff]  }
0x422d   : > { %v15873_v56 = vld [vmem:[%s17618_s22 + $0x1e0] sm:$0xff]  }
0x422f   : > { %14474 = vmatpush3.bf16.msra.mxu1 %v15850_v59  ;;  %14496 = vmatpush3.bf16.msra.mxu0 %v15851_v60  ;;  %v15874_v59 = vld [vmem:[%s17618_s22 + $0x120] sm:$0xff]  }
0x4230   : > { %14475 = vmatprep.subr.bf16.mxu1 %v15852_v9  ;;  %14497 = vmatprep.subr.bf16.mxu0 %v15853_v28  ;;  %v15875_v60 = vld [vmem:[%s17618_s22 + $0x1a0] sm:$0xff]   ;;  %v15876_v9 = vld [vmem:[%s17618_s22 + $0x168] sm:$0xff]  }
0x4231   : > { %v15877_v28 = vld [vmem:[%s17618_s22 + $0x1e8] sm:$0xff]  }
0x4233   : > { %14476 = vmatpush3.bf16.msra.mxu1 %v15854_v63  ;;  %14498 = vmatpush3.bf16.msra.mxu0 %v15855_v0  ;;  %v10472_v63 = vsub.s32 4, %v18282_v48  ;;  %v10480_v0 = vsub.s32 6, %v18282_v48 }
0x4234   : > { %14505 = vmatprep.subr.bf16.mxu1 %v15856_v50  ;;  %14527 = vmatprep.subr.bf16.mxu0 %v15857_v4  ;;  %v10476_v50 = vsub.s32 5, %v18282_v48  ;;  %v10484_v4 = vsub.s32 7, %v18282_v48 }
0x4289   : > { %v11208_v2 = vpop.f32.mrb[68].mxu1  ;;  %v11251_v51 = vpop.f32.mrb[16].mxu0 }
0x428a   : > { %v11209_v22 = vadd.f32 %v11208_v2, %v10457_v12  ;;  %v11252_v58 = vadd.f32 %v11251_v51, %v10465_v54  ;;  %v11210_v1 = vpop.f32.mrb[69].mxu1  ;;  %v11253_v26 = vpop.f32.mrb[17].mxu0  ;;  %v15880_v2 = vld [vmem:[%s17618_s22 + $0x170] sm:$0xff]  }
0x428b   : > { %v11211_v16 = vadd.f32 %v11210_v1, %v10461_v55  ;;  %v11254_v19 = vadd.f32 %v11253_v26, %v10469_v17  ;;  %v11212_v53 = vpop.f32.mrb[70].mxu1  ;;  %v11255_v7 = vpop.f32.mrb[18].mxu0  ;;  %v15881_v51 = vld [vmem:[%s17618_s22 + $0x1f0] sm:$0xff]  }
0x428c   : > { %v11213_v62 = vadd.f32 %v11212_v53, %v10457_v12  ;;  %v11256_v24 = vadd.f32 %v11255_v7, %v10465_v54  ;;  %v11214_v30 = vpop.f32.mrb[71].mxu1  ;;  %v11257_v13 = vpop.f32.mrb[19].mxu0  ;;  %v11518_v43 = vmax.f32 %v11209_v22, 0.0  ;;  %v11520_v11 = vmax.f32 %v11252_v58, 0.0  ;;  %v15878_v12 = vld [vmem:[%s17618_s22 + $0x128] sm:$0xff]  }
0x428d   : > { %v11215_v25 = vadd.f32 %v11214_v30, %v10461_v55  ;;  %v11258_v27 = vadd.f32 %v11257_v13, %v10469_v17  ;;  %v11519_v31 = vmax.f32 %v11211_v16, 0.0  ;;  %v11521_v6 = vmax.f32 %v11254_v19, 0.0  ;;  %v15879_v54 = vld [vmem:[%s17618_s22 + $0x1a8] sm:$0xff]   ;;  %v15882_v16 = vld [vmem:[%s17618_s22 + $0x130] sm:$0xff]   ;;  %v15884_v30 = vld [vmem:[%s17618_s22 + $0x178] sm:$0xff]  }
0x428e   : > { %v11534_v29 = vmax.f32 %v11213_v62, 0.0  ;;  %v11536_v15 = vmax.f32 %v11256_v24, 0.0  ;;  %v10473_v55 = vrot.slane %v18951_v14, %v10472_v63  ;;  %v10481_v17 = vrot.slane %v18951_v14, %v10480_v0  ;;  %v15883_v19 = vld [vmem:[%s17618_s22 + $0x1b0] sm:$0xff]   ;;  %v15885_v13 = vld [vmem:[%s17618_s22 + $0x1f8] sm:$0xff]  }
0x428f   : > { %v11535_v3 = vmax.f32 %v11215_v25, 0.0  ;;  %v11537_v32 = vmax.f32 %v11258_v27, 0.0  ;;  %v10477_v22 = vrot.slane %v18951_v14, %v10476_v50  ;;  %v10485_v58 = vrot.slane %v18951_v14, %v10484_v4 }
0x4290   : > { %v11550_v33 = vpack.c.bf16 %v11534_v29, %v11518_v43  ;;  %v11552_v34 = vpack.c.bf16 %v11536_v15, %v11520_v11 }
0x4291   : > { %v11551_v5 = vpack.c.bf16 %v11535_v3, %v11519_v31  ;;  %v11553_v35 = vpack.c.bf16 %v11537_v32, %v11521_v6  ;;  %v15886_v32 = vld [vmem:[%s17618_s22 + $0x138] sm:$0xff]  }
0x4293   : > { %12372 = vmatprep.mubr.bf16.mxu1 %v11551_v5  ;;  %12413 = vmatprep.mubr.bf16.mxu0 %v11553_v35 }
0x4294   : > { %12373 = vmatmul.mubr.bf16.vlgmr.msra.gmra.mrb[84].mxu1 %v11550_v33  ;;  %12414 = vmatmul.mubr.bf16.vlgmr.msra.gmra.mrb[32].mxu0 %v11552_v34  ;;  %v15887_v33 = vld [vmem:[%s17618_s22 + $0x1b8] sm:$0xff]  }
0x4295   : > { %14506 = vmatpush3.bf16.msra.mxu1 %v15858_v45  ;;  %14528 = vmatpush3.bf16.msra.mxu0 %v15859_v36  ;;  %v15888_v36 = vld [vmem:[%s17618_s22 + $0x240] sm:$0xff]  }
0x4296   : > { %14507 = vmatprep.subr.bf16.mxu1 %v15860_v18  ;;  %14529 = vmatprep.subr.bf16.mxu0 %v15861_v37  ;;  %v15889_v18 = vld [vmem:[%s17618_s22 + $0x2c0] sm:$0xff]  }
0x4299   : > { %14508 = vmatpush3.bf16.msra.mxu1 %v15862_v23  ;;  %14530 = vmatpush3.bf16.msra.mxu0 %v15863_v38 }
0x429a   : > { %14509 = vmatprep.subr.bf16.mxu1 %v15864_v39  ;;  %14531 = vmatprep.subr.bf16.mxu0 %v15865_v40 }
0x429d   : > { %14510 = vmatpush3.bf16.msra.mxu1 %v15866_v41  ;;  %14532 = vmatpush3.bf16.msra.mxu0 %v15867_v21 }
0x429e   : > { %14511 = vmatprep.subr.bf16.mxu1 %v15868_v42  ;;  %14533 = vmatprep.subr.bf16.mxu0 %v15869_v44  ;;  %v15890_v44 = vld [vmem:[%s17618_s22 + $0x200] sm:$0xff]  }
0x42a1   : > { %14512 = vmatpush3.bf16.msra.mxu1 %v15870_v49  ;;  %14534 = vmatpush3.bf16.msra.mxu0 %v15871_v46  ;;  %v15891_v49 = vld [vmem:[%s17618_s22 + $0x280] sm:$0xff]   ;;  %v15892_v46 = vld [vmem:[%s17618_s22 + $0x248] sm:$0xff]  }
0x42a2   : > { %14513 = vmatprep.subr.bf16.mxu1 %v15872_v47  ;;  %14535 = vmatprep.subr.bf16.mxu0 %v15873_v56  ;;  %v15893_v47 = vld [vmem:[%s17618_s22 + $0x2c8] sm:$0xff]  }
0x42a3   : > { %v15894_v56 = vld [vmem:[%s17618_s22 + $0x208] sm:$0xff]  }
0x42a5   : > { %14514 = vmatpush3.bf16.msra.mxu1 %v15874_v59  ;;  %14536 = vmatpush3.bf16.msra.mxu0 %v15875_v60  ;;  %v15895_v59 = vld [vmem:[%s17618_s22 + $0x288] sm:$0xff]   ;;  %v15896_v60 = vld [vmem:[%s17618_s22 + $0x250] sm:$0xff]  }
0x42a6   : > { %14515 = vmatprep.subr.bf16.mxu1 %v15876_v9  ;;  %14537 = vmatprep.subr.bf16.mxu0 %v15877_v28  ;;  %v15897_v9 = vld [vmem:[%s17618_s22 + $0x2d0] sm:$0xff]  }
0x42a7   : > { %v15898_v28 = vld [vmem:[%s17618_s22 + $0x210] sm:$0xff]  }
0x42a9   : > { %v11294_v1 = vpop.f32.mrb[72].mxu1  ;;  %v11337_v26 = vpop.f32.mrb[20].mxu0  ;;  %14516 = vmatpush3.bf16.msra.mxu1 %v15878_v12  ;;  %14538 = vmatpush3.bf16.msra.mxu0 %v15879_v54  ;;  %v15899_v12 = vld [vmem:[%s17618_s22 + $0x290] sm:$0xff]   ;;  %v15900_v54 = vld [vmem:[%s17618_s22 + $0x258] sm:$0xff]  }
0x42aa   : > { %v11295_v53 = vadd.f32 %v11294_v1, %v10473_v55  ;;  %v11338_v7 = vadd.f32 %v11337_v26, %v10481_v17  ;;  %v11296_v62 = vpop.f32.mrb[73].mxu1  ;;  %v11339_v24 = vpop.f32.mrb[21].mxu0  ;;  %14517 = vmatprep.subr.bf16.mxu1 %v15880_v2  ;;  %14539 = vmatprep.subr.bf16.mxu0 %v15881_v51  ;;  %v15903_v2 = vld [vmem:[%s17618_s22 + $0x298] sm:$0xff]   ;;  %v15904_v51 = vld [vmem:[%s17618_s22 + $0x260] sm:$0xff]   ;;  %v15908_v26 = vld [vmem:[%s17618_s22 + $0x268] sm:$0xff]  }
0x42ab   : > { %v11297_v25 = vadd.f32 %v11296_v62, %v10477_v22  ;;  %v11340_v27 = vadd.f32 %v11339_v24, %v10485_v58  ;;  %v11298_v43 = vpop.f32.mrb[74].mxu1  ;;  %v11341_v14 = vpop.f32.mrb[22].mxu0  ;;  %v15907_v1 = vld [vmem:[%s17618_s22 + $0x2a0] sm:$0xff]  }
0x42ac   : > { %v11299_v11 = vadd.f32 %v11298_v43, %v10473_v55  ;;  %v11342_v29 = vadd.f32 %v11341_v14, %v10481_v17  ;;  %v11300_v15 = vpop.f32.mrb[75].mxu1  ;;  %v11343_v31 = vpop.f32.mrb[23].mxu0  ;;  %v11522_v34 = vmax.f32 %v11295_v53, 0.0  ;;  %v11524_v5 = vmax.f32 %v11338_v7, 0.0  ;;  %v15901_v55 = vld [vmem:[%s17618_s22 + $0x2d8] sm:$0xff]   ;;  %v15910_v53 = vld [vmem:[%s17618_s22 + $0x228] sm:$0xff]  }
0x42ad   : > { %v11301_v6 = vadd.f32 %v11300_v15, %v10477_v22  ;;  %v11344_v3 = vadd.f32 %v11343_v31, %v10485_v58  ;;  %14518 = vmatpush3.bf16.msra.mxu1 %v15882_v16  ;;  %14540 = vmatpush3.bf16.msra.mxu0 %v15883_v19  ;;  %v11523_v37 = vmax.f32 %v11297_v25, 0.0  ;;  %v11525_v23 = vmax.f32 %v11340_v27, 0.0  ;;  %v15902_v17 = vld [vmem:[%s17618_s22 + $0x218] sm:$0xff]   ;;  %v15905_v22 = vld [vmem:[%s17618_s22 + $0x2e0] sm:$0xff]   ;;  %v15909_v16 = vld [vmem:[%s17618_s22 + $0x2e8] sm:$0xff]  }
0x42ae   : > { %v11538_v35 = vmax.f32 %v11299_v11, 0.0  ;;  %v11540_v45 = vmax.f32 %v11342_v29, 0.0  ;;  %14519 = vmatprep.subr.bf16.mxu1 %v15884_v30  ;;  %14541 = vmatprep.subr.bf16.mxu0 %v15885_v13  ;;  %v15906_v58 = vld [vmem:[%s17618_s22 + $0x220] sm:$0xff]   ;;  %v19032_v19 = vld [vmem:[%s17615_s3 + $0x8] sm:$0xff]  ;;  %v15912_v30 = vld [vmem:[%s17618_s22 + $0x270] sm:$0xff]  }
0x42af   : > { %v11539_v38 = vmax.f32 %v11301_v6, 0.0  ;;  %v11541_v39 = vmax.f32 %v11344_v3, 0.0  ;;  %v15911_v7 = vld [vmem:[%s17618_s22 + $0x2a8] sm:$0xff]   ;;  %v10489_v62 = vrot.slane %v19032_v19, %v18292_v57  ;;  %v10497_v24 = vrot.slane %v19032_v19, %v18338_v10  ;;  %v15913_v13 = vld [vmem:[%s17618_s22 + $0x2f0] sm:$0xff]   ;;  %v15916_v6 = vld [vmem:[%s17618_s22 + $0x278] sm:$0xff]  }
0x42b0   : > { %v11554_v40 = vpack.c.bf16 %v11538_v35, %v11522_v34  ;;  %v11556_v41 = vpack.c.bf16 %v11540_v45, %v11524_v5  ;;  %v10493_v25 = vrot.slane %v19032_v19, %v18286_v52  ;;  %v10501_v27 = vrot.slane %v19032_v19, %v10468_v8  ;;  %v15914_v11 = vld [vmem:[%s17618_s22 + $0x230] sm:$0xff]   ;;  %v15917_v52 = vld [vmem:[%s17618_s22 + $0x2f8] sm:$0xff]  }
0x42b1   : > { %v11555_v21 = vpack.c.bf16 %v11539_v38, %v11523_v37  ;;  %v11557_v42 = vpack.c.bf16 %v11541_v39, %v11525_v23  ;;  %14520 = vmatpush3.bf16.msra.mxu1 %v15886_v32  ;;  %14542 = vmatpush3.bf16.msra.mxu0 %v15887_v33  ;;  %v15915_v57 = vld [vmem:[%s17618_s22 + $0x2b0] sm:$0xff]   ;;  %v15918_v37 = vld [vmem:[%s17618_s22 + $0x238] sm:$0xff]  }
0x42b2   : > { %14549 = vmatprep.subr.bf16.mxu1 %v15888_v36  ;;  %14571 = vmatprep.subr.bf16.mxu0 %v15889_v18  ;;  %v15919_v23 = vld [vmem:[%s17618_s22 + $0x2b8] sm:$0xff]  }
0x42b3   : > { %12454 = vmatprep.mubr.bf16.mxu1 %v11555_v21  ;;  %12495 = vmatprep.mubr.bf16.mxu0 %v11557_v42  ;;  %v15920_v21 = vld [vmem:[%s17618_s22 + $0x340] sm:$0xff]  }
0x42b4   : > { %12455 = vmatmul.mubr.bf16.vlgmr.msra.gmra.mrb[88].mxu1 %v11554_v40  ;;  %12496 = vmatmul.mubr.bf16.vlgmr.msra.gmra.mrb[36].mxu0 %v11556_v41  ;;  %v15921_v42 = vld [vmem:[%s17618_s22 + $0x3c0] sm:$0xff]  }
0x42b5   : > { %14550 = vmatpush3.bf16.msra.mxu1 %v15890_v44  ;;  %14572 = vmatpush3.bf16.msra.mxu0 %v15891_v49 }
0x42b6   : > { %14551 = vmatprep.subr.bf16.mxu1 %v15892_v46  ;;  %14573 = vmatprep.subr.bf16.mxu0 %v15893_v47 }
0x42b9   : > { %14552 = vmatpush3.bf16.msra.mxu1 %v15894_v56  ;;  %14574 = vmatpush3.bf16.msra.mxu0 %v15895_v59 }
0x42ba   : > { %14553 = vmatprep.subr.bf16.mxu1 %v15896_v60  ;;  %14575 = vmatprep.subr.bf16.mxu0 %v15897_v9 }
0x42bd   : > { %14554 = vmatpush3.bf16.msra.mxu1 %v15898_v28  ;;  %14576 = vmatpush3.bf16.msra.mxu0 %v15899_v12  ;;  %v15922_v28 = vld [vmem:[%s17618_s22 + $0x300] sm:$0xff]  }
0x42be   : > { %14555 = vmatprep.subr.bf16.mxu1 %v15900_v54  ;;  %14577 = vmatprep.subr.bf16.mxu0 %v15901_v55  ;;  %v15923_v12 = vld [vmem:[%s17618_s22 + $0x380] sm:$0xff]   ;;  %v15924_v54 = vld [vmem:[%s17618_s22 + $0x348] sm:$0xff]  }
0x42bf   : > { %v15925_v55 = vld [vmem:[%s17618_s22 + $0x3c8] sm:$0xff]  }
0x42c1   : > { %14556 = vmatpush3.bf16.msra.mxu1 %v15902_v17  ;;  %14578 = vmatpush3.bf16.msra.mxu0 %v15903_v2  ;;  %v15926_v17 = vld [vmem:[%s17618_s22 + $0x308] sm:$0xff]  }
0x42c2   : > { %14557 = vmatprep.subr.bf16.mxu1 %v15904_v51  ;;  %14579 = vmatprep.subr.bf16.mxu0 %v15905_v22  ;;  %v15927_v2 = vld [vmem:[%s17618_s22 + $0x388] sm:$0xff]   ;;  %v15928_v51 = vld [vmem:[%s17618_s22 + $0x350] sm:$0xff]  }
0x42c3   : > { %v15929_v22 = vld [vmem:[%s17618_s22 + $0x3d0] sm:$0xff]  }
0x42c5   : > { %14558 = vmatpush3.bf16.msra.mxu1 %v15906_v58  ;;  %14580 = vmatpush3.bf16.msra.mxu0 %v15907_v1  ;;  %v15930_v58 = vld [vmem:[%s17618_s22 + $0x310] sm:$0xff]  }
0x42c6   : > { %14559 = vmatprep.subr.bf16.mxu1 %v15908_v26  ;;  %14581 = vmatprep.subr.bf16.mxu0 %v15909_v16  ;;  %v15931_v1 = vld [vmem:[%s17618_s22 + $0x390] sm:$0xff]   ;;  %v15932_v26 = vld [vmem:[%s17618_s22 + $0x358] sm:$0xff]  }
0x42c7   : > { %v15933_v16 = vld [vmem:[%s17618_s22 + $0x3d8] sm:$0xff]  }
0x42c9   : > { %v11380_v43 = vpop.f32.mrb[76].mxu1  ;;  %v11423_v14 = vpop.f32.mrb[24].mxu0  ;;  %14560 = vmatpush3.bf16.msra.mxu1 %v15910_v53  ;;  %14582 = vmatpush3.bf16.msra.mxu0 %v15911_v7  ;;  %v15934_v53 = vld [vmem:[%s17618_s22 + $0x318] sm:$0xff]  }
0x42ca   : > { %v11381_v29 = vadd.f32 %v11380_v43, %v10489_v62  ;;  %v11424_v15 = vadd.f32 %v11423_v14, %v10497_v24  ;;  %v11382_v10 = vpop.f32.mrb[77].mxu1  ;;  %v11425_v31 = vpop.f32.mrb[25].mxu0  ;;  %14561 = vmatprep.subr.bf16.mxu1 %v15912_v30  ;;  %14583 = vmatprep.subr.bf16.mxu0 %v15913_v13  ;;  %v15935_v7 = vld [vmem:[%s17618_s22 + $0x398] sm:$0xff]   ;;  %v15938_v30 = vld [vmem:[%s17618_s22 + $0x320] sm:$0xff]   ;;  %v15942_v43 = vld [vmem:[%s17618_s22 + $0x328] sm:$0xff]  }
0x42cb   : > { %v11383_v3 = vadd.f32 %v11382_v10, %v10493_v25  ;;  %v11426_v32 = vadd.f32 %v11425_v31, %v10501_v27  ;;  %v11384_v33 = vpop.f32.mrb[78].mxu1  ;;  %v11427_v8 = vpop.f32.mrb[26].mxu0  ;;  %v15939_v13 = vld [vmem:[%s17618_s22 + $0x3a0] sm:$0xff]   ;;  %v15943_v14 = vld [vmem:[%s17618_s22 + $0x3a8] sm:$0xff]   ;;  %v10509_v10 = vrot.slane %v19032_v19, %v10476_v50  ;;  %v10517_v31 = vrot.slane %v19032_v19, %v10484_v4  ;;  %v15949_v50 = vld [vmem:[%s17618_s22 + $0x3f8] sm:$0xff]  }
0x42cc   : > { %v11385_v34 = vadd.f32 %v11384_v33, %v10489_v62  ;;  %v11428_v5 = vadd.f32 %v11427_v8, %v10497_v24  ;;  %v11386_v35 = vpop.f32.mrb[79].mxu1  ;;  %v11429_v45 = vpop.f32.mrb[27].mxu0  ;;  %v11526_v38 = vmax.f32 %v11381_v29, 0.0  ;;  %v11528_v39 = vmax.f32 %v11424_v15, 0.0  ;;  %v15936_v62 = vld [vmem:[%s17618_s22 + $0x360] sm:$0xff]   ;;  %v15944_v29 = vld [vmem:[%s17618_s22 + $0x370] sm:$0xff]  }
0x42cd   : > { %v11387_v36 = vadd.f32 %v11386_v35, %v10493_v25  ;;  %v11430_v18 = vadd.f32 %v11429_v45, %v10501_v27  ;;  %14562 = vmatpush3.bf16.msra.mxu1 %v15914_v11  ;;  %14584 = vmatpush3.bf16.msra.mxu0 %v15915_v57  ;;  %v11527_v44 = vmax.f32 %v11383_v3, 0.0  ;;  %v11529_v49 = vmax.f32 %v11426_v32, 0.0  ;;  %v15937_v24 = vld [vmem:[%s17618_s22 + $0x3e0] sm:$0xff]   ;;  %v15940_v25 = vld [vmem:[%s17618_s22 + $0x368] sm:$0xff]   ;;  %v15945_v15 = vld [vmem:[%s17618_s22 + $0x3f0] sm:$0xff]  }
0x42ce   : > { %v11542_v40 = vmax.f32 %v11385_v34, 0.0  ;;  %v11544_v41 = vmax.f32 %v11428_v5, 0.0  ;;  %14563 = vmatprep.subr.bf16.mxu1 %v15916_v6  ;;  %14585 = vmatprep.subr.bf16.mxu0 %v15917_v52  ;;  %v15941_v27 = vld [vmem:[%s17618_s22 + $0x3e8] sm:$0xff]   ;;  %v10505_v11 = vrot.slane %v19032_v19, %v10472_v63  ;;  %v10513_v57 = vrot.slane %v19032_v19, %v10480_v0  ;;  %v15946_v63 = vld [vmem:[%s17618_s22 + $0x330] sm:$0xff]   ;;  %v15948_v34 = vld [vmem:[%s17618_s22 + $0x378] sm:$0xff]  }
0x42cf   : > { %v11543_v46 = vmax.f32 %v11387_v36, 0.0  ;;  %v11545_v47 = vmax.f32 %v11430_v18, 0.0  ;;  %v15947_v3 = vld [vmem:[%s17618_s22 + $0x3b0] sm:$0xff]  }
0x42d0   : > { %v11558_v56 = vpack.c.bf16 %v11542_v40, %v11526_v38  ;;  %v11560_v59 = vpack.c.bf16 %v11544_v41, %v11528_v39  ;;  %v15950_v38 = vld [vmem:[%s17618_s22 + $0x338] sm:$0xff]  }
0x42d1   : > { %v11559_v60 = vpack.c.bf16 %v11543_v46, %v11527_v44  ;;  %v11561_v9 = vpack.c.bf16 %v11545_v47, %v11529_v49  ;;  %14564 = vmatpush3.bf16.msra.mxu1 %v15918_v37  ;;  %14586 = vmatpush3.bf16.msra.mxu0 %v15919_v23  ;;  %v15951_v39 = vld [vmem:[%s17618_s22 + $0x3b8] sm:$0xff]  }
0x42d2   : > { %14593 = vmatprep.subr.bf16.mxu1 %v15920_v21  ;;  %14615 = vmatprep.subr.bf16.mxu0 %v15921_v42 }
0x42d3   : > { %12536 = vmatprep.mubr.bf16.mxu1 %v11559_v60  ;;  %12577 = vmatprep.mubr.bf16.mxu0 %v11561_v9 }
0x42d4   : > { %12537 = vmatmul.mubr.bf16.vlgmr.msra.gmra.mrb[92].mxu1 %v11558_v56  ;;  %12578 = vmatmul.mubr.bf16.vlgmr.msra.gmra.mrb[40].mxu0 %v11560_v59 }
0x42d5   : > { %14594 = vmatpush3.bf16.msra.mxu1 %v15922_v28  ;;  %14616 = vmatpush3.bf16.msra.mxu0 %v15923_v12 }
0x42d6   : > { %14595 = vmatprep.subr.bf16.mxu1 %v15924_v54  ;;  %14617 = vmatprep.subr.bf16.mxu0 %v15925_v55  ;;  %v13957_v54 = vld [vmem:[%s1096_s13] ss:$0 sm:$0xff] }
0x42d9   : > { %14596 = vmatpush3.bf16.msra.mxu1 %v15926_v17  ;;  %14618 = vmatpush3.bf16.msra.mxu0 %v15927_v2 }
0x42da   : > { %14597 = vmatprep.subr.bf16.mxu1 %v15928_v51  ;;  %14619 = vmatprep.subr.bf16.mxu0 %v15929_v22 }
0x42dd   : > { %14598 = vmatpush3.bf16.msra.mxu1 %v15930_v58  ;;  %14620 = vmatpush3.bf16.msra.mxu0 %v15931_v1 }
0x42de   : > { %14599 = vmatprep.subr.bf16.mxu1 %v15932_v26  ;;  %14621 = vmatprep.subr.bf16.mxu0 %v15933_v16 }
0x42e1   : > { %14600 = vmatpush3.bf16.msra.mxu1 %v15934_v53  ;;  %14622 = vmatpush3.bf16.msra.mxu0 %v15935_v7 }
0x42e2   : > { %14601 = vmatprep.subr.bf16.mxu1 %v15936_v62  ;;  %14623 = vmatprep.subr.bf16.mxu0 %v15937_v24 }
0x42e5   : > { %14602 = vmatpush3.bf16.msra.mxu1 %v15938_v30  ;;  %14624 = vmatpush3.bf16.msra.mxu0 %v15939_v13 }
0x42e6   : > { %14603 = vmatprep.subr.bf16.mxu1 %v15940_v25  ;;  %14625 = vmatprep.subr.bf16.mxu0 %v15941_v27 }
0x42e9   : > { %v11466_v6 = vpop.f32.mrb[80].mxu1  ;;  %v11509_v52 = vpop.f32.mrb[28].mxu0  ;;  %14604 = vmatpush3.bf16.msra.mxu1 %v15942_v43  ;;  %14626 = vmatpush3.bf16.msra.mxu0 %v15943_v14 }
0x42ea   : > { %v11467_v32 = vadd.f32 %v11466_v6, %v10505_v11  ;;  %v11510_v0 = vadd.f32 %v11509_v52, %v10513_v57  ;;  %v11468_v33 = vpop.f32.mrb[81].mxu1  ;;  %v11511_v8 = vpop.f32.mrb[29].mxu0  ;;  %14605 = vmatprep.subr.bf16.mxu1 %v15944_v29  ;;  %14627 = vmatprep.subr.bf16.mxu0 %v15945_v15 }
0x42eb   : > { %v11469_v5 = vadd.f32 %v11468_v33, %v10509_v10  ;;  %v11512_v48 = vadd.f32 %v11511_v8, %v10517_v31  ;;  %v11470_v35 = vpop.f32.mrb[82].mxu1  ;;  %v11513_v4 = vpop.f32.mrb[30].mxu0 }
0x42ec   : > { %v11471_v19 = vadd.f32 %v11470_v35, %v10505_v11  ;;  %v11514_v45 = vadd.f32 %v11513_v4, %v10513_v57  ;;  %v11472_v36 = vpop.f32.mrb[83].mxu1  ;;  %v11515_v18 = vpop.f32.mrb[31].mxu0  ;;  %v11530_v40 = vmax.f32 %v11467_v32, 0.0  ;;  %v11532_v41 = vmax.f32 %v11510_v0, 0.0 }
0x42ed   : > { %v11473_v37 = vadd.f32 %v11472_v36, %v10509_v10  ;;  %v11516_v23 = vadd.f32 %v11515_v18, %v10517_v31  ;;  %14606 = vmatpush3.bf16.msra.mxu1 %v15946_v63  ;;  %14628 = vmatpush3.bf16.msra.mxu0 %v15947_v3  ;;  %v11531_v44 = vmax.f32 %v11469_v5, 0.0  ;;  %v11533_v49 = vmax.f32 %v11512_v48, 0.0 }
0x42ee   : > { %v11546_v21 = vmax.f32 %v11471_v19, 0.0  ;;  %v11548_v42 = vmax.f32 %v11514_v45, 0.0  ;;  %14607 = vmatprep.subr.bf16.mxu1 %v15948_v34  ;;  %14629 = vmatprep.subr.bf16.mxu0 %v15949_v50 }
0x42ef   : > { %v11547_v46 = vmax.f32 %v11473_v37, 0.0  ;;  %v11549_v47 = vmax.f32 %v11516_v23, 0.0 }
0x42f0   : > { %v11562_v56 = vpack.c.bf16 %v11546_v21, %v11530_v40  ;;  %v11564_v59 = vpack.c.bf16 %v11548_v42, %v11532_v41 }
0x42f1   : > { %v11563_v60 = vpack.c.bf16 %v11547_v46, %v11531_v44  ;;  %v11565_v9 = vpack.c.bf16 %v11549_v47, %v11533_v49  ;;  %14608 = vmatpush3.bf16.msra.mxu1 %v15950_v38  ;;  %14630 = vmatpush3.bf16.msra.mxu0 %v15951_v39 }
0x42f3   : > { %12618 = vmatprep.mubr.bf16.mxu1 %v11563_v60  ;;  %12659 = vmatprep.mubr.bf16.mxu0 %v11565_v9 }
0x42f4   : > { %12619 = vmatmul.mubr.bf16.vlgmr.msra.gmra.mrb[96].mxu1 %v11562_v56  ;;  %12660 = vmatmul.mubr.bf16.vlgmr.msra.gmra.mrb[44].mxu0 %v11564_v59 }
0x4367   : > { %v14477_v28 = vpop.f32.mrb[84].mxu1  ;;  %v14499_v12 = vpop.f32.mrb[32].mxu0 }
0x4368   : > { %v14478_v55 = vpop.f32.mrb[85].mxu1  ;;  %v14500_v17 = vpop.f32.mrb[33].mxu0 }
0x4369   : > { %v14479_v2 = vadd.f32 %v14478_v55, %v14477_v28  ;;  %v14501_v51 = vadd.f32 %v14500_v17, %v14499_v12  ;;  %v14480_v22 = vpop.f32.mrb[86].mxu1  ;;  %v14502_v58 = vpop.f32.mrb[34].mxu0 }
0x436a   : > { %v14481_v1 = vpop.f32.mrb[87].mxu1  ;;  %v14503_v26 = vpop.f32.mrb[35].mxu0 }
0x436b   : > { %v12375_v16 = vadd.f32 %v14479_v2, %v13957_v54  ;;  %v14482_v53 = vadd.f32 %v14481_v1, %v14480_v22  ;;  %v14504_v7 = vadd.f32 %v14503_v26, %v14502_v58 }
0x436d   : > { %v12416_v62 = vadd.f32 %v14501_v51, %v12375_v16  ;;  %v12378_v24 = vadd.f32 %v14482_v53, %v13957_v54 }
0x436f   : > { %v12419_v30 = vadd.f32 %v14504_v7, %v12378_v24 }
0x4387   : > { %v14521_v13 = vpop.f32.mrb[88].mxu1  ;;  %v14543_v25 = vpop.f32.mrb[36].mxu0 }
0x4388   : > { %v14522_v27 = vpop.f32.mrb[89].mxu1  ;;  %v14544_v43 = vpop.f32.mrb[37].mxu0 }
0x4389   : > { %v14523_v14 = vadd.f32 %v14522_v27, %v14521_v13  ;;  %v14545_v11 = vadd.f32 %v14544_v43, %v14543_v25  ;;  %v14524_v57 = vpop.f32.mrb[90].mxu1  ;;  %v14546_v29 = vpop.f32.mrb[38].mxu0  ;;  %v14086_v43 = vld [vmem:[%s1104_s5] ss:$0 sm:$0xff] }
0x438a   : > { %v14525_v15 = vpop.f32.mrb[91].mxu1  ;;  %v14547_v10 = vpop.f32.mrb[39].mxu0 }
0x438b   : > { %v12457_v31 = vadd.f32 %v14523_v14, %v12416_v62  ;;  %v14526_v6 = vadd.f32 %v14525_v15, %v14524_v57  ;;  %v14548_v52 = vadd.f32 %v14547_v10, %v14546_v29 }
0x438d   : > { %v12498_v63 = vadd.f32 %v14545_v11, %v12457_v31  ;;  %v12460_v3 = vadd.f32 %v14526_v6, %v12419_v30  ;;  %v14087_v11 = vld [vmem:[%s1112_s15] ss:$0 sm:$0xff] }
0x438f   : > { %v12501_v32 = vadd.f32 %v14548_v52, %v12460_v3 }
0x43a7   : > { %v14565_v0 = vpop.f32.mrb[92].mxu1  ;;  %v14587_v33 = vpop.f32.mrb[40].mxu0 }
0x43a8   : > { %v14566_v8 = vpop.f32.mrb[93].mxu1  ;;  %v14588_v34 = vpop.f32.mrb[41].mxu0 }
0x43a9   : > { %v14567_v50 = vadd.f32 %v14566_v8, %v14565_v0  ;;  %v14589_v5 = vadd.f32 %v14588_v34, %v14587_v33  ;;  %v14568_v48 = vpop.f32.mrb[94].mxu1  ;;  %v14590_v35 = vpop.f32.mrb[42].mxu0 }
0x43aa   : > { %v14569_v4 = vpop.f32.mrb[95].mxu1  ;;  %v14591_v19 = vpop.f32.mrb[43].mxu0 }
0x43ab   : > { %v12539_v45 = vadd.f32 %v14567_v50, %v12498_v63  ;;  %v14570_v36 = vadd.f32 %v14569_v4, %v14568_v48  ;;  %v14592_v18 = vadd.f32 %v14591_v19, %v14590_v35 }
0x43ad   : > { %v12580_v37 = vadd.f32 %v14589_v5, %v12539_v45  ;;  %v12542_v23 = vadd.f32 %v14570_v36, %v12501_v32 }
0x43af   : > { %v12583_v38 = vadd.f32 %v14592_v18, %v12542_v23 }
0x43c7   : > { %v14609_v39 = vpop.f32.mrb[96].mxu1  ;;  %v14631_v40 = vpop.f32.mrb[44].mxu0 }
0x43c8   : > { %v14610_v41 = vpop.f32.mrb[97].mxu1  ;;  %v14632_v21 = vpop.f32.mrb[45].mxu0 }
0x43c9   : > { %v14611_v42 = vadd.f32 %v14610_v41, %v14609_v39  ;;  %v14633_v44 = vadd.f32 %v14632_v21, %v14631_v40  ;;  %v14612_v49 = vpop.f32.mrb[98].mxu1  ;;  %v14634_v46 = vpop.f32.mrb[46].mxu0 }
0x43ca   : > { %v14613_v47 = vpop.f32.mrb[99].mxu1  ;;  %v14635_v56 = vpop.f32.mrb[47].mxu0 }
0x43cb   : > { %v12621_v59 = vadd.f32 %v14611_v42, %v12580_v37  ;;  %v14614_v60 = vadd.f32 %v14613_v47, %v14612_v49  ;;  %v14636_v9 = vadd.f32 %v14635_v56, %v14634_v46 }
0x43cd   : > { %v12662_v28 = vadd.f32 %v14633_v44, %v12621_v59  ;;  %v12624_v12 = vadd.f32 %v14614_v60, %v12583_v38 }
0x43cf   : > { %v12665_v54 = vadd.f32 %v14636_v9, %v12624_v12  ;;  %v12668_v2 = vadd.f32 %v12662_v28, %v18806_v61 }
0x43d1   : > { %v12669_v55 = vadd.f32 %v12665_v54, %v18808_v20 }
0x43d3   : > { %v12672_v17 = vsel %vm10411_vm13, %v12669_v55, 0.0 }
0x43d4   : > { %12673 = vadd.xlane.f32.xlu0 %v12672_v17 }
0x43d8   : > { %12670 = vadd.xlane.f32.xlu0 %v12668_v2 }
0x4461   : > { %v12674_v51 = vpop.xlane.xlu0 %12673 }
0x4462   : > { %v12676_v22 = vmul.f32 0.0078125, %v12674_v51 }
0x4464   : > { %v12678_v58 = vsub.f32 %v12669_v55, %v12676_v22 }
0x4465   : > { %v12671_v1 = vpop.xlane.xlu0 %12670 }
0x4466   : > { %v12675_v26 = vmul.f32 0.0078125, %v12671_v1  ;;  %v12680_v16 = vmul.f32 %v12678_v58, %v12678_v58 }
0x4468   : > { %v12677_v53 = vsub.f32 %v12668_v2, %v12675_v26  ;;  %v12683_v7 = vsel %vm10411_vm13, %v12680_v16, 0.0 }
0x4469   : > { %12684 = vadd.xlane.f32.xlu1 %v12683_v7 }
0x446a   : > { %v12679_v62 = vmul.f32 %v12677_v53, %v12677_v53 }
0x446c   : > { %12681 = vadd.xlane.f32.xlu0 %v12679_v62 }
0x44f6   : > { %v12685_v20 = vpop.xlane.xlu1 %12684 }
0x44f7   : > { %v12687_v24 = vmul.f32 0.0078125, %v12685_v20 }
0x44f9   : > { %v12689_v30 = vadd.f32 1e-05, %v12687_v24  ;;  %v12682_v13 = vpop.xlane.xlu0 %12681 }
0x44fa   : > { %v12686_v61 = vmul.f32 0.0078125, %v12682_v13 }
0x44fb   : > { %16020 = vrsqrt.f32 %v12689_v30 }
0x44fc   : > { %v12688_v25 = vadd.f32 1e-05, %v12686_v61 }
0x44fe   : > { %16022 = vrsqrt.f32 %v12688_v25 }
0x4505   : > { %v16021_v27 = vpop.eup %16020 }
0x4506   : > { %v12693_v14 = vmul.f32 %v16021_v27, %v12678_v58 }
0x4508   : > { %v16023_v57 = vpop.eup %16022  ;;  %v12701_v29 = vmul.f32 %v14086_v43, %v12693_v14 }
0x4509   : > { %v12692_v15 = vmul.f32 %v16023_v57, %v12677_v53 }
0x450a   : > { %v12709_v10 = vadd.f32 %v14087_v11, %v12701_v29 }
0x450b   : > { %v12700_v31 = vmul.f32 %v14086_v43, %v12692_v15 }
0x450c   : > { %12711 = vst [vmem:[#allocation3 + $0x8] sm:$0x3] %v12709_v10 }
0x450d   : > { %v12708_v6 = vadd.f32 %v14087_v11, %v12700_v31 }
0x450f   : > { %12710 = vst [vmem:[#allocation3] sm:$0xff] %v12708_v6 }
0x4510 PF: > { %p14088_p0 = scmp.ne.s32.totalorder %s16911_s2, 4 }
0x4511   : > { %vm12723_vm14 = vcmask (!%p14088_p0), 1041408   ;;  %v16763_v3 = vmov (!%p14088_p0), 0.0|0.0   ;;  %vm16764_vm15 = vmmov (!%p14088_p0), 1   ;;  %s19385_s25 = sld [smem:[#allocation61_spill]] (!%p14088_p0)  ;;  %vm16765_vm1 = vmmov (!%p14088_p0), 0   ;;  %s19387_s20 = sld [smem:[#allocation71_spill]] (!%p14088_p0) }
0x4512   : > { %12715 = sbr.rel (%p14088_p0) target bundleno = 18121 (0x46c9), region = 208  ;;  %15252 = vmatprep.subr.bf16.mxu0 (!%p14088_p0), %v16763_v3  ;;  %vm15254_vm0 = vmpackc.low (!%p14088_p0), %vm12723_vm14, %vm16764_vm15  ;;  %15256 = vmatprep.subr.bf16.mxu1 (!%p14088_p0), %v16763_v3  ;;  %v16766_v33 = vmov (!%p14088_p0), 0.0   ;;  %v12716_v5 = vld [vmem:[#allocation18] sm:$0x3] (!%p14088_p0)  ;;  %vm12719_vm2 = vcmask (!%p14088_p0), 80896   ;;  %vm12978_vm3 = vcmask (!%p14088_p0), 1024  }
0x4513   : > { %v12718_v63 = vld [vmem:[#allocation3 + $0x8] sm:$0x3] (!%p14088_p0)  ;;  %15155 = vmatprep.mubr.msk.f32.mxu0 (!%p14088_p0), %vm16765_vm1, %v16766_v33  ;;  %15190 = vmatprep.mubr.msk.f32.mxu1 (!%p14088_p0), %vm16765_vm1, %v16766_v33  ;;  %v12797_v27 = vld [vmem:[#allocation2] sm:$0x3] (!%p14088_p0)  ;;  %v14091_v15 = vld [vmem:[#allocation4] ss:$0 sm:$0xff] (!%p14088_p0) }
0x4516   : > { %v12717_v52 = vld [vmem:[#allocation3] sm:$0xff] (!%p14088_p0) }
0x4517   : > { %v15253_v32 = vpack.c.bf16 (!%p14088_p0), %v12718_v63, %v12717_v52  ;;  %s19386_s0 = smov (!%p14088_p0), %s19385_s25  ;;  %v12798_v0 = vld [vmem:[%s19385_s25] sm:$0xff] (!%p14088_p0) }
0x4518   : > { %v12799_v8 = vld [vmem:[%s19386_s0 + $0x8] sm:$0xff] (!%p14088_p0)  ;;  %v12814_v34 = vld [vmem:[%s19386_s0 + $0x80] sm:$0xff] (!%p14088_p0)  ;;  %v12816_v4 = vld [vmem:[%s19386_s0 + $0x90] sm:$0xff] (!%p14088_p0) }
0x4519   : > { %v12815_v50 = vld [vmem:[%s19386_s0 + $0x88] sm:$0xff]  ;;  %15255 = vmatpush3.bf16.msk.msra.mxu0 %vm15254_vm0, %v15253_v32  ;;  %v15281_v48 = vpack.c.bf16 %v12799_v8, %v12798_v0  ;;  %v12800_v19 = vld [vmem:[%s19386_s0 + $0x10] sm:$0xff]  ;;  %v12801_v45 = vld [vmem:[%s19386_s0 + $0x18] sm:$0xff] }
0x451a   : > { %v15257_v35 = vpack.c.bf16 %v12815_v50, %v12814_v34  ;;  %15280 = vmatprep.subr.bf16.mxu0 %v16763_v3  ;;  %v12817_v36 = vld [vmem:[%s19386_s0 + $0x98] sm:$0xff]  ;;  %v12818_v37 = vld [vmem:[%s19386_s0 + $0xa0] sm:$0xff]  ;;  %v12819_v23 = vld [vmem:[%s19386_s0 + $0xa8] sm:$0xff]  ;;  %v15284_v38 = vpack.c.bf16 %v12801_v45, %v12800_v19 }
0x451b   : > { %v15260_v18 = vpack.c.bf16 %v12817_v36, %v12816_v4  ;;  %v12802_v39 = vld [vmem:[%s19386_s0 + $0x20] sm:$0xff]  ;;  %v12803_v40 = vld [vmem:[%s19386_s0 + $0x28] sm:$0xff]  ;;  %v15263_v41 = vpack.c.bf16 %v12819_v23, %v12818_v37  ;;  %v12820_v21 = vld [vmem:[%s19386_s0 + $0xb0] sm:$0xff] }
0x451c   : > { %15258 = vmatpush3.bf16.msra.mxu1 %v15257_v35  ;;  %15156 = vmatmul.mubr.msk.f32.vlgmr.msra.gmra.mrb[0].mxu0 %vm12719_vm2, %v12716_v5  ;;  %v12821_v42 = vld [vmem:[%s19386_s0 + $0xb8] sm:$0xff]  ;;  %v15287_v44 = vpack.c.bf16 %v12803_v40, %v12802_v39  ;;  %v12804_v49 = vld [vmem:[%s19386_s0 + $0x30] sm:$0xff]  ;;  %v12822_v56 = vld [vmem:[%s19386_s0 + $0xc0] sm:$0xff] }
0x451d   : > { %15259 = vmatprep.subr.bf16.mxu1 %v16763_v3  ;;  %15282 = vmatpush3.bf16.msra.mxu0 %v15281_v48  ;;  %v12805_v46 = vld [vmem:[%s19386_s0 + $0x38] sm:$0xff]  ;;  %v15266_v47 = vpack.c.bf16 %v12821_v42, %v12820_v21  ;;  %v12823_v59 = vld [vmem:[%s19386_s0 + $0xc8] sm:$0xff]  ;;  %v12806_v9 = vld [vmem:[%s19386_s0 + $0x40] sm:$0xff] }
0x451e   : > { %15225 = vmatprep.mubr.msk.f32.mxu0 %vm16765_vm1, %v16766_v33  ;;  %15283 = vmatprep.subr.bf16.mxu0 %v16763_v3  ;;  %v15290_v60 = vpack.c.bf16 %v12805_v46, %v12804_v49  ;;  %v12807_v28 = vld [vmem:[%s19386_s0 + $0x48] sm:$0xff]  ;;  %v15269_v12 = vpack.c.bf16 %v12823_v59, %v12822_v56  ;;  %v12824_v54 = vld [vmem:[%s19386_s0 + $0xd0] sm:$0xff]  ;;  %v12825_v55 = vld [vmem:[%s19386_s0 + $0xd8] sm:$0xff] }
0x451f   : > { %v15293_v17 = vpack.c.bf16 %v12807_v28, %v12806_v9  ;;  %v12808_v2 = vld [vmem:[%s19386_s0 + $0x50] sm:$0xff]  ;;  %v12809_v51 = vld [vmem:[%s19386_s0 + $0x58] sm:$0xff]  ;;  %v15272_v22 = vpack.c.bf16 %v12825_v55, %v12824_v54  ;;  %v12826_v58 = vld [vmem:[%s19386_s0 + $0xe0] sm:$0xff] }
0x4520   : > { %15261 = vmatpush3.bf16.msra.mxu1 %v15260_v18  ;;  %v12827_v1 = vld [vmem:[%s19386_s0 + $0xe8] sm:$0xff]  ;;  %v15296_v26 = vpack.c.bf16 %v12809_v51, %v12808_v2  ;;  %v12810_v16 = vld [vmem:[%s19386_s0 + $0x60] sm:$0xff]  ;;  %v12828_v62 = vld [vmem:[%s19386_s0 + $0xf0] sm:$0xff] }
0x4521   : > { %15262 = vmatprep.subr.bf16.mxu1 %v16763_v3  ;;  %15285 = vmatpush3.bf16.msra.mxu0 %v15284_v38  ;;  %v12811_v53 = vld [vmem:[%s19386_s0 + $0x68] sm:$0xff]  ;;  %v15275_v7 = vpack.c.bf16 %v12827_v1, %v12826_v58  ;;  %v12829_v20 = vld [vmem:[%s19386_s0 + $0xf8] sm:$0xff]  ;;  %v12812_v30 = vld [vmem:[%s19386_s0 + $0x70] sm:$0xff] }
0x4522   : > { %15286 = vmatprep.subr.bf16.mxu0 %v16763_v3  ;;  %v15299_v24 = vpack.c.bf16 %v12811_v53, %v12810_v16  ;;  %v12813_v13 = vld [vmem:[%s19386_s0 + $0x78] sm:$0xff]  ;;  %v15278_v61 = vpack.c.bf16 %v12829_v20, %v12828_v62 }
0x4523   : > { %v15302_v25 = vpack.c.bf16 %v12813_v13, %v12812_v30 }
0x4524   : > { %15264 = vmatpush3.bf16.msra.mxu1 %v15263_v41 }
0x4525   : > { %15265 = vmatprep.subr.bf16.mxu1 %v16763_v3  ;;  %15288 = vmatpush3.bf16.msra.mxu0 %v15287_v44 }
0x4526   : > { %15289 = vmatprep.subr.bf16.mxu0 %v16763_v3 }
0x4528   : > { %15267 = vmatpush3.bf16.msra.mxu1 %v15266_v47 }
0x4529   : > { %15268 = vmatprep.subr.bf16.mxu1 %v16763_v3  ;;  %15291 = vmatpush3.bf16.msra.mxu0 %v15290_v60 }
0x452a   : > { %15292 = vmatprep.subr.bf16.mxu0 %v16763_v3 }
0x452c   : > { %15270 = vmatpush3.bf16.msra.mxu1 %v15269_v12 }
0x452d   : > { %15271 = vmatprep.subr.bf16.mxu1 %v16763_v3  ;;  %15294 = vmatpush3.bf16.msra.mxu0 %v15293_v17 }
0x452e   : > { %15295 = vmatprep.subr.bf16.mxu0 %v16763_v3 }
0x4530   : > { %15273 = vmatpush3.bf16.msra.mxu1 %v15272_v22 }
0x4531   : > { %15274 = vmatprep.subr.bf16.mxu1 %v16763_v3  ;;  %15297 = vmatpush3.bf16.msra.mxu0 %v15296_v26 }
0x4532   : > { %15298 = vmatprep.subr.bf16.mxu0 %v16763_v3 }
0x4534   : > { %15276 = vmatpush3.bf16.msra.mxu1 %v15275_v7 }
0x4535   : > { %15277 = vmatprep.subr.bf16.mxu1 %v16763_v3  ;;  %15300 = vmatpush3.bf16.msra.mxu0 %v15299_v24 }
0x4536   : > { %15301 = vmatprep.subr.bf16.mxu0 %v16763_v3 }
0x4538   : > { %15279 = vmatpush3.bf16.msra.mxu1 %v15278_v61 }
0x4539   : > { %15303 = vmatpush3.bf16.msra.mxu0 %v15302_v25 }
0x453c   : > { %15226 = vmatmul.mubr.f32.vlgmr.msra.gmra.mrb[2].mxu0 %v12797_v27 }
0x45ef   : > { %v12793_v43 = vpop.f32.mrb[0].mxu0 }
0x45f0   : > { %v15157_v14 = vpop.f32.mrb[1].mxu0  ;;  %15191 = vmatmul.mubr.f32.vlgmr.msra.gmra.mrb[0].mxu1 %v12793_v43 }
0x460f   : > { %v12966_v11 = vpop.f32.mrb[2].mxu0 }
0x4610   : > { %v15227_v57 = vpop.f32.mrb[3].mxu0 }
0x46c3   : > { %v12896_v29 = vpop.f32.mrb[0].mxu1 }
0x46c4   : > { %v12967_v10 = vadd.f32 %v12966_v11, %v12896_v29  ;;  %v15192_v31 = vpop.f32.mrb[1].mxu1 }
0x46c6   : > { %v12977_v6 = vadd.f32 %v14091_v15, %v12967_v10 }
0x46c8   : > { %12979 = vst.msk [vmem:[%s19387_s20] sm:$0x3] %vm12978_vm3, %v12977_v6 }
0x46c9 PF: > { %s19388_s5 = sld [smem:[#allocation50_spill]]  ;;  %s19389_s4 = sld [smem:[#allocation48_spill]] }
0x46ca   : > { %s19390_s25 = sld [smem:[#allocation51_spill]]  ;;  %s19391_s24 = smov %s16704_s10 }
0x46cf   : > { %p55_p11 = scmp.ge.s32.totalorder %s19388_s5, 7   ;;  %s19392_s10 = smov %s19389_s4 }
0x46d1   :  { %57 = sbr.rel (!%p55_p11) target bundleno = 38 (0x26), region = 328 }
0x46d8   :  { %12991 = vsyncpa [#allocation6], 1 }
0x46d9   :  { %12993 = vsyncpa [#allocation6 + $0x1], 1 }
0x46da   :  { %12994 = vsyncpa [#allocation8], 1 }
0x46db   :  { %12995 = vsyncpa [#allocation11], 1 }
0x46dc   :  { %12996 = vsyncpa [#allocation14], 1 }
0x46dd   :  { %12997 = vsyncpa [#allocation17], 1 }
0x46de   :  { %12998 = vsyncpa [#allocation20], 1 }
0x46df   :  { %13000 = vsyncpa [#allocation20 + $0x1], 1 }
0x46e0   :  { %13001 = vsyncpa [#allocation23], 1 }
0x46e1   :  { %13003 = vsyncpa [#allocation23 + $0x1], 1 }
0x46e2   :  { %13004 = vsyncpa [#allocation26], 1 }
0x46e3   :  { %13006 = vsyncpa [#allocation26 + $0x1], 1 }
0x46e4   :  { %13007 = vsyncpa [#allocation29], 1 }
0x46e5   :  { %13009 = vsyncpa [#allocation29 + $0x1], 1 }
0x46e6   :  { %13010 = vsyncpa [#allocation32], 1 }
0x46e7   :  { %13012 = vsyncpa [#allocation32 + $0x1], 1 }
0x46e8   :  { %13013 = vsyncpa [#allocation35], 1 }
0x46e9   :  { %13015 = vsyncpa [#allocation35 + $0x1], 1 }

</bundles_post_ra>
